<compile_context>
chip_gen: v6e
topology: v6e:2x2x1
jax: 0.10.0
libtpu: 0.0.40
codegen_flags: <defaults>
</compile_context>

<pallas_src>
import functools

import jax
import jax.numpy as jnp
from jax.experimental import pallas as pl
from jax.experimental.pallas import tpu as pltpu

DROPOUT_P = 0.1

# murmur3 fmix32 constants, expressed as signed 32-bit values.
_GOLDEN = 0x9E3779B9
_FMIX1 = 0x85EBCA6B
_FMIX2 = 0xC2B2AE35


def _i32(v):
    """Python int -> jnp.int32 with two's-complement wraparound."""
    return jnp.int32(((v + 0x80000000) & 0xFFFFFFFF) - 0x80000000)


def _srl(x, n):
    return jax.lax.shift_right_logical(x, jnp.int32(n))


def _softmax_dropout_kernel(seed_ref, x_ref, o_ref, *, apply_dropout, p):
    # x_ref: (TILE_R, D_pad) block in VMEM.
    x = x_ref[...].astype(jnp.float32)
    m = jnp.max(x, axis=-1, keepdims=True)
    e = jnp.exp(x - m)
    s = jnp.sum(e, axis=-1, keepdims=True)

    if not apply_dropout:
        o_ref[...] = (e * pl.reciprocal(s, approx=False)).astype(o_ref.dtype)
        return

    # Fold the 1/(1-p) keep-scale into the (column-wise) softmax denominator:
    # one approx reciprocal on a (TILE_R, 1) column, no extra full-tile mul.
    inv = pl.reciprocal(s * jnp.float32(1.0 - p), approx=True)
    probs = e * inv

    # Stateless counter-based PRNG: murmur3 finalizer over the global element
    # index mixed with the seed.  Pure int32 ops (iota/xor/mul/shift) ->
    # portable and order-independent (safe with "parallel" grid semantics).
    tr, d = x_ref.shape
    rows = jax.lax.broadcasted_iota(jnp.int32, (tr, d), 0)
    cols = jax.lax.broadcasted_iota(jnp.int32, (tr, d), 1)
    gidx = (pl.program_id(0) * tr + rows) * d + cols
    h = gidx ^ (seed_ref[0] * _i32(_GOLDEN))
    h = h ^ _srl(h, 16)
    h = h * _i32(_FMIX1)
    h = h ^ _srl(h, 13)
    h = h * _i32(_FMIX2)
    h = h ^ _srl(h, 16)
    bits24 = _srl(h, 8)                              # uniform in [0, 2^24)
    threshold = jnp.int32(int(round(p * (1 << 24))))  # drop iff bits24 < p*2^24
    keep = bits24 >= threshold

    o_ref[...] = jnp.where(keep, probs, jnp.float32(0.0)).astype(o_ref.dtype)


def softmax_dropout(x, seed=0, *, training=True, p=DROPOUT_P,
                    tile_rows=None, target_block_bytes=1 << 20):
    """softmax(x, axis=-1) followed by dropout(p) (when training), fused."""
    orig_shape = x.shape
    D = orig_shape[-1]
    x2 = x.reshape(-1, D)
    R = x2.shape[0]

    # Lane-dense last dim: pad D to a multiple of 128 with a large negative so
    # padded columns contribute exp(.) == 0 to the softmax denominator.
    D_pad = pl.cdiv(D, 128) * 128
    if D_pad != D:
        x2 = jnp.pad(x2, ((0, 0), (0, D_pad - D)), constant_values=-1e30)

    # Row tiling: large tiles to amortize per-grid-step overhead, capped at
    # ~target_block_bytes per f32 block so double-buffered in+out plus f32
    # temporaries fit every generation's default scoped VMEM (16 MiB v5e,
    # 32 MiB v6e/v7x).  e.g. [1,4,384,384] f32 -> tile_rows=512, grid=3.
    if tile_rows is None:
        budget_rows = max(8, (target_block_bytes // (D_pad * 4)) // 8 * 8)
        n_steps = pl.cdiv(R, budget_rows)
        tile_rows = pl.cdiv(pl.cdiv(R, n_steps), 8) * 8
    tile_rows = max(8, pl.cdiv(tile_rows, 8) * 8)

    grid_n = pl.cdiv(R, tile_rows)
    R_pad = grid_n * tile_rows
    if R_pad != R:
        x2 = jnp.pad(x2, ((0, R_pad - R), (0, 0)))

    seed_arr = jnp.asarray([seed], dtype=jnp.int32)
    kernel = functools.partial(_softmax_dropout_kernel,
                               apply_dropout=training, p=p)

    out2 = pl.pallas_call(
        kernel,
        out_shape=jax.ShapeDtypeStruct((R_pad, D_pad), x.dtype),
        grid_spec=pltpu.PrefetchScalarGridSpec(
            num_scalar_prefetch=1,
            grid=(grid_n,),
            in_specs=[pl.BlockSpec((tile_rows, D_pad), lambda i, _: (i, 0))],
            out_specs=pl.BlockSpec((tile_rows, D_pad), lambda i, _: (i, 0)),
        ),
        compiler_params=pltpu.CompilerParams(
            # Stateless per-element PRNG -> grid steps are order-independent;
            # "parallel" lets v7x shard the row grid across both TensorCores.
            dimension_semantics=("parallel",),
        ),
    )(seed_arr, x2)

    return out2[:R, :D].reshape(orig_shape)


if __name__ == "__main__":
    # Small shape consistent with the module's [1, 4, 384, 384] attention
    # probabilities (same heads / key length, shorter query length).
    B, H, S, D = 1, 4, 128, 384
    key = jax.random.PRNGKey(0)
    x = jax.random.normal(key, (B, H, S, D), dtype=jnp.float32)

    out = jax.block_until_ready(softmax_dropout(x, seed=0, training=True))
    assert out.shape == x.shape and out.dtype == x.dtype

    ref_sm = jax.nn.softmax(x, axis=-1)
    kept = out != 0.0
    # Non-dropped entries equal softmax / (1 - p), up to the approx-reciprocal
    # precision used in the training path.
    assert jnp.allclose(
        jnp.where(kept, out, 0.0),
        jnp.where(kept, ref_sm / (1.0 - DROPOUT_P), 0.0),
        rtol=1e-2, atol=1e-7,
    )
    drop_frac = float(1.0 - jnp.mean(kept.astype(jnp.float32)))
    assert 0.05 < drop_frac < 0.15, f"unexpected drop fraction {drop_frac}"

    # Eval path (dropout disabled) matches plain softmax.
    out_eval = jax.block_until_ready(softmax_dropout(x, training=False))
    assert jnp.allclose(out_eval, ref_sm, atol=1e-6)

    print("KERNEL_OK")
</pallas_src>

<mosaic_0001>
module attributes {stable_mosaic.version = 11 : i64} {
  func.func @_softmax_dropout_kernel(%arg0: i32, %arg1: memref<1xi32, #tpu.memory_space<smem>>, %arg2: memref<512x384xf32, #tpu.memory_space<vmem>>, %arg3: memref<512x384xf32, #tpu.memory_space<vmem>>) attributes {dimension_semantics = [#tpu.dimension_semantics<parallel>], iteration_bounds = array<i64: 1>, scalar_prefetch = 1 : i64, scratch_operands = 0 : i64, tpu.core_type = #tpu.core_type<tc>, window_params = [{transform_indices = @transform_0, window_bounds = array<i64: 512, 384>}, {transform_indices = @transform_1, window_bounds = array<i64: 512, 384>}]} {
    %c0 = arith.constant 0 : index
    %c0_0 = arith.constant 0 : index
    %0 = vector.load %arg2[%c0, %c0_0] : memref<512x384xf32, #tpu.memory_space<vmem>>, vector<512x384xf32>
    %cst = arith.constant dense<0xFF800000> : vector<512xf32>
    %1 = vector.multi_reduction <maximumf>, %0, %cst [1] : vector<512x384xf32> to vector<512xf32>
    %2 = vector.shape_cast %1 : vector<512xf32> to vector<512x1xf32>
    %3 = vector.broadcast %2 : vector<512x1xf32> to vector<512x384xf32>
    %4 = arith.subf %0, %3 : vector<512x384xf32>
    %5 = math.exp %4 : vector<512x384xf32>
    %cst_1 = arith.constant dense<0.000000e+00> : vector<512xf32>
    %6 = vector.multi_reduction <add>, %5, %cst_1 [1] : vector<512x384xf32> to vector<512xf32>
    %7 = vector.shape_cast %6 : vector<512xf32> to vector<512x1xf32>
    %cst_2 = arith.constant 0.899999976 : f32
    %8 = vector.broadcast %cst_2 : f32 to vector<512x1xf32>
    %9 = arith.mulf %7, %8 : vector<512x1xf32>
    %10 = tpu.reciprocal %9 {approx = true} : vector<512x1xf32> -> vector<512x1xf32>
    %11 = vector.broadcast %10 : vector<512x1xf32> to vector<512x384xf32>
    %12 = arith.mulf %5, %11 : vector<512x384xf32>
    %13 = tpu.iota {dimensions = array<i32: 0>} : vector<512x384xi32>
    %14 = tpu.iota {dimensions = array<i32: 1>} : vector<512x384xi32>
    %c512_i32 = arith.constant 512 : i32
    %15 = arith.muli %arg0, %c512_i32 : i32
    %16 = vector.broadcast %15 : i32 to vector<512x384xi32>
    %17 = arith.addi %16, %13 : vector<512x384xi32>
    %c384_i32 = arith.constant 384 : i32
    %18 = vector.broadcast %c384_i32 : i32 to vector<512x384xi32>
    %19 = arith.muli %17, %18 : vector<512x384xi32>
    %20 = arith.addi %19, %14 : vector<512x384xi32>
    %c0_3 = arith.constant 0 : index
    %21 = memref.load %arg1[%c0_3] : memref<1xi32, #tpu.memory_space<smem>>
    %c-1640531527_i32 = arith.constant -1640531527 : i32
    %22 = arith.muli %21, %c-1640531527_i32 : i32
    %23 = vector.broadcast %22 : i32 to vector<512x384xi32>
    %24 = arith.xori %20, %23 : vector<512x384xi32>
    %c16_i32 = arith.constant 16 : i32
    %25 = vector.broadcast %c16_i32 : i32 to vector<512x384xi32>
    %26 = arith.shrui %24, %25 : vector<512x384xi32>
    %27 = arith.xori %24, %26 : vector<512x384xi32>
    %c-2048144789_i32 = arith.constant -2048144789 : i32
    %28 = vector.broadcast %c-2048144789_i32 : i32 to vector<512x384xi32>
    %29 = arith.muli %27, %28 : vector<512x384xi32>
    %c13_i32 = arith.constant 13 : i32
    %30 = vector.broadcast %c13_i32 : i32 to vector<512x384xi32>
    %31 = arith.shrui %29, %30 : vector<512x384xi32>
    %32 = arith.xori %29, %31 : vector<512x384xi32>
    %c-1028477387_i32 = arith.constant -1028477387 : i32
    %33 = vector.broadcast %c-1028477387_i32 : i32 to vector<512x384xi32>
    %34 = arith.muli %32, %33 : vector<512x384xi32>
    %c16_i32_4 = arith.constant 16 : i32
    %35 = vector.broadcast %c16_i32_4 : i32 to vector<512x384xi32>
    %36 = arith.shrui %34, %35 : vector<512x384xi32>
    %37 = arith.xori %34, %36 : vector<512x384xi32>
    %c8_i32 = arith.constant 8 : i32
    %38 = vector.broadcast %c8_i32 : i32 to vector<512x384xi32>
    %39 = arith.shrui %37, %38 : vector<512x384xi32>
    %c1677722_i32 = arith.constant 1677722 : i32
    %40 = vector.broadcast %c1677722_i32 : i32 to vector<512x384xi32>
    %41 = arith.cmpi sge, %39, %40 : vector<512x384xi32>
    %cst_5 = arith.constant 0.000000e+00 : f32
    %42 = vector.broadcast %cst_5 : f32 to vector<512x384xf32>
    %43 = arith.select %41, %12, %42 : vector<512x384xi1>, vector<512x384xf32>
    %c0_6 = arith.constant 0 : index
    %c0_7 = arith.constant 0 : index
    %44 = vector.load %arg3[%c0_6, %c0_7] : memref<512x384xf32, #tpu.memory_space<vmem>>, vector<512x384xf32>
    tpu.vector_store %arg3[%c0_6, %c0_7], %43 {strides = array<i32>} : memref<512x384xf32, #tpu.memory_space<vmem>>, vector<512x384xf32>,
    return
  }
  func.func @transform_0(%arg0: i32, %arg1: memref<1xi32, #tpu.memory_space<smem>>) -> (i32, i32) {
    %c0_i32 = arith.constant 0 : i32
    %c0_i32_0 = arith.constant 0 : i32
    return %arg0, %c0_i32 : i32, i32
  }
  func.func @transform_1(%arg0: i32, %arg1: memref<1xi32, #tpu.memory_space<smem>>) -> (i32, i32) {
    %c0_i32 = arith.constant 0 : i32
    %c0_i32_0 = arith.constant 0 : i32
    return %arg0, %c0_i32 : i32, i32
  }
}

</mosaic_0001>

<bundles_post_ra>
// kernel: tpu_custom_call.1
= control target key start
LH: loop header
LB: loop body
LE: loop exit
PB: predicated region body
PF: predicated region fallthrough
CT: control target
= control target key end

     0   :  { %8 = vsyncpa [#allocation5], 0  ;;  %s7621_s0 = inlined_call_operand.<no memory space> [shape: s32[1], index: 0, kind: input, shape index: {}]   ;;  %s7622_s1 = inlined_call_operand.hbm [shape: f32[512,384], index: 1, kind: input, shape index: {}]   ;;  %s7623_s2 = inlined_call_operand.hbm [shape: f32[512,384], index: 2, kind: output, shape index: {}]  }
   0x1   :  { %9 = vsyncpa [#allocation6], 0  ;;  %s5221_s9 = smov [#allocation4]  }
   0x2   :  { %s15_s10 = sshll.u32 %s5221_s9, 4  ;;  %s16_s10 = int_to_ptr.vmem [resolvable:$true] %s15_s10 }
   0x3   :  { %s5185_s11 = scalar_lea.vmem %s16_s10, 24576  ;;  %p5190_p1 = scmp.lt.s32.totalorder %s16_s10, %s16_s10 }
   0x4   :  { %p5186_p0 = scmp.ne.s32.totalorder %s16_s10, %s5185_s11  ;;  %p5191_p2 = scmp.lt.s32.totalorder %s5185_s11, %s5185_s11 }
   0x6   :  { %p5192_p3 = por %p5191_p2, %p5190_p1 }
   0x8   :  { %p5193_p4 = pnand %p5192_p3, %p5186_p0 }
   0xa   :  { %5196 = shalt.err (!%p5193_p4)
}
   0xb   :  { %s5222_s12 = smov 384   ;;  %s5223_s13 = smov 24  }
   0xc   :  { %21 = dma.hbm_to_vmem [thread:$0]  %s7622_s1, 24576, %s16_s10, [#allocation5], %s5222_s12, %s5222_s12, %s5223_s13  }
   0xd   :  { %5217 = dma.done.wait [#allocation5], 24576  }
   0xe   :  { %5218 = vsyncadd [#allocation5], 4294942720  ;;  %v5246_v0 = vld [vmem:[#allocation4] sm:$0xff]  ;;  %v5248_v1 = vld [vmem:[#allocation4 + $0x8] sm:$0xff]  ;;  %s2017_s17 = smul.u32 2654435769, %s7621_s0 }
   0xf   :  { %v5250_v2 = vld [vmem:[#allocation4 + $0x10] sm:$0xff]  ;;  %v217_v3 = vmax.f32 %v5246_v0, %v5248_v1  ;;  %v5256_v5 = vld [vmem:[#allocation4 + $0x38] sm:$0xff]  ;;  %v5258_v6 = vld [vmem:[#allocation4 + $0x40] sm:$0xff]  ;;  %s5224_s0 = smov [#allocation7]  }
  0x10   :  { %v5254_v4 = vld [vmem:[#allocation4 + $0x30] sm:$0xff]  ;;  %v5262_v8 = vld [vmem:[#allocation4 + $0x18] sm:$0xff]  ;;  %v5264_v9 = vld [vmem:[#allocation4 + $0x20] sm:$0xff]  ;;  %s4520_s18 = sshll.u32 %s5224_s0, 4  ;;  %s4521_s18 = int_to_ptr.vmem [resolvable:$true] %s4520_s18 }
  0x11   :  { %v225_v7 = vmax.f32 %v5254_v4, %v5256_v5  ;;  %v5266_v10 = vld [vmem:[#allocation4 + $0x28] sm:$0xff]  ;;  %v218_v11 = vmax.f32 %v217_v3, %v5250_v2  ;;  %v221_v12 = vmax.f32 %v5262_v8, %v5264_v9  ;;  %v5273_v14 = vld [vmem:[#allocation4 + $0x50] sm:$0xff]  ;;  %v5275_v15 = vld [vmem:[#allocation4 + $0x58] sm:$0xff]  ;;  %s5197_s19 = scalar_lea.vmem %s4521_s18, 24576  ;;  %p5202_p6 = scmp.lt.s32.totalorder %s4521_s18, %s4521_s18 }
  0x12   :  { %v5271_v13 = vld [vmem:[#allocation4 + $0x48] sm:$0xff]  ;;  %v5280_v18 = vld [vmem:[#allocation4 + $0x60] sm:$0xff]  ;;  %v5287_v22 = vld [vmem:[#allocation4 + $0x78] sm:$0xff]  ;;  %p5198_p5 = scmp.ne.s32.totalorder %s4521_s18, %s5197_s19  ;;  %p5203_p7 = scmp.lt.s32.totalorder %s5197_s19, %s5197_s19 }
  0x13   :  { %v226_v16 = vmax.f32 %v225_v7, %v5258_v6  ;;  %v229_v17 = vmax.f32 %v5271_v13, %v5273_v14  ;;  %v5282_v19 = vld [vmem:[#allocation4 + $0x68] sm:$0xff]  ;;  %219 = vmax.xlane.f32.xlu0 %v218_v11  ;;  %v222_v20 = vmax.f32 %v221_v12, %v5266_v10  ;;  %v5289_v23 = vld [vmem:[#allocation4 + $0x80] sm:$0xff]  ;;  %v5292_v25 = vld [vmem:[#allocation4 + $0x70] sm:$0xff] }
  0x14   :  { %v233_v21 = vmax.f32 %v5280_v18, %v5282_v19  ;;  %v237_v26 = vmax.f32 %v5287_v22, %v5289_v23  ;;  %v5296_v27 = vld [vmem:[#allocation4 + $0x90] sm:$0xff]  ;;  %v5298_v28 = vld [vmem:[#allocation4 + $0x98] sm:$0xff]  ;;  %v5300_v29 = vld [vmem:[#allocation4 + $0x88] sm:$0xff]  ;;  %p5204_p8 = por %p5203_p7, %p5202_p6 }
  0x15   :  { %227 = vmax.xlane.f32.xlu1 %v226_v16  ;;  %v230_v24 = vmax.f32 %v229_v17, %v5275_v15  ;;  %v5302_v30 = vld [vmem:[#allocation4 + $0xa8] sm:$0xff]  ;;  %v5304_v31 = vld [vmem:[#allocation4 + $0xb0] sm:$0xff]  ;;  %v241_v33 = vmax.f32 %v5296_v27, %v5298_v28  ;;  %v5310_v35 = vld [vmem:[#allocation4 + $0xa0] sm:$0xff] }
  0x16   :  { %v234_v32 = vmax.f32 %v233_v21, %v5292_v25  ;;  %v238_v34 = vmax.f32 %v237_v26, %v5300_v29  ;;  %v245_v36 = vmax.f32 %v5302_v30, %v5304_v31  ;;  %v5314_v37 = vld [vmem:[#allocation4 + $0xc0] sm:$0xff]  ;;  %v5316_v38 = vld [vmem:[#allocation4 + $0xc8] sm:$0xff]  ;;  %v5318_v39 = vld [vmem:[#allocation4 + $0xb8] sm:$0xff]  ;;  %p5205_p9 = pnand %p5204_p8, %p5198_p5 }
  0x17   :  { %223 = vmax.xlane.f32.xlu0 %v222_v20  ;;  %v5320_v40 = vld [vmem:[#allocation4 + $0xd8] sm:$0xff]  ;;  %v5322_v41 = vld [vmem:[#allocation4 + $0xe0] sm:$0xff]  ;;  %v242_v42 = vmax.f32 %v241_v33, %v5310_v35  ;;  %v249_v43 = vmax.f32 %v5314_v37, %v5316_v38  ;;  %v5328_v45 = vld [vmem:[#allocation4 + $0xd0] sm:$0xff] }
  0x18   :  { %v246_v44 = vmax.f32 %v245_v36, %v5318_v39  ;;  %v253_v46 = vmax.f32 %v5320_v40, %v5322_v41  ;;  %v5332_v47 = vld [vmem:[#allocation4 + $0xf0] sm:$0xff]  ;;  %v5334_v48 = vld [vmem:[#allocation4 + $0xf8] sm:$0xff]  ;;  %v5336_v49 = vld [vmem:[#allocation4 + $0xe8] sm:$0xff] }
  0x19   :  { %231 = vmax.xlane.f32.xlu1 %v230_v24  ;;  %v5338_v50 = vld [vmem:[#allocation4 + $0x108] sm:$0xff]  ;;  %v5340_v51 = vld [vmem:[#allocation4 + $0x110] sm:$0xff]  ;;  %v250_v52 = vmax.f32 %v249_v43, %v5328_v45  ;;  %v257_v53 = vmax.f32 %v5332_v47, %v5334_v48  ;;  %v5346_v55 = vld [vmem:[#allocation4 + $0x100] sm:$0xff] }
  0x1a   :  { %v254_v54 = vmax.f32 %v253_v46, %v5336_v49  ;;  %v261_v56 = vmax.f32 %v5338_v50, %v5340_v51  ;;  %v5350_v57 = vld [vmem:[#allocation4 + $0x120] sm:$0xff]  ;;  %v5352_v58 = vld [vmem:[#allocation4 + $0x128] sm:$0xff]  ;;  %v5354_v59 = vld [vmem:[#allocation4 + $0x118] sm:$0xff] }
  0x1b   :  { %235 = vmax.xlane.f32.xlu0 %v234_v32  ;;  %v5356_v60 = vld [vmem:[#allocation4 + $0x138] sm:$0xff]  ;;  %v5358_v61 = vld [vmem:[#allocation4 + $0x140] sm:$0xff]  ;;  %v258_v62 = vmax.f32 %v257_v53, %v5346_v55  ;;  %v265_v63 = vmax.f32 %v5350_v57, %v5352_v58  ;;  %v5364_v7 = vld [vmem:[#allocation4 + $0x130] sm:$0xff] }
  0x1c   :  { %7812 = vst [vmem:[#allocation10_spill] sm:$0xff] %v5356_v60  ;;  %7813 = vst [vmem:[#allocation11_spill] sm:$0xff] %v5358_v61  ;;  %v262_v3 = vmax.f32 %v261_v56, %v5354_v59  ;;  %v269_v11 = vmax.f32 %v5356_v60, %v5358_v61  ;;  %v5368_v12 = vld [vmem:[#allocation4 + $0x150] sm:$0xff]  ;;  %v5370_v16 = vld [vmem:[#allocation4 + $0x158] sm:$0xff] }
  0x1d   :  { %239 = vmax.xlane.f32.xlu1 %v238_v34  ;;  %7814 = vst [vmem:[#allocation12_spill] sm:$0xff] %v5364_v7  ;;  %7815 = vst [vmem:[#allocation13_spill] sm:$0xff] %v5368_v12  ;;  %v5372_v17 = vld [vmem:[#allocation4 + $0x148] sm:$0xff]  ;;  %v5376_v21 = vld [vmem:[#allocation4 + $0x170] sm:$0xff]  ;;  %v266_v24 = vmax.f32 %v265_v63, %v5364_v7  ;;  %v273_v26 = vmax.f32 %v5368_v12, %v5370_v16 }
  0x1e   :  { %7816 = vst [vmem:[#allocation14_spill] sm:$0xff] %v5370_v16  ;;  %7817 = vst [vmem:[#allocation15_spill] sm:$0xff] %v5372_v17  ;;  %v5374_v20 = vld [vmem:[#allocation4 + $0x168] sm:$0xff]  ;;  %v270_v32 = vmax.f32 %v269_v11, %v5372_v17  ;;  %v5382_v33 = vld [vmem:[#allocation4 + $0x160] sm:$0xff] }
  0x1f   :  { %243 = vmax.xlane.f32.xlu0 %v242_v42  ;;  %7818 = vst [vmem:[#allocation16_spill] sm:$0xff] %v5374_v20  ;;  %7819 = vst [vmem:[#allocation17_spill] sm:$0xff] %v5376_v21  ;;  %v277_v34 = vmax.f32 %v5374_v20, %v5376_v21  ;;  %v5386_v36 = vld [vmem:[#allocation4 + $0x180] sm:$0xff]  ;;  %v5388_v42 = vld [vmem:[#allocation4 + $0x188] sm:$0xff] }
  0x20   :  { %7820 = vst [vmem:[#allocation18_spill] sm:$0xff] %v5382_v33  ;;  %7821 = vst [vmem:[#allocation19_spill] sm:$0xff] %v5386_v36  ;;  %v5390_v43 = vld [vmem:[#allocation4 + $0x178] sm:$0xff]  ;;  %v5394_v46 = vld [vmem:[#allocation4 + $0x1a0] sm:$0xff]  ;;  %v281_v53 = vmax.f32 %v5386_v36, %v5388_v42 }
  0x21   :  { %247 = vmax.xlane.f32.xlu1 %v246_v44  ;;  %7822 = vst [vmem:[#allocation20_spill] sm:$0xff] %v5388_v42  ;;  %7823 = vst [vmem:[#allocation21_spill] sm:$0xff] %v5390_v43  ;;  %v5392_v44 = vld [vmem:[#allocation4 + $0x198] sm:$0xff]  ;;  %v5400_v56 = vld [vmem:[#allocation4 + $0x190] sm:$0xff] }
  0x22   :  { %7824 = vst [vmem:[#allocation22_spill] sm:$0xff] %v5392_v44  ;;  %7825 = vst [vmem:[#allocation23_spill] sm:$0xff] %v5394_v46  ;;  %v5404_v63 = vld [vmem:[#allocation4 + $0x1b0] sm:$0xff]  ;;  %v5408_v11 = vld [vmem:[#allocation4 + $0x1a8] sm:$0xff] }
  0x23   :  { %251 = vmax.xlane.f32.xlu0 %v250_v52  ;;  %v274_v52 = vmax.f32 %v273_v26, %v5382_v33  ;;  %7826 = vst [vmem:[#allocation24_spill] sm:$0xff] %v5400_v56  ;;  %7827 = vst [vmem:[#allocation25_spill] sm:$0xff] %v5404_v63  ;;  %v5412_v26 = vld [vmem:[#allocation4 + $0x1d0] sm:$0xff]  ;;  %v5422_v36 = vld [vmem:[#allocation4 + $0x1e0] sm:$0xff] }
  0x24   :  { %7829 = vst [vmem:[#allocation27_spill] sm:$0xff] %v5408_v11  ;;  %7831 = vst [vmem:[#allocation29_spill] sm:$0xff] %v5412_v26  ;;  %v5426_v21 = vld [vmem:[#allocation4 + $0x1d8] sm:$0xff]  ;;  %v89_v20 = vld [vmem:[#allocation4 + $0x200] sm:$0xff] }
  0x25   :  { %255 = vmax.xlane.f32.xlu1 %v254_v54  ;;  %v278_v54 = vmax.f32 %v277_v34, %v5390_v43  ;;  %7833 = vst [vmem:[#allocation31_spill] sm:$0xff] %v5422_v36  ;;  %v5424_v43 = vld [vmem:[#allocation4 + $0x1e8] sm:$0xff]  ;;  %7835 = vst [vmem:[#allocation33_spill] sm:$0xff] %v5426_v21  ;;  %v95_v33 = vld [vmem:[#allocation4 + $0x230] sm:$0xff] }
  0x26   :  { %7834 = vst [vmem:[#allocation32_spill] sm:$0xff] %v5424_v43  ;;  %v99_v61 = vld [vmem:[#allocation4 + $0x250] sm:$0xff]  ;;  %v104_v7 = vld [vmem:[#allocation4 + $0x278] sm:$0xff] }
  0x27   :  { %259 = vmax.xlane.f32.xlu0 %v258_v62  ;;  %v285_v62 = vmax.f32 %v5392_v44, %v5394_v46  ;;  %v5418_v46 = vld [vmem:[#allocation4 + $0x1c0] sm:$0xff] }
  0x28   :  { %7832 = vst [vmem:[#allocation30_spill] sm:$0xff] %v5418_v46 }
  0x29   :  { %263 = vmax.xlane.f32.xlu1 %v262_v3  ;;  %v5406_v3 = vld [vmem:[#allocation4 + $0x1b8] sm:$0xff]  ;;  %v286_v42 = vmax.f32 %v285_v62, %v5408_v11  ;;  %v90_v11 = vld [vmem:[#allocation4 + $0x208] sm:$0xff] }
  0x2a   :  { %7828 = vst [vmem:[#allocation26_spill] sm:$0xff] %v5406_v3  ;;  %v289_v34 = vmax.f32 %v5404_v63, %v5406_v3  ;;  %v5432_v3 = vld [vmem:[#allocation4 + $0x1f0] sm:$0xff]  ;;  %v92_v63 = vld [vmem:[#allocation4 + $0x218] sm:$0xff] }
  0x2b   :  { %267 = vmax.xlane.f32.xlu0 %v266_v24  ;;  %v5410_v24 = vld [vmem:[#allocation4 + $0x1c8] sm:$0xff]  ;;  %7836 = vst [vmem:[#allocation34_spill] sm:$0xff] %v5432_v3 }
  0x2c   :  { %7830 = vst [vmem:[#allocation28_spill] sm:$0xff] %v5410_v24  ;;  %v293_v44 = vmax.f32 %v5410_v24, %v5412_v26  ;;  %v91_v24 = vld [vmem:[#allocation4 + $0x210] sm:$0xff] }
  0x2d   :  { %271 = vmax.xlane.f32.xlu1 %v270_v32  ;;  %v282_v32 = vmax.f32 %v281_v53, %v5400_v56  ;;  %v290_v53 = vmax.f32 %v289_v34, %v5418_v46  ;;  %v94_v56 = vld [vmem:[#allocation4 + $0x228] sm:$0xff]  ;;  %v93_v46 = vld [vmem:[#allocation4 + $0x220] sm:$0xff] }
  0x2e   :  { %v294_v62 = vmax.f32 %v293_v44, %v5426_v21  ;;  %v309_v12 = vmax.f32 %v94_v56, %v95_v33  ;;  %v100_v44 = vld [vmem:[#allocation4 + $0x258] sm:$0xff]  ;;  %v101_v21 = vld [vmem:[#allocation4 + $0x260] sm:$0xff] }
  0x2f   :  { %275 = vmax.xlane.f32.xlu0 %v274_v52  ;;  %v88_v52 = vld [vmem:[#allocation4 + $0x1f8] sm:$0xff]  ;;  %v317_v60 = vmax.f32 %v100_v44, %v101_v21  ;;  %v115_v44 = vld [vmem:[#allocation4 + $0x2d0] sm:$0xff] }
  0x30   :  { %v301_v26 = vmax.f32 %v88_v52, %v89_v20 }
  0x31   :  { %279 = vmax.xlane.f32.xlu1 %v278_v54  ;;  %v297_v54 = vmax.f32 %v5422_v36, %v5424_v43  ;;  %v97_v43 = vld [vmem:[#allocation4 + $0x240] sm:$0xff]  ;;  %v96_v36 = vld [vmem:[#allocation4 + $0x238] sm:$0xff] }
  0x32   :  { %v302_v34 = vmax.f32 %v301_v26, %v90_v11  ;;  %v310_v17 = vmax.f32 %v309_v12, %v96_v36  ;;  %v105_v26 = vld [vmem:[#allocation4 + $0x280] sm:$0xff] }
  0x33   :  { %283 = vmax.xlane.f32.xlu0 %v282_v32  ;;  %v298_v16 = vmax.f32 %v297_v54, %v5432_v3  ;;  %v305_v32 = vmax.f32 %v91_v24, %v92_v63  ;;  %v102_v54 = vld [vmem:[#allocation4 + $0x268] sm:$0xff]  ;;  %v107_v24 = vld [vmem:[#allocation4 + $0x290] sm:$0xff]  ;;  %v109_v3 = vld [vmem:[#allocation4 + $0x2a0] sm:$0xff] }
  0x34   :  { %v106_v63 = vld [vmem:[#allocation4 + $0x288] sm:$0xff]  ;;  %v318_v56 = vmax.f32 %v317_v60, %v102_v54  ;;  %v117_v54 = vld [vmem:[#allocation4 + $0x2e0] sm:$0xff] }
  0x35   :  { %287 = vmax.xlane.f32.xlu1 %v286_v42  ;;  %v98_v42 = vld [vmem:[#allocation4 + $0x248] sm:$0xff]  ;;  %v306_v20 = vmax.f32 %v305_v32, %v93_v46  ;;  %v108_v46 = vld [vmem:[#allocation4 + $0x298] sm:$0xff]  ;;  %v113_v32 = vld [vmem:[#allocation4 + $0x2c0] sm:$0xff] }
  0x36   :  { %v313_v52 = vmax.f32 %v97_v43, %v98_v42  ;;  %v112_v43 = vld [vmem:[#allocation4 + $0x2b8] sm:$0xff] }
  0x37   :  { %291 = vmax.xlane.f32.xlu0 %v290_v53  ;;  %v103_v53 = vld [vmem:[#allocation4 + $0x270] sm:$0xff]  ;;  %v333_v42 = vmax.f32 %v112_v43, %v113_v32 }
  0x38   :  { %v314_v11 = vmax.f32 %v313_v52, %v99_v61  ;;  %v321_v33 = vmax.f32 %v103_v53, %v104_v7  ;;  %v114_v61 = vld [vmem:[#allocation4 + $0x2c8] sm:$0xff]  ;;  %v127_v32 = vld [vmem:[#allocation4 + $0x330] sm:$0xff] }
  0x39   :  { %295 = vmax.xlane.f32.xlu1 %v294_v62  ;;  %v325_v62 = vmax.f32 %v106_v63, %v107_v24  ;;  %v118_v7 = vld [vmem:[#allocation4 + $0x2e8] sm:$0xff]  ;;  %v334_v53 = vmax.f32 %v333_v42, %v114_v61  ;;  %v121_v24 = vld [vmem:[#allocation4 + $0x300] sm:$0xff] }
  0x3a   :  { %v322_v12 = vmax.f32 %v321_v33, %v105_v26  ;;  %v120_v33 = vld [vmem:[#allocation4 + $0x2f8] sm:$0xff]  ;;  %v129_v61 = vld [vmem:[#allocation4 + $0x340] sm:$0xff] }
  0x3b   :  { %299 = vmax.xlane.f32.xlu0 %v298_v16  ;;  %v110_v16 = vld [vmem:[#allocation4 + $0x2a8] sm:$0xff]  ;;  %v326_v36 = vmax.f32 %v325_v62, %v108_v46  ;;  %v123_v46 = vld [vmem:[#allocation4 + $0x310] sm:$0xff] }
  0x3c   :  { %v329_v21 = vmax.f32 %v109_v3, %v110_v16  ;;  %v124_v3 = vld [vmem:[#allocation4 + $0x318] sm:$0xff] }
  0x3d   :  { %303 = vmax.xlane.f32.xlu1 %v302_v34  ;;  %v111_v34 = vld [vmem:[#allocation4 + $0x2b0] sm:$0xff] }
  0x3e   :  { %v330_v60 = vmax.f32 %v329_v21, %v111_v34  ;;  %v126_v21 = vld [vmem:[#allocation4 + $0x328] sm:$0xff] }
  0x3f   :  { %307 = vmax.xlane.f32.xlu0 %v306_v20  ;;  %v116_v20 = vld [vmem:[#allocation4 + $0x2d8] sm:$0xff]  ;;  %v130_v34 = vld [vmem:[#allocation4 + $0x348] sm:$0xff] }
  0x40   :  { %v337_v52 = vmax.f32 %v115_v44, %v116_v20 }
  0x41   :  { %311 = vmax.xlane.f32.xlu1 %v310_v17  ;;  %v119_v17 = vld [vmem:[#allocation4 + $0x2f0] sm:$0xff] }
  0x42   :  { %v341_v63 = vmax.f32 %v118_v7, %v119_v17  ;;  %v338_v26 = vmax.f32 %v337_v52, %v117_v54  ;;  %v133_v17 = vld [vmem:[#allocation4 + $0x360] sm:$0xff]  ;;  %v132_v52 = vld [vmem:[#allocation4 + $0x358] sm:$0xff] }
  0x43   :  { %315 = vmax.xlane.f32.xlu0 %v314_v11  ;;  %v122_v11 = vld [vmem:[#allocation4 + $0x308] sm:$0xff]  ;;  %v136_v54 = vld [vmem:[#allocation4 + $0x378] sm:$0xff] }
  0x44   :  { %v345_v62 = vmax.f32 %v121_v24, %v122_v11  ;;  %v342_v16 = vmax.f32 %v341_v63, %v120_v33  ;;  %v135_v33 = vld [vmem:[#allocation4 + $0x370] sm:$0xff] }
  0x45   :  { %319 = vmax.xlane.f32.xlu1 %v318_v56  ;;  %v125_v56 = vld [vmem:[#allocation4 + $0x320] sm:$0xff] }
  0x46   :  { %v349_v43 = vmax.f32 %v124_v3, %v125_v56  ;;  %v346_v42 = vmax.f32 %v345_v62, %v123_v46  ;;  %v139_v56 = vld [vmem:[#allocation4 + $0x390] sm:$0xff]  ;;  %v138_v62 = vld [vmem:[#allocation4 + $0x388] sm:$0xff] }
  0x47   :  { %323 = vmax.xlane.f32.xlu0 %v322_v12  ;;  %v128_v12 = vld [vmem:[#allocation4 + $0x338] sm:$0xff]  ;;  %v142_v46 = vld [vmem:[#allocation4 + $0x3a8] sm:$0xff] }
  0x48   :  { %v353_v44 = vmax.f32 %v127_v32, %v128_v12  ;;  %v350_v20 = vmax.f32 %v349_v43, %v126_v21  ;;  %v141_v21 = vld [vmem:[#allocation4 + $0x3a0] sm:$0xff] }
  0x49   :  { %327 = vmax.xlane.f32.xlu1 %v326_v36  ;;  %v131_v36 = vld [vmem:[#allocation4 + $0x350] sm:$0xff] }
  0x4a   :  { %v357_v7 = vmax.f32 %v130_v34, %v131_v36  ;;  %v354_v63 = vmax.f32 %v353_v44, %v129_v61  ;;  %v145_v36 = vld [vmem:[#allocation4 + $0x3c0] sm:$0xff]  ;;  %v144_v44 = vld [vmem:[#allocation4 + $0x3b8] sm:$0xff] }
  0x4b   :  { %331 = vmax.xlane.f32.xlu0 %v330_v60  ;;  %v134_v60 = vld [vmem:[#allocation4 + $0x368] sm:$0xff]  ;;  %v148_v61 = vld [vmem:[#allocation4 + $0x3d8] sm:$0xff] }
  0x4c   :  { %v361_v24 = vmax.f32 %v133_v17, %v134_v60  ;;  %v358_v11 = vmax.f32 %v357_v7, %v132_v52  ;;  %v147_v52 = vld [vmem:[#allocation4 + $0x3d0] sm:$0xff] }
  0x4d   :  { %335 = vmax.xlane.f32.xlu1 %v334_v53  ;;  %v137_v53 = vld [vmem:[#allocation4 + $0x380] sm:$0xff] }
  0x4e   :  { %v365_v3 = vmax.f32 %v136_v54, %v137_v53  ;;  %v362_v43 = vmax.f32 %v361_v24, %v135_v33  ;;  %v151_v53 = vld [vmem:[#allocation4 + $0x3f0] sm:$0xff]  ;;  %v150_v24 = vld [vmem:[#allocation4 + $0x3e8] sm:$0xff] }
  0x4f   :  { %339 = vmax.xlane.f32.xlu0 %v338_v26  ;;  %v140_v26 = vld [vmem:[#allocation4 + $0x398] sm:$0xff]  ;;  %v154_v33 = vld [vmem:[#allocation4 + $0x408] sm:$0xff] }
  0x50   :  { %v369_v32 = vmax.f32 %v139_v56, %v140_v26  ;;  %v366_v12 = vmax.f32 %v365_v3, %v138_v62  ;;  %v153_v62 = vld [vmem:[#allocation4 + $0x400] sm:$0xff] }
  0x51   :  { %343 = vmax.xlane.f32.xlu1 %v342_v16  ;;  %v143_v16 = vld [vmem:[#allocation4 + $0x3b0] sm:$0xff] }
  0x52   :  { %v373_v34 = vmax.f32 %v142_v46, %v143_v16  ;;  %v370_v7 = vmax.f32 %v369_v32, %v141_v21  ;;  %v157_v16 = vld [vmem:[#allocation4 + $0x420] sm:$0xff]  ;;  %v156_v32 = vld [vmem:[#allocation4 + $0x418] sm:$0xff] }
  0x53   :  { %347 = vmax.xlane.f32.xlu0 %v346_v42  ;;  %v146_v42 = vld [vmem:[#allocation4 + $0x3c8] sm:$0xff]  ;;  %v160_v21 = vld [vmem:[#allocation4 + $0x438] sm:$0xff] }
  0x54   :  { %v377_v17 = vmax.f32 %v145_v36, %v146_v42  ;;  %v374_v60 = vmax.f32 %v373_v34, %v144_v44  ;;  %v159_v44 = vld [vmem:[#allocation4 + $0x430] sm:$0xff] }
  0x55   :  { %351 = vmax.xlane.f32.xlu1 %v350_v20  ;;  %v149_v20 = vld [vmem:[#allocation4 + $0x3e0] sm:$0xff] }
  0x56   :  { %v381_v54 = vmax.f32 %v148_v61, %v149_v20  ;;  %v378_v3 = vmax.f32 %v377_v17, %v147_v52  ;;  %v163_v20 = vld [vmem:[#allocation4 + $0x450] sm:$0xff]  ;;  %v162_v17 = vld [vmem:[#allocation4 + $0x448] sm:$0xff] }
  0x57   :  { %355 = vmax.xlane.f32.xlu0 %v354_v63  ;;  %v152_v63 = vld [vmem:[#allocation4 + $0x3f8] sm:$0xff]  ;;  %v166_v52 = vld [vmem:[#allocation4 + $0x468] sm:$0xff] }
  0x58   :  { %v385_v56 = vmax.f32 %v151_v53, %v152_v63  ;;  %v382_v26 = vmax.f32 %v381_v54, %v150_v24  ;;  %v165_v24 = vld [vmem:[#allocation4 + $0x460] sm:$0xff] }
  0x59   :  { %359 = vmax.xlane.f32.xlu1 %v358_v11  ;;  %v155_v11 = vld [vmem:[#allocation4 + $0x410] sm:$0xff] }
  0x5a   :  { %v389_v46 = vmax.f32 %v154_v33, %v155_v11  ;;  %v386_v34 = vmax.f32 %v385_v56, %v153_v62  ;;  %v169_v11 = vld [vmem:[#allocation4 + $0x480] sm:$0xff]  ;;  %v168_v56 = vld [vmem:[#allocation4 + $0x478] sm:$0xff] }
  0x5b   :  { %363 = vmax.xlane.f32.xlu0 %v362_v43  ;;  %v158_v43 = vld [vmem:[#allocation4 + $0x428] sm:$0xff]  ;;  %v172_v62 = vld [vmem:[#allocation4 + $0x498] sm:$0xff] }
  0x5c   :  { %v393_v36 = vmax.f32 %v157_v16, %v158_v43  ;;  %v390_v42 = vmax.f32 %v389_v46, %v156_v32  ;;  %v171_v32 = vld [vmem:[#allocation4 + $0x490] sm:$0xff] }
  0x5d   :  { %367 = vmax.xlane.f32.xlu1 %v366_v12  ;;  %v161_v12 = vld [vmem:[#allocation4 + $0x440] sm:$0xff] }
  0x5e   :  { %v397_v61 = vmax.f32 %v160_v21, %v161_v12  ;;  %v394_v54 = vmax.f32 %v393_v36, %v159_v44  ;;  %v175_v12 = vld [vmem:[#allocation4 + $0x4b0] sm:$0xff]  ;;  %v174_v36 = vld [vmem:[#allocation4 + $0x4a8] sm:$0xff] }
  0x5f   :  { %371 = vmax.xlane.f32.xlu0 %v370_v7  ;;  %v164_v7 = vld [vmem:[#allocation4 + $0x458] sm:$0xff]  ;;  %v178_v44 = vld [vmem:[#allocation4 + $0x4c8] sm:$0xff] }
  0x60   :  { %v401_v53 = vmax.f32 %v163_v20, %v164_v7  ;;  %v398_v63 = vmax.f32 %v397_v61, %v162_v17  ;;  %v177_v17 = vld [vmem:[#allocation4 + $0x4c0] sm:$0xff] }
  0x61   :  { %375 = vmax.xlane.f32.xlu1 %v374_v60  ;;  %v167_v60 = vld [vmem:[#allocation4 + $0x470] sm:$0xff] }
  0x62   :  { %v405_v33 = vmax.f32 %v166_v52, %v167_v60  ;;  %v402_v46 = vmax.f32 %v401_v53, %v165_v24  ;;  %v181_v60 = vld [vmem:[#allocation4 + $0x4e0] sm:$0xff]  ;;  %v180_v53 = vld [vmem:[#allocation4 + $0x4d8] sm:$0xff] }
  0x63   :  { %379 = vmax.xlane.f32.xlu0 %v378_v3  ;;  %v170_v3 = vld [vmem:[#allocation4 + $0x488] sm:$0xff]  ;;  %v184_v24 = vld [vmem:[#allocation4 + $0x4f8] sm:$0xff] }
  0x64   :  { %v409_v16 = vmax.f32 %v169_v11, %v170_v3  ;;  %v406_v43 = vmax.f32 %v405_v33, %v168_v56  ;;  %v183_v56 = vld [vmem:[#allocation4 + $0x4f0] sm:$0xff] }
  0x65   :  { %383 = vmax.xlane.f32.xlu1 %v382_v26  ;;  %v173_v26 = vld [vmem:[#allocation4 + $0x4a0] sm:$0xff] }
  0x66   :  { %v413_v21 = vmax.f32 %v172_v62, %v173_v26  ;;  %v410_v61 = vmax.f32 %v409_v16, %v171_v32  ;;  %v187_v26 = vld [vmem:[#allocation4 + $0x510] sm:$0xff]  ;;  %v186_v16 = vld [vmem:[#allocation4 + $0x508] sm:$0xff] }
  0x67   :  { %387 = vmax.xlane.f32.xlu0 %v386_v34  ;;  %v176_v34 = vld [vmem:[#allocation4 + $0x4b8] sm:$0xff]  ;;  %v190_v32 = vld [vmem:[#allocation4 + $0x528] sm:$0xff] }
  0x68   :  { %v417_v20 = vmax.f32 %v175_v12, %v176_v34  ;;  %v414_v7 = vmax.f32 %v413_v21, %v174_v36  ;;  %v189_v36 = vld [vmem:[#allocation4 + $0x520] sm:$0xff] }
  0x69   :  { %391 = vmax.xlane.f32.xlu1 %v390_v42  ;;  %v179_v42 = vld [vmem:[#allocation4 + $0x4d0] sm:$0xff] }
  0x6a   :  { %v421_v52 = vmax.f32 %v178_v44, %v179_v42  ;;  %v418_v33 = vmax.f32 %v417_v20, %v177_v17  ;;  %v193_v42 = vld [vmem:[#allocation4 + $0x540] sm:$0xff]  ;;  %v192_v20 = vld [vmem:[#allocation4 + $0x538] sm:$0xff] }
  0x6b   :  { %395 = vmax.xlane.f32.xlu0 %v394_v54  ;;  %v182_v54 = vld [vmem:[#allocation4 + $0x4e8] sm:$0xff]  ;;  %v196_v17 = vld [vmem:[#allocation4 + $0x558] sm:$0xff] }
  0x6c   :  { %v425_v11 = vmax.f32 %v181_v60, %v182_v54  ;;  %v422_v3 = vmax.f32 %v421_v52, %v180_v53  ;;  %v195_v53 = vld [vmem:[#allocation4 + $0x550] sm:$0xff] }
  0x6d   :  { %399 = vmax.xlane.f32.xlu1 %v398_v63  ;;  %v185_v63 = vld [vmem:[#allocation4 + $0x500] sm:$0xff] }
  0x6e   :  { %v429_v62 = vmax.f32 %v184_v24, %v185_v63  ;;  %v426_v21 = vmax.f32 %v425_v11, %v183_v56  ;;  %v199_v63 = vld [vmem:[#allocation4 + $0x570] sm:$0xff]  ;;  %v198_v11 = vld [vmem:[#allocation4 + $0x568] sm:$0xff] }
  0x6f   :  { %403 = vmax.xlane.f32.xlu0 %v402_v46  ;;  %v188_v46 = vld [vmem:[#allocation4 + $0x518] sm:$0xff]  ;;  %v202_v56 = vld [vmem:[#allocation4 + $0x588] sm:$0xff] }
  0x70   :  { %v433_v12 = vmax.f32 %v187_v26, %v188_v46  ;;  %v430_v34 = vmax.f32 %v429_v62, %v186_v16  ;;  %v201_v16 = vld [vmem:[#allocation4 + $0x580] sm:$0xff] }
  0x71   :  { %407 = vmax.xlane.f32.xlu1 %v406_v43  ;;  %v191_v43 = vld [vmem:[#allocation4 + $0x530] sm:$0xff] }
  0x72   :  { %v437_v44 = vmax.f32 %v190_v32, %v191_v43  ;;  %v434_v52 = vmax.f32 %v433_v12, %v189_v36  ;;  %v205_v43 = vld [vmem:[#allocation4 + $0x5a0] sm:$0xff]  ;;  %v204_v12 = vld [vmem:[#allocation4 + $0x598] sm:$0xff] }
  0x73   :  { %411 = vmax.xlane.f32.xlu0 %v410_v61  ;;  %v194_v61 = vld [vmem:[#allocation4 + $0x548] sm:$0xff]  ;;  %v208_v36 = vld [vmem:[#allocation4 + $0x5b8] sm:$0xff] }
  0x74   :  { %v441_v60 = vmax.f32 %v193_v42, %v194_v61  ;;  %v438_v54 = vmax.f32 %v437_v44, %v192_v20  ;;  %v207_v20 = vld [vmem:[#allocation4 + $0x5b0] sm:$0xff] }
  0x75   :  { %415 = vmax.xlane.f32.xlu1 %v414_v7  ;;  %v197_v7 = vld [vmem:[#allocation4 + $0x560] sm:$0xff] }
  0x76   :  { %v445_v24 = vmax.f32 %v196_v17, %v197_v7  ;;  %v442_v62 = vmax.f32 %v441_v60, %v195_v53  ;;  %v211_v7 = vld [vmem:[#allocation4 + $0x5d0] sm:$0xff]  ;;  %v210_v60 = vld [vmem:[#allocation4 + $0x5c8] sm:$0xff] }
  0x77   :  { %419 = vmax.xlane.f32.xlu0 %v418_v33  ;;  %v200_v33 = vld [vmem:[#allocation4 + $0x578] sm:$0xff]  ;;  %v214_v53 = vld [vmem:[#allocation4 + $0x5e8] sm:$0xff] }
  0x78   :  { %v449_v26 = vmax.f32 %v199_v63, %v200_v33  ;;  %v446_v46 = vmax.f32 %v445_v24, %v198_v11  ;;  %v213_v11 = vld [vmem:[#allocation4 + $0x5e0] sm:$0xff] }
  0x79   :  { %423 = vmax.xlane.f32.xlu1 %v422_v3  ;;  %v203_v3 = vld [vmem:[#allocation4 + $0x590] sm:$0xff] }
  0x7a   :  { %v453_v32 = vmax.f32 %v202_v56, %v203_v3  ;;  %v450_v44 = vmax.f32 %v449_v26, %v201_v16  ;;  %v216_v3 = vld [vmem:[#allocation4 + $0x5f8] sm:$0xff] }
  0x7b   :  { %427 = vmax.xlane.f32.xlu0 %v426_v21  ;;  %v206_v21 = vld [vmem:[#allocation4 + $0x5a8] sm:$0xff] }
  0x7c   :  { %v457_v42 = vmax.f32 %v205_v43, %v206_v21  ;;  %v454_v61 = vmax.f32 %v453_v32, %v204_v12 }
  0x7d   :  { %431 = vmax.xlane.f32.xlu1 %v430_v34  ;;  %v209_v34 = vld [vmem:[#allocation4 + $0x5c0] sm:$0xff] }
  0x7e   :  { %v461_v17 = vmax.f32 %v208_v36, %v209_v34  ;;  %v458_v24 = vmax.f32 %v457_v42, %v207_v20 }
  0x7f   :  { %435 = vmax.xlane.f32.xlu0 %v434_v52  ;;  %v212_v52 = vld [vmem:[#allocation4 + $0x5d8] sm:$0xff] }
  0x80   :  { %v465_v63 = vmax.f32 %v211_v7, %v212_v52  ;;  %v462_v33 = vmax.f32 %v461_v17, %v210_v60 }
  0x81   :  { %439 = vmax.xlane.f32.xlu1 %v438_v54  ;;  %v215_v54 = vld [vmem:[#allocation4 + $0x5f0] sm:$0xff] }
  0x82   :  { %v469_v56 = vmax.f32 %v214_v53, %v215_v54 }
  0x83   :  { %443 = vmax.xlane.f32.xlu0 %v442_v62  ;;  %v466_v62 = vmax.f32 %v465_v63, %v213_v11 }
  0x84   :  { %v470_v26 = vmax.f32 %v469_v56, %v216_v3 }
  0x85   :  { %447 = vmax.xlane.f32.xlu1 %v446_v46 }
  0x87   :  { %451 = vmax.xlane.f32.xlu0 %v450_v44 }
  0x89   :  { %455 = vmax.xlane.f32.xlu1 %v454_v61 }
  0x8b   :  { %459 = vmax.xlane.f32.xlu0 %v458_v24 }
  0x8d   :  { %463 = vmax.xlane.f32.xlu1 %v462_v33 }
  0x8f   :  { %467 = vmax.xlane.f32.xlu0 %v466_v62 }
  0x91   :  { %471 = vmax.xlane.f32.xlu1 %v470_v26 }
  0x9c   :  { %v220_v46 = vpop.xlane.xlu0 %219 }
  0x9d   :  { %v473_v16 = vsub.f32 %v5246_v0, %v220_v46  ;;  %v474_v32 = vsub.f32 %v5248_v1, %v220_v46  ;;  %v475_v43 = vsub.f32 %v5250_v2, %v220_v46 }
  0x9e   :  { %v228_v21 = vpop.xlane.xlu1 %227 }
  0x9f   :  { %v479_v12 = vsub.f32 %v5254_v4, %v228_v21  ;;  %v480_v36 = vsub.f32 %v5256_v5, %v228_v21  ;;  %v481_v34 = vsub.f32 %v5258_v6, %v228_v21  ;;  %v665_v44 = vmul.f32 1.442695, %v473_v16 }
  0xa0   :  { %v667_v42 = vmul.f32 1.442695, %v474_v32  ;;  %v669_v61 = vmul.f32 1.442695, %v475_v43  ;;  %v224_v7 = vpop.xlane.xlu0 %223 }
  0xa1   :  { %v677_v20 = vmul.f32 1.442695, %v479_v12  ;;  %v679_v17 = vmul.f32 1.442695, %v480_v36  ;;  %4536 = vpow2.f32 %v665_v44  ;;  %v476_v0 = vsub.f32 %v5262_v8, %v224_v7 }
  0xa2   :  { %v477_v1 = vsub.f32 %v5264_v9, %v224_v7  ;;  %v478_v2 = vsub.f32 %v5266_v10, %v224_v7  ;;  %v232_v52 = vpop.xlane.xlu1 %231  ;;  %4538 = vpow2.f32 %v667_v42  ;;  %v681_v4 = vmul.f32 1.442695, %v481_v34 }
  0xa3   :  { %v482_v5 = vsub.f32 %v5271_v13, %v232_v52  ;;  %4540 = vpow2.f32 %v669_v61  ;;  %v671_v6 = vmul.f32 1.442695, %v476_v0  ;;  %v483_v60 = vsub.f32 %v5273_v14, %v232_v52 }
  0xa4   :  { %4542 = vpow2.f32 %v677_v20  ;;  %v673_v53 = vmul.f32 1.442695, %v477_v1  ;;  %v484_v54 = vsub.f32 %v5275_v15, %v232_v52  ;;  %v236_v24 = vpop.xlane.xlu0 %235  ;;  %v675_v8 = vmul.f32 1.442695, %v478_v2 }
  0xa5   :  { %4544 = vpow2.f32 %v679_v17  ;;  %v485_v9 = vsub.f32 %v5280_v18, %v236_v24  ;;  %v683_v10 = vmul.f32 1.442695, %v482_v5  ;;  %v486_v33 = vsub.f32 %v5282_v19, %v236_v24 }
  0xa6   :  { %v240_v63 = vpop.xlane.xlu1 %239  ;;  %4546 = vpow2.f32 %v681_v4  ;;  %v685_v13 = vmul.f32 1.442695, %v483_v60  ;;  %v487_v11 = vsub.f32 %v5292_v25, %v236_v24  ;;  %v687_v56 = vmul.f32 1.442695, %v484_v54 }
  0xa7   :  { %4548 = vpow2.f32 %v671_v6  ;;  %v488_v14 = vsub.f32 %v5287_v22, %v240_v63  ;;  %v489_v15 = vsub.f32 %v5289_v23, %v240_v63  ;;  %v490_v3 = vsub.f32 %v5300_v29, %v240_v63 }
  0xa8   :  { %4550 = vpow2.f32 %v673_v53  ;;  %v244_v62 = vpop.xlane.xlu0 %243  ;;  %v689_v18 = vmul.f32 1.442695, %v485_v9  ;;  %v691_v16 = vmul.f32 1.442695, %v486_v33  ;;  %v693_v32 = vmul.f32 1.442695, %v487_v11 }
  0xa9   :  { %4552 = vpow2.f32 %v675_v8  ;;  %v491_v26 = vsub.f32 %v5296_v27, %v244_v62  ;;  %v492_v46 = vsub.f32 %v5298_v28, %v244_v62  ;;  %v493_v25 = vsub.f32 %v5310_v35, %v244_v62 }
  0xaa   :  { %v248_v19 = vpop.xlane.xlu1 %247  ;;  %4554 = vpow2.f32 %v683_v10  ;;  %v695_v43 = vmul.f32 1.442695, %v488_v14  ;;  %v697_v29 = vmul.f32 1.442695, %v489_v15  ;;  %v699_v21 = vmul.f32 1.442695, %v490_v3 }
  0xab   :  { %v494_v22 = vsub.f32 %v5302_v30, %v248_v19  ;;  %4556 = vpow2.f32 %v685_v13  ;;  %v495_v23 = vsub.f32 %v5304_v31, %v248_v19  ;;  %v496_v12 = vsub.f32 %v5318_v39, %v248_v19  ;;  %v7839_v19 = vld [vmem:[#allocation10_spill] sm:$0xff] }
  0xac   :  { %4558 = vpow2.f32 %v687_v56  ;;  %v252_v27 = vpop.xlane.xlu0 %251  ;;  %v701_v28 = vmul.f32 1.442695, %v491_v26  ;;  %v703_v36 = vmul.f32 1.442695, %v492_v46  ;;  %v705_v30 = vmul.f32 1.442695, %v493_v25 }
  0xad   :  { %4560 = vpow2.f32 %v689_v18  ;;  %v497_v34 = vsub.f32 %v5314_v37, %v252_v27  ;;  %v707_v42 = vmul.f32 1.442695, %v494_v22  ;;  %v498_v61 = vsub.f32 %v5316_v38, %v252_v27  ;;  %v7838_v26 = vld [vmem:[#allocation12_spill] sm:$0xff]  ;;  %v7840_v25 = vld [vmem:[#allocation11_spill] sm:$0xff] }
  0xae   :  { %v256_v44 = vpop.xlane.xlu1 %255  ;;  %v5460_v35 = vpop.eup %4536  ;;  %4562 = vpow2.f32 %v691_v16  ;;  %v709_v20 = vmul.f32 1.442695, %v495_v23  ;;  %v499_v39 = vsub.f32 %v5328_v45, %v252_v27  ;;  %v711_v37 = vmul.f32 1.442695, %v496_v12 }
  0xaf   :  { %v5463_v31 = vpop.eup %4538  ;;  %4564 = vpow2.f32 %v693_v32  ;;  %v500_v17 = vsub.f32 %v5320_v40, %v256_v44  ;;  %v501_v0 = vsub.f32 %v5322_v41, %v256_v44  ;;  %v502_v1 = vsub.f32 %v5336_v49, %v256_v44 }
  0xb0   :  { %v5467_v7 = vpop.eup %4540  ;;  %4566 = vpow2.f32 %v695_v43  ;;  %v260_v2 = vpop.xlane.xlu0 %259  ;;  %v713_v38 = vmul.f32 1.442695, %v497_v34  ;;  %v715_v40 = vmul.f32 1.442695, %v498_v61  ;;  %v717_v49 = vmul.f32 1.442695, %v499_v39 }
  0xb1   :  { %v5471_v52 = vpop.eup %4542  ;;  %4568 = vpow2.f32 %v697_v29  ;;  %v503_v4 = vsub.f32 %v5332_v47, %v260_v2  ;;  %v504_v5 = vsub.f32 %v5334_v48, %v260_v2  ;;  %v505_v60 = vsub.f32 %v5346_v55, %v260_v2  ;;  %v7842_v43 = vld [vmem:[#allocation15_spill] sm:$0xff]  ;;  %v7846_v61 = vld [vmem:[#allocation14_spill] sm:$0xff] }
  0xb2   :  { %v264_v45 = vpop.xlane.xlu1 %263  ;;  %v5475_v6 = vpop.eup %4544  ;;  %4570 = vpow2.f32 %v699_v21  ;;  %v719_v54 = vmul.f32 1.442695, %v500_v17  ;;  %v721_v47 = vmul.f32 1.442695, %v501_v0  ;;  %v723_v48 = vmul.f32 1.442695, %v502_v1 }
  0xb3   :  { %v506_v41 = vsub.f32 %v5338_v50, %v264_v45  ;;  %v5479_v53 = vpop.eup %4546  ;;  %4572 = vpow2.f32 %v701_v28  ;;  %v507_v24 = vsub.f32 %v5340_v51, %v264_v45  ;;  %v508_v9 = vsub.f32 %v5354_v59, %v264_v45 }
  0xb4   :  { %v5482_v8 = vpop.eup %4548  ;;  %4574 = vpow2.f32 %v703_v36  ;;  %v268_v63 = vpop.xlane.xlu0 %267  ;;  %v725_v55 = vmul.f32 1.442695, %v503_v4  ;;  %v727_v50 = vmul.f32 1.442695, %v504_v5  ;;  %v1049_v33 = vadd.f32 %v5463_v31, %v5460_v35  ;;  %v7844_v36 = vld [vmem:[#allocation13_spill] sm:$0xff]  ;;  %v7849_v5 = vld [vmem:[#allocation18_spill] sm:$0xff] }
  0xb5   :  { %v5485_v10 = vpop.eup %4550  ;;  %4576 = vpow2.f32 %v705_v30  ;;  %v729_v51 = vmul.f32 1.442695, %v505_v60  ;;  %v5491_v14 = vmul.f32 1.442695, %v506_v41  ;;  %v509_v56 = vsub.f32 %v5350_v57, %v268_v63  ;;  %v7851_v41 = vld [vmem:[#allocation16_spill] sm:$0xff] }
  0xb6   :  { %v272_v13 = vpop.xlane.xlu1 %271  ;;  %v5489_v11 = vpop.eup %4552  ;;  %4578 = vpow2.f32 %v707_v42  ;;  %v5496_v59 = vmul.f32 1.442695, %v507_v24  ;;  %v1050_v3 = vadd.f32 %v5467_v7, %v1049_v33  ;;  %v510_v62 = vsub.f32 %v5352_v58, %v268_v63  ;;  %v7853_v33 = vld [vmem:[#allocation17_spill] sm:$0xff] }
  0xb7   :  { %v5494_v15 = vpop.eup %4554  ;;  %4580 = vpow2.f32 %v709_v20  ;;  %v511_v46 = vsub.f32 %v7838_v26, %v268_v63  ;;  %v512_v16 = vsub.f32 %v7839_v19, %v272_v13  ;;  %v513_v22 = vsub.f32 %v7840_v25, %v272_v13 }
  0xb8   :  { %v5500_v18 = vpop.eup %4556  ;;  %4582 = vpow2.f32 %v711_v37  ;;  %v276_v32 = vpop.xlane.xlu0 %275  ;;  %1051 = vadd.xlane.f32.xlu0 %v1050_v3  ;;  %v514_v23 = vsub.f32 %v7842_v43, %v272_v13  ;;  %v1057_v29 = vadd.f32 %v5475_v6, %v5471_v52  ;;  %v1053_v58 = vadd.f32 %v5485_v10, %v5482_v8 }
  0xb9   :  { %7837 = vst [vmem:[#allocation35_spill] sm:$0xff] %v5500_v18  ;;  %v5505_v57 = vpop.eup %4558  ;;  %4584 = vpow2.f32 %v713_v38  ;;  %v735_v27 = vmul.f32 1.442695, %v508_v9  ;;  %v737_v28 = vmul.f32 1.442695, %v509_v56  ;;  %v515_v34 = vsub.f32 %v7844_v36, %v276_v32 }
  0xba   :  { %7841 = vst [vmem:[#allocation12_spill] sm:$0xff] %v5505_v57  ;;  %v280_v21 = vpop.xlane.xlu1 %279  ;;  %v5512_v12 = vpop.eup %4560  ;;  %4586 = vpow2.f32 %v715_v40  ;;  %v1058_v30 = vadd.f32 %v5479_v53, %v1057_v29  ;;  %v1054_v42 = vadd.f32 %v5489_v11, %v1053_v58  ;;  %v516_v20 = vsub.f32 %v7846_v61, %v276_v32  ;;  %v7860_v29 = vld [vmem:[#allocation24_spill] sm:$0xff] }
  0xbb   :  { %7843 = vst [vmem:[#allocation10_spill] sm:$0xff] %v5512_v12  ;;  %v5515_v44 = vpop.eup %4562  ;;  %4588 = vpow2.f32 %v717_v49  ;;  %v739_v17 = vmul.f32 1.442695, %v510_v62  ;;  %v741_v37 = vmul.f32 1.442695, %v511_v46  ;;  %v517_v45 = vsub.f32 %v7849_v5, %v276_v32 }
  0xbc   :  { %7845 = vst [vmem:[#allocation11_spill] sm:$0xff] %v5515_v44  ;;  %v5520_v39 = vpop.eup %4564  ;;  %4590 = vpow2.f32 %v719_v54  ;;  %v5522_v0 = vmul.f32 1.442695, %v512_v16  ;;  %v284_v1 = vpop.xlane.xlu0 %283  ;;  %v5526_v38 = vmul.f32 1.442695, %v513_v22  ;;  %1059 = vadd.xlane.f32.xlu0 %v1058_v30  ;;  %1055 = vadd.xlane.f32.xlu1 %v1054_v42  ;;  %v518_v49 = vsub.f32 %v7851_v41, %v280_v21  ;;  %v7857_v16 = vld [vmem:[#allocation19_spill] sm:$0xff] }
  0xbd   :  { %7847 = vst [vmem:[#allocation15_spill] sm:$0xff] %v5520_v39  ;;  %v5524_v2 = vpop.eup %4566  ;;  %4592 = vpow2.f32 %v721_v47  ;;  %v5528_v4 = vmul.f32 1.442695, %v514_v23  ;;  %v1061_v54 = vadd.f32 %v5500_v18, %v5494_v15  ;;  %v1065_v24 = vadd.f32 %v5515_v44, %v5512_v12  ;;  %v7858_v22 = vld [vmem:[#allocation20_spill] sm:$0xff]  ;;  %v7864_v42 = vld [vmem:[#allocation27_spill] sm:$0xff] }
  0xbe   :  { %7848 = vst [vmem:[#allocation13_spill] sm:$0xff] %v5524_v2  ;;  %v288_v40 = vpop.xlane.xlu1 %287  ;;  %v5531_v60 = vpop.eup %4568  ;;  %4594 = vpow2.f32 %v723_v48  ;;  %v5540_v9 = vmul.f32 1.442695, %v515_v34  ;;  %v5542_v63 = vmul.f32 1.442695, %v516_v20  ;;  %v519_v13 = vsub.f32 %v7853_v33, %v280_v21  ;;  %v7855_v48 = vld [vmem:[#allocation21_spill] sm:$0xff] }
  0xbf   :  { %7850 = vst [vmem:[#allocation14_spill] sm:$0xff] %v5531_v60  ;;  %v5538_v47 = vpop.eup %4570  ;;  %4596 = vpow2.f32 %v725_v55  ;;  %v520_v3 = vsub.f32 %v7855_v48, %v280_v21  ;;  %v1062_v62 = vadd.f32 %v5505_v57, %v1061_v54  ;;  %v1066_v26 = vadd.f32 %v5520_v39, %v1065_v24  ;;  %v7861_v21 = vld [vmem:[#allocation22_spill] sm:$0xff]  ;;  %v7863_v34 = vld [vmem:[#allocation23_spill] sm:$0xff]  ;;  %v7868_v48 = vld [vmem:[#allocation25_spill] sm:$0xff] }
  0xc0   :  { %7852 = vst [vmem:[#allocation18_spill] sm:$0xff] %v5538_v47  ;;  %v5545_v56 = vpop.eup %4572  ;;  %4598 = vpow2.f32 %v727_v50  ;;  %v5550_v46 = vpop.xlane.xlu0 %291  ;;  %v5554_v55 = vmul.f32 1.442695, %v517_v45  ;;  %v521_v25 = vsub.f32 %v7857_v16, %v284_v1  ;;  %v522_v32 = vsub.f32 %v7858_v22, %v284_v1 }
  0xc1   :  { %7854 = vst [vmem:[#allocation16_spill] sm:$0xff] %v5545_v56  ;;  %v5552_v19 = vpop.eup %4574  ;;  %4600 = vpow2.f32 %v729_v51  ;;  %v5563_v23 = vmul.f32 1.442695, %v518_v49  ;;  %1063 = vadd.xlane.f32.xlu1 %v1062_v62  ;;  %1067 = vadd.xlane.f32.xlu0 %v1066_v26  ;;  %v523_v58 = vsub.f32 %v7860_v29, %v284_v1  ;;  %v524_v51 = vsub.f32 %v7861_v21, %v288_v40 }
  0xc2   :  { %7856 = vst [vmem:[#allocation17_spill] sm:$0xff] %v5552_v19  ;;  %v5558_v43 = vpop.xlane.xlu1 %295  ;;  %v5560_v50 = vpop.eup %4576  ;;  %4602 = vpow2.f32 %v5491_v14  ;;  %v525_v30 = vsub.f32 %v7863_v34, %v288_v40  ;;  %v526_v61 = vsub.f32 %v7864_v42, %v288_v40  ;;  %v1069_v20 = vadd.f32 %v5531_v60, %v5524_v2  ;;  %v7875_v34 = vld [vmem:[#allocation29_spill] sm:$0xff] }
  0xc3   :  { %7859 = vst [vmem:[#allocation21_spill] sm:$0xff] %v5560_v50  ;;  %v5567_v36 = vpop.eup %4578  ;;  %4604 = vpow2.f32 %v5496_v59  ;;  %v5576_v5 = vmul.f32 1.442695, %v519_v13  ;;  %v5578_v45 = vmul.f32 1.442695, %v520_v3  ;;  %v1073_v1 = vadd.f32 %v5552_v19, %v5545_v56 }
  0xc4   :  { %7862 = vst [vmem:[#allocation19_spill] sm:$0xff] %v5567_v36  ;;  %v5574_v14 = vpop.eup %4580  ;;  %4606 = vpow2.f32 %v735_v27  ;;  %v5582_v41 = vpop.xlane.xlu0 %299  ;;  %v5586_v49 = vmul.f32 1.442695, %v521_v25  ;;  %v5588_v40 = vmul.f32 1.442695, %v522_v32  ;;  %v1070_v54 = vadd.f32 %v5538_v47, %v1069_v20  ;;  %v7872_v32 = vld [vmem:[#allocation30_spill] sm:$0xff] }
  0xc5   :  { %7865 = vst [vmem:[#allocation20_spill] sm:$0xff] %v5574_v14  ;;  %v5584_v59 = vpop.eup %4582  ;;  %4608 = vpow2.f32 %v737_v28  ;;  %v5595_v33 = vmul.f32 1.442695, %v523_v58  ;;  %v1074_v13 = vadd.f32 %v5560_v50, %v1073_v1  ;;  %v527_v3 = vsub.f32 %v7868_v48, %v5550_v46  ;;  %v7877_v1 = vld [vmem:[#allocation33_spill] sm:$0xff] }
  0xc6   :  { %7866 = vst [vmem:[#allocation24_spill] sm:$0xff] %v5584_v59  ;;  %v5591_v24 = vpop.xlane.xlu1 %303  ;;  %v5593_v27 = vpop.eup %4584  ;;  %4610 = vpow2.f32 %v739_v17  ;;  %v5602_v28 = vmul.f32 1.442695, %v524_v51  ;;  %v5604_v26 = vmul.f32 1.442695, %v525_v30  ;;  %1071 = vadd.xlane.f32.xlu1 %v1070_v54  ;;  %v7871_v17 = vld [vmem:[#allocation26_spill] sm:$0xff]  ;;  %v529_v29 = vsub.f32 %v7872_v32, %v5550_v46 }
  0xc7   :  { %7867 = vst [vmem:[#allocation22_spill] sm:$0xff] %v5593_v27  ;;  %v5600_v62 = vpop.eup %4586  ;;  %4612 = vpow2.f32 %v741_v37  ;;  %v5606_v16 = vmul.f32 1.442695, %v526_v61  ;;  %1075 = vadd.xlane.f32.xlu0 %v1074_v13  ;;  %v528_v22 = vsub.f32 %v7871_v17, %v5550_v46  ;;  %v7873_v37 = vld [vmem:[#allocation28_spill] sm:$0xff]  ;;  %v531_v30 = vsub.f32 %v7875_v34, %v5558_v43  ;;  %v7878_v54 = vld [vmem:[#allocation31_spill] sm:$0xff] }
  0xc8   :  { %7869 = vst [vmem:[#allocation23_spill] sm:$0xff] %v5600_v62  ;;  %v5608_v25 = vpop.eup %4588  ;;  %4614 = vpow2.f32 %v5522_v0  ;;  %v530_v58 = vsub.f32 %v7873_v37, %v5558_v43  ;;  %v5617_v21 = vpop.xlane.xlu0 %307  ;;  %v1077_v0 = vadd.f32 %v5574_v14, %v5567_v36  ;;  %v1081_v42 = vadd.f32 %v5600_v62, %v5593_v27  ;;  %v7880_v37 = vld [vmem:[#allocation32_spill] sm:$0xff]  ;;  %v5056_v27 = vld [vmem:[#allocation4 + $0x238] sm:$0xff]  ;;  %v5065_v14 = vld [vmem:[#allocation4 + $0x280] sm:$0xff] }
  0xc9   :  { %7870 = vst [vmem:[#allocation27_spill] sm:$0xff] %v5608_v25  ;;  %v5619_v51 = vpop.eup %4590  ;;  %4616 = vpow2.f32 %v5526_v38  ;;  %v5633_v20 = vmul.f32 1.442695, %v527_v3  ;;  %v532_v38 = vsub.f32 %v7877_v1, %v5558_v43  ;;  %v533_v13 = vsub.f32 %v7878_v54, %v5582_v41 }
  0xca   :  { %7874 = vst [vmem:[#allocation25_spill] sm:$0xff] %v5619_v51  ;;  %v5628_v61 = vpop.xlane.xlu1 %311  ;;  %v5630_v46 = vpop.eup %4592  ;;  %4618 = vpow2.f32 %v5528_v4  ;;  %v1078_v17 = vadd.f32 %v5584_v59, %v1077_v0  ;;  %v1082_v32 = vadd.f32 %v5608_v25, %v1081_v42  ;;  %v534_v34 = vsub.f32 %v7880_v37, %v5582_v41  ;;  %v7883_v42 = vld [vmem:[#allocation34_spill] sm:$0xff] }
  0xcb   :  { %7876 = vst [vmem:[#allocation26_spill] sm:$0xff] %v5630_v46  ;;  %v5639_v48 = vpop.eup %4594  ;;  %4620 = vpow2.f32 %v5540_v9  ;;  %v5649_v3 = vmul.f32 1.442695, %v528_v22  ;;  %v5651_v43 = vmul.f32 1.442695, %v529_v29  ;;  %v535_v37 = vsub.f32 %v7883_v42, %v5582_v41  ;;  %v5049_v42 = vld [vmem:[#allocation4 + $0x200] sm:$0xff] }
  0xcc   :  { %7879 = vst [vmem:[#allocation30_spill] sm:$0xff] %v5639_v48  ;;  %v5646_v4 = vpop.eup %4596  ;;  %4622 = vpow2.f32 %v5542_v63  ;;  %v5653_v1 = vmul.f32 1.442695, %v530_v58  ;;  %v5655_v54 = vpop.xlane.xlu0 %315  ;;  %v5660_v0 = vmul.f32 1.442695, %v531_v30  ;;  %1079 = vadd.xlane.f32.xlu1 %v1078_v17  ;;  %1083 = vadd.xlane.f32.xlu0 %v1082_v32  ;;  %v5048_v63 = vld [vmem:[#allocation4 + $0x1f8] sm:$0xff] }
  0xcd   :  { %7881 = vst [vmem:[#allocation28_spill] sm:$0xff] %v5646_v4  ;;  %v5657_v9 = vpop.eup %4598  ;;  %4624 = vpow2.f32 %v5554_v55  ;;  %v536_v22 = vsub.f32 %v5048_v63, %v5591_v24  ;;  %v5670_v25 = vmul.f32 1.442695, %v532_v38  ;;  %v1085_v55 = vadd.f32 %v5630_v46, %v5619_v51  ;;  %v5050_v38 = vld [vmem:[#allocation4 + $0x208] sm:$0xff] }
  0xce   :  { %7882 = vst [vmem:[#allocation29_spill] sm:$0xff] %v5657_v9  ;;  %v5665_v29 = vpop.xlane.xlu1 %319  ;;  %v5667_v58 = vpop.eup %4600  ;;  %4626 = vpow2.f32 %v5563_v23  ;;  %v1089_v30 = vadd.f32 %v5657_v9, %v5646_v4  ;;  %v5679_v41 = vmul.f32 1.442695, %v533_v13  ;;  %v5681_v32 = vmul.f32 1.442695, %v534_v34 }
  0xcf   :  { %7884 = vst [vmem:[#allocation33_spill] sm:$0xff] %v5667_v58  ;;  %v5676_v17 = vpop.eup %4602  ;;  %4628 = vpow2.f32 %v5576_v5  ;;  %v537_v63 = vsub.f32 %v5049_v42, %v5591_v24  ;;  %v538_v46 = vsub.f32 %v5050_v38, %v5591_v24  ;;  %v1086_v9 = vadd.f32 %v5639_v48, %v1085_v55  ;;  %v5051_v42 = vld [vmem:[#allocation4 + $0x210] sm:$0xff]  ;;  %v5052_v55 = vld [vmem:[#allocation4 + $0x218] sm:$0xff]  ;;  %v5053_v38 = vld [vmem:[#allocation4 + $0x220] sm:$0xff] }
  0xd0   :  { %7885 = vst [vmem:[#allocation31_spill] sm:$0xff] %v5676_v17  ;;  %v5684_v23 = vpop.eup %4604  ;;  %4630 = vpow2.f32 %v5578_v45  ;;  %v1090_v4 = vadd.f32 %v5667_v58, %v1089_v30  ;;  %v5690_v51 = vpop.xlane.xlu0 %323  ;;  %v5695_v13 = vmul.f32 1.442695, %v535_v37  ;;  %v5697_v34 = vmul.f32 1.442695, %v536_v22  ;;  %v5054_v37 = vld [vmem:[#allocation4 + $0x228] sm:$0xff] }
  0xd1   :  { %7886 = vst [vmem:[#allocation32_spill] sm:$0xff] %v5684_v23  ;;  %v5692_v5 = vpop.eup %4606  ;;  %4632 = vpow2.f32 %v5586_v49  ;;  %v539_v45 = vsub.f32 %v5051_v42, %v5617_v21  ;;  %1087 = vadd.xlane.f32.xlu1 %v1086_v9  ;;  %v540_v30 = vsub.f32 %v5052_v55, %v5617_v21  ;;  %v541_v49 = vsub.f32 %v5053_v38, %v5617_v21  ;;  %v5055_v42 = vld [vmem:[#allocation4 + $0x230] sm:$0xff] }
  0xd2   :  { %7887 = vst [vmem:[#allocation34_spill] sm:$0xff] %v5692_v5  ;;  %v5700_v62 = vpop.xlane.xlu1 %327  ;;  %v5702_v24 = vpop.eup %4608  ;;  %4634 = vpow2.f32 %v5588_v40  ;;  %1091 = vadd.xlane.f32.xlu0 %v1090_v4  ;;  %v542_v22 = vsub.f32 %v5054_v37, %v5628_v61  ;;  %v543_v48 = vsub.f32 %v5055_v42, %v5628_v61  ;;  %v544_v40 = vsub.f32 %v5056_v27, %v5628_v61  ;;  %v5057_v42 = vld [vmem:[#allocation4 + $0x240] sm:$0xff] }
  0xd3   :  { %7888 = vst [vmem:[#allocation36_spill] sm:$0xff] %v5702_v24  ;;  %v5708_v58 = vpop.eup %4610  ;;  %4636 = vpow2.f32 %v5595_v33  ;;  %v1093_v4 = vadd.f32 %v5684_v23, %v5676_v17  ;;  %v5718_v21 = vmul.f32 1.442695, %v537_v63  ;;  %v5720_v55 = vmul.f32 1.442695, %v538_v46 }
  0xd4   :  { %7889 = vst [vmem:[#allocation37_spill] sm:$0xff] %v5708_v58  ;;  %v5715_v9 = vpop.eup %4612  ;;  %4638 = vpow2.f32 %v5602_v28  ;;  %v1097_v33 = vadd.f32 %v5708_v58, %v5702_v24  ;;  %v5724_v38 = vpop.xlane.xlu0 %331  ;;  %v5729_v27 = vmul.f32 1.442695, %v539_v45  ;;  %v545_v28 = vsub.f32 %v5057_v42, %v5655_v54 }
  0xd5   :  { %7890 = vst [vmem:[#allocation38_spill] sm:$0xff] %v5715_v9  ;;  %v5726_v37 = vpop.eup %4614  ;;  %4640 = vpow2.f32 %v5604_v26  ;;  %v1094_v61 = vadd.f32 %v5692_v5, %v1093_v4  ;;  %v5738_v58 = vmul.f32 1.442695, %v540_v30  ;;  %v5740_v24 = vmul.f32 1.442695, %v541_v49  ;;  %v5059_v49 = vld [vmem:[#allocation4 + $0x250] sm:$0xff] }
  0xd6   :  { %7891 = vst [vmem:[#allocation39_spill] sm:$0xff] %v5726_v37  ;;  %v5733_v63 = vpop.xlane.xlu1 %335  ;;  %v5735_v46 = vpop.eup %4616  ;;  %4642 = vpow2.f32 %v5606_v16  ;;  %v1098_v23 = vadd.f32 %v5715_v9, %v1097_v33  ;;  %v5746_v45 = vmul.f32 1.442695, %v542_v22  ;;  %v5748_v4 = vmul.f32 1.442695, %v543_v48  ;;  %v5058_v16 = vld [vmem:[#allocation4 + $0x248] sm:$0xff] }
  0xd7   :  { %7892 = vst [vmem:[#allocation40_spill] sm:$0xff] %v5735_v46  ;;  %v5743_v26 = vpop.eup %4618  ;;  %4644 = vpow2.f32 %v5633_v20  ;;  %v5750_v42 = vmul.f32 1.442695, %v544_v40  ;;  %1095 = vadd.xlane.f32.xlu1 %v1094_v61  ;;  %v546_v30 = vsub.f32 %v5058_v16, %v5655_v54  ;;  %v547_v33 = vsub.f32 %v5059_v49, %v5655_v54  ;;  %v5060_v9 = vld [vmem:[#allocation4 + $0x258] sm:$0xff]  ;;  %v5061_v61 = vld [vmem:[#allocation4 + $0x260] sm:$0xff] }
  0xd8   :  { %7893 = vst [vmem:[#allocation41_spill] sm:$0xff] %v5743_v26  ;;  %v5752_v5 = vpop.eup %4620  ;;  %4646 = vpow2.f32 %v5649_v3  ;;  %1099 = vadd.xlane.f32.xlu0 %v1098_v23  ;;  %v548_v20 = vsub.f32 %v5060_v9, %v5665_v29  ;;  %v5758_v22 = vpop.xlane.xlu0 %339  ;;  %v5763_v40 = vmul.f32 1.442695, %v545_v28  ;;  %v549_v3 = vsub.f32 %v5061_v61, %v5665_v29  ;;  %v5062_v9 = vld [vmem:[#allocation4 + $0x268] sm:$0xff]  ;;  %v5063_v28 = vld [vmem:[#allocation4 + $0x270] sm:$0xff] }
  0xd9   :  { %7894 = vst [vmem:[#allocation42_spill] sm:$0xff] %v5752_v5  ;;  %v5760_v48 = vpop.eup %4622  ;;  %4648 = vpow2.f32 %v5651_v43  ;;  %v1101_v23 = vadd.f32 %v5735_v46, %v5726_v37  ;;  %v550_v49 = vsub.f32 %v5062_v9, %v5665_v29  ;;  %v551_v17 = vsub.f32 %v5063_v28, %v5690_v51  ;;  %v5064_v46 = vld [vmem:[#allocation4 + $0x278] sm:$0xff] }
  0xda   :  { %7895 = vst [vmem:[#allocation43_spill] sm:$0xff] %v5760_v48  ;;  %v5768_v16 = vpop.xlane.xlu1 %343  ;;  %v5770_v54 = vpop.eup %4624  ;;  %4650 = vpow2.f32 %v5653_v1  ;;  %v1105_v43 = vadd.f32 %v5760_v48, %v5752_v5  ;;  %v552_v37 = vsub.f32 %v5064_v46, %v5690_v51  ;;  %v553_v1 = vsub.f32 %v5065_v14, %v5690_v51  ;;  %v5066_v14 = vld [vmem:[#allocation4 + $0x288] sm:$0xff] }
  0xdb   :  { %7896 = vst [vmem:[#allocation44_spill] sm:$0xff] %v5770_v54  ;;  %v5777_v59 = vpop.eup %4626  ;;  %4652 = vpow2.f32 %v5660_v0  ;;  %v1102_v61 = vadd.f32 %v5743_v26, %v1101_v23  ;;  %v5786_v29 = vmul.f32 1.442695, %v546_v30  ;;  %v5788_v9 = vmul.f32 1.442695, %v547_v33 }
  0xdc   :  { %7897 = vst [vmem:[#allocation45_spill] sm:$0xff] %v5777_v59  ;;  %v5783_v36 = vpop.eup %4628  ;;  %4654 = vpow2.f32 %v5670_v25  ;;  %v1106_v28 = vadd.f32 %v5770_v54, %v1105_v43  ;;  %v5791_v48 = vpop.xlane.xlu0 %347  ;;  %v5796_v46 = vmul.f32 1.442695, %v548_v20  ;;  %v5798_v23 = vmul.f32 1.442695, %v549_v3  ;;  %v5067_v43 = vld [vmem:[#allocation4 + $0x290] sm:$0xff] }
  0xdd   :  { %7898 = vst [vmem:[#allocation46_spill] sm:$0xff] %v5783_v36  ;;  %v5793_v0 = vpop.eup %4630  ;;  %4656 = vpow2.f32 %v5679_v41  ;;  %1103 = vadd.xlane.f32.xlu1 %v1102_v61  ;;  %v554_v25 = vsub.f32 %v5066_v14, %v5700_v62  ;;  %v5806_v33 = vmul.f32 1.442695, %v550_v49  ;;  %v555_v41 = vsub.f32 %v5067_v43, %v5700_v62  ;;  %v5068_v49 = vld [vmem:[#allocation4 + $0x298] sm:$0xff] }
  0xde   :  { %7899 = vst [vmem:[#allocation47_spill] sm:$0xff] %v5793_v0  ;;  %v5801_v51 = vpop.xlane.xlu1 %351  ;;  %v5803_v30 = vpop.eup %4632  ;;  %4658 = vpow2.f32 %v5681_v32  ;;  %1107 = vadd.xlane.f32.xlu0 %v1106_v28  ;;  %v1109_v20 = vadd.f32 %v5783_v36, %v5777_v59  ;;  %v5814_v61 = vmul.f32 1.442695, %v551_v17  ;;  %v5816_v14 = vmul.f32 1.442695, %v552_v37  ;;  %v5069_v37 = vld [vmem:[#allocation4 + $0x2a0] sm:$0xff] }
  0xdf   :  { %7900 = vst [vmem:[#allocation48_spill] sm:$0xff] %v5803_v30  ;;  %v5811_v3 = vpop.eup %4634  ;;  %4660 = vpow2.f32 %v5695_v13  ;;  %v5818_v54 = vmul.f32 1.442695, %v553_v1  ;;  %v556_v28 = vsub.f32 %v5068_v49, %v5700_v62  ;;  %v5832_v13 = vmul.f32 1.442695, %v554_v25 }
  0xe0   :  { %7901 = vst [vmem:[#allocation49_spill] sm:$0xff] %v5811_v3  ;;  %v5820_v32 = vpop.eup %4636  ;;  %4662 = vpow2.f32 %v5697_v34  ;;  %v1110_v43 = vadd.f32 %v5793_v0, %v1109_v20  ;;  %v1113_v36 = vadd.f32 %v5811_v3, %v5803_v30  ;;  %v5827_v59 = vpop.xlane.xlu0 %355  ;;  %v557_v1 = vsub.f32 %v5069_v37, %v5724_v38  ;;  %v5070_v34 = vld [vmem:[#allocation4 + $0x2a8] sm:$0xff]  ;;  %v5071_v3 = vld [vmem:[#allocation4 + $0x2b0] sm:$0xff]  ;;  %v5072_v37 = vld [vmem:[#allocation4 + $0x2b8] sm:$0xff] }
  0xe1   :  { %7902 = vst [vmem:[#allocation50_spill] sm:$0xff] %v5820_v32  ;;  %v5829_v17 = vpop.eup %4638  ;;  %4664 = vpow2.f32 %v5718_v21  ;;  %v558_v5 = vsub.f32 %v5070_v34, %v5724_v38  ;;  %v5839_v20 = vmul.f32 1.442695, %v555_v41  ;;  %v559_v21 = vsub.f32 %v5071_v3, %v5724_v38  ;;  %v5073_v34 = vld [vmem:[#allocation4 + $0x2c0] sm:$0xff]  ;;  %v5074_v38 = vld [vmem:[#allocation4 + $0x2c8] sm:$0xff]  ;;  %v5075_v3 = vld [vmem:[#allocation4 + $0x2d0] sm:$0xff] }
  0xe2   :  { %7903 = vst [vmem:[#allocation51_spill] sm:$0xff] %v5829_v17  ;;  %v5836_v62 = vpop.eup %4640  ;;  %4666 = vpow2.f32 %v5720_v55  ;;  %1111 = vadd.xlane.f32.xlu1 %v1110_v43  ;;  %v1114_v49 = vadd.f32 %v5820_v32, %v1113_v36  ;;  %v560_v30 = vsub.f32 %v5072_v37, %v5733_v63  ;;  %v561_v0 = vsub.f32 %v5073_v34, %v5733_v63  ;;  %v5850_v41 = vpop.xlane.xlu1 %359 }
  0xe3   :  { %7904 = vst [vmem:[#allocation52_spill] sm:$0xff] %v5836_v62  ;;  %v5843_v25 = vpop.eup %4642  ;;  %4668 = vpow2.f32 %v5729_v27  ;;  %v1117_v55 = vadd.f32 %v5836_v62, %v5829_v17  ;;  %v5855_v36 = vmul.f32 1.442695, %v556_v28  ;;  %v562_v27 = vsub.f32 %v5074_v38, %v5733_v63 }
  0xe4   :  { %7905 = vst [vmem:[#allocation53_spill] sm:$0xff] %v5843_v25  ;;  %v5852_v43 = vpop.eup %4644  ;;  %4670 = vpow2.f32 %v5738_v58  ;;  %1115 = vadd.xlane.f32.xlu0 %v1114_v49  ;;  %v563_v37 = vsub.f32 %v5075_v3, %v5758_v22  ;;  %v5862_v34 = vmul.f32 1.442695, %v557_v1  ;;  %v5864_v62 = vmul.f32 1.442695, %v558_v5  ;;  %v5076_v49 = vld [vmem:[#allocation4 + $0x2d8] sm:$0xff]  ;;  %v5875_v3 = vpop.xlane.xlu0 %363 }
  0xe5   :  { %7906 = vst [vmem:[#allocation54_spill] sm:$0xff] %v5852_v43  ;;  %v5859_v32 = vpop.eup %4646  ;;  %4672 = vpow2.f32 %v5740_v24  ;;  %v1118_v17 = vadd.f32 %v5843_v25, %v1117_v55  ;;  %v5870_v28 = vmul.f32 1.442695, %v559_v21  ;;  %v564_v38 = vsub.f32 %v5076_v49, %v5758_v22 }
  0xe6   :  { %7907 = vst [vmem:[#allocation55_spill] sm:$0xff] %v5859_v32  ;;  %v5867_v58 = vpop.eup %4648  ;;  %4674 = vpow2.f32 %v5746_v45  ;;  %v1121_v63 = vadd.f32 %v5859_v32, %v5852_v43  ;;  %v5880_v5 = vmul.f32 1.442695, %v560_v30  ;;  %v5882_v1 = vmul.f32 1.442695, %v561_v0  ;;  %v5077_v45 = vld [vmem:[#allocation4 + $0x2e0] sm:$0xff] }
  0xe7   :  { %7908 = vst [vmem:[#allocation56_spill] sm:$0xff] %v5867_v58  ;;  %v5877_v24 = vpop.eup %4650  ;;  %4676 = vpow2.f32 %v5748_v4  ;;  %1119 = vadd.xlane.f32.xlu1 %v1118_v17  ;;  %v565_v21 = vsub.f32 %v5077_v45, %v5758_v22  ;;  %v5888_v32 = vmul.f32 1.442695, %v562_v27  ;;  %v5891_v43 = vmul.f32 1.442695, %v563_v37  ;;  %v5078_v4 = vld [vmem:[#allocation4 + $0x2e8] sm:$0xff] }
  0xe8   :  { %7909 = vst [vmem:[#allocation57_spill] sm:$0xff] %v5877_v24  ;;  %v5885_v55 = vpop.eup %4652  ;;  %4678 = vpow2.f32 %v5750_v42  ;;  %v1122_v49 = vadd.f32 %v5867_v58, %v1121_v63  ;;  %v566_v0 = vsub.f32 %v5078_v4, %v5768_v16  ;;  %v5079_v30 = vld [vmem:[#allocation4 + $0x2f0] sm:$0xff]  ;;  %v5900_v42 = vpop.xlane.xlu1 %367  ;;  %v5905_v37 = vmul.f32 1.442695, %v564_v38  ;;  %v5080_v63 = vld [vmem:[#allocation4 + $0x2f8] sm:$0xff]  ;;  %v5081_v45 = vld [vmem:[#allocation4 + $0x300] sm:$0xff] }
  0xe9   :  { %7910 = vst [vmem:[#allocation58_spill] sm:$0xff] %v5885_v55  ;;  %v5893_v25 = vpop.eup %4654  ;;  %4680 = vpow2.f32 %v5763_v40  ;;  %v567_v22 = vsub.f32 %v5079_v30, %v5768_v16  ;;  %v1125_v17 = vadd.f32 %v5885_v55, %v5877_v24  ;;  %v568_v40 = vsub.f32 %v5080_v63, %v5768_v16  ;;  %v5082_v24 = vld [vmem:[#allocation4 + $0x308] sm:$0xff]  ;;  %v5083_v38 = vld [vmem:[#allocation4 + $0x310] sm:$0xff] }
  0xea   :  { %7911 = vst [vmem:[#allocation59_spill] sm:$0xff] %v5893_v25  ;;  %v5902_v27 = vpop.eup %4656  ;;  %4682 = vpow2.f32 %v5786_v29  ;;  %1123 = vadd.xlane.f32.xlu0 %v1122_v49  ;;  %v569_v4 = vsub.f32 %v5081_v45, %v5791_v48  ;;  %v5912_v30 = vmul.f32 1.442695, %v565_v21  ;;  %v570_v29 = vsub.f32 %v5082_v24, %v5791_v48  ;;  %v5084_v45 = vld [vmem:[#allocation4 + $0x318] sm:$0xff]  ;;  %v5923_v21 = vpop.xlane.xlu0 %371 }
  0xeb   :  { %7912 = vst [vmem:[#allocation60_spill] sm:$0xff] %v5902_v27  ;;  %v5909_v58 = vpop.eup %4658  ;;  %4684 = vpow2.f32 %v5788_v9  ;;  %v1126_v55 = vadd.f32 %v5893_v25, %v1125_v17  ;;  %v571_v63 = vsub.f32 %v5083_v38, %v5791_v48  ;;  %v572_v9 = vsub.f32 %v5084_v45, %v5801_v51 }
  0xec   :  { %7913 = vst [vmem:[#allocation61_spill] sm:$0xff] %v5909_v58  ;;  %v5916_v49 = vpop.eup %4660  ;;  %4686 = vpow2.f32 %v5796_v46  ;;  %v1129_v16 = vadd.f32 %v5909_v58, %v5902_v27  ;;  %v5928_v24 = vmul.f32 1.442695, %v566_v0  ;;  %v5930_v17 = vmul.f32 1.442695, %v567_v22  ;;  %v5085_v46 = vld [vmem:[#allocation4 + $0x320] sm:$0xff] }
  0xed   :  { %7914 = vst [vmem:[#allocation62_spill] sm:$0xff] %v5916_v49  ;;  %v5925_v26 = vpop.eup %4662  ;;  %4688 = vpow2.f32 %v5798_v23  ;;  %1127 = vadd.xlane.f32.xlu1 %v1126_v55  ;;  %v573_v58 = vsub.f32 %v5085_v46, %v5801_v51  ;;  %v5936_v48 = vmul.f32 1.442695, %v568_v40  ;;  %v5939_v45 = vmul.f32 1.442695, %v569_v4  ;;  %v5086_v55 = vld [vmem:[#allocation4 + $0x328] sm:$0xff]  ;;  %v5949_v46 = vpop.xlane.xlu1 %375 }
  0xee   :  { %7915 = vst [vmem:[#allocation63_spill] sm:$0xff] %v5925_v26  ;;  %v5933_v27 = vpop.eup %4664  ;;  %4690 = vpow2.f32 %v5806_v33  ;;  %v1130_v38 = vadd.f32 %v5916_v49, %v1129_v16  ;;  %v5944_v23 = vmul.f32 1.442695, %v570_v29  ;;  %v574_v0 = vsub.f32 %v5086_v55, %v5801_v51 }
  0xef   :  { %7916 = vst [vmem:[#allocation64_spill] sm:$0xff] %v5933_v27  ;;  %v5941_v25 = vpop.eup %4666  ;;  %4692 = vpow2.f32 %v5814_v61  ;;  %v1133_v22 = vadd.f32 %v5933_v27, %v5925_v26  ;;  %v5954_v40 = vmul.f32 1.442695, %v571_v63  ;;  %v5956_v4 = vmul.f32 1.442695, %v572_v9  ;;  %v5087_v61 = vld [vmem:[#allocation4 + $0x330] sm:$0xff] }
  0xf0   :  { %7917 = vst [vmem:[#allocation65_spill] sm:$0xff] %v5941_v25  ;;  %v5951_v33 = vpop.eup %4668  ;;  %4694 = vpow2.f32 %v5816_v14  ;;  %1131 = vadd.xlane.f32.xlu0 %v1130_v38  ;;  %v575_v29 = vsub.f32 %v5087_v61, %v5827_v59  ;;  %v5962_v51 = vmul.f32 1.442695, %v573_v58  ;;  %v5088_v27 = vld [vmem:[#allocation4 + $0x338] sm:$0xff]  ;;  %v5089_v9 = vld [vmem:[#allocation4 + $0x340] sm:$0xff]  ;;  %v5090_v61 = vld [vmem:[#allocation4 + $0x348] sm:$0xff]  ;;  %v5973_v58 = vpop.xlane.xlu0 %379 }
  0xf1   :  { %7918 = vst [vmem:[#allocation66_spill] sm:$0xff] %v5951_v33  ;;  %v5959_v16 = vpop.eup %4670  ;;  %4696 = vpow2.f32 %v5818_v54  ;;  %v1134_v55 = vadd.f32 %v5941_v25, %v1133_v22  ;;  %v576_v26 = vsub.f32 %v5088_v27, %v5827_v59  ;;  %v577_v38 = vsub.f32 %v5089_v9, %v5827_v59  ;;  %v5091_v22 = vld [vmem:[#allocation4 + $0x350] sm:$0xff]  ;;  %v5092_v25 = vld [vmem:[#allocation4 + $0x358] sm:$0xff] }
  0xf2   :  { %7919 = vst [vmem:[#allocation67_spill] sm:$0xff] %v5959_v16  ;;  %v5966_v14 = vpop.eup %4672  ;;  %4698 = vpow2.f32 %v5832_v13  ;;  %v1137_v63 = vadd.f32 %v5959_v16, %v5951_v33  ;;  %v578_v54 = vsub.f32 %v5090_v61, %v5850_v41  ;;  %v5978_v27 = vmul.f32 1.442695, %v574_v0  ;;  %v5093_v61 = vld [vmem:[#allocation4 + $0x360] sm:$0xff] }
  0xf3   :  { %7920 = vst [vmem:[#allocation68_spill] sm:$0xff] %v5966_v14  ;;  %v5975_v49 = vpop.eup %4674  ;;  %4700 = vpow2.f32 %v5839_v20  ;;  %1135 = vadd.xlane.f32.xlu1 %v1134_v55  ;;  %v579_v13 = vsub.f32 %v5091_v22, %v5850_v41  ;;  %v580_v16 = vsub.f32 %v5092_v25, %v5850_v41  ;;  %v5986_v9 = vmul.f32 1.442695, %v575_v29  ;;  %v5094_v41 = vld [vmem:[#allocation4 + $0x368] sm:$0xff] }
  0xf4   :  { %7921 = vst [vmem:[#allocation69_spill] sm:$0xff] %v5975_v49  ;;  %v5982_v33 = vpop.eup %4676  ;;  %4702 = vpow2.f32 %v5855_v36  ;;  %v1138_v59 = vadd.f32 %v5966_v14, %v1137_v63  ;;  %v581_v20 = vsub.f32 %v5093_v61, %v5875_v3  ;;  %v5992_v55 = vmul.f32 1.442695, %v576_v26  ;;  %v5997_v36 = vpop.xlane.xlu1 %383 }
  0xf5   :  { %7922 = vst [vmem:[#allocation70_spill] sm:$0xff] %v5982_v33  ;;  %v5989_v0 = vpop.eup %4678  ;;  %4704 = vpow2.f32 %v5862_v34  ;;  %v1141_v25 = vadd.f32 %v5982_v33, %v5975_v49  ;;  %v582_v22 = vsub.f32 %v5094_v41, %v5875_v3  ;;  %v6002_v29 = vmul.f32 1.442695, %v577_v38  ;;  %v5095_v34 = vld [vmem:[#allocation4 + $0x370] sm:$0xff] }
  0xf6   :  { %7923 = vst [vmem:[#allocation71_spill] sm:$0xff] %v5989_v0  ;;  %v5999_v63 = vpop.eup %4680  ;;  %4706 = vpow2.f32 %v5864_v62  ;;  %1139 = vadd.xlane.f32.xlu0 %v1138_v59  ;;  %v6004_v61 = vmul.f32 1.442695, %v578_v54  ;;  %v583_v26 = vsub.f32 %v5095_v34, %v5875_v3  ;;  %v6010_v33 = vmul.f32 1.442695, %v579_v13  ;;  %v5096_v3 = vld [vmem:[#allocation4 + $0x378] sm:$0xff]  ;;  %v6023_v59 = vpop.xlane.xlu0 %387 }
  0xf7   :  { %7924 = vst [vmem:[#allocation72_spill] sm:$0xff] %v5999_v63  ;;  %v6007_v14 = vpop.eup %4682  ;;  %4708 = vpow2.f32 %v5870_v28  ;;  %v6012_v41 = vmul.f32 1.442695, %v580_v16  ;;  %v1142_v49 = vadd.f32 %v5989_v0, %v1141_v25  ;;  %v6020_v38 = vmul.f32 1.442695, %v581_v20  ;;  %v5097_v13 = vld [vmem:[#allocation4 + $0x380] sm:$0xff] }
  0xf8   :  { %7925 = vst [vmem:[#allocation73_spill] sm:$0xff] %v6007_v14  ;;  %v6015_v50 = vpop.eup %4684  ;;  %4710 = vpow2.f32 %v5880_v5  ;;  %v1145_v62 = vadd.f32 %v6007_v14, %v5999_v63  ;;  %v584_v54 = vsub.f32 %v5096_v3, %v5900_v42  ;;  %v6028_v16 = vmul.f32 1.442695, %v582_v22  ;;  %v5098_v25 = vld [vmem:[#allocation4 + $0x388] sm:$0xff]  ;;  %v5099_v63 = vld [vmem:[#allocation4 + $0x390] sm:$0xff]  ;;  %v6046_v0 = vpop.xlane.xlu1 %391 }
  0xf9   :  { %7926 = vst [vmem:[#allocation74_spill] sm:$0xff] %v6015_v50  ;;  %v6025_v28 = vpop.eup %4686  ;;  %4712 = vpow2.f32 %v5882_v1  ;;  %1143 = vadd.xlane.f32.xlu1 %v1142_v49  ;;  %v585_v5 = vsub.f32 %v5097_v13, %v5900_v42  ;;  %v586_v34 = vsub.f32 %v5098_v25, %v5900_v42  ;;  %v6036_v14 = vmul.f32 1.442695, %v583_v26  ;;  %v5100_v13 = vld [vmem:[#allocation4 + $0x398] sm:$0xff]  ;;  %v5101_v25 = vld [vmem:[#allocation4 + $0x3a0] sm:$0xff] }
  0xfa   :  { %7927 = vst [vmem:[#allocation75_spill] sm:$0xff] %v6025_v28  ;;  %v6032_v20 = vpop.eup %4688  ;;  %4714 = vpow2.f32 %v5888_v32  ;;  %v1146_v3 = vadd.f32 %v6015_v50, %v1145_v62  ;;  %v587_v1 = vsub.f32 %v5099_v63, %v5923_v21  ;;  %v588_v42 = vsub.f32 %v5100_v13, %v5923_v21  ;;  %v5102_v62 = vld [vmem:[#allocation4 + $0x3a8] sm:$0xff]  ;;  %v5103_v50 = vld [vmem:[#allocation4 + $0x3b0] sm:$0xff]  ;;  %v6071_v19 = vpop.xlane.xlu0 %395 }
  0xfb   :  { %7928 = vst [vmem:[#allocation76_spill] sm:$0xff] %v6032_v20  ;;  %v6039_v49 = vpop.eup %4690  ;;  %4716 = vpow2.f32 %v5891_v43  ;;  %v1149_v22 = vadd.f32 %v6032_v20, %v6025_v28  ;;  %v589_v32 = vsub.f32 %v5101_v25, %v5923_v21  ;;  %v6051_v63 = vmul.f32 1.442695, %v584_v54 }
  0xfc   :  { %7929 = vst [vmem:[#allocation77_spill] sm:$0xff] %v6039_v49  ;;  %v6048_v26 = vpop.eup %4692  ;;  %4718 = vpow2.f32 %v5905_v37  ;;  %1147 = vadd.xlane.f32.xlu0 %v1146_v3  ;;  %v590_v43 = vsub.f32 %v5102_v62, %v5949_v46  ;;  %v591_v20 = vsub.f32 %v5103_v50, %v5949_v46  ;;  %v6058_v21 = vmul.f32 1.442695, %v585_v5  ;;  %v5104_v50 = vld [vmem:[#allocation4 + $0x3b8] sm:$0xff] }
  0xfd   :  { %7930 = vst [vmem:[#allocation78_spill] sm:$0xff] %v6048_v26  ;;  %v6055_v28 = vpop.eup %4694  ;;  %4720 = vpow2.f32 %v5912_v30  ;;  %v6060_v13 = vmul.f32 1.442695, %v586_v34  ;;  %v1150_v25 = vadd.f32 %v6039_v49, %v1149_v22  ;;  %v6068_v3 = vmul.f32 1.442695, %v587_v1  ;;  %v5112_v49 = vld [vmem:[#allocation4 + $0x3f8] sm:$0xff] }
  0xfe   :  { %7931 = vst [vmem:[#allocation79_spill] sm:$0xff] %v6055_v28  ;;  %v6063_v37 = vpop.eup %4696  ;;  %4722 = vpow2.f32 %v5928_v24  ;;  %v1153_v54 = vadd.f32 %v6055_v28, %v6048_v26  ;;  %v592_v62 = vsub.f32 %v5104_v50, %v5949_v46  ;;  %v6076_v5 = vmul.f32 1.442695, %v588_v42  ;;  %v5105_v24 = vld [vmem:[#allocation4 + $0x3c0] sm:$0xff]  ;;  %v5106_v42 = vld [vmem:[#allocation4 + $0x3c8] sm:$0xff]  ;;  %v6119_v56 = vpop.xlane.xlu0 %403 }
  0xff   :  { %7932 = vst [vmem:[#allocation80_spill] sm:$0xff] %v6063_v37  ;;  %v6073_v30 = vpop.eup %4698  ;;  %4724 = vpow2.f32 %v5930_v17  ;;  %1151 = vadd.xlane.f32.xlu1 %v1150_v25  ;;  %v6078_v34 = vmul.f32 1.442695, %v589_v32  ;;  %v593_v22 = vsub.f32 %v5105_v24, %v5973_v58  ;;  %v6085_v1 = vmul.f32 1.442695, %v590_v43  ;;  %v5107_v25 = vld [vmem:[#allocation4 + $0x3d0] sm:$0xff] }
 0x100   :  { %7933 = vst [vmem:[#allocation81_spill] sm:$0xff] %v6073_v30  ;;  %v6081_v28 = vpop.eup %4700  ;;  %4726 = vpow2.f32 %v5936_v48  ;;  %v1154_v46 = vadd.f32 %v6063_v37, %v1153_v54  ;;  %v6087_v50 = vmul.f32 1.442695, %v591_v20  ;;  %v594_v32 = vsub.f32 %v5106_v42, %v5973_v58  ;;  %v6096_v48 = vpop.xlane.xlu1 %399  ;;  %v5108_v43 = vld [vmem:[#allocation4 + $0x3d8] sm:$0xff]  ;;  %v5109_v37 = vld [vmem:[#allocation4 + $0x3e0] sm:$0xff] }
 0x101   :  { %7934 = vst [vmem:[#allocation82_spill] sm:$0xff] %v6081_v28  ;;  %v6089_v26 = vpop.eup %4702  ;;  %4728 = vpow2.f32 %v5939_v45  ;;  %v1157_v17 = vadd.f32 %v6081_v28, %v6073_v30  ;;  %v595_v24 = vsub.f32 %v5107_v25, %v5973_v58  ;;  %v6101_v20 = vmul.f32 1.442695, %v592_v62  ;;  %v5110_v25 = vld [vmem:[#allocation4 + $0x3e8] sm:$0xff] }
 0x102   :  { %7935 = vst [vmem:[#allocation83_spill] sm:$0xff] %v6089_v26  ;;  %v6098_v54 = vpop.eup %4704  ;;  %4730 = vpow2.f32 %v5944_v23  ;;  %1155 = vadd.xlane.f32.xlu0 %v1154_v46  ;;  %v596_v45 = vsub.f32 %v5108_v43, %v5997_v36  ;;  %v597_v28 = vsub.f32 %v5109_v37, %v5997_v36  ;;  %v6109_v42 = vmul.f32 1.442695, %v593_v22  ;;  %v5111_v43 = vld [vmem:[#allocation4 + $0x3f0] sm:$0xff] }
 0x103   :  { %7936 = vst [vmem:[#allocation84_spill] sm:$0xff] %v6098_v54  ;;  %v6105_v30 = vpop.eup %4706  ;;  %4732 = vpow2.f32 %v5954_v40  ;;  %v1158_v58 = vadd.f32 %v6089_v26, %v1157_v17  ;;  %v598_v23 = vsub.f32 %v5110_v25, %v5997_v36  ;;  %v599_v37 = vsub.f32 %v5111_v43, %v6023_v59 }
 0x104   :  { %7937 = vst [vmem:[#allocation85_spill] sm:$0xff] %v6105_v30  ;;  %v6112_v46 = vpop.eup %4708  ;;  %4734 = vpow2.f32 %v5956_v4  ;;  %v1161_v62 = vadd.f32 %v6105_v30, %v6098_v54  ;;  %v600_v40 = vsub.f32 %v5112_v49, %v6023_v59  ;;  %v6124_v36 = vmul.f32 1.442695, %v594_v32  ;;  %v5113_v4 = vld [vmem:[#allocation4 + $0x400] sm:$0xff] }
 0x105   :  { %7938 = vst [vmem:[#allocation86_spill] sm:$0xff] %v6112_v46  ;;  %v6121_v22 = vpop.eup %4710  ;;  %4736 = vpow2.f32 %v5962_v51  ;;  %1159 = vadd.xlane.f32.xlu1 %v1158_v58  ;;  %v6126_v17 = vmul.f32 1.442695, %v595_v24  ;;  %v601_v25 = vsub.f32 %v5113_v4, %v6023_v59  ;;  %v6133_v43 = vmul.f32 1.442695, %v596_v45  ;;  %v5114_v59 = vld [vmem:[#allocation4 + $0x408] sm:$0xff]  ;;  %v6145_v58 = vpop.xlane.xlu1 %407 }
 0x106   :  { %7939 = vst [vmem:[#allocation87_spill] sm:$0xff] %v6121_v22  ;;  %v6129_v30 = vpop.eup %4712  ;;  %4738 = vpow2.f32 %v5978_v27  ;;  %v1162_v49 = vadd.f32 %v6112_v46, %v1161_v62  ;;  %v6135_v54 = vmul.f32 1.442695, %v597_v28  ;;  %v6140_v51 = vmul.f32 1.442695, %v598_v23  ;;  %v6169_v46 = vpop.xlane.xlu0 %411 }
 0x107   :  { %7940 = vst [vmem:[#allocation88_spill] sm:$0xff] %v6129_v30  ;;  %v6137_v26 = vpop.eup %4714  ;;  %4740 = vpow2.f32 %v5986_v9  ;;  %v1165_v32 = vadd.f32 %v6129_v30, %v6121_v22  ;;  %v602_v24 = vsub.f32 %v5114_v59, %v6046_v0  ;;  %v6150_v28 = vmul.f32 1.442695, %v599_v37  ;;  %v5115_v9 = vld [vmem:[#allocation4 + $0x410] sm:$0xff]  ;;  %v5116_v30 = vld [vmem:[#allocation4 + $0x418] sm:$0xff] }
 0x108   :  { %7941 = vst [vmem:[#allocation89_spill] sm:$0xff] %v6137_v26  ;;  %v6147_v27 = vpop.eup %4716  ;;  %4742 = vpow2.f32 %v5992_v55  ;;  %1163 = vadd.xlane.f32.xlu0 %v1162_v49  ;;  %v6152_v45 = vmul.f32 1.442695, %v600_v40  ;;  %v603_v23 = vsub.f32 %v5115_v9, %v6046_v0  ;;  %v6159_v59 = vmul.f32 1.442695, %v601_v25  ;;  %v5117_v40 = vld [vmem:[#allocation4 + $0x420] sm:$0xff] }
 0x109   :  { %7942 = vst [vmem:[#allocation90_spill] sm:$0xff] %v6147_v27  ;;  %v6155_v62 = vpop.eup %4718  ;;  %4744 = vpow2.f32 %v6002_v29  ;;  %v1166_v4 = vadd.f32 %v6137_v26, %v1165_v32  ;;  %v604_v22 = vsub.f32 %v5116_v30, %v6046_v0  ;;  %v605_v49 = vsub.f32 %v5117_v40, %v6071_v19  ;;  %v5118_v9 = vld [vmem:[#allocation4 + $0x428] sm:$0xff]  ;;  %v5119_v30 = vld [vmem:[#allocation4 + $0x430] sm:$0xff]  ;;  %v5120_v32 = vld [vmem:[#allocation4 + $0x438] sm:$0xff] }
 0x10a   :  { %7943 = vst [vmem:[#allocation91_spill] sm:$0xff] %v6155_v62  ;;  %v6162_v55 = vpop.eup %4720  ;;  %4746 = vpow2.f32 %v6004_v61  ;;  %v1169_v37 = vadd.f32 %v6155_v62, %v6147_v27  ;;  %v606_v29 = vsub.f32 %v5118_v9, %v6071_v19  ;;  %v6174_v0 = vmul.f32 1.442695, %v602_v24  ;;  %v5121_v26 = vld [vmem:[#allocation4 + $0x440] sm:$0xff] }
 0x10b   :  { %7944 = vst [vmem:[#allocation92_spill] sm:$0xff] %v6162_v55  ;;  %v6171_v25 = vpop.eup %4722  ;;  %4748 = vpow2.f32 %v6010_v33  ;;  %1167 = vadd.xlane.f32.xlu1 %v1166_v4  ;;  %v607_v61 = vsub.f32 %v5119_v30, %v6071_v19  ;;  %v608_v62 = vsub.f32 %v5120_v32, %v6096_v48  ;;  %v6182_v9 = vmul.f32 1.442695, %v603_v23  ;;  %v5122_v30 = vld [vmem:[#allocation4 + $0x448] sm:$0xff] }
 0x10c   :  { %7945 = vst [vmem:[#allocation93_spill] sm:$0xff] %v6171_v25  ;;  %v6178_v27 = vpop.eup %4724  ;;  %4750 = vpow2.f32 %v6012_v41  ;;  %v1170_v40 = vadd.f32 %v6162_v55, %v1169_v37  ;;  %v609_v33 = vsub.f32 %v5121_v26, %v6096_v48  ;;  %v6188_v24 = vmul.f32 1.442695, %v604_v22  ;;  %v6193_v41 = vpop.xlane.xlu1 %415 }
 0x10d   :  { %7946 = vst [vmem:[#allocation94_spill] sm:$0xff] %v6178_v27  ;;  %v6185_v4 = vpop.eup %4726  ;;  %4752 = vpow2.f32 %v6020_v38  ;;  %v1173_v19 = vadd.f32 %v6178_v27, %v6171_v25  ;;  %v610_v32 = vsub.f32 %v5122_v30, %v6096_v48  ;;  %v6198_v26 = vmul.f32 1.442695, %v605_v49  ;;  %v5123_v38 = vld [vmem:[#allocation4 + $0x450] sm:$0xff] }
 0x10e   :  { %7947 = vst [vmem:[#allocation95_spill] sm:$0xff] %v6185_v4  ;;  %v6195_v37 = vpop.eup %4728  ;;  %4754 = vpow2.f32 %v6028_v16  ;;  %1171 = vadd.xlane.f32.xlu0 %v1170_v40  ;;  %v6200_v23 = vmul.f32 1.442695, %v606_v29  ;;  %v611_v22 = vsub.f32 %v5123_v38, %v6119_v56  ;;  %v6207_v30 = vmul.f32 1.442695, %v607_v61  ;;  %v5124_v29 = vld [vmem:[#allocation4 + $0x458] sm:$0xff]  ;;  %v6219_v38 = vpop.xlane.xlu0 %419 }
 0x10f   :  { %7948 = vst [vmem:[#allocation96_spill] sm:$0xff] %v6195_v37  ;;  %v6203_v55 = vpop.eup %4730  ;;  %4756 = vpow2.f32 %v6036_v14  ;;  %v1174_v48 = vadd.f32 %v6185_v4, %v1173_v19  ;;  %v6209_v27 = vmul.f32 1.442695, %v608_v62  ;;  %v6216_v49 = vmul.f32 1.442695, %v609_v33  ;;  %v5125_v61 = vld [vmem:[#allocation4 + $0x460] sm:$0xff] }
 0x110   :  { %7949 = vst [vmem:[#allocation97_spill] sm:$0xff] %v6203_v55  ;;  %v6211_v25 = vpop.eup %4732  ;;  %4758 = vpow2.f32 %v6051_v63  ;;  %v1177_v16 = vadd.f32 %v6203_v55, %v6195_v37  ;;  %v612_v40 = vsub.f32 %v5124_v29, %v6119_v56  ;;  %v6224_v62 = vmul.f32 1.442695, %v610_v32  ;;  %v5126_v19 = vld [vmem:[#allocation4 + $0x468] sm:$0xff]  ;;  %v5127_v4 = vld [vmem:[#allocation4 + $0x470] sm:$0xff]  ;;  %v5128_v32 = vld [vmem:[#allocation4 + $0x478] sm:$0xff]  ;;  %v6242_v47 = vpop.xlane.xlu1 %423 }
 0x111   :  { %7950 = vst [vmem:[#allocation98_spill] sm:$0xff] %v6211_v25  ;;  %v6221_v14 = vpop.eup %4734  ;;  %4760 = vpow2.f32 %v6058_v21  ;;  %1175 = vadd.xlane.f32.xlu1 %v1174_v48  ;;  %v613_v63 = vsub.f32 %v5125_v61, %v6119_v56  ;;  %v614_v55 = vsub.f32 %v5126_v19, %v6145_v58  ;;  %v6232_v37 = vmul.f32 1.442695, %v611_v22  ;;  %v5129_v19 = vld [vmem:[#allocation4 + $0x480] sm:$0xff] }
 0x112   :  { %7951 = vst [vmem:[#allocation99_spill] sm:$0xff] %v6221_v14  ;;  %v6228_v33 = vpop.eup %4736  ;;  %4762 = vpow2.f32 %v6060_v13  ;;  %v1178_v29 = vadd.f32 %v6211_v25, %v1177_v16  ;;  %v615_v21 = vsub.f32 %v5127_v4, %v6145_v58  ;;  %v616_v61 = vsub.f32 %v5128_v32, %v6145_v58  ;;  %v5130_v16 = vld [vmem:[#allocation4 + $0x488] sm:$0xff]  ;;  %v5131_v25 = vld [vmem:[#allocation4 + $0x490] sm:$0xff] }
 0x113   :  { %7952 = vst [vmem:[#allocation100_spill] sm:$0xff] %v6228_v33  ;;  %v6235_v48 = vpop.eup %4738  ;;  %4764 = vpow2.f32 %v6068_v3  ;;  %v1181_v56 = vadd.f32 %v6228_v33, %v6221_v14  ;;  %v617_v13 = vsub.f32 %v5129_v19, %v6169_v46  ;;  %v6247_v4 = vmul.f32 1.442695, %v612_v40 }
 0x114   :  { %7953 = vst [vmem:[#allocation101_spill] sm:$0xff] %v6235_v48  ;;  %v6244_v22 = vpop.eup %4740  ;;  %4766 = vpow2.f32 %v6076_v5  ;;  %1179 = vadd.xlane.f32.xlu0 %v1178_v29  ;;  %v618_v3 = vsub.f32 %v5130_v16, %v6169_v46  ;;  %v619_v33 = vsub.f32 %v5131_v25, %v6169_v46  ;;  %v6255_v32 = vmul.f32 1.442695, %v613_v63  ;;  %v5132_v46 = vld [vmem:[#allocation4 + $0x498] sm:$0xff]  ;;  %v6267_v16 = vpop.xlane.xlu0 %427 }
 0x115   :  { %7954 = vst [vmem:[#allocation102_spill] sm:$0xff] %v6244_v22  ;;  %v6251_v14 = vpop.eup %4742  ;;  %4768 = vpow2.f32 %v6078_v34  ;;  %v1182_v58 = vadd.f32 %v6235_v48, %v1181_v56  ;;  %v6257_v19 = vmul.f32 1.442695, %v614_v55  ;;  %v6264_v29 = vmul.f32 1.442695, %v615_v21 }
 0x116   :  { %7955 = vst [vmem:[#allocation103_spill] sm:$0xff] %v6251_v14  ;;  %v6259_v5 = vpop.eup %4744  ;;  %4770 = vpow2.f32 %v6085_v1  ;;  %v1185_v40 = vadd.f32 %v6251_v14, %v6244_v22  ;;  %v620_v25 = vsub.f32 %v5132_v46, %v6193_v41  ;;  %v6272_v55 = vmul.f32 1.442695, %v616_v61  ;;  %v5133_v1 = vld [vmem:[#allocation4 + $0x4a0] sm:$0xff]  ;;  %v5134_v61 = vld [vmem:[#allocation4 + $0x4a8] sm:$0xff] }
 0x117   :  { %7956 = vst [vmem:[#allocation104_spill] sm:$0xff] %v6259_v5  ;;  %v6269_v34 = vpop.eup %4746  ;;  %4772 = vpow2.f32 %v6087_v50  ;;  %1183 = vadd.xlane.f32.xlu1 %v1182_v58  ;;  %v6274_v63 = vmul.f32 1.442695, %v617_v13  ;;  %v621_v56 = vsub.f32 %v5133_v1, %v6193_v41  ;;  %v6281_v46 = vmul.f32 1.442695, %v618_v3  ;;  %v5135_v58 = vld [vmem:[#allocation4 + $0x4b0] sm:$0xff] }
 0x118   :  { %7957 = vst [vmem:[#allocation105_spill] sm:$0xff] %v6269_v34  ;;  %v6277_v14 = vpop.eup %4748  ;;  %4774 = vpow2.f32 %v6101_v20  ;;  %v1186_v21 = vadd.f32 %v6259_v5, %v1185_v40  ;;  %v6283_v22 = vmul.f32 1.442695, %v619_v33  ;;  %v622_v13 = vsub.f32 %v5134_v61, %v6193_v41  ;;  %v6292_v20 = vpop.xlane.xlu1 %431  ;;  %v5136_v3 = vld [vmem:[#allocation4 + $0x4b8] sm:$0xff]  ;;  %v5137_v5 = vld [vmem:[#allocation4 + $0x4c0] sm:$0xff] }
 0x119   :  { %7958 = vst [vmem:[#allocation106_spill] sm:$0xff] %v6277_v14  ;;  %v6285_v48 = vpop.eup %4750  ;;  %4776 = vpow2.f32 %v6109_v42  ;;  %v1189_v50 = vadd.f32 %v6277_v14, %v6269_v34  ;;  %v623_v1 = vsub.f32 %v5135_v58, %v6219_v38  ;;  %v6297_v33 = vmul.f32 1.442695, %v620_v25  ;;  %v5138_v58 = vld [vmem:[#allocation4 + $0x4c8] sm:$0xff]  ;;  %v6315_v60 = vpop.xlane.xlu0 %435 }
 0x11a   :  { %7959 = vst [vmem:[#allocation107_spill] sm:$0xff] %v6285_v48  ;;  %v6294_v40 = vpop.eup %4752  ;;  %4778 = vpow2.f32 %v6124_v36  ;;  %1187 = vadd.xlane.f32.xlu0 %v1186_v21  ;;  %v624_v42 = vsub.f32 %v5136_v3, %v6219_v38  ;;  %v625_v14 = vsub.f32 %v5137_v5, %v6219_v38  ;;  %v6305_v61 = vmul.f32 1.442695, %v621_v56  ;;  %v5139_v3 = vld [vmem:[#allocation4 + $0x4d0] sm:$0xff]  ;;  %v5140_v5 = vld [vmem:[#allocation4 + $0x4d8] sm:$0xff] }
 0x11b   :  { %7960 = vst [vmem:[#allocation108_spill] sm:$0xff] %v6294_v40  ;;  %v6301_v34 = vpop.eup %4754  ;;  %4780 = vpow2.f32 %v6126_v17  ;;  %v1190_v41 = vadd.f32 %v6285_v48, %v1189_v50  ;;  %v626_v36 = vsub.f32 %v5138_v58, %v6242_v47  ;;  %v627_v38 = vsub.f32 %v5139_v3, %v6242_v47 }
 0x11c   :  { %7961 = vst [vmem:[#allocation109_spill] sm:$0xff] %v6301_v34  ;;  %v6308_v21 = vpop.eup %4756  ;;  %4782 = vpow2.f32 %v6133_v43  ;;  %v1193_v25 = vadd.f32 %v6301_v34, %v6294_v40  ;;  %v628_v17 = vsub.f32 %v5140_v5, %v6242_v47  ;;  %v6320_v50 = vmul.f32 1.442695, %v622_v13  ;;  %v5141_v43 = vld [vmem:[#allocation4 + $0x4e0] sm:$0xff] }
 0x11d   :  { %7962 = vst [vmem:[#allocation110_spill] sm:$0xff] %v6308_v21  ;;  %v6317_v56 = vpop.eup %4758  ;;  %4784 = vpow2.f32 %v6135_v54  ;;  %1191 = vadd.xlane.f32.xlu1 %v1190_v41  ;;  %v6322_v58 = vmul.f32 1.442695, %v623_v1  ;;  %v629_v34 = vsub.f32 %v5141_v43, %v6267_v16  ;;  %v6329_v3 = vmul.f32 1.442695, %v624_v42  ;;  %v5142_v1 = vld [vmem:[#allocation4 + $0x4e8] sm:$0xff]  ;;  %v6341_v43 = vpop.xlane.xlu1 %439 }
 0x11e   :  { %7963 = vst [vmem:[#allocation111_spill] sm:$0xff] %v6317_v56  ;;  %v6325_v40 = vpop.eup %4760  ;;  %4786 = vpow2.f32 %v6140_v51  ;;  %v1194_v47 = vadd.f32 %v6308_v21, %v1193_v25  ;;  %v6331_v5 = vmul.f32 1.442695, %v625_v14  ;;  %v6338_v13 = vmul.f32 1.442695, %v626_v36 }
 0x11f   :  { %7964 = vst [vmem:[#allocation112_spill] sm:$0xff] %v6325_v40  ;;  %v6333_v48 = vpop.eup %4762  ;;  %4788 = vpow2.f32 %v6150_v28  ;;  %v1197_v54 = vadd.f32 %v6325_v40, %v6317_v56  ;;  %v630_v41 = vsub.f32 %v5142_v1, %v6267_v16  ;;  %v6346_v14 = vmul.f32 1.442695, %v627_v38  ;;  %v5143_v28 = vld [vmem:[#allocation4 + $0x4f0] sm:$0xff]  ;;  %v5144_v56 = vld [vmem:[#allocation4 + $0x4f8] sm:$0xff] }
 0x120   :  { %7965 = vst [vmem:[#allocation113_spill] sm:$0xff] %v6333_v48  ;;  %v6343_v51 = vpop.eup %4764  ;;  %4790 = vpow2.f32 %v6152_v45  ;;  %1195 = vadd.xlane.f32.xlu0 %v1194_v47  ;;  %v6348_v42 = vmul.f32 1.442695, %v628_v17  ;;  %v631_v25 = vsub.f32 %v5143_v28, %v6267_v16  ;;  %v6355_v1 = vmul.f32 1.442695, %v629_v34  ;;  %v5145_v17 = vld [vmem:[#allocation4 + $0x500] sm:$0xff]  ;;  %v6365_v28 = vpop.xlane.xlu0 %443 }
 0x121   :  { %7966 = vst [vmem:[#allocation114_spill] sm:$0xff] %v6343_v51  ;;  %v6351_v40 = vpop.eup %4766  ;;  %4792 = vpow2.f32 %v6159_v59  ;;  %v1198_v36 = vadd.f32 %v6333_v48, %v1197_v54  ;;  %v632_v21 = vsub.f32 %v5144_v56, %v6292_v20  ;;  %v633_v16 = vsub.f32 %v5145_v17, %v6292_v20  ;;  %v5146_v47 = vld [vmem:[#allocation4 + $0x508] sm:$0xff]  ;;  %v5147_v54 = vld [vmem:[#allocation4 + $0x510] sm:$0xff]  ;;  %v5148_v48 = vld [vmem:[#allocation4 + $0x518] sm:$0xff] }
 0x122   :  { %7967 = vst [vmem:[#allocation115_spill] sm:$0xff] %v6351_v40  ;;  %v6358_v45 = vpop.eup %4768  ;;  %4794 = vpow2.f32 %v6174_v0  ;;  %v1201_v38 = vadd.f32 %v6351_v40, %v6343_v51  ;;  %v634_v59 = vsub.f32 %v5146_v47, %v6292_v20  ;;  %v6370_v56 = vmul.f32 1.442695, %v630_v41  ;;  %v5149_v47 = vld [vmem:[#allocation4 + $0x520] sm:$0xff] }
 0x123   :  { %7968 = vst [vmem:[#allocation116_spill] sm:$0xff] %v6358_v45  ;;  %v6367_v34 = vpop.eup %4770  ;;  %4796 = vpow2.f32 %v6182_v9  ;;  %1199 = vadd.xlane.f32.xlu1 %v1198_v36  ;;  %v635_v0 = vsub.f32 %v5147_v54, %v6315_v60  ;;  %v636_v40 = vsub.f32 %v5148_v48, %v6315_v60  ;;  %v6378_v17 = vmul.f32 1.442695, %v631_v25  ;;  %v5150_v48 = vld [vmem:[#allocation4 + $0x528] sm:$0xff] }
 0x124   :  { %7969 = vst [vmem:[#allocation117_spill] sm:$0xff] %v6367_v34  ;;  %v6374_v51 = vpop.eup %4772  ;;  %4798 = vpow2.f32 %v6188_v24  ;;  %v1202_v20 = vadd.f32 %v6358_v45, %v1201_v38  ;;  %v637_v9 = vsub.f32 %v5149_v47, %v6315_v60  ;;  %v6386_v54 = vmul.f32 1.442695, %v632_v21  ;;  %v6389_v24 = vpop.xlane.xlu1 %447 }
 0x125   :  { %7970 = vst [vmem:[#allocation118_spill] sm:$0xff] %v6374_v51  ;;  %v6381_v36 = vpop.eup %4774  ;;  %4800 = vpow2.f32 %v6198_v26  ;;  %v1205_v41 = vadd.f32 %v6374_v51, %v6367_v34  ;;  %v638_v2 = vsub.f32 %v5150_v48, %v6341_v43  ;;  %v6394_v60 = vmul.f32 1.442695, %v633_v16  ;;  %v5151_v26 = vld [vmem:[#allocation4 + $0x530] sm:$0xff] }
 0x126   :  { %7971 = vst [vmem:[#allocation119_spill] sm:$0xff] %v6381_v36  ;;  %v6391_v38 = vpop.eup %4776  ;;  %4802 = vpow2.f32 %v6200_v23  ;;  %1203 = vadd.xlane.f32.xlu0 %v1202_v20  ;;  %v6396_v25 = vmul.f32 1.442695, %v634_v59  ;;  %v639_v47 = vsub.f32 %v5151_v26, %v6341_v43  ;;  %v6403_v48 = vmul.f32 1.442695, %v635_v0  ;;  %v5152_v59 = vld [vmem:[#allocation4 + $0x538] sm:$0xff]  ;;  %v6415_v26 = vpop.xlane.xlu0 %451 }
 0x127   :  { %7972 = vst [vmem:[#allocation120_spill] sm:$0xff] %v6391_v38  ;;  %v6399_v51 = vpop.eup %4778  ;;  %4804 = vpow2.f32 %v6207_v30  ;;  %v1206_v21 = vadd.f32 %v6381_v36, %v1205_v41  ;;  %v6405_v34 = vmul.f32 1.442695, %v636_v40  ;;  %v6412_v16 = vmul.f32 1.442695, %v637_v9  ;;  %v5153_v0 = vld [vmem:[#allocation4 + $0x540] sm:$0xff] }
 0x128   :  { %7973 = vst [vmem:[#allocation121_spill] sm:$0xff] %v6399_v51  ;;  %v6407_v45 = vpop.eup %4780  ;;  %4806 = vpow2.f32 %v6209_v27  ;;  %v1209_v23 = vadd.f32 %v6399_v51, %v6391_v38  ;;  %v640_v20 = vsub.f32 %v5152_v59, %v6341_v43  ;;  %v6420_v40 = vmul.f32 1.442695, %v638_v2  ;;  %v5154_v41 = vld [vmem:[#allocation4 + $0x548] sm:$0xff]  ;;  %v5155_v38 = vld [vmem:[#allocation4 + $0x550] sm:$0xff]  ;;  %v5157_v36 = vld [vmem:[#allocation4 + $0x560] sm:$0xff]  ;;  %v6438_v39 = vpop.xlane.xlu1 %455 }
 0x129   :  { %7974 = vst [vmem:[#allocation122_spill] sm:$0xff] %v6407_v45  ;;  %v6417_v30 = vpop.eup %4782  ;;  %4808 = vpow2.f32 %v6216_v49  ;;  %1207 = vadd.xlane.f32.xlu1 %v1206_v21  ;;  %v641_v27 = vsub.f32 %v5153_v0, %v6365_v28  ;;  %v642_v51 = vsub.f32 %v5154_v41, %v6365_v28  ;;  %v6428_v59 = vmul.f32 1.442695, %v639_v47  ;;  %v5156_v0 = vld [vmem:[#allocation4 + $0x558] sm:$0xff] }
 0x12a   :  { %7975 = vst [vmem:[#allocation123_spill] sm:$0xff] %v6417_v30  ;;  %v6424_v9 = vpop.eup %4784  ;;  %4810 = vpow2.f32 %v6224_v62  ;;  %v1210_v43 = vadd.f32 %v6407_v45, %v1209_v23  ;;  %v643_v49 = vsub.f32 %v5155_v38, %v6365_v28  ;;  %v644_v41 = vsub.f32 %v5156_v0, %v6389_v24  ;;  %v5158_v38 = vld [vmem:[#allocation4 + $0x568] sm:$0xff]  ;;  %v5159_v23 = vld [vmem:[#allocation4 + $0x570] sm:$0xff] }
 0x12b   :  { %7976 = vst [vmem:[#allocation124_spill] sm:$0xff] %v6424_v9  ;;  %v6431_v21 = vpop.eup %4786  ;;  %4812 = vpow2.f32 %v6232_v37  ;;  %v1213_v2 = vadd.f32 %v6424_v9, %v6417_v30  ;;  %v645_v62 = vsub.f32 %v5157_v36, %v6389_v24  ;;  %v6443_v28 = vmul.f32 1.442695, %v640_v20 }
 0x12c   :  { %7977 = vst [vmem:[#allocation125_spill] sm:$0xff] %v6431_v21  ;;  %v6440_v47 = vpop.eup %4788  ;;  %4814 = vpow2.f32 %v6247_v4  ;;  %1211 = vadd.xlane.f32.xlu0 %v1210_v43  ;;  %v646_v37 = vsub.f32 %v5158_v38, %v6389_v24  ;;  %v647_v9 = vsub.f32 %v5159_v23, %v6415_v26  ;;  %v6451_v0 = vmul.f32 1.442695, %v641_v27  ;;  %v5160_v43 = vld [vmem:[#allocation4 + $0x578] sm:$0xff]  ;;  %v6463_v23 = vpop.xlane.xlu0 %459 }
 0x12d   :  { %7978 = vst [vmem:[#allocation126_spill] sm:$0xff] %v6440_v47  ;;  %v6447_v30 = vpop.eup %4790  ;;  %4816 = vpow2.f32 %v6255_v32  ;;  %v1214_v36 = vadd.f32 %v6431_v21, %v1213_v2  ;;  %v6453_v45 = vmul.f32 1.442695, %v642_v51  ;;  %v6460_v20 = vmul.f32 1.442695, %v643_v49 }
 0x12e   :  { %7979 = vst [vmem:[#allocation127_spill] sm:$0xff] %v6447_v30  ;;  %v6455_v4 = vpop.eup %4792  ;;  %4818 = vpow2.f32 %v6257_v19  ;;  %v1217_v24 = vadd.f32 %v6447_v30, %v6440_v47  ;;  %v648_v38 = vsub.f32 %v5160_v43, %v6415_v26  ;;  %v6468_v51 = vmul.f32 1.442695, %v644_v41  ;;  %v5161_v19 = vld [vmem:[#allocation4 + $0x580] sm:$0xff]  ;;  %v5162_v41 = vld [vmem:[#allocation4 + $0x588] sm:$0xff] }
 0x12f   :  { %7980 = vst [vmem:[#allocation128_spill] sm:$0xff] %v6455_v4  ;;  %v6465_v32 = vpop.eup %4794  ;;  %4820 = vpow2.f32 %v6264_v29  ;;  %1215 = vadd.xlane.f32.xlu1 %v1214_v36  ;;  %v6470_v27 = vmul.f32 1.442695, %v645_v62  ;;  %v649_v2 = vsub.f32 %v5161_v19, %v6415_v26  ;;  %v6477_v43 = vmul.f32 1.442695, %v646_v37  ;;  %v5163_v62 = vld [vmem:[#allocation4 + $0x590] sm:$0xff] }
 0x130   :  { %7981 = vst [vmem:[#allocation129_spill] sm:$0xff] %v6465_v32  ;;  %v6473_v30 = vpop.eup %4796  ;;  %4822 = vpow2.f32 %v6272_v55  ;;  %v1218_v49 = vadd.f32 %v6455_v4, %v1217_v24  ;;  %v6479_v47 = vmul.f32 1.442695, %v647_v9  ;;  %v650_v26 = vsub.f32 %v5162_v41, %v6438_v39  ;;  %v6488_v55 = vpop.xlane.xlu1 %463  ;;  %v5164_v37 = vld [vmem:[#allocation4 + $0x598] sm:$0xff]  ;;  %v5165_v19 = vld [vmem:[#allocation4 + $0x5a0] sm:$0xff]  ;;  %v5166_v4 = vld [vmem:[#allocation4 + $0x5a8] sm:$0xff] }
 0x131   :  { %7982 = vst [vmem:[#allocation130_spill] sm:$0xff] %v6473_v30  ;;  %v6481_v21 = vpop.eup %4798  ;;  %4824 = vpow2.f32 %v6274_v63  ;;  %v1221_v29 = vadd.f32 %v6473_v30, %v6465_v32  ;;  %v651_v36 = vsub.f32 %v5163_v62, %v6438_v39  ;;  %v6493_v9 = vmul.f32 1.442695, %v648_v38  ;;  %v5167_v38 = vld [vmem:[#allocation4 + $0x5b0] sm:$0xff]  ;;  %v6511_v44 = vpop.xlane.xlu0 %467 }
 0x132   :  { %7983 = vst [vmem:[#allocation131_spill] sm:$0xff] %v6481_v21  ;;  %v6490_v24 = vpop.eup %4800  ;;  %4826 = vpow2.f32 %v6281_v46  ;;  %1219 = vadd.xlane.f32.xlu0 %v1218_v49  ;;  %v652_v63 = vsub.f32 %v5164_v37, %v6438_v39  ;;  %v653_v30 = vsub.f32 %v5165_v19, %v6463_v23  ;;  %v6501_v62 = vmul.f32 1.442695, %v649_v2  ;;  %v5168_v19 = vld [vmem:[#allocation4 + $0x5b8] sm:$0xff] }
 0x133   :  { %7984 = vst [vmem:[#allocation132_spill] sm:$0xff] %v6490_v24  ;;  %v6497_v32 = vpop.eup %4802  ;;  %4828 = vpow2.f32 %v6283_v22  ;;  %v1222_v41 = vadd.f32 %v6481_v21, %v1221_v29  ;;  %v654_v46 = vsub.f32 %v5166_v4, %v6463_v23  ;;  %v655_v37 = vsub.f32 %v5167_v38, %v6463_v23 }
 0x134   :  { %7985 = vst [vmem:[#allocation133_spill] sm:$0xff] %v6497_v32  ;;  %v6504_v49 = vpop.eup %4804  ;;  %4830 = vpow2.f32 %v6297_v33  ;;  %v1225_v39 = vadd.f32 %v6497_v32, %v6490_v24  ;;  %v656_v22 = vsub.f32 %v5168_v19, %v6488_v55  ;;  %v6516_v4 = vmul.f32 1.442695, %v650_v26  ;;  %v5169_v33 = vld [vmem:[#allocation4 + $0x5c0] sm:$0xff]  ;;  %v5170_v26 = vld [vmem:[#allocation4 + $0x5c8] sm:$0xff] }
 0x135   :  { %7986 = vst [vmem:[#allocation134_spill] sm:$0xff] %v6504_v49  ;;  %v6513_v2 = vpop.eup %4806  ;;  %4832 = vpow2.f32 %v6305_v61  ;;  %1223 = vadd.xlane.f32.xlu1 %v1222_v41  ;;  %v6518_v29 = vmul.f32 1.442695, %v651_v36  ;;  %v657_v32 = vsub.f32 %v5169_v33, %v6488_v55  ;;  %v6525_v38 = vmul.f32 1.442695, %v652_v63  ;;  %v5171_v41 = vld [vmem:[#allocation4 + $0x5d0] sm:$0xff] }
 0x136   :  { %7987 = vst [vmem:[#allocation135_spill] sm:$0xff] %v6513_v2  ;;  %v6521_v24 = vpop.eup %4808  ;;  %4834 = vpow2.f32 %v6320_v50  ;;  %v1226_v23 = vadd.f32 %v6504_v49, %v1225_v39  ;;  %v6527_v19 = vmul.f32 1.442695, %v653_v30  ;;  %v658_v36 = vsub.f32 %v5170_v26, %v6488_v55  ;;  %v472_v50 = vpop.xlane.xlu1 %471 }
 0x137   :  { %7988 = vst [vmem:[#allocation136_spill] sm:$0xff] %v6521_v24  ;;  %v6529_v21 = vpop.eup %4810  ;;  %4836 = vpow2.f32 %v6322_v58  ;;  %v1229_v61 = vadd.f32 %v6521_v24, %v6513_v2  ;;  %v659_v33 = vsub.f32 %v5171_v41, %v6511_v44  ;;  %v6539_v30 = vmul.f32 1.442695, %v654_v46  ;;  %v5172_v41 = vld [vmem:[#allocation4 + $0x5d8] sm:$0xff]  ;;  %v5173_v46 = vld [vmem:[#allocation4 + $0x5e0] sm:$0xff] }
 0x138   :  { %7989 = vst [vmem:[#allocation137_spill] sm:$0xff] %v6529_v21  ;;  %v6536_v12 = vpop.eup %4812  ;;  %4838 = vpow2.f32 %v6329_v3  ;;  %1227 = vadd.xlane.f32.xlu0 %v1226_v23  ;;  %v6541_v63 = vmul.f32 1.442695, %v655_v37  ;;  %v6543_v58 = vmul.f32 1.442695, %v656_v22  ;;  %v660_v24 = vsub.f32 %v5172_v41, %v6511_v44  ;;  %v5174_v22 = vld [vmem:[#allocation4 + $0x5e8] sm:$0xff] }
 0x139   :  { %7990 = vst [vmem:[#allocation138_spill] sm:$0xff] %v6536_v12  ;;  %v6545_v39 = vpop.eup %4814  ;;  %4840 = vpow2.f32 %v6331_v5  ;;  %v1230_v55 = vadd.f32 %v6529_v21, %v1229_v61  ;;  %v6549_v26 = vmul.f32 1.442695, %v657_v32  ;;  %v661_v37 = vsub.f32 %v5173_v46, %v6511_v44  ;;  %v5176_v46 = vld [vmem:[#allocation4 + $0x5f8] sm:$0xff] }
 0x13a   :  { %7991 = vst [vmem:[#allocation139_spill] sm:$0xff] %v6545_v39  ;;  %v6552_v2 = vpop.eup %4816  ;;  %4842 = vpow2.f32 %v6338_v13  ;;  %v1233_v3 = vadd.f32 %v6545_v39, %v6536_v12  ;;  %v662_v23 = vsub.f32 %v5174_v22, %v472_v50  ;;  %v6561_v32 = vmul.f32 1.442695, %v658_v36  ;;  %v5175_v39 = vld [vmem:[#allocation4 + $0x5f0] sm:$0xff] }
 0x13b   :  { %7992 = vst [vmem:[#allocation140_spill] sm:$0xff] %v6552_v2  ;;  %v6558_v5 = vpop.eup %4818  ;;  %4844 = vpow2.f32 %v6346_v14  ;;  %1231 = vadd.xlane.f32.xlu1 %v1230_v55  ;;  %v6563_v61 = vmul.f32 1.442695, %v659_v33  ;;  %v1625_v41 = vlaneseq  ;;  %v663_v44 = vsub.f32 %v5175_v39, %v472_v50 }
 0x13c   :  { %7993 = vst [vmem:[#allocation141_spill] sm:$0xff] %v6558_v5  ;;  %v6565_v21 = vpop.eup %4820  ;;  %4846 = vpow2.f32 %v6348_v42  ;;  %v1234_v13 = vadd.f32 %v6552_v2, %v1233_v3  ;;  %v664_v22 = vsub.f32 %v5176_v46, %v472_v50  ;;  %v6584_v50 = vmul.f32 1.442695, %v660_v24 }
 0x13d   :  { %7994 = vst [vmem:[#allocation142_spill] sm:$0xff] %v6565_v21  ;;  %v6569_v12 = vpop.eup %4822  ;;  %4848 = vpow2.f32 %v6355_v1  ;;  %v1237_v14 = vadd.f32 %v6565_v21, %v6558_v5  ;;  %v6574_v36 = vshrl.u32 %v1625_v41, 7  ;;  %v6576_v33 = vand.u32 127, %v1625_v41 }
 0x13e   :  { %7995 = vst [vmem:[#allocation143_spill] sm:$0xff] %v6569_v12  ;;  %v6581_v42 = vpop.eup %4824  ;;  %4850 = vpow2.f32 %v6370_v56  ;;  %1235 = vadd.xlane.f32.xlu0 %v1234_v13  ;;  %v6586_v39 = vmul.f32 1.442695, %v661_v37  ;;  %v6588_v1 = vmul.f32 1.442695, %v662_v23 }
 0x13f   :  { %7996 = vst [vmem:[#allocation144_spill] sm:$0xff] %v6581_v42  ;;  %v6590_v55 = vpop.eup %4826  ;;  %4852 = vpow2.f32 %v6378_v17  ;;  %v1238_v3 = vadd.f32 %v6569_v12, %v1237_v14  ;;  %v6595_v41 = vadd.s32 128, %v6576_v33  ;;  %v6598_v46 = vadd.s32 256, %v6576_v33 }
 0x140   :  { %7997 = vst [vmem:[#allocation145_spill] sm:$0xff] %v6590_v55  ;;  %v6600_v56 = vpop.eup %4828  ;;  %4854 = vpow2.f32 %v6386_v54  ;;  %v1241_v24 = vadd.f32 %v6590_v55, %v6581_v42  ;;  %v1760_v37 = vmul.u32 384, %v6574_v36  ;;  %v1627_v23 = vadd.s32 8, %v6574_v36 }
 0x141   :  { %7998 = vst [vmem:[#allocation146_spill] sm:$0xff] %v6600_v56  ;;  %v6607_v17 = vpop.eup %4830  ;;  %4856 = vpow2.f32 %v6394_v60  ;;  %1239 = vadd.xlane.f32.xlu1 %v1238_v3  ;;  %v6610_v13 = vmul.f32 1.442695, %v663_v44  ;;  %v6612_v14 = vmul.f32 1.442695, %v664_v22  ;;  %v6614_v12 = vstv %s2017_s17 }
 0x142   :  { %7999 = vst [vmem:[#allocation147_spill] sm:$0xff] %v6607_v17  ;;  %v6616_v21 = vpop.eup %4832  ;;  %4858 = vpow2.f32 %v6396_v25  ;;  %v1242_v54 = vadd.f32 %v6600_v56, %v1241_v24  ;;  %v1824_v55 = vadd.s32 %v1760_v37, %v6576_v33  ;;  %v1825_v42 = vadd.s32 %v1760_v37, %v6595_v41 }
 0x143   :  { %8000 = vst [vmem:[#allocation148_spill] sm:$0xff] %v6616_v21  ;;  %v6622_v5 = vpop.eup %4834  ;;  %4860 = vpow2.f32 %v6403_v48  ;;  %v1245_v60 = vadd.f32 %v6616_v21, %v6607_v17  ;;  %v1826_v44 = vadd.s32 %v1760_v37, %v6598_v46  ;;  %v6629_v22 = vadd.s32 16, %v6574_v36 }
 0x144   :  { %8001 = vst [vmem:[#allocation149_spill] sm:$0xff] %v6622_v5  ;;  %v6631_v3 = vpop.eup %4836  ;;  %4862 = vpow2.f32 %v6405_v34  ;;  %1243 = vadd.xlane.f32.xlu0 %v1242_v54  ;;  %v2019_v25 = vxor.u32 %v6614_v12, %v1824_v55  ;;  %v2020_v24 = vxor.u32 %v6614_v12, %v1825_v42  ;;  %v1761_v56 = vmul.u32 384, %v1627_v23 }
 0x145   :  { %8002 = vst [vmem:[#allocation150_spill] sm:$0xff] %v6631_v3  ;;  %v6636_v2 = vpop.eup %4838  ;;  %4864 = vpow2.f32 %v6412_v16  ;;  %v1246_v48 = vadd.f32 %v6622_v5, %v1245_v60  ;;  %v2021_v37 = vxor.u32 %v6614_v12, %v1826_v44  ;;  %v6642_v21 = vadd.s32 24, %v6574_v36 }
 0x146   :  { %8003 = vst [vmem:[#allocation151_spill] sm:$0xff] %v6636_v2  ;;  %v6644_v17 = vpop.eup %4840  ;;  %4866 = vpow2.f32 %v6420_v40  ;;  %v1249_v34 = vadd.f32 %v6636_v2, %v6631_v3  ;;  %v2211_v42 = vshrl.u32 %v2019_v25, 16  ;;  %v2212_v55 = vshrl.u32 %v2020_v24, 16 }
 0x147   :  { %v6649_v23 = vpop.eup %4842  ;;  %4868 = vpow2.f32 %v6428_v59  ;;  %1247 = vadd.xlane.f32.xlu1 %v1246_v48  ;;  %v2213_v16 = vshrl.u32 %v2021_v37, 16  ;;  %v1827_v54 = vadd.s32 %v1761_v56, %v6576_v33  ;;  %v1828_v60 = vadd.s32 %v1761_v56, %v6595_v41 }
 0x148   :  { %v6654_v44 = vpop.eup %4844  ;;  %4870 = vpow2.f32 %v6443_v28  ;;  %v1250_v40 = vadd.f32 %v6644_v17, %v1249_v34  ;;  %v2403_v5 = vxor.u32 %v2211_v42, %v2019_v25  ;;  %v2404_v2 = vxor.u32 %v2212_v55, %v2020_v24 }
 0x149   :  { %v6658_v3 = vpop.eup %4846  ;;  %4872 = vpow2.f32 %v6451_v0  ;;  %v1253_v59 = vadd.f32 %v6654_v44, %v6649_v23  ;;  %v2405_v48 = vxor.u32 %v2213_v16, %v2021_v37  ;;  %v1829_v49 = vadd.s32 %v1761_v56, %v6598_v46 }
 0x14a   :  { %v6664_v57 = vpop.eup %4848  ;;  %4874 = vpow2.f32 %v6453_v45  ;;  %1251 = vadd.xlane.f32.xlu0 %v1250_v40  ;;  %v2595_v28 = vmul.u32 2246822507, %v2403_v5  ;;  %v2596_v18 = vmul.u32 2246822507, %v2404_v2  ;;  %v2022_v25 = vxor.u32 %v6614_v12, %v1827_v54 }
 0x14b   :  { %8004 = vst [vmem:[#allocation152_spill] sm:$0xff] %v6664_v57  ;;  %v6668_v24 = vpop.eup %4850  ;;  %4876 = vpow2.f32 %v6460_v20  ;;  %v1254_v0 = vadd.f32 %v6658_v3, %v1253_v59  ;;  %v2597_v34 = vmul.u32 2246822507, %v2405_v48  ;;  %v2023_v37 = vxor.u32 %v6614_v12, %v1828_v60 }
 0x14c   :  { %8005 = vst [vmem:[#allocation153_spill] sm:$0xff] %v6668_v24  ;;  %v6673_v42 = vpop.eup %4852  ;;  %4878 = vpow2.f32 %v6468_v51  ;;  %v1257_v45 = vadd.f32 %v6668_v24, %v6664_v57  ;;  %v2787_v5 = vshrl.u32 %v2595_v28, 13  ;;  %v2788_v2 = vshrl.u32 %v2596_v18, 13 }
 0x14d   :  { %v6678_v56 = vpop.eup %4854  ;;  %4880 = vpow2.f32 %v6470_v27  ;;  %1255 = vadd.xlane.f32.xlu1 %v1254_v0  ;;  %v2789_v20 = vshrl.u32 %v2597_v34, 13  ;;  %v2024_v55 = vxor.u32 %v6614_v12, %v1829_v49  ;;  %v2214_v16 = vshrl.u32 %v2022_v25, 16 }
 0x14e   :  { %v6682_v54 = vpop.eup %4856  ;;  %4882 = vpow2.f32 %v6477_v43  ;;  %v1258_v51 = vadd.f32 %v6673_v42, %v1257_v45  ;;  %v2979_v60 = vxor.u32 %v2787_v5, %v2595_v28  ;;  %v2980_v40 = vxor.u32 %v2788_v2, %v2596_v18 }
 0x14f   :  { %v6686_v59 = vpop.eup %4858  ;;  %4884 = vpow2.f32 %v6479_v47  ;;  %v1261_v27 = vadd.f32 %v6682_v54, %v6678_v56  ;;  %v2981_v48 = vxor.u32 %v2789_v20, %v2597_v34  ;;  %v2215_v0 = vshrl.u32 %v2023_v37, 16 }
 0x150   :  { %v6691_v24 = vpop.eup %4860  ;;  %4886 = vpow2.f32 %v6493_v9  ;;  %1259 = vadd.xlane.f32.xlu0 %v1258_v51  ;;  %v3171_v49 = vmul.u32 3266489909, %v2979_v60  ;;  %v3172_v43 = vmul.u32 3266489909, %v2980_v40  ;;  %v2216_v57 = vshrl.u32 %v2024_v55, 16 }
 0x151   :  { %v6694_v45 = vpop.eup %4862  ;;  %4888 = vpow2.f32 %v6501_v62  ;;  %v1262_v18 = vadd.f32 %v6686_v59, %v1261_v27  ;;  %v3173_v47 = vmul.u32 3266489909, %v2981_v48  ;;  %v2406_v28 = vxor.u32 %v2214_v16, %v2022_v25  ;;  %v1052_v62 = vpop.xlane.xlu0 %1051 }
 0x152   :  { %v6698_v5 = vpop.eup %4864  ;;  %4890 = vpow2.f32 %v6516_v4  ;;  %v1265_v34 = vadd.f32 %v6694_v45, %v6691_v24  ;;  %v3363_v9 = vshrl.u32 %v3171_v49, 16  ;;  %v3364_v2 = vshrl.u32 %v3172_v43, 16 }
 0x153   :  { %v6703_v20 = vpop.eup %4866  ;;  %4892 = vpow2.f32 %v6518_v29  ;;  %1263 = vadd.xlane.f32.xlu1 %v1262_v18  ;;  %v3365_v51 = vshrl.u32 %v3173_v47, 16  ;;  %v2407_v60 = vxor.u32 %v2215_v0, %v2023_v37  ;;  %v2408_v40 = vxor.u32 %v2216_v57, %v2024_v55 }
 0x154   :  { %v6706_v27 = vpop.eup %4868  ;;  %4894 = vpow2.f32 %v6525_v38  ;;  %v1266_v4 = vadd.f32 %v6698_v5, %v1265_v34  ;;  %v6710_v25 = vxor.u32 %v3363_v9, %v3171_v49  ;;  %v6712_v16 = vxor.u32 %v3364_v2, %v3172_v43 }
 0x155   :  { %v6714_v48 = vpop.eup %4870  ;;  %4896 = vpow2.f32 %v6527_v19  ;;  %v1269_v29 = vadd.f32 %v6706_v27, %v6703_v20  ;;  %v6719_v18 = vxor.u32 %v3365_v51, %v3173_v47  ;;  %v2598_v57 = vmul.u32 2246822507, %v2406_v28  ;;  %v1056_v47 = vpop.xlane.xlu1 %1055 }
 0x156   :  { %v6721_v37 = vpop.eup %4872  ;;  %4898 = vpow2.f32 %v6539_v30  ;;  %1267 = vadd.xlane.f32.xlu0 %v1266_v4  ;;  %v1305_v38 = vmul.f32 0.9, %v1052_v62  ;;  %v2599_v55 = vmul.u32 2246822507, %v2407_v60  ;;  %v6725_v0 = vadd.s32 32, %v6574_v36 }
 0x157   :  { %v6727_v49 = vpop.eup %4874  ;;  %4900 = vpow2.f32 %v6541_v63  ;;  %v1270_v19 = vadd.f32 %v6714_v48, %v1269_v29  ;;  %v2600_v43 = vmul.u32 2246822507, %v2408_v40  ;;  %v1762_v28 = vmul.u32 384, %v6629_v22 }
 0x158   :  { %v6732_v34 = vpop.eup %4876  ;;  %4902 = vpow2.f32 %v6543_v58  ;;  %v1273_v30 = vadd.f32 %v6727_v49, %v6721_v37  ;;  %v2790_v62 = vshrl.u32 %v2598_v57, 13  ;;  %v2791_v22 = vshrl.u32 %v2599_v55, 13 }
 0x159   :  { %8006 = vst [vmem:[#allocation154_spill] sm:$0xff] %v6732_v34  ;;  %v6739_v51 = vpop.eup %4878  ;;  %4904 = vpow2.f32 %v6549_v26  ;;  %1271 = vadd.xlane.f32.xlu1 %v1270_v19  ;;  %v2792_v40 = vshrl.u32 %v2600_v43, 13  ;;  %v1306_v4 = vmul.f32 0.9, %v1056_v47 }
 0x15a   :  { %8007 = vst [vmem:[#allocation155_spill] sm:$0xff] %v6739_v51  ;;  %v6743_v60 = vpop.eup %4880  ;;  %4906 = vpow2.f32 %v6561_v32  ;;  %v1274_v58 = vadd.f32 %v6732_v34, %v1273_v30  ;;  %v2982_v19 = vxor.u32 %v2790_v62, %v2598_v57  ;;  %v2983_v2 = vxor.u32 %v2791_v22, %v2599_v55 }
 0x15b   :  { %8008 = vst [vmem:[#allocation156_spill] sm:$0xff] %v6743_v60  ;;  %v6747_v29 = vpop.eup %4882  ;;  %4908 = vpow2.f32 %v6563_v61  ;;  %v1277_v26 = vadd.f32 %v6743_v60, %v6739_v51  ;;  %v2984_v9 = vxor.u32 %v2792_v40, %v2600_v43  ;;  %v1830_v32 = vadd.s32 %v1762_v28, %v6576_v33 }
 0x15c   :  { %8009 = vst [vmem:[#allocation157_spill] sm:$0xff] %v6747_v29  ;;  %v6752_v63 = vpop.eup %4884  ;;  %4910 = vpow2.f32 %v6584_v50  ;;  %1275 = vadd.xlane.f32.xlu0 %v1274_v58  ;;  %v1831_v30 = vadd.s32 %v1762_v28, %v6595_v41  ;;  %v3174_v34 = vmul.u32 3266489909, %v2982_v19  ;;  %v3175_v60 = vmul.u32 3266489909, %v2983_v2 }
 0x15d   :  { %8010 = vst [vmem:[#allocation158_spill] sm:$0xff] %v6752_v63  ;;  %v6757_v47 = vpop.eup %4886  ;;  %4912 = vpow2.f32 %v6586_v39  ;;  %v1278_v61 = vadd.f32 %v6747_v29, %v1277_v26  ;;  %v3176_v55 = vmul.u32 3266489909, %v2984_v9  ;;  %v1832_v43 = vadd.s32 %v1762_v28, %v6598_v46 }
 0x15e   :  { %8011 = vst [vmem:[#allocation159_spill] sm:$0xff] %v6757_v47  ;;  %v6761_v57 = vpop.eup %4888  ;;  %4914 = vpow2.f32 %v6588_v1  ;;  %v1281_v50 = vadd.f32 %v6757_v47, %v6752_v63  ;;  %v3366_v39 = vshrl.u32 %v3174_v34, 16  ;;  %v3367_v22 = vshrl.u32 %v3175_v60, 16 }
 0x15f   :  { %8012 = vst [vmem:[#allocation160_spill] sm:$0xff] %v6761_v57  ;;  %v6767_v62 = vpop.eup %4890  ;;  %4916 = vpow2.f32 %v6610_v13  ;;  %1279 = vadd.xlane.f32.xlu1 %v1278_v61  ;;  %v2025_v58 = vxor.u32 %v6614_v12, %v1830_v32  ;;  %v3368_v40 = vshrl.u32 %v3176_v55, 16  ;;  %v2026_v9 = vxor.u32 %v6614_v12, %v1831_v30 }
 0x160   :  { %v6771_v2 = vpop.eup %4892  ;;  %4918 = vpow2.f32 %v6612_v14  ;;  %v1282_v1 = vadd.f32 %v6761_v57, %v1281_v50  ;;  %v3558_v13 = vxor.u32 %v3366_v39, %v3174_v34  ;;  %v3559_v19 = vxor.u32 %v3367_v22, %v3175_v60  ;;  %v1060_v50 = vpop.xlane.xlu0 %1059 }
 0x161   :  { %8013 = vst [vmem:[#allocation161_spill] sm:$0xff] %v6771_v2  ;;  %v6776_v26 = vpop.eup %4894  ;;  %v1285_v28 = vadd.f32 %v6771_v2, %v6767_v62  ;;  %4920 = vrcp.f32 %v1305_v38  ;;  %v3560_v32 = vxor.u32 %v3368_v40, %v3176_v55  ;;  %v2027_v14 = vxor.u32 %v6614_v12, %v1832_v43  ;;  %v1064_v22 = vpop.xlane.xlu1 %1063 }
 0x162   :  { %8014 = vst [vmem:[#allocation162_spill] sm:$0xff] %v6776_v26  ;;  %v6780_v61 = vpop.eup %4896  ;;  %1283 = vadd.xlane.f32.xlu0 %v1282_v1  ;;  %4922 = vrcp.f32 %v1306_v4  ;;  %v2217_v47 = vshrl.u32 %v2025_v58, 16  ;;  %v3750_v63 = vshrl.u32 %v3558_v13, 8  ;;  %v3751_v29 = vshrl.u32 %v3559_v19, 8 }
 0x163   :  { %8015 = vst [vmem:[#allocation163_spill] sm:$0xff] %v6780_v61  ;;  %v6783_v57 = vpop.eup %4898  ;;  %v1286_v30 = vadd.f32 %v6776_v26, %v1285_v28  ;;  %v2218_v51 = vshrl.u32 %v2026_v9, 16  ;;  %v3752_v34 = vshrl.u32 %v3560_v32, 8  ;;  %v2219_v60 = vshrl.u32 %v2027_v14, 16 }
 0x164   :  { %8016 = vst [vmem:[#allocation164_spill] sm:$0xff] %v6783_v57  ;;  %v6786_v2 = vpop.eup %4900  ;;  %v1289_v38 = vadd.f32 %v6783_v57, %v6780_v61  ;;  %v2409_v55 = vxor.u32 %v2217_v47, %v2025_v58  ;;  %v1307_v39 = vmul.f32 0.9, %v1060_v50  ;;  %v8020_v28 = vshrl.u32 %v6710_v25, 8 }
 0x165   :  { %8017 = vst [vmem:[#allocation165_spill] sm:$0xff] %v6786_v2  ;;  %v6790_v4 = vpop.eup %4902  ;;  %1287 = vadd.xlane.f32.xlu1 %v1286_v30  ;;  %v2410_v43 = vxor.u32 %v2218_v51, %v2026_v9  ;;  %v8023_v19 = vshrl.u32 %v6712_v16, 8  ;;  %v8026_v51 = vshrl.u32 %v6719_v18, 8  ;;  %v2411_v9 = vxor.u32 %v2219_v60, %v2027_v14 }
 0x166   :  { %8018 = vst [vmem:[#allocation166_spill] sm:$0xff] %v6790_v4  ;;  %v6792_v1 = vpop.eup %4904  ;;  %v1290_v40 = vadd.f32 %v6786_v2, %v1289_v38  ;;  %vm6797_vm0 = vcmp.ge.s32.totalorder %v8020_v28, 1677722  ;;  %v2601_v32 = vmul.u32 2246822507, %v2409_v55  ;;  %4924 = vrcp.f32 %v1307_v39 }
 0x167   :  { %8019 = vst [vmem:[#allocation167_spill] sm:$0xff] %v6792_v1  ;;  %vm6803_vm1 = vcmp.ge.s32.totalorder %v8023_v19, 1677722  ;;  %vm6809_vm2 = vcmp.ge.s32.totalorder %v8026_v51, 1677722  ;;  %v6813_v50 = vpop.eup %4906  ;;  %v1293_v25 = vadd.f32 %v6792_v1, %v6790_v4  ;;  %v1763_v14 = vmul.u32 384, %v6642_v21 }
 0x168   :  { %8029 = vst [vmem:[#allocation168_spill] sm:$0xff] %v6813_v50  ;;  %vm6817_vm3 = vcmp.ge.s32.totalorder %v3750_v63, 1677722  ;;  %vm6821_vm4 = vcmp.ge.s32.totalorder %v3751_v29, 1677722  ;;  %v6830_v60 = vpop.eup %4908  ;;  %1291 = vadd.xlane.f32.xlu0 %v1290_v40  ;;  %v2793_v63 = vshrl.u32 %v2601_v32, 13 }
 0x169   :  { %vm6825_vm5 = vcmp.ge.s32.totalorder %v3752_v34, 1677722  ;;  %v2602_v38 = vmul.u32 2246822507, %v2410_v43  ;;  %v2603_v55 = vmul.u32 2246822507, %v2411_v9  ;;  %v6835_v29 = vpop.eup %4910  ;;  %v1294_v34 = vadd.f32 %v6813_v50, %v1293_v25 }
 0x16a   :  { %v1308_v28 = vmul.f32 0.9, %v1064_v22  ;;  %v6833_v19 = vmul.u32 384, %v6725_v0  ;;  %8036 = vst [vmem:[#allocation169_spill] sm:$0xff] %v6835_v29  ;;  %v1833_v1 = vadd.s32 %v1763_v14, %v6576_v33  ;;  %v1834_v43 = vadd.s32 %v1763_v14, %v6595_v41  ;;  %v6840_v39 = vpop.eup %4912 }
 0x16b   :  { %v2794_v51 = vshrl.u32 %v2602_v38, 13  ;;  %8037 = vst [vmem:[#allocation170_spill] sm:$0xff] %v6840_v39  ;;  %v1297_v21 = vadd.f32 %v6835_v29, %v6830_v60  ;;  %v2795_v40 = vshrl.u32 %v2603_v55, 13  ;;  %v2985_v9 = vxor.u32 %v2793_v63, %v2601_v32  ;;  %v6845_v0 = vpop.eup %4914  ;;  %1295 = vadd.xlane.f32.xlu1 %v1294_v34 }
 0x16c   :  { %v1835_v22 = vadd.s32 %v1763_v14, %v6598_v46  ;;  %8038 = vst [vmem:[#allocation171_spill] sm:$0xff] %v6845_v0  ;;  %v2028_v25 = vxor.u32 %v6614_v12, %v1833_v1  ;;  %v2029_v50 = vxor.u32 %v6614_v12, %v1834_v43  ;;  %4926 = vrcp.f32 %v1308_v28  ;;  %v6849_v2 = vpop.eup %4916 }
 0x16d   :  { %v2986_v4 = vxor.u32 %v2794_v51, %v2602_v38  ;;  %8039 = vst [vmem:[#allocation172_spill] sm:$0xff] %v6849_v2  ;;  %v1298_v57 = vadd.f32 %v6840_v39, %v1297_v21  ;;  %v2987_v61 = vxor.u32 %v2795_v40, %v2603_v55  ;;  %v3177_v26 = vmul.u32 3266489909, %v2985_v9  ;;  %v6853_v32 = vpop.eup %4918 }
 0x16e   :  { %v2030_v29 = vxor.u32 %v6614_v12, %v1835_v22  ;;  %v1301_v14 = vadd.f32 %v6849_v2, %v6845_v0  ;;  %v2220_v38 = vshrl.u32 %v2028_v25, 16  ;;  %v2221_v34 = vshrl.u32 %v2029_v50, 16  ;;  %v4921_v1 = vpop.eup %4920 }
 0x16f   :  { %v3178_v63 = vmul.u32 3266489909, %v2986_v4  ;;  %1299 = vadd.xlane.f32.xlu0 %v1298_v57  ;;  %v3179_v51 = vmul.u32 3266489909, %v2987_v61  ;;  %v3369_v28 = vshrl.u32 %v3177_v26, 16  ;;  %v1836_v21 = vadd.s32 %v6833_v19, %v6576_v33  ;;  %v4923_v55 = vpop.eup %4922 }
 0x170   :  { %v2222_v43 = vshrl.u32 %v2030_v29, 16  ;;  %v1302_v40 = vadd.f32 %v6853_v32, %v1301_v14  ;;  %v1433_v9 = vmul.f32 %v4921_v1, %v5460_v35  ;;  %v1434_v22 = vmul.f32 %v4921_v1, %v5463_v31 }
 0x171   :  { %v1435_v2 = vmul.f32 %v4921_v1, %v5467_v7  ;;  %v1436_v4 = vmul.f32 %v4923_v55, %v5482_v8  ;;  %v1437_v0 = vmul.f32 %v4923_v55, %v5485_v10  ;;  %v1438_v57 = vmul.f32 %v4923_v55, %v5489_v11 }
 0x172   :  { %v3370_v61 = vshrl.u32 %v3178_v63, 16  ;;  %1303 = vadd.xlane.f32.xlu1 %v1302_v40  ;;  %v4131_v39 = vsel %vm6797_vm0, %v1433_v9, 0.0  ;;  %v4132_v14 = vsel %vm6803_vm1, %v1434_v22, 0.0  ;;  %v3371_v31 = vshrl.u32 %v3179_v51, 16  ;;  %v1068_v9 = vpop.xlane.xlu0 %1067 }
 0x173   :  { %v4133_v35 = vsel %vm6809_vm2, %v1435_v2, 0.0  ;;  %4323 = vst [vmem:[#allocation7] sm:$0xff] %v4131_v39  ;;  %4324 = vst [vmem:[#allocation7 + $0x8] sm:$0xff] %v4132_v14  ;;  %v4134_v7 = vsel %vm6817_vm3, %v1436_v4, 0.0  ;;  %v4135_v8 = vsel %vm6821_vm4, %v1437_v0, 0.0  ;;  %v4136_v10 = vsel %vm6825_vm5, %v1438_v57, 0.0  ;;  %v4925_v39 = vpop.eup %4924 }
 0x174   :  { %4325 = vst [vmem:[#allocation7 + $0x10] sm:$0xff] %v4133_v35  ;;  %v3561_v11 = vxor.u32 %v3369_v28, %v3177_v26  ;;  %4326 = vst [vmem:[#allocation7 + $0x18] sm:$0xff] %v4134_v7  ;;  %v3562_v13 = vxor.u32 %v3370_v61, %v3178_v63  ;;  %v3563_v47 = vxor.u32 %v3371_v31, %v3179_v51  ;;  %v8041_v4 = vld [vmem:[#allocation12_spill] sm:$0xff] }
 0x175   :  { %4327 = vst [vmem:[#allocation7 + $0x20] sm:$0xff] %v4135_v8  ;;  %4328 = vst [vmem:[#allocation7 + $0x28] sm:$0xff] %v4136_v10  ;;  %v2412_v2 = vxor.u32 %v2220_v38, %v2028_v25  ;;  %v2413_v58 = vxor.u32 %v2221_v34, %v2029_v50  ;;  %v2414_v55 = vxor.u32 %v2222_v43, %v2030_v29  ;;  %v1309_v8 = vmul.f32 0.9, %v1068_v9 }
 0x176   :  { %v3753_v1 = vshrl.u32 %v3561_v11, 8  ;;  %v1837_v30 = vadd.s32 %v6833_v19, %v6595_v41  ;;  %v1838_v16 = vadd.s32 %v6833_v19, %v6598_v46  ;;  %v3754_v0 = vshrl.u32 %v3562_v13, 8 }
 0x177   :  { %v3755_v18 = vshrl.u32 %v3563_v47, 8  ;;  %v1439_v26 = vmul.f32 %v4925_v39, %v5471_v52  ;;  %v1440_v28 = vmul.f32 %v4925_v39, %v5475_v6  ;;  %v1441_v63 = vmul.f32 %v4925_v39, %v5479_v53  ;;  %v8040_v53 = vld [vmem:[#allocation35_spill] sm:$0xff] }
 0x178   :  { %vm3945_vm6 = vcmp.ge.s32.totalorder %v3753_v1, 1677722  ;;  %v2604_v25 = vmul.u32 2246822507, %v2412_v2  ;;  %v2605_v50 = vmul.u32 2246822507, %v2413_v58  ;;  %v2031_v38 = vxor.u32 %v6614_v12, %v1836_v21 }
 0x179   :  { %vm3946_vm7 = vcmp.ge.s32.totalorder %v3754_v0, 1677722  ;;  %vm3947_vm8 = vcmp.ge.s32.totalorder %v3755_v18, 1677722  ;;  %v4137_v29 = vsel %vm3945_vm6, %v1439_v26, 0.0  ;;  %v4927_v34 = vpop.eup %4926  ;;  %v2032_v21 = vxor.u32 %v6614_v12, %v1837_v30 }
 0x17a   :  { %v4138_v51 = vsel %vm3946_vm7, %v1440_v28, 0.0  ;;  %v4139_v43 = vsel %vm3947_vm8, %v1441_v63, 0.0  ;;  %4329 = vst [vmem:[#allocation7 + $0x30] sm:$0xff] %v4137_v29  ;;  %v2606_v19 = vmul.u32 2246822507, %v2414_v55  ;;  %v2796_v40 = vshrl.u32 %v2604_v25, 13 }
 0x17b   :  { %4330 = vst [vmem:[#allocation7 + $0x38] sm:$0xff] %v4138_v51  ;;  %4331 = vst [vmem:[#allocation7 + $0x40] sm:$0xff] %v4139_v43  ;;  %v2797_v52 = vshrl.u32 %v2605_v50, 13  ;;  %v1442_v6 = vmul.f32 %v4927_v34, %v5494_v15  ;;  %v1443_v22 = vmul.f32 %v4927_v34, %v8040_v53  ;;  %v1444_v57 = vmul.f32 %v4927_v34, %v8041_v4 }
 0x17c   :  { %v2798_v61 = vshrl.u32 %v2606_v19, 13  ;;  %v2988_v14 = vxor.u32 %v2796_v40, %v2604_v25  ;;  %v2033_v35 = vxor.u32 %v6614_v12, %v1838_v16  ;;  %v2223_v7 = vshrl.u32 %v2031_v38, 16 }
 0x17d   :  { %v2989_v31 = vxor.u32 %v2797_v52, %v2605_v50  ;;  %v1631_v10 = vadd.s32 40, %v6574_v36  ;;  %v2224_v47 = vshrl.u32 %v2032_v21, 16  ;;  %4928 = vrcp.f32 %v1309_v8 }
 0x17e   :  { %v2990_v11 = vxor.u32 %v2798_v61, %v2606_v19  ;;  %v3180_v13 = vmul.u32 3266489909, %v2988_v14  ;;  %v2225_v2 = vshrl.u32 %v2033_v35, 16  ;;  %v2415_v58 = vxor.u32 %v2223_v7, %v2031_v38 }
 0x17f   :  { %v3181_v15 = vmul.u32 3266489909, %v2989_v31  ;;  %v1765_v39 = vmul.u32 384, %v1631_v10  ;;  %v2416_v0 = vxor.u32 %v2224_v47, %v2032_v21 }
 0x180   :  { %v3182_v1 = vmul.u32 3266489909, %v2990_v11  ;;  %v3372_v55 = vshrl.u32 %v3180_v13, 16  ;;  %v2417_v18 = vxor.u32 %v2225_v2, %v2033_v35  ;;  %v2607_v26 = vmul.u32 2246822507, %v2415_v58  ;;  %v1072_v11 = vpop.xlane.xlu1 %1071 }
 0x181   :  { %v3373_v30 = vshrl.u32 %v3181_v15, 16  ;;  %v1839_v16 = vadd.s32 %v1765_v39, %v6576_v33  ;;  %v1840_v28 = vadd.s32 %v1765_v39, %v6595_v41  ;;  %v2608_v50 = vmul.u32 2246822507, %v2416_v0 }
 0x182   :  { %v3374_v63 = vshrl.u32 %v3182_v1, 16  ;;  %v3564_v25 = vxor.u32 %v3372_v55, %v3180_v13  ;;  %v2609_v29 = vmul.u32 2246822507, %v2417_v18  ;;  %v2799_v51 = vshrl.u32 %v2607_v26, 13 }
 0x183   :  { %v3565_v34 = vxor.u32 %v3373_v30, %v3181_v15  ;;  %v1841_v38 = vadd.s32 %v1765_v39, %v6598_v46  ;;  %v2034_v43 = vxor.u32 %v6614_v12, %v1839_v16  ;;  %v2800_v9 = vshrl.u32 %v2608_v50, 13 }
 0x184   :  { %v3566_v19 = vxor.u32 %v3374_v63, %v3182_v1  ;;  %v3756_v40 = vshrl.u32 %v3564_v25, 8  ;;  %v2801_v52 = vshrl.u32 %v2609_v29, 13  ;;  %v2991_v4 = vxor.u32 %v2799_v51, %v2607_v26 }
 0x185   :  { %v3757_v53 = vshrl.u32 %v3565_v34, 8  ;;  %v2035_v61 = vxor.u32 %v6614_v12, %v1840_v28  ;;  %v2036_v14 = vxor.u32 %v6614_v12, %v1841_v38  ;;  %v2992_v35 = vxor.u32 %v2800_v9, %v2608_v50  ;;  %v8042_v34 = vld [vmem:[#allocation10_spill] sm:$0xff]  ;;  %v8043_v38 = vld [vmem:[#allocation11_spill] sm:$0xff] }
 0x186   :  { %v3758_v21 = vshrl.u32 %v3566_v19, 8  ;;  %vm3948_vm9 = vcmp.ge.s32.totalorder %v3756_v40, 1677722  ;;  %v2993_v31 = vxor.u32 %v2801_v52, %v2609_v29  ;;  %v3183_v8 = vmul.u32 3266489909, %v2991_v4 }
 0x187   :  { %vm3949_vm10 = vcmp.ge.s32.totalorder %v3757_v53, 1677722  ;;  %v4140_v7 = vsel %vm3948_vm9, %v1442_v6, 0.0  ;;  %v2226_v10 = vshrl.u32 %v2034_v43, 16  ;;  %v3184_v47 = vmul.u32 3266489909, %v2992_v35 }
 0x188   :  { %vm3950_vm11 = vcmp.ge.s32.totalorder %v3758_v21, 1677722  ;;  %v4141_v13 = vsel %vm3949_vm10, %v1443_v22, 0.0  ;;  %4332 = vst [vmem:[#allocation7 + $0x48] sm:$0xff] %v4140_v7  ;;  %v2227_v2 = vshrl.u32 %v2035_v61, 16  ;;  %v3375_v39 = vshrl.u32 %v3183_v8, 16  ;;  %v1076_v7 = vpop.xlane.xlu0 %1075 }
 0x189   :  { %v4142_v15 = vsel %vm3950_vm11, %v1444_v57, 0.0  ;;  %4333 = vst [vmem:[#allocation7 + $0x50] sm:$0xff] %v4141_v13  ;;  %v3185_v58 = vmul.u32 3266489909, %v2993_v31  ;;  %v2228_v1 = vshrl.u32 %v2036_v14, 16  ;;  %v3376_v55 = vshrl.u32 %v3184_v47, 16 }
 0x18a   :  { %4334 = vst [vmem:[#allocation7 + $0x58] sm:$0xff] %v4142_v15  ;;  %v2418_v0 = vxor.u32 %v2226_v10, %v2034_v43  ;;  %v2419_v18 = vxor.u32 %v2227_v2, %v2035_v61  ;;  %v1310_v30 = vmul.f32 0.9, %v1072_v11  ;;  %v3567_v6 = vxor.u32 %v3375_v39, %v3183_v8  ;;  %v4929_v63 = vpop.eup %4928  ;;  %v8044_v43 = vld [vmem:[#allocation15_spill] sm:$0xff] }
 0x18b   :  { %v3377_v26 = vshrl.u32 %v3185_v58, 16  ;;  %v2420_v16 = vxor.u32 %v2228_v1, %v2036_v14  ;;  %v1632_v28 = vadd.s32 48, %v6574_v36  ;;  %v3568_v22 = vxor.u32 %v3376_v55, %v3184_v47 }
 0x18c   :  { %v2610_v25 = vmul.u32 2246822507, %v2418_v0  ;;  %v2611_v50 = vmul.u32 2246822507, %v2419_v18  ;;  %4930 = vrcp.f32 %v1310_v30  ;;  %v3759_v29 = vshrl.u32 %v3567_v6, 8  ;;  %v1080_v6 = vpop.xlane.xlu1 %1079 }
 0x18d   :  { %v3569_v57 = vxor.u32 %v3377_v26, %v3185_v58  ;;  %v1445_v51 = vmul.f32 %v4929_v63, %v8042_v34  ;;  %v1446_v19 = vmul.f32 %v4929_v63, %v8043_v38  ;;  %v3760_v40 = vshrl.u32 %v3568_v22, 8 }
 0x18e   :  { %v1447_v9 = vmul.f32 %v4929_v63, %v8044_v43  ;;  %v2612_v52 = vmul.u32 2246822507, %v2420_v16  ;;  %v2802_v53 = vshrl.u32 %v2610_v25, 13  ;;  %vm3951_vm12 = vcmp.ge.s32.totalorder %v3759_v29, 1677722 }
 0x18f   :  { %v3761_v4 = vshrl.u32 %v3569_v57, 8  ;;  %v2803_v61 = vshrl.u32 %v2611_v50, 13  ;;  %v1766_v14 = vmul.u32 384, %v1632_v28  ;;  %vm3952_vm13 = vcmp.ge.s32.totalorder %v3760_v40, 1677722 }
 0x190   :  { %v4143_v21 = vsel %vm3951_vm12, %v1445_v51, 0.0  ;;  %v2804_v35 = vshrl.u32 %v2612_v52, 13  ;;  %v2994_v31 = vxor.u32 %v2802_v53, %v2610_v25  ;;  %v4144_v8 = vsel %vm3952_vm13, %v1446_v19, 0.0 }
 0x191   :  { %vm3953_vm14 = vcmp.ge.s32.totalorder %v3761_v4, 1677722  ;;  %4335 = vst [vmem:[#allocation7 + $0x60] sm:$0xff] %v4143_v21  ;;  %v2995_v10 = vxor.u32 %v2803_v61, %v2611_v50  ;;  %v1842_v11 = vadd.s32 %v1766_v14, %v6576_v33  ;;  %4336 = vst [vmem:[#allocation7 + $0x68] sm:$0xff] %v4144_v8  ;;  %v1843_v15 = vadd.s32 %v1766_v14, %v6595_v41 }
 0x192   :  { %v4145_v13 = vsel %vm3953_vm14, %v1447_v9, 0.0  ;;  %v2996_v47 = vxor.u32 %v2804_v35, %v2612_v52  ;;  %v3186_v2 = vmul.u32 3266489909, %v2994_v31  ;;  %v1844_v39 = vadd.s32 %v1766_v14, %v6598_v46  ;;  %v8045_v35 = vld [vmem:[#allocation13_spill] sm:$0xff] }
 0x193   :  { %4337 = vst [vmem:[#allocation7 + $0x70] sm:$0xff] %v4145_v13  ;;  %v3187_v58 = vmul.u32 3266489909, %v2995_v10  ;;  %v2037_v1 = vxor.u32 %v6614_v12, %v1842_v11  ;;  %v1311_v55 = vmul.f32 0.9, %v1076_v7  ;;  %v2038_v30 = vxor.u32 %v6614_v12, %v1843_v15  ;;  %v8046_v7 = vld [vmem:[#allocation14_spill] sm:$0xff] }
 0x194   :  { %v3188_v0 = vmul.u32 3266489909, %v2996_v47  ;;  %v3378_v18 = vshrl.u32 %v3186_v2, 16  ;;  %v1633_v26 = vadd.s32 56, %v6574_v36  ;;  %v2039_v28 = vxor.u32 %v6614_v12, %v1844_v39  ;;  %v8047_v10 = vld [vmem:[#allocation18_spill] sm:$0xff] }
 0x195   :  { %v3379_v16 = vshrl.u32 %v3187_v58, 16  ;;  %v2229_v63 = vshrl.u32 %v2037_v1, 16  ;;  %4932 = vrcp.f32 %v1311_v55  ;;  %v2230_v50 = vshrl.u32 %v2038_v30, 16 }
 0x196   :  { %v3380_v22 = vshrl.u32 %v3188_v0, 16  ;;  %v3570_v25 = vxor.u32 %v3378_v18, %v3186_v2  ;;  %v1767_v57 = vmul.u32 384, %v1633_v26  ;;  %v2231_v34 = vshrl.u32 %v2039_v28, 16  ;;  %v1084_v18 = vpop.xlane.xlu0 %1083 }
 0x197   :  { %v3571_v29 = vxor.u32 %v3379_v16, %v3187_v58  ;;  %v2421_v51 = vxor.u32 %v2229_v63, %v2037_v1  ;;  %v1312_v38 = vmul.f32 0.9, %v1080_v6  ;;  %v2422_v43 = vxor.u32 %v2230_v50, %v2038_v30 }
 0x198   :  { %v3572_v19 = vxor.u32 %v3380_v22, %v3188_v0  ;;  %v3762_v40 = vshrl.u32 %v3570_v25, 8  ;;  %v1845_v9 = vadd.s32 %v1767_v57, %v6576_v33  ;;  %v2423_v4 = vxor.u32 %v2231_v34, %v2039_v28 }
 0x199   :  { %v4931_v52 = vpop.eup %4930  ;;  %v3763_v53 = vshrl.u32 %v3571_v29, 8  ;;  %v2613_v61 = vmul.u32 2246822507, %v2421_v51  ;;  %v1846_v14 = vadd.s32 %v1767_v57, %v6595_v41  ;;  %v2614_v13 = vmul.u32 2246822507, %v2422_v43 }
 0x19a   :  { %v3764_v21 = vshrl.u32 %v3572_v19, 8  ;;  %vm3954_vm15 = vcmp.ge.s32.totalorder %v3762_v40, 1677722  ;;  %v1448_v31 = vmul.f32 %v4931_v52, %v8045_v35  ;;  %v1449_v8 = vmul.f32 %v4931_v52, %v8046_v7  ;;  %v8049_v35 = vld [vmem:[#allocation17_spill] sm:$0xff] }
 0x19b   :  { %vm3955_vm0 = vcmp.ge.s32.totalorder %v3763_v53, 1677722  ;;  %v1450_v11 = vmul.f32 %v4931_v52, %v8047_v10  ;;  %v2615_v47 = vmul.u32 2246822507, %v2423_v4  ;;  %v2805_v58 = vshrl.u32 %v2613_v61, 13 }
 0x19c   :  { %vm3956_vm1 = vcmp.ge.s32.totalorder %v3764_v21, 1677722  ;;  %v4146_v2 = vsel %vm3954_vm15, %v1448_v31, 0.0  ;;  %v4147_v15 = vsel %vm3955_vm0, %v1449_v8, 0.0  ;;  %v2806_v1 = vshrl.u32 %v2614_v13, 13  ;;  %v8050_v8 = vld [vmem:[#allocation21_spill] sm:$0xff] }
 0x19d   :  { %v4148_v39 = vsel %vm3956_vm1, %v1450_v11, 0.0  ;;  %4338 = vst [vmem:[#allocation7 + $0x78] sm:$0xff] %v4146_v2  ;;  %4339 = vst [vmem:[#allocation7 + $0x80] sm:$0xff] %v4147_v15  ;;  %v2807_v55 = vshrl.u32 %v2615_v47, 13  ;;  %v1847_v0 = vadd.s32 %v1767_v57, %v6598_v46  ;;  %v2997_v30 = vxor.u32 %v2805_v58, %v2613_v61 }
 0x19e   :  { %4340 = vst [vmem:[#allocation7 + $0x88] sm:$0xff] %v4148_v39  ;;  %v2040_v26 = vxor.u32 %v6614_v12, %v1845_v9  ;;  %v2041_v6 = vxor.u32 %v6614_v12, %v1846_v14  ;;  %4934 = vrcp.f32 %v1312_v38  ;;  %v2998_v16 = vxor.u32 %v2806_v1, %v2614_v13  ;;  %v8048_v14 = vld [vmem:[#allocation16_spill] sm:$0xff] }
 0x19f   :  { %v2999_v28 = vxor.u32 %v2807_v55, %v2615_v47  ;;  %v2042_v63 = vxor.u32 %v6614_v12, %v1847_v0  ;;  %v1634_v22 = vadd.s32 64, %v6574_v36  ;;  %v3189_v25 = vmul.u32 3266489909, %v2997_v30 }
 0x1a0   :  { %v2232_v50 = vshrl.u32 %v2040_v26, 16  ;;  %v2233_v29 = vshrl.u32 %v2041_v6, 16  ;;  %v1313_v34 = vmul.f32 0.9, %v1084_v18  ;;  %v3190_v51 = vmul.u32 3266489909, %v2998_v16 }
 0x1a1   :  { %v3191_v57 = vmul.u32 3266489909, %v2999_v28  ;;  %v2234_v19 = vshrl.u32 %v2042_v63, 16  ;;  %v1635_v40 = vadd.s32 72, %v6574_v36  ;;  %v3381_v9 = vshrl.u32 %v3189_v25, 16 }
 0x1a2   :  { %v4933_v43 = vpop.eup %4932  ;;  %v2424_v52 = vxor.u32 %v2232_v50, %v2040_v26  ;;  %v2425_v53 = vxor.u32 %v2233_v29, %v2041_v6  ;;  %v1768_v38 = vmul.u32 384, %v1634_v22  ;;  %v3382_v4 = vshrl.u32 %v3190_v51, 16 }
 0x1a3   :  { %v3383_v61 = vshrl.u32 %v3191_v57, 16  ;;  %v1451_v21 = vmul.f32 %v4933_v43, %v8048_v14  ;;  %v1452_v31 = vmul.f32 %v4933_v43, %v8049_v35  ;;  %v3573_v7 = vxor.u32 %v3381_v9, %v3189_v25 }
 0x1a4   :  { %v1453_v10 = vmul.f32 %v4933_v43, %v8050_v8  ;;  %v2426_v11 = vxor.u32 %v2234_v19, %v2042_v63  ;;  %v2616_v13 = vmul.u32 2246822507, %v2424_v52  ;;  %v3574_v47 = vxor.u32 %v3382_v4, %v3190_v51 }
 0x1a5   :  { %v3575_v2 = vxor.u32 %v3383_v61, %v3191_v57  ;;  %v2617_v15 = vmul.u32 2246822507, %v2425_v53  ;;  %v1848_v58 = vadd.s32 %v1768_v38, %v6576_v33  ;;  %v3765_v39 = vshrl.u32 %v3573_v7, 8  ;;  %v8051_v61 = vld [vmem:[#allocation19_spill] sm:$0xff]  ;;  %v8053_v7 = vld [vmem:[#allocation24_spill] sm:$0xff] }
 0x1a6   :  { %v2618_v1 = vmul.u32 2246822507, %v2426_v11  ;;  %v2808_v55 = vshrl.u32 %v2616_v13, 13  ;;  %v1849_v0 = vadd.s32 %v1768_v38, %v6595_v41  ;;  %v3766_v18 = vshrl.u32 %v3574_v47, 8 }
 0x1a7   :  { %v3767_v30 = vshrl.u32 %v3575_v2, 8  ;;  %v2809_v26 = vshrl.u32 %v2617_v15, 13  ;;  %v1850_v6 = vadd.s32 %v1768_v38, %v6598_v46  ;;  %vm3957_vm2 = vcmp.ge.s32.totalorder %v3765_v39, 1677722 }
 0x1a8   :  { %v2810_v16 = vshrl.u32 %v2618_v1, 13  ;;  %v3000_v28 = vxor.u32 %v2808_v55, %v2616_v13  ;;  %v2043_v63 = vxor.u32 %v6614_v12, %v1848_v58  ;;  %vm3958_vm3 = vcmp.ge.s32.totalorder %v3766_v18, 1677722  ;;  %v1088_v13 = vpop.xlane.xlu1 %1087 }
 0x1a9   :  { %vm3959_vm4 = vcmp.ge.s32.totalorder %v3767_v30, 1677722  ;;  %v4149_v22 = vsel %vm3957_vm2, %v1451_v21, 0.0  ;;  %v3001_v25 = vxor.u32 %v2809_v26, %v2617_v15  ;;  %v4150_v50 = vsel %vm3958_vm3, %v1452_v31, 0.0  ;;  %v8052_v21 = vld [vmem:[#allocation20_spill] sm:$0xff] }
 0x1aa   :  { %v4151_v29 = vsel %vm3959_vm4, %v1453_v10, 0.0  ;;  %4341 = vst [vmem:[#allocation7 + $0x90] sm:$0xff] %v4149_v22  ;;  %v3002_v51 = vxor.u32 %v2810_v16, %v2618_v1  ;;  %v3192_v57 = vmul.u32 3266489909, %v3000_v28  ;;  %4342 = vst [vmem:[#allocation7 + $0x98] sm:$0xff] %v4150_v50  ;;  %v2044_v9 = vxor.u32 %v6614_v12, %v1849_v0 }
 0x1ab   :  { %v4935_v19 = vpop.eup %4934  ;;  %4343 = vst [vmem:[#allocation7 + $0xa0] sm:$0xff] %v4151_v29  ;;  %v3193_v43 = vmul.u32 3266489909, %v3001_v25  ;;  %v2045_v52 = vxor.u32 %v6614_v12, %v1850_v6  ;;  %v2235_v53 = vshrl.u32 %v2043_v63, 16  ;;  %4936 = vrcp.f32 %v1313_v34 }
 0x1ac   :  { %v3194_v38 = vmul.u32 3266489909, %v3002_v51  ;;  %v3384_v4 = vshrl.u32 %v3192_v57, 16  ;;  %v1454_v14 = vmul.f32 %v4935_v19, %v8051_v61  ;;  %v1455_v35 = vmul.f32 %v4935_v19, %v8052_v21 }
 0x1ad   :  { %v3385_v31 = vshrl.u32 %v3193_v43, 16  ;;  %v1456_v8 = vmul.f32 %v4935_v19, %v8053_v7  ;;  %v2236_v10 = vshrl.u32 %v2044_v9, 16  ;;  %v2237_v11 = vshrl.u32 %v2045_v52, 16 }
 0x1ae   :  { %v3386_v47 = vshrl.u32 %v3194_v38, 16  ;;  %v3576_v2 = vxor.u32 %v3384_v4, %v3192_v57  ;;  %v2427_v15 = vxor.u32 %v2235_v53, %v2043_v63  ;;  %v1769_v55 = vmul.u32 384, %v1635_v40 }
 0x1af   :  { %v3577_v58 = vxor.u32 %v3385_v31, %v3193_v43  ;;  %v2428_v39 = vxor.u32 %v2236_v10, %v2044_v9  ;;  %v2429_v1 = vxor.u32 %v2237_v11, %v2045_v52  ;;  %v1314_v26 = vmul.f32 0.9, %v1088_v13 }
 0x1b0   :  { %v3578_v0 = vxor.u32 %v3386_v47, %v3194_v38  ;;  %v3768_v18 = vshrl.u32 %v3576_v2, 8  ;;  %v2619_v30 = vmul.u32 2246822507, %v2427_v15  ;;  %v1851_v22 = vadd.s32 %v1769_v55, %v6576_v33  ;;  %v1092_v38 = vpop.xlane.xlu0 %1091 }
 0x1b1   :  { %v3769_v6 = vshrl.u32 %v3577_v58, 8  ;;  %v2620_v16 = vmul.u32 2246822507, %v2428_v39  ;;  %v2621_v28 = vmul.u32 2246822507, %v2429_v1  ;;  %v1852_v29 = vadd.s32 %v1769_v55, %v6595_v41 }
 0x1b2   :  { %v3770_v25 = vshrl.u32 %v3578_v0, 8  ;;  %vm3960_vm5 = vcmp.ge.s32.totalorder %v3768_v18, 1677722  ;;  %v2811_v50 = vshrl.u32 %v2619_v30, 13  ;;  %v1853_v19 = vadd.s32 %v1769_v55, %v6598_v46 }
 0x1b3   :  { %vm3961_vm6 = vcmp.ge.s32.totalorder %v3769_v6, 1677722  ;;  %v4152_v34 = vsel %vm3960_vm5, %v1454_v14, 0.0  ;;  %v2812_v63 = vshrl.u32 %v2620_v16, 13  ;;  %v2813_v51 = vshrl.u32 %v2621_v28, 13 }
 0x1b4   :  { %vm3962_vm7 = vcmp.ge.s32.totalorder %v3770_v25, 1677722  ;;  %v4153_v40 = vsel %vm3961_vm6, %v1455_v35, 0.0  ;;  %4344 = vst [vmem:[#allocation7 + $0xa8] sm:$0xff] %v4152_v34  ;;  %v3003_v57 = vxor.u32 %v2811_v50, %v2619_v30  ;;  %v2046_v53 = vxor.u32 %v6614_v12, %v1851_v22  ;;  %v8055_v25 = vld [vmem:[#allocation23_spill] sm:$0xff] }
 0x1b5   :  { %v4154_v43 = vsel %vm3962_vm7, %v1456_v8, 0.0  ;;  %4345 = vst [vmem:[#allocation7 + $0xb0] sm:$0xff] %v4153_v40  ;;  %v3004_v9 = vxor.u32 %v2812_v63, %v2620_v16  ;;  %v3005_v52 = vxor.u32 %v2813_v51, %v2621_v28  ;;  %v2047_v61 = vxor.u32 %v6614_v12, %v1852_v29  ;;  %v8054_v28 = vld [vmem:[#allocation22_spill] sm:$0xff]  ;;  %v8056_v29 = vld [vmem:[#allocation27_spill] sm:$0xff] }
 0x1b6   :  { %4346 = vst [vmem:[#allocation7 + $0xb8] sm:$0xff] %v4154_v43  ;;  %v3195_v4 = vmul.u32 3266489909, %v3003_v57  ;;  %v2048_v14 = vxor.u32 %v6614_v12, %v1853_v19  ;;  %4938 = vrcp.f32 %v1314_v26  ;;  %v2238_v31 = vshrl.u32 %v2046_v53, 16 }
 0x1b7   :  { %v3196_v21 = vmul.u32 3266489909, %v3004_v9  ;;  %v3197_v35 = vmul.u32 3266489909, %v3005_v52  ;;  %v1636_v7 = vadd.s32 80, %v6574_v36  ;;  %v2239_v8 = vshrl.u32 %v2047_v61, 16 }
 0x1b8   :  { %v3387_v10 = vshrl.u32 %v3195_v4, 16  ;;  %v2240_v11 = vshrl.u32 %v2048_v14, 16  ;;  %v1315_v13 = vmul.f32 0.9, %v1092_v38  ;;  %v2430_v15 = vxor.u32 %v2238_v31, %v2046_v53  ;;  %v4937_v0 = vpop.eup %4936  ;;  %v1096_v38 = vpop.xlane.xlu1 %1095 }
 0x1b9   :  { %v3388_v47 = vshrl.u32 %v3196_v21, 16  ;;  %v3389_v2 = vshrl.u32 %v3197_v35, 16  ;;  %v1770_v58 = vmul.u32 384, %v1636_v7  ;;  %v2431_v1 = vxor.u32 %v2239_v8, %v2047_v61 }
 0x1ba   :  { %v3579_v39 = vxor.u32 %v3387_v10, %v3195_v4  ;;  %v2432_v55 = vxor.u32 %v2240_v11, %v2048_v14  ;;  %4940 = vrcp.f32 %v1315_v13  ;;  %v2622_v26 = vmul.u32 2246822507, %v2430_v15 }
 0x1bb   :  { %v3580_v18 = vxor.u32 %v3388_v47, %v3196_v21  ;;  %v3581_v30 = vxor.u32 %v3389_v2, %v3197_v35  ;;  %v1854_v6 = vadd.s32 %v1770_v58, %v6576_v33  ;;  %v1457_v22 = vmul.f32 %v4937_v0, %v8054_v28  ;;  %v8059_v28 = vld [vmem:[#allocation30_spill] sm:$0xff] }
 0x1bc   :  { %v3771_v16 = vshrl.u32 %v3579_v39, 8  ;;  %v1458_v50 = vmul.f32 %v4937_v0, %v8055_v25  ;;  %v1459_v34 = vmul.f32 %v4937_v0, %v8056_v29  ;;  %v2623_v40 = vmul.u32 2246822507, %v2431_v1 }
 0x1bd   :  { %v3772_v63 = vshrl.u32 %v3580_v18, 8  ;;  %v3773_v51 = vshrl.u32 %v3581_v30, 8  ;;  %v2624_v57 = vmul.u32 2246822507, %v2432_v55  ;;  %v2814_v19 = vshrl.u32 %v2622_v26, 13  ;;  %v8057_v18 = vld [vmem:[#allocation25_spill] sm:$0xff] }
 0x1be   :  { %vm3963_vm8 = vcmp.ge.s32.totalorder %v3771_v16, 1677722  ;;  %v1855_v43 = vadd.s32 %v1770_v58, %v6595_v41  ;;  %v1856_v9 = vadd.s32 %v1770_v58, %v6598_v46  ;;  %v2815_v53 = vshrl.u32 %v2623_v40, 13 }
 0x1bf   :  { %vm3964_vm9 = vcmp.ge.s32.totalorder %v3772_v63, 1677722  ;;  %vm3965_vm10 = vcmp.ge.s32.totalorder %v3773_v51, 1677722  ;;  %v4155_v52 = vsel %vm3963_vm8, %v1457_v22, 0.0  ;;  %v2816_v14 = vshrl.u32 %v2624_v57, 13 }
 0x1c0   :  { %v4156_v4 = vsel %vm3964_vm9, %v1458_v50, 0.0  ;;  %v4157_v61 = vsel %vm3965_vm10, %v1459_v34, 0.0  ;;  %4347 = vst [vmem:[#allocation7 + $0xc0] sm:$0xff] %v4155_v52  ;;  %v3006_v21 = vxor.u32 %v2814_v19, %v2622_v26  ;;  %v3007_v35 = vxor.u32 %v2815_v53, %v2623_v40  ;;  %v8058_v26 = vld [vmem:[#allocation26_spill] sm:$0xff] }
 0x1c1   :  { %4348 = vst [vmem:[#allocation7 + $0xc8] sm:$0xff] %v4156_v4  ;;  %4349 = vst [vmem:[#allocation7 + $0xd0] sm:$0xff] %v4157_v61  ;;  %v2049_v31 = vxor.u32 %v6614_v12, %v1854_v6  ;;  %v2050_v7 = vxor.u32 %v6614_v12, %v1855_v43  ;;  %v2051_v10 = vxor.u32 %v6614_v12, %v1856_v9  ;;  %v1637_v13 = vadd.s32 88, %v6574_v36 }
 0x1c2   :  { %v3008_v8 = vxor.u32 %v2816_v14, %v2624_v57  ;;  %v3198_v11 = vmul.u32 3266489909, %v3006_v21  ;;  %v1316_v47 = vmul.f32 0.9, %v1096_v38  ;;  %v3199_v15 = vmul.u32 3266489909, %v3007_v35 }
 0x1c3   :  { %v4939_v2 = vpop.eup %4938  ;;  %v2241_v58 = vshrl.u32 %v2049_v31, 16  ;;  %v2242_v39 = vshrl.u32 %v2050_v7, 16  ;;  %v2243_v1 = vshrl.u32 %v2051_v10, 16  ;;  %v1771_v51 = vmul.u32 384, %v1637_v13  ;;  %v8060_v38 = vld [vmem:[#allocation28_spill] sm:$0xff]  ;;  %v8061_v35 = vld [vmem:[#allocation29_spill] sm:$0xff] }
 0x1c4   :  { %v3200_v55 = vmul.u32 3266489909, %v3008_v8  ;;  %v3390_v0 = vshrl.u32 %v3198_v11, 16  ;;  %v1460_v30 = vmul.f32 %v4939_v2, %v8057_v18  ;;  %v1461_v6 = vmul.f32 %v4939_v2, %v8058_v26  ;;  %v8062_v8 = vld [vmem:[#allocation33_spill] sm:$0xff] }
 0x1c5   :  { %v3391_v16 = vshrl.u32 %v3199_v15, 16  ;;  %v1462_v22 = vmul.f32 %v4939_v2, %v8059_v28  ;;  %v2433_v25 = vxor.u32 %v2241_v58, %v2049_v31  ;;  %v2434_v50 = vxor.u32 %v2242_v39, %v2050_v7 }
 0x1c6   :  { %v3392_v29 = vshrl.u32 %v3200_v55, 16  ;;  %v3582_v34 = vxor.u32 %v3390_v0, %v3198_v11  ;;  %v2435_v63 = vxor.u32 %v2243_v1, %v2051_v10  ;;  %4942 = vrcp.f32 %v1316_v47  ;;  %v1100_v1 = vpop.xlane.xlu0 %1099 }
 0x1c7   :  { %v4941_v40 = vpop.eup %4940  ;;  %v3583_v57 = vxor.u32 %v3391_v16, %v3199_v15  ;;  %v2625_v19 = vmul.u32 2246822507, %v2433_v25  ;;  %v2626_v43 = vmul.u32 2246822507, %v2434_v50  ;;  %v1857_v39 = vadd.s32 %v1771_v51, %v6576_v33 }
 0x1c8   :  { %v3584_v9 = vxor.u32 %v3392_v29, %v3200_v55  ;;  %v3774_v52 = vshrl.u32 %v3582_v34, 8  ;;  %v2627_v53 = vmul.u32 2246822507, %v2435_v63  ;;  %v6953_v4 = vmul.f32 %v4941_v40, %v8060_v38 }
 0x1c9   :  { %v3775_v61 = vshrl.u32 %v3583_v57, 8  ;;  %v2817_v14 = vshrl.u32 %v2625_v19, 13  ;;  %v2818_v21 = vshrl.u32 %v2626_v43, 13  ;;  %v1464_v31 = vmul.f32 %v4941_v40, %v8061_v35 }
 0x1ca   :  { %v3776_v7 = vshrl.u32 %v3584_v9, 8  ;;  %vm3966_vm11 = vcmp.ge.s32.totalorder %v3774_v52, 1677722  ;;  %v2819_v10 = vshrl.u32 %v2627_v53, 13  ;;  %v1465_v11 = vmul.f32 %v4941_v40, %v8062_v8 }
 0x1cb   :  { %vm3967_vm12 = vcmp.ge.s32.totalorder %v3775_v61, 1677722  ;;  %v4158_v13 = vsel %vm3966_vm11, %v1460_v30, 0.0  ;;  %v3009_v2 = vxor.u32 %v2817_v14, %v2625_v19  ;;  %v3010_v47 = vxor.u32 %v2818_v21, %v2626_v43 }
 0x1cc   :  { %vm3968_vm13 = vcmp.ge.s32.totalorder %v3776_v7, 1677722  ;;  %v4159_v15 = vsel %vm3967_vm12, %v1461_v6, 0.0  ;;  %4350 = vst [vmem:[#allocation7 + $0xd8] sm:$0xff] %v4158_v13  ;;  %v3011_v58 = vxor.u32 %v2819_v10, %v2627_v53  ;;  %v1858_v26 = vadd.s32 %v1771_v51, %v6595_v41 }
 0x1cd   :  { %v4160_v55 = vsel %vm3968_vm13, %v1462_v22, 0.0  ;;  %4351 = vst [vmem:[#allocation7 + $0xe0] sm:$0xff] %v4159_v15  ;;  %v3201_v0 = vmul.u32 3266489909, %v3009_v2  ;;  %v3202_v18 = vmul.u32 3266489909, %v3010_v47  ;;  %v1859_v28 = vadd.s32 %v1771_v51, %v6598_v46 }
 0x1ce   :  { %4352 = vst [vmem:[#allocation7 + $0xe8] sm:$0xff] %v4160_v55  ;;  %v3203_v16 = vmul.u32 3266489909, %v3011_v58  ;;  %v2052_v30 = vxor.u32 %v6614_v12, %v1857_v39  ;;  %v1638_v25 = vadd.s32 96, %v6574_v36  ;;  %v2053_v29 = vxor.u32 %v6614_v12, %v1858_v26  ;;  %v8063_v15 = vld [vmem:[#allocation31_spill] sm:$0xff] }
 0x1cf   :  { %v3393_v6 = vshrl.u32 %v3201_v0, 16  ;;  %v3394_v50 = vshrl.u32 %v3202_v18, 16  ;;  %v1317_v34 = vmul.f32 0.9, %v1100_v1  ;;  %v2054_v22 = vxor.u32 %v6614_v12, %v1859_v28 }
 0x1d0   :  { %v3395_v63 = vshrl.u32 %v3203_v16, 16  ;;  %v2244_v40 = vshrl.u32 %v2052_v30, 16  ;;  %v1772_v57 = vmul.u32 384, %v1638_v25  ;;  %v2245_v9 = vshrl.u32 %v2053_v29, 16 }
 0x1d1   :  { %v3585_v19 = vxor.u32 %v3393_v6, %v3201_v0  ;;  %v3586_v43 = vxor.u32 %v3394_v50, %v3202_v18  ;;  %4944 = vrcp.f32 %v1317_v34  ;;  %v2246_v51 = vshrl.u32 %v2054_v22, 16  ;;  %v8065_v6 = vld [vmem:[#allocation34_spill] sm:$0xff] }
 0x1d2   :  { %v3587_v52 = vxor.u32 %v3395_v63, %v3203_v16  ;;  %v2436_v53 = vxor.u32 %v2244_v40, %v2052_v30  ;;  %v1860_v38 = vadd.s32 %v1772_v57, %v6576_v33  ;;  %v2437_v21 = vxor.u32 %v2245_v9, %v2053_v29  ;;  %v8064_v16 = vld [vmem:[#allocation32_spill] sm:$0xff]  ;;  %v1104_v30 = vpop.xlane.xlu1 %1103 }
 0x1d3   :  { %v3777_v61 = vshrl.u32 %v3585_v19, 8  ;;  %v3778_v14 = vshrl.u32 %v3586_v43, 8  ;;  %v1861_v35 = vadd.s32 %v1772_v57, %v6595_v41  ;;  %v4943_v7 = vpop.eup %4942  ;;  %v2438_v8 = vxor.u32 %v2246_v51, %v2054_v22 }
 0x1d4   :  { %v3779_v10 = vshrl.u32 %v3587_v52, 8  ;;  %v2628_v13 = vmul.u32 2246822507, %v2436_v53  ;;  %v1862_v2 = vadd.s32 %v1772_v57, %v6598_v46  ;;  %v2629_v47 = vmul.u32 2246822507, %v2437_v21 }
 0x1d5   :  { %vm3969_vm14 = vcmp.ge.s32.totalorder %v3777_v61, 1677722  ;;  %vm3970_vm15 = vcmp.ge.s32.totalorder %v3778_v14, 1677722  ;;  %v6968_v58 = vmul.f32 %v4943_v7, %v8063_v15  ;;  %v2630_v55 = vmul.u32 2246822507, %v2438_v8 }
 0x1d6   :  { %vm3971_vm0 = vcmp.ge.s32.totalorder %v3779_v10, 1677722  ;;  %v4161_v39 = vsel %vm3969_vm14, %v6953_v4, 0.0  ;;  %v4162_v1 = vsel %vm3970_vm15, %v1464_v31, 0.0  ;;  %v2820_v18 = vshrl.u32 %v2628_v13, 13 }
 0x1d7   :  { %v4163_v0 = vsel %vm3971_vm0, %v1465_v11, 0.0  ;;  %4353 = vst [vmem:[#allocation7 + $0xf0] sm:$0xff] %v4161_v39  ;;  %4354 = vst [vmem:[#allocation7 + $0xf8] sm:$0xff] %v4162_v1  ;;  %v2821_v26 = vshrl.u32 %v2629_v47, 13  ;;  %v1467_v28 = vmul.f32 %v4943_v7, %v8064_v16  ;;  %v2822_v25 = vshrl.u32 %v2630_v55, 13 }
 0x1d8   :  { %4355 = vst [vmem:[#allocation7 + $0x100] sm:$0xff] %v4163_v0  ;;  %v1468_v50 = vmul.f32 %v4943_v7, %v8065_v6  ;;  %v2055_v29 = vxor.u32 %v6614_v12, %v1860_v38  ;;  %v2056_v34 = vxor.u32 %v6614_v12, %v1861_v35  ;;  %v3012_v63 = vxor.u32 %v2820_v18, %v2628_v13 }
 0x1d9   :  { %v3013_v4 = vxor.u32 %v2821_v26, %v2629_v47  ;;  %v2057_v31 = vxor.u32 %v6614_v12, %v1862_v2  ;;  %v1639_v11 = vadd.s32 104, %v6574_v36  ;;  %v3014_v22 = vxor.u32 %v2822_v25, %v2630_v55  ;;  %v8066_v55 = vld [vmem:[#allocation36_spill] sm:$0xff] }
 0x1da   :  { %v2247_v40 = vshrl.u32 %v2055_v29, 16  ;;  %v2248_v57 = vshrl.u32 %v2056_v34, 16  ;;  %v1318_v19 = vmul.f32 0.9, %v1104_v30  ;;  %v3204_v43 = vmul.u32 3266489909, %v3012_v63 }
 0x1db   :  { %v3205_v9 = vmul.u32 3266489909, %v3013_v4  ;;  %v2249_v52 = vshrl.u32 %v2057_v31, 16  ;;  %v1640_v51 = vadd.s32 112, %v6574_v36  ;;  %v3206_v53 = vmul.u32 3266489909, %v3014_v22 }
 0x1dc   :  { %v2439_v61 = vxor.u32 %v2247_v40, %v2055_v29  ;;  %v2440_v38 = vxor.u32 %v2248_v57, %v2056_v34  ;;  %v1773_v14 = vmul.u32 384, %v1639_v11  ;;  %v3396_v21 = vshrl.u32 %v3204_v43, 16  ;;  %v8067_v30 = vld [vmem:[#allocation37_spill] sm:$0xff]  ;;  %v8068_v63 = vld [vmem:[#allocation38_spill] sm:$0xff] }
 0x1dd   :  { %v3397_v35 = vshrl.u32 %v3205_v9, 16  ;;  %v2441_v7 = vxor.u32 %v2249_v52, %v2057_v31  ;;  %4946 = vrcp.f32 %v1318_v19  ;;  %v3398_v8 = vshrl.u32 %v3206_v53, 16 }
 0x1de   :  { %v4945_v10 = vpop.eup %4944  ;;  %v2631_v13 = vmul.u32 2246822507, %v2439_v61  ;;  %v2632_v2 = vmul.u32 2246822507, %v2440_v38  ;;  %v1863_v47 = vadd.s32 %v1773_v14, %v6576_v33  ;;  %v3588_v15 = vxor.u32 %v3396_v21, %v3204_v43 }
 0x1df   :  { %v3589_v39 = vxor.u32 %v3397_v35, %v3205_v9  ;;  %v2633_v1 = vmul.u32 2246822507, %v2441_v7  ;;  %v6980_v0 = vmul.f32 %v4945_v10, %v8066_v55  ;;  %v3590_v18 = vxor.u32 %v3398_v8, %v3206_v53  ;;  %v1108_v53 = vpop.xlane.xlu0 %1107 }
 0x1e0   :  { %v2823_v26 = vshrl.u32 %v2631_v13, 13  ;;  %v2824_v16 = vshrl.u32 %v2632_v2, 13  ;;  %v6983_v25 = vmul.f32 %v4945_v10, %v8067_v30  ;;  %v3780_v6 = vshrl.u32 %v3588_v15, 8 }
 0x1e1   :  { %v3781_v29 = vshrl.u32 %v3589_v39, 8  ;;  %v2825_v34 = vshrl.u32 %v2633_v1, 13  ;;  %v1471_v4 = vmul.f32 %v4945_v10, %v8068_v63  ;;  %v3782_v31 = vshrl.u32 %v3590_v18, 8 }
 0x1e2   :  { %v3015_v11 = vxor.u32 %v2823_v26, %v2631_v13  ;;  %v3016_v22 = vxor.u32 %v2824_v16, %v2632_v2  ;;  %v1864_v40 = vadd.s32 %v1773_v14, %v6595_v41  ;;  %vm3972_vm1 = vcmp.ge.s32.totalorder %v3780_v6, 1677722 }
 0x1e3   :  { %vm3973_vm2 = vcmp.ge.s32.totalorder %v3781_v29, 1677722  ;;  %v3017_v57 = vxor.u32 %v2825_v34, %v2633_v1  ;;  %v1865_v19 = vadd.s32 %v1773_v14, %v6598_v46  ;;  %vm3974_vm3 = vcmp.ge.s32.totalorder %v3782_v31, 1677722 }
 0x1e4   :  { %v4164_v43 = vsel %vm3972_vm1, %v6968_v58, 0.0  ;;  %v4165_v9 = vsel %vm3973_vm2, %v1467_v28, 0.0  ;;  %v3207_v52 = vmul.u32 3266489909, %v3015_v11  ;;  %v4166_v61 = vsel %vm3974_vm3, %v1468_v50, 0.0  ;;  %v8069_v11 = vld [vmem:[#allocation39_spill] sm:$0xff] }
 0x1e5   :  { %4356 = vst [vmem:[#allocation7 + $0x108] sm:$0xff] %v4164_v43  ;;  %4357 = vst [vmem:[#allocation7 + $0x110] sm:$0xff] %v4165_v9  ;;  %v3208_v38 = vmul.u32 3266489909, %v3016_v22  ;;  %v3209_v21 = vmul.u32 3266489909, %v3017_v57  ;;  %v2058_v35 = vxor.u32 %v6614_v12, %v1863_v47  ;;  %v2059_v10 = vxor.u32 %v6614_v12, %v1864_v40 }
 0x1e6   :  { %4358 = vst [vmem:[#allocation7 + $0x118] sm:$0xff] %v4166_v61  ;;  %v3399_v7 = vshrl.u32 %v3207_v52, 16  ;;  %v2060_v8 = vxor.u32 %v6614_v12, %v1865_v19  ;;  %v1774_v14 = vmul.u32 384, %v1640_v51  ;;  %v1319_v28 = vmul.f32 0.9, %v1108_v53  ;;  %v8070_v19 = vld [vmem:[#allocation40_spill] sm:$0xff] }
 0x1e7   :  { %v3400_v13 = vshrl.u32 %v3208_v38, 16  ;;  %v3401_v2 = vshrl.u32 %v3209_v21, 16  ;;  %v2250_v58 = vshrl.u32 %v2058_v35, 16  ;;  %v2251_v39 = vshrl.u32 %v2059_v10, 16 }
 0x1e8   :  { %v3591_v15 = vxor.u32 %v3399_v7, %v3207_v52  ;;  %v2252_v50 = vshrl.u32 %v2060_v8, 16  ;;  %v1866_v1 = vadd.s32 %v1774_v14, %v6576_v33  ;;  %v1867_v47 = vadd.s32 %v1774_v14, %v6595_v41  ;;  %v8071_v7 = vld [vmem:[#allocation41_spill] sm:$0xff] }
 0x1e9   :  { %v3592_v55 = vxor.u32 %v3400_v13, %v3208_v38  ;;  %v3593_v18 = vxor.u32 %v3401_v2, %v3209_v21  ;;  %v2442_v26 = vxor.u32 %v2250_v58, %v2058_v35  ;;  %v2443_v6 = vxor.u32 %v2251_v39, %v2059_v10  ;;  %v1112_v39 = vpop.xlane.xlu1 %1111 }
 0x1ea   :  { %v4947_v16 = vpop.eup %4946  ;;  %v3783_v30 = vshrl.u32 %v3591_v15, 8  ;;  %v2444_v29 = vxor.u32 %v2252_v50, %v2060_v8  ;;  %v1868_v51 = vadd.s32 %v1774_v14, %v6598_v46  ;;  %v2061_v8 = vxor.u32 %v6614_v12, %v1866_v1 }
 0x1eb   :  { %v3784_v34 = vshrl.u32 %v3592_v55, 8  ;;  %v3785_v63 = vshrl.u32 %v3593_v18, 8  ;;  %v2634_v31 = vmul.u32 2246822507, %v2442_v26  ;;  %v6996_v22 = vmul.f32 %v4947_v16, %v8069_v11 }
 0x1ec   :  { %vm3975_vm4 = vcmp.ge.s32.totalorder %v3783_v30, 1677722  ;;  %v2635_v40 = vmul.u32 2246822507, %v2443_v6  ;;  %v2636_v57 = vmul.u32 2246822507, %v2444_v29  ;;  %v6999_v43 = vmul.f32 %v4947_v16, %v8070_v19 }
 0x1ed   :  { %vm3976_vm5 = vcmp.ge.s32.totalorder %v3784_v34, 1677722  ;;  %vm3977_vm6 = vcmp.ge.s32.totalorder %v3785_v63, 1677722  ;;  %v4167_v9 = vsel %vm3975_vm4, %v6980_v0, 0.0  ;;  %v2826_v52 = vshrl.u32 %v2634_v31, 13 }
 0x1ee   :  { %v4168_v53 = vsel %vm3976_vm5, %v6983_v25, 0.0  ;;  %v4169_v61 = vsel %vm3977_vm6, %v1471_v4, 0.0  ;;  %4359 = vst [vmem:[#allocation7 + $0x120] sm:$0xff] %v4167_v9  ;;  %v2827_v38 = vshrl.u32 %v2635_v40, 13  ;;  %v2828_v21 = vshrl.u32 %v2636_v57, 13 }
 0x1ef   :  { %4360 = vst [vmem:[#allocation7 + $0x128] sm:$0xff] %v4168_v53  ;;  %4361 = vst [vmem:[#allocation7 + $0x130] sm:$0xff] %v4169_v61  ;;  %v3018_v35 = vxor.u32 %v2826_v52, %v2634_v31  ;;  %v1474_v10 = vmul.f32 %v4947_v16, %v8071_v7  ;;  %v2062_v14 = vxor.u32 %v6614_v12, %v1867_v47  ;;  %4948 = vrcp.f32 %v1319_v28 }
 0x1f0   :  { %v3019_v13 = vxor.u32 %v2827_v38, %v2635_v40  ;;  %v3020_v2 = vxor.u32 %v2828_v21, %v2636_v57  ;;  %v2063_v0 = vxor.u32 %v6614_v12, %v1868_v51  ;;  %v2253_v25 = vshrl.u32 %v2061_v8, 16 }
 0x1f1   :  { %v3210_v58 = vmul.u32 3266489909, %v3018_v35  ;;  %v2254_v4 = vshrl.u32 %v2062_v14, 16  ;;  %v1641_v15 = vadd.s32 120, %v6574_v36  ;;  %v1642_v26 = vadd.s32 128, %v6574_v36 }
 0x1f2   :  { %v3211_v50 = vmul.u32 3266489909, %v3019_v13  ;;  %v3212_v55 = vmul.u32 3266489909, %v3020_v2  ;;  %v2255_v18 = vshrl.u32 %v2063_v0, 16  ;;  %v2445_v1 = vxor.u32 %v2253_v25, %v2061_v8 }
 0x1f3   :  { %v3402_v16 = vshrl.u32 %v3210_v58, 16  ;;  %v2446_v30 = vxor.u32 %v2254_v4, %v2062_v14  ;;  %v1775_v47 = vmul.u32 384, %v1641_v15  ;;  %v1320_v51 = vmul.f32 0.9, %v1112_v39 }
 0x1f4   :  { %v3403_v6 = vshrl.u32 %v3211_v50, 16  ;;  %v3404_v29 = vshrl.u32 %v3212_v55, 16  ;;  %v2447_v34 = vxor.u32 %v2255_v18, %v2063_v0  ;;  %v2637_v63 = vmul.u32 2246822507, %v2445_v1 }
 0x1f5   :  { %v3594_v28 = vxor.u32 %v3402_v16, %v3210_v58  ;;  %v2638_v31 = vmul.u32 2246822507, %v2446_v30  ;;  %v1869_v11 = vadd.s32 %v1775_v47, %v6576_v33  ;;  %v1870_v9 = vadd.s32 %v1775_v47, %v6595_v41 }
 0x1f6   :  { %v3595_v40 = vxor.u32 %v3403_v6, %v3211_v50  ;;  %v3596_v57 = vxor.u32 %v3404_v29, %v3212_v55  ;;  %v2639_v19 = vmul.u32 2246822507, %v2447_v34  ;;  %v2829_v53 = vshrl.u32 %v2637_v63, 13  ;;  %v8072_v29 = vld [vmem:[#allocation42_spill] sm:$0xff] }
 0x1f7   :  { %v3786_v52 = vshrl.u32 %v3594_v28, 8  ;;  %v2830_v61 = vshrl.u32 %v2638_v31, 13  ;;  %v1871_v38 = vadd.s32 %v1775_v47, %v6598_v46  ;;  %v2064_v8 = vxor.u32 %v6614_v12, %v1869_v11  ;;  %v8074_v28 = vld [vmem:[#allocation44_spill] sm:$0xff] }
 0x1f8   :  { %v3787_v21 = vshrl.u32 %v3595_v40, 8  ;;  %v3788_v35 = vshrl.u32 %v3596_v57, 8  ;;  %v2831_v7 = vshrl.u32 %v2639_v19, 13  ;;  %v3021_v14 = vxor.u32 %v2829_v53, %v2637_v63 }
 0x1f9   :  { %vm3978_vm7 = vcmp.ge.s32.totalorder %v3786_v52, 1677722  ;;  %v3022_v13 = vxor.u32 %v2830_v61, %v2638_v31  ;;  %v2065_v2 = vxor.u32 %v6614_v12, %v1870_v9  ;;  %v2066_v55 = vxor.u32 %v6614_v12, %v1871_v38 }
 0x1fa   :  { %vm3979_vm8 = vcmp.ge.s32.totalorder %v3787_v21, 1677722  ;;  %vm3980_vm9 = vcmp.ge.s32.totalorder %v3788_v35, 1677722  ;;  %v4170_v0 = vsel %vm3978_vm7, %v6996_v22, 0.0  ;;  %v3023_v58 = vxor.u32 %v2831_v7, %v2639_v19 }
 0x1fb   :  { %v4171_v25 = vsel %vm3979_vm8, %v6999_v43, 0.0  ;;  %v4172_v4 = vsel %vm3980_vm9, %v1474_v10, 0.0  ;;  %4362 = vst [vmem:[#allocation7 + $0x138] sm:$0xff] %v4170_v0  ;;  %v3213_v15 = vmul.u32 3266489909, %v3021_v14  ;;  %v2256_v18 = vshrl.u32 %v2064_v8, 16 }
 0x1fc   :  { %v3214_v39 = vmul.u32 3266489909, %v3022_v13  ;;  %4363 = vst [vmem:[#allocation7 + $0x140] sm:$0xff] %v4171_v25  ;;  %4364 = vst [vmem:[#allocation7 + $0x148] sm:$0xff] %v4172_v4  ;;  %v3215_v50 = vmul.u32 3266489909, %v3023_v58  ;;  %v4949_v1 = vpop.eup %4948  ;;  %4950 = vrcp.f32 %v1320_v51 }
 0x1fd   :  { %v2257_v16 = vshrl.u32 %v2065_v2, 16  ;;  %v3405_v30 = vshrl.u32 %v3213_v15, 16  ;;  %v1776_v6 = vmul.u32 384, %v1642_v26  ;;  %v1475_v34 = vmul.f32 %v4949_v1, %v8072_v29  ;;  %v8073_v43 = vld [vmem:[#allocation43_spill] sm:$0xff] }
 0x1fe   :  { %v3406_v47 = vshrl.u32 %v3214_v39, 16  ;;  %v3407_v22 = vshrl.u32 %v3215_v50, 16  ;;  %v1476_v10 = vmul.f32 %v4949_v1, %v8073_v43  ;;  %v1477_v63 = vmul.f32 %v4949_v1, %v8074_v28 }
 0x1ff   :  { %v3597_v31 = vxor.u32 %v3405_v30, %v3213_v15  ;;  %v2258_v40 = vshrl.u32 %v2066_v55, 16  ;;  %v2448_v57 = vxor.u32 %v2256_v18, %v2064_v8  ;;  %v2449_v9 = vxor.u32 %v2257_v16, %v2065_v2  ;;  %v1116_v2 = vpop.xlane.xlu0 %1115  ;;  %v1120_v30 = vpop.xlane.xlu1 %1119 }
 0x200   :  { %v3598_v11 = vxor.u32 %v3406_v47, %v3214_v39  ;;  %v3599_v19 = vxor.u32 %v3407_v22, %v3215_v50  ;;  %v1872_v52 = vadd.s32 %v1776_v6, %v6576_v33  ;;  %v1873_v53 = vadd.s32 %v1776_v6, %v6595_v41 }
 0x201   :  { %v3789_v61 = vshrl.u32 %v3597_v31, 8  ;;  %v2450_v26 = vxor.u32 %v2258_v40, %v2066_v55  ;;  %v2640_v38 = vmul.u32 2246822507, %v2448_v57  ;;  %v2641_v35 = vmul.u32 2246822507, %v2449_v9 }
 0x202   :  { %v3790_v51 = vshrl.u32 %v3598_v11, 8  ;;  %v3791_v21 = vshrl.u32 %v3599_v19, 8  ;;  %v1874_v7 = vadd.s32 %v1776_v6, %v6598_v46  ;;  %v2067_v14 = vxor.u32 %v6614_v12, %v1872_v52 }
 0x203   :  { %vm3981_vm10 = vcmp.ge.s32.totalorder %v3789_v61, 1677722  ;;  %v2642_v13 = vmul.u32 2246822507, %v2450_v26  ;;  %v2068_v8 = vxor.u32 %v6614_v12, %v1873_v53  ;;  %v2832_v25 = vshrl.u32 %v2640_v38, 13 }
 0x204   :  { %vm3982_vm11 = vcmp.ge.s32.totalorder %v3790_v51, 1677722  ;;  %vm3983_vm12 = vcmp.ge.s32.totalorder %v3791_v21, 1677722  ;;  %v4173_v0 = vsel %vm3981_vm10, %v1475_v34, 0.0  ;;  %v2833_v15 = vshrl.u32 %v2641_v35, 13 }
 0x205   :  { %v4174_v58 = vsel %vm3982_vm11, %v1476_v10, 0.0  ;;  %v4175_v4 = vsel %vm3983_vm12, %v1477_v63, 0.0  ;;  %4365 = vst [vmem:[#allocation7 + $0x150] sm:$0xff] %v4173_v0  ;;  %v2834_v39 = vshrl.u32 %v2642_v13, 13  ;;  %v2069_v50 = vxor.u32 %v6614_v12, %v1874_v7  ;;  %v8075_v51 = vld [vmem:[#allocation45_spill] sm:$0xff]  ;;  %v8077_v7 = vld [vmem:[#allocation47_spill] sm:$0xff] }
 0x206   :  { %4366 = vst [vmem:[#allocation7 + $0x158] sm:$0xff] %v4174_v58  ;;  %4367 = vst [vmem:[#allocation7 + $0x160] sm:$0xff] %v4175_v4  ;;  %v3024_v55 = vxor.u32 %v2832_v25, %v2640_v38  ;;  %v2259_v18 = vshrl.u32 %v2067_v14, 16  ;;  %v2260_v16 = vshrl.u32 %v2068_v8, 16  ;;  %v1321_v1 = vmul.f32 0.9, %v1116_v2 }
 0x207   :  { %v3025_v47 = vxor.u32 %v2833_v15, %v2641_v35  ;;  %v3026_v6 = vxor.u32 %v2834_v39, %v2642_v13  ;;  %v2261_v22 = vshrl.u32 %v2069_v50, 16  ;;  %v1643_v29 = vadd.s32 136, %v6574_v36  ;;  %v8076_v38 = vld [vmem:[#allocation46_spill] sm:$0xff] }
 0x208   :  { %v3216_v34 = vmul.u32 3266489909, %v3024_v55  ;;  %v2451_v43 = vxor.u32 %v2259_v18, %v2067_v14  ;;  %v2452_v10 = vxor.u32 %v2260_v16, %v2068_v8  ;;  %4952 = vrcp.f32 %v1321_v1 }
 0x209   :  { %v3217_v28 = vmul.u32 3266489909, %v3025_v47  ;;  %v3218_v63 = vmul.u32 3266489909, %v3026_v6  ;;  %v2453_v31 = vxor.u32 %v2261_v22, %v2069_v50  ;;  %v1322_v11 = vmul.f32 0.9, %v1120_v30  ;;  %v4951_v40 = vpop.eup %4950 }
 0x20a   :  { %v3408_v57 = vshrl.u32 %v3216_v34, 16  ;;  %v2643_v19 = vmul.u32 2246822507, %v2451_v43  ;;  %v2644_v9 = vmul.u32 2246822507, %v2452_v10  ;;  %v1644_v52 = vadd.s32 144, %v6574_v36 }
 0x20b   :  { %v3409_v53 = vshrl.u32 %v3217_v28, 16  ;;  %v3410_v61 = vshrl.u32 %v3218_v63, 16  ;;  %v1478_v26 = vmul.f32 %v4951_v40, %v8075_v51  ;;  %v1479_v21 = vmul.f32 %v4951_v40, %v8076_v38 }
 0x20c   :  { %v3600_v35 = vxor.u32 %v3408_v57, %v3216_v34  ;;  %v1480_v14 = vmul.f32 %v4951_v40, %v8077_v7  ;;  %v2645_v13 = vmul.u32 2246822507, %v2453_v31  ;;  %v2835_v8 = vshrl.u32 %v2643_v19, 13 }
 0x20d   :  { %v3601_v2 = vxor.u32 %v3409_v53, %v3217_v28  ;;  %v3602_v0 = vxor.u32 %v3410_v61, %v3218_v63  ;;  %v2836_v58 = vshrl.u32 %v2644_v9, 13  ;;  %v1777_v25 = vmul.u32 384, %v1643_v29  ;;  %v1124_v29 = vpop.xlane.xlu0 %1123 }
 0x20e   :  { %v3792_v4 = vshrl.u32 %v3600_v35, 8  ;;  %v2837_v15 = vshrl.u32 %v2645_v13, 13  ;;  %v3027_v39 = vxor.u32 %v2835_v8, %v2643_v19  ;;  %4954 = vrcp.f32 %v1322_v11  ;;  %v8079_v8 = vld [vmem:[#allocation49_spill] sm:$0xff] }
 0x20f   :  { %v3793_v50 = vshrl.u32 %v3601_v2, 8  ;;  %v3794_v55 = vshrl.u32 %v3602_v0, 8  ;;  %v3028_v18 = vxor.u32 %v2836_v58, %v2644_v9  ;;  %v1875_v16 = vadd.s32 %v1777_v25, %v6576_v33  ;;  %v8080_v58 = vld [vmem:[#allocation50_spill] sm:$0xff] }
 0x210   :  { %vm3984_vm13 = vcmp.ge.s32.totalorder %v3792_v4, 1677722  ;;  %v3029_v1 = vxor.u32 %v2837_v15, %v2645_v13  ;;  %v3219_v30 = vmul.u32 3266489909, %v3027_v39  ;;  %v1876_v47 = vadd.s32 %v1777_v25, %v6595_v41 }
 0x211   :  { %vm3985_vm14 = vcmp.ge.s32.totalorder %v3793_v50, 1677722  ;;  %vm3986_vm15 = vcmp.ge.s32.totalorder %v3794_v55, 1677722  ;;  %v4176_v6 = vsel %vm3984_vm13, %v1478_v26, 0.0  ;;  %v1877_v22 = vadd.s32 %v1777_v25, %v6598_v46 }
 0x212   :  { %v4177_v34 = vsel %vm3985_vm14, %v1479_v21, 0.0  ;;  %v4178_v43 = vsel %vm3986_vm15, %v1480_v14, 0.0  ;;  %4368 = vst [vmem:[#allocation7 + $0x168] sm:$0xff] %v4176_v6  ;;  %v3220_v10 = vmul.u32 3266489909, %v3028_v18  ;;  %v3411_v63 = vshrl.u32 %v3219_v30, 16 }
 0x213   :  { %v3221_v28 = vmul.u32 3266489909, %v3029_v1  ;;  %4369 = vst [vmem:[#allocation7 + $0x170] sm:$0xff] %v4177_v34  ;;  %4370 = vst [vmem:[#allocation7 + $0x178] sm:$0xff] %v4178_v43  ;;  %v2070_v31 = vxor.u32 %v6614_v12, %v1875_v16  ;;  %v2071_v11 = vxor.u32 %v6614_v12, %v1876_v47  ;;  %v2072_v40 = vxor.u32 %v6614_v12, %v1877_v22  ;;  %v8078_v14 = vld [vmem:[#allocation48_spill] sm:$0xff] }
 0x214   :  { %v3412_v57 = vshrl.u32 %v3220_v10, 16  ;;  %v1778_v9 = vmul.u32 384, %v1644_v52  ;;  %v1323_v53 = vmul.f32 0.9, %v1124_v29  ;;  %v3603_v51 = vxor.u32 %v3411_v63, %v3219_v30 }
 0x215   :  { %v3413_v19 = vshrl.u32 %v3221_v28, 16  ;;  %v4953_v61 = vpop.eup %4952  ;;  %v2262_v26 = vshrl.u32 %v2070_v31, 16  ;;  %v2263_v38 = vshrl.u32 %v2071_v11, 16  ;;  %v2264_v21 = vshrl.u32 %v2072_v40, 16 }
 0x216   :  { %v3604_v35 = vxor.u32 %v3412_v57, %v3220_v10  ;;  %v1481_v13 = vmul.f32 %v4953_v61, %v8078_v14  ;;  %v1482_v2 = vmul.f32 %v4953_v61, %v8079_v8  ;;  %v3795_v0 = vshrl.u32 %v3603_v51, 8 }
 0x217   :  { %v3605_v7 = vxor.u32 %v3413_v19, %v3221_v28  ;;  %v1483_v25 = vmul.f32 %v4953_v61, %v8080_v58  ;;  %v2454_v4 = vxor.u32 %v2262_v26, %v2070_v31  ;;  %v2455_v15 = vxor.u32 %v2263_v38, %v2071_v11  ;;  %v8081_v28 = vld [vmem:[#allocation51_spill] sm:$0xff]  ;;  %v8082_v31 = vld [vmem:[#allocation52_spill] sm:$0xff]  ;;  %v1128_v26 = vpop.xlane.xlu1 %1127 }
 0x218   :  { %v3796_v39 = vshrl.u32 %v3604_v35, 8  ;;  %v2456_v52 = vxor.u32 %v2264_v21, %v2072_v40  ;;  %v1878_v55 = vadd.s32 %v1778_v9, %v6576_v33  ;;  %vm3987_vm0 = vcmp.ge.s32.totalorder %v3795_v0, 1677722  ;;  %v8083_v40 = vld [vmem:[#allocation53_spill] sm:$0xff] }
 0x219   :  { %v3797_v50 = vshrl.u32 %v3605_v7, 8  ;;  %v2646_v18 = vmul.u32 2246822507, %v2454_v4  ;;  %v2647_v16 = vmul.u32 2246822507, %v2455_v15  ;;  %v1879_v1 = vadd.s32 %v1778_v9, %v6595_v41 }
 0x21a   :  { %vm3988_vm1 = vcmp.ge.s32.totalorder %v3796_v39, 1677722  ;;  %v4179_v30 = vsel %vm3987_vm0, %v1481_v13, 0.0  ;;  %v1880_v47 = vadd.s32 %v1778_v9, %v6598_v46  ;;  %v2648_v34 = vmul.u32 2246822507, %v2456_v52 }
 0x21b   :  { %vm3989_vm2 = vcmp.ge.s32.totalorder %v3797_v50, 1677722  ;;  %v4955_v6 = vpop.eup %4954  ;;  %v4180_v22 = vsel %vm3988_vm1, %v1482_v2, 0.0  ;;  %4371 = vst [vmem:[#allocation7 + $0x180] sm:$0xff] %v4179_v30  ;;  %v2838_v43 = vshrl.u32 %v2646_v18, 13  ;;  %v2839_v10 = vshrl.u32 %v2647_v16, 13 }
 0x21c   :  { %v4181_v29 = vsel %vm3989_vm2, %v1483_v25, 0.0  ;;  %4372 = vst [vmem:[#allocation7 + $0x188] sm:$0xff] %v4180_v22  ;;  %v1484_v63 = vmul.f32 %v4955_v6, %v8081_v28  ;;  %v1485_v11 = vmul.f32 %v4955_v6, %v8082_v31  ;;  %v1486_v57 = vmul.f32 %v4955_v6, %v8083_v40 }
 0x21d   :  { %4373 = vst [vmem:[#allocation7 + $0x190] sm:$0xff] %v4181_v29  ;;  %v2840_v19 = vshrl.u32 %v2648_v34, 13  ;;  %v3030_v61 = vxor.u32 %v2838_v43, %v2646_v18  ;;  %v2073_v51 = vxor.u32 %v6614_v12, %v1878_v55  ;;  %v2074_v9 = vxor.u32 %v6614_v12, %v1879_v1 }
 0x21e   :  { %v3031_v38 = vxor.u32 %v2839_v10, %v2647_v16  ;;  %v2075_v21 = vxor.u32 %v6614_v12, %v1880_v47  ;;  %4956 = vrcp.f32 %v1323_v53  ;;  %v1645_v35 = vadd.s32 152, %v6574_v36 }
 0x21f   :  { %v3032_v7 = vxor.u32 %v2840_v19, %v2648_v34  ;;  %v3222_v14 = vmul.u32 3266489909, %v3030_v61  ;;  %v2265_v13 = vshrl.u32 %v2073_v51, 16  ;;  %v2266_v8 = vshrl.u32 %v2074_v9, 16 }
 0x220   :  { %v3223_v2 = vmul.u32 3266489909, %v3031_v38  ;;  %v2267_v0 = vshrl.u32 %v2075_v21, 16  ;;  %v1779_v58 = vmul.u32 384, %v1645_v35  ;;  %v1324_v25 = vmul.f32 0.9, %v1128_v26 }
 0x221   :  { %v3224_v4 = vmul.u32 3266489909, %v3032_v7  ;;  %v3414_v15 = vshrl.u32 %v3222_v14, 16  ;;  %v2457_v39 = vxor.u32 %v2265_v13, %v2073_v51  ;;  %v2458_v50 = vxor.u32 %v2266_v8, %v2074_v9 }
 0x222   :  { %v3415_v52 = vshrl.u32 %v3223_v2, 16  ;;  %v2459_v55 = vxor.u32 %v2267_v0, %v2075_v21  ;;  %v1881_v18 = vadd.s32 %v1779_v58, %v6576_v33  ;;  %v1882_v53 = vadd.s32 %v1779_v58, %v6595_v41 }
 0x223   :  { %v3416_v16 = vshrl.u32 %v3224_v4, 16  ;;  %v3606_v1 = vxor.u32 %v3414_v15, %v3222_v14  ;;  %v2649_v30 = vmul.u32 2246822507, %v2457_v39  ;;  %v2650_v47 = vmul.u32 2246822507, %v2458_v50 }
 0x224   :  { %v3607_v6 = vxor.u32 %v3415_v52, %v3223_v2  ;;  %v2651_v22 = vmul.u32 2246822507, %v2459_v55  ;;  %v1883_v29 = vadd.s32 %v1779_v58, %v6598_v46  ;;  %v2076_v34 = vxor.u32 %v6614_v12, %v1881_v18  ;;  %v8084_v18 = vld [vmem:[#allocation54_spill] sm:$0xff] }
 0x225   :  { %v3608_v43 = vxor.u32 %v3416_v16, %v3224_v4  ;;  %v3798_v10 = vshrl.u32 %v3606_v1, 8  ;;  %v2841_v28 = vshrl.u32 %v2649_v30, 13  ;;  %v2842_v31 = vshrl.u32 %v2650_v47, 13  ;;  %v8085_v16 = vld [vmem:[#allocation55_spill] sm:$0xff]  ;;  %v1132_v1 = vpop.xlane.xlu0 %1131 }
 0x226   :  { %v3799_v40 = vshrl.u32 %v3607_v6, 8  ;;  %v2843_v19 = vshrl.u32 %v2651_v22, 13  ;;  %v2077_v61 = vxor.u32 %v6614_v12, %v1882_v53  ;;  %v2078_v51 = vxor.u32 %v6614_v12, %v1883_v29 }
 0x227   :  { %v3800_v9 = vshrl.u32 %v3608_v43, 8  ;;  %vm3990_vm3 = vcmp.ge.s32.totalorder %v3798_v10, 1677722  ;;  %v3033_v26 = vxor.u32 %v2841_v28, %v2649_v30  ;;  %v3034_v38 = vxor.u32 %v2842_v31, %v2650_v47  ;;  %v8086_v47 = vld [vmem:[#allocation56_spill] sm:$0xff] }
 0x228   :  { %vm3991_vm4 = vcmp.ge.s32.totalorder %v3799_v40, 1677722  ;;  %v4182_v21 = vsel %vm3990_vm3, %v1484_v63, 0.0  ;;  %v3035_v35 = vxor.u32 %v2843_v19, %v2651_v22  ;;  %v2268_v7 = vshrl.u32 %v2076_v34, 16 }
 0x229   :  { %vm3992_vm5 = vcmp.ge.s32.totalorder %v3800_v9, 1677722  ;;  %v4183_v14 = vsel %vm3991_vm4, %v1485_v11, 0.0  ;;  %4374 = vst [vmem:[#allocation7 + $0x198] sm:$0xff] %v4182_v21  ;;  %v3225_v13 = vmul.u32 3266489909, %v3033_v26  ;;  %4958 = vrcp.f32 %v1324_v25 }
 0x22a   :  { %v2269_v8 = vshrl.u32 %v2077_v61, 16  ;;  %v4184_v2 = vsel %vm3992_vm5, %v1486_v57, 0.0  ;;  %4375 = vst [vmem:[#allocation7 + $0x1a0] sm:$0xff] %v4183_v14  ;;  %v3226_v0 = vmul.u32 3266489909, %v3034_v38  ;;  %v2270_v4 = vshrl.u32 %v2078_v51, 16 }
 0x22b   :  { %v3227_v58 = vmul.u32 3266489909, %v3035_v35  ;;  %v4957_v15 = vpop.eup %4956  ;;  %4376 = vst [vmem:[#allocation7 + $0x1a8] sm:$0xff] %v4184_v2  ;;  %v3417_v39 = vshrl.u32 %v3225_v13, 16  ;;  %v2460_v50 = vxor.u32 %v2268_v7, %v2076_v34  ;;  %v1646_v28 = vadd.s32 160, %v6574_v36  ;;  %v1136_v7 = vpop.xlane.xlu1 %1135 }
 0x22c   :  { %v2461_v52 = vxor.u32 %v2269_v8, %v2077_v61  ;;  %v3418_v55 = vshrl.u32 %v3226_v0, 16  ;;  %v1487_v53 = vmul.f32 %v4957_v15, %v8084_v18  ;;  %v1488_v11 = vmul.f32 %v4957_v15, %v8085_v16 }
 0x22d   :  { %v3419_v63 = vshrl.u32 %v3227_v58, 16  ;;  %v3609_v30 = vxor.u32 %v3417_v39, %v3225_v13  ;;  %v1489_v57 = vmul.f32 %v4957_v15, %v8086_v47  ;;  %v2462_v6 = vxor.u32 %v2270_v4, %v2078_v51 }
 0x22e   :  { %v2652_v22 = vmul.u32 2246822507, %v2460_v50  ;;  %v3610_v29 = vxor.u32 %v3418_v55, %v3226_v0  ;;  %v2653_v10 = vmul.u32 2246822507, %v2461_v52  ;;  %v1325_v40 = vmul.f32 0.9, %v1132_v1 }
 0x22f   :  { %v3611_v43 = vxor.u32 %v3419_v63, %v3227_v58  ;;  %v3801_v34 = vshrl.u32 %v3609_v30, 8  ;;  %v2654_v31 = vmul.u32 2246822507, %v2462_v6  ;;  %v1780_v26 = vmul.u32 384, %v1646_v28  ;;  %v8087_v28 = vld [vmem:[#allocation57_spill] sm:$0xff] }
 0x230   :  { %v2844_v25 = vshrl.u32 %v2652_v22, 13  ;;  %v3802_v19 = vshrl.u32 %v3610_v29, 8  ;;  %v2845_v9 = vshrl.u32 %v2653_v10, 13  ;;  %4960 = vrcp.f32 %v1325_v40 }
 0x231   :  { %v3803_v61 = vshrl.u32 %v3611_v43, 8  ;;  %vm3993_vm6 = vcmp.ge.s32.totalorder %v3801_v34, 1677722  ;;  %v2846_v38 = vshrl.u32 %v2654_v31, 13  ;;  %v1884_v58 = vadd.s32 %v1780_v26, %v6576_v33 }
 0x232   :  { %v3036_v21 = vxor.u32 %v2844_v25, %v2652_v22  ;;  %vm3994_vm7 = vcmp.ge.s32.totalorder %v3802_v19, 1677722  ;;  %v4185_v51 = vsel %vm3993_vm6, %v1487_v53, 0.0  ;;  %v3037_v35 = vxor.u32 %v2845_v9, %v2653_v10  ;;  %v8089_v19 = vld [vmem:[#allocation59_spill] sm:$0xff] }
 0x233   :  { %vm3995_vm8 = vcmp.ge.s32.totalorder %v3803_v61, 1677722  ;;  %v4186_v14 = vsel %vm3994_vm7, %v1488_v11, 0.0  ;;  %4377 = vst [vmem:[#allocation7 + $0x1b0] sm:$0xff] %v4185_v51  ;;  %v3038_v8 = vxor.u32 %v2846_v38, %v2654_v31  ;;  %v1885_v4 = vadd.s32 %v1780_v26, %v6595_v41  ;;  %v8088_v31 = vld [vmem:[#allocation58_spill] sm:$0xff] }
 0x234   :  { %v4187_v13 = vsel %vm3995_vm8, %v1489_v57, 0.0  ;;  %v3228_v2 = vmul.u32 3266489909, %v3036_v21  ;;  %4378 = vst [vmem:[#allocation7 + $0x1b8] sm:$0xff] %v4186_v14  ;;  %v3229_v0 = vmul.u32 3266489909, %v3037_v35  ;;  %v1886_v15 = vadd.s32 %v1780_v26, %v6598_v46 }
 0x235   :  { %4379 = vst [vmem:[#allocation7 + $0x1c0] sm:$0xff] %v4187_v13  ;;  %v3230_v39 = vmul.u32 3266489909, %v3038_v8  ;;  %v1647_v52 = vadd.s32 168, %v6574_v36  ;;  %v1326_v55 = vmul.f32 0.9, %v1136_v7  ;;  %v2079_v18 = vxor.u32 %v6614_v12, %v1884_v58 }
 0x236   :  { %v3420_v50 = vshrl.u32 %v3228_v2, 16  ;;  %v3421_v63 = vshrl.u32 %v3229_v0, 16  ;;  %v2080_v53 = vxor.u32 %v6614_v12, %v1885_v4  ;;  %v2081_v16 = vxor.u32 %v6614_v12, %v1886_v15  ;;  %v4959_v47 = vpop.eup %4958 }
 0x237   :  { %v3422_v11 = vshrl.u32 %v3230_v39, 16  ;;  %v1781_v30 = vmul.u32 384, %v1647_v52  ;;  %4962 = vrcp.f32 %v1326_v55  ;;  %v2271_v6 = vshrl.u32 %v2079_v18, 16  ;;  %v8090_v55 = vld [vmem:[#allocation60_spill] sm:$0xff] }
 0x238   :  { %v3612_v1 = vxor.u32 %v3420_v50, %v3228_v2  ;;  %v3613_v57 = vxor.u32 %v3421_v63, %v3229_v0  ;;  %v2272_v22 = vshrl.u32 %v2080_v53, 16  ;;  %v2273_v29 = vshrl.u32 %v2081_v16, 16  ;;  %v1140_v50 = vpop.xlane.xlu0 %1139 }
 0x239   :  { %v3614_v43 = vxor.u32 %v3422_v11, %v3230_v39  ;;  %v1490_v34 = vmul.f32 %v4959_v47, %v8087_v28  ;;  %v1491_v25 = vmul.f32 %v4959_v47, %v8088_v31  ;;  %v1492_v61 = vmul.f32 %v4959_v47, %v8089_v19 }
 0x23a   :  { %v3804_v10 = vshrl.u32 %v3612_v1, 8  ;;  %v3805_v40 = vshrl.u32 %v3613_v57, 8  ;;  %v2463_v9 = vxor.u32 %v2271_v6, %v2079_v18  ;;  %v2464_v26 = vxor.u32 %v2272_v22, %v2080_v53  ;;  %v8091_v18 = vld [vmem:[#allocation61_spill] sm:$0xff] }
 0x23b   :  { %v3806_v38 = vshrl.u32 %v3614_v43, 8  ;;  %v2465_v21 = vxor.u32 %v2273_v29, %v2081_v16  ;;  %v1887_v51 = vadd.s32 %v1781_v30, %v6576_v33  ;;  %v1888_v14 = vadd.s32 %v1781_v30, %v6595_v41  ;;  %v8092_v16 = vld [vmem:[#allocation62_spill] sm:$0xff] }
 0x23c   :  { %vm3996_vm9 = vcmp.ge.s32.totalorder %v3804_v10, 1677722  ;;  %vm3997_vm10 = vcmp.ge.s32.totalorder %v3805_v40, 1677722  ;;  %v2655_v7 = vmul.u32 2246822507, %v2463_v9  ;;  %v1889_v2 = vadd.s32 %v1781_v30, %v6598_v46 }
 0x23d   :  { %v4188_v35 = vsel %vm3996_vm9, %v1490_v34, 0.0  ;;  %vm3998_vm11 = vcmp.ge.s32.totalorder %v3806_v38, 1677722  ;;  %v4189_v13 = vsel %vm3997_vm10, %v1491_v25, 0.0  ;;  %v2656_v8 = vmul.u32 2246822507, %v2464_v26  ;;  %v4961_v0 = vpop.eup %4960 }
 0x23e   :  { %4380 = vst [vmem:[#allocation7 + $0x1c8] sm:$0xff] %v4188_v35  ;;  %v4190_v58 = vsel %vm3998_vm11, %v1492_v61, 0.0  ;;  %4381 = vst [vmem:[#allocation7 + $0x1d0] sm:$0xff] %v4189_v13  ;;  %v2657_v4 = vmul.u32 2246822507, %v2465_v21  ;;  %v2847_v15 = vshrl.u32 %v2655_v7, 13  ;;  %v2082_v39 = vxor.u32 %v6614_v12, %v1887_v51 }
 0x23f   :  { %4382 = vst [vmem:[#allocation7 + $0x1d8] sm:$0xff] %v4190_v58  ;;  %v2848_v52 = vshrl.u32 %v2656_v8, 13  ;;  %v1493_v63 = vmul.f32 %v4961_v0, %v8090_v55  ;;  %v1494_v53 = vmul.f32 %v4961_v0, %v8091_v18  ;;  %v1495_v11 = vmul.f32 %v4961_v0, %v8092_v16  ;;  %v8094_v13 = vld [vmem:[#allocation64_spill] sm:$0xff] }
 0x240   :  { %v2849_v1 = vshrl.u32 %v2657_v4, 13  ;;  %v3039_v47 = vxor.u32 %v2847_v15, %v2655_v7  ;;  %v2083_v30 = vxor.u32 %v6614_v12, %v1888_v14  ;;  %v2084_v57 = vxor.u32 %v6614_v12, %v1889_v2  ;;  %v8093_v7 = vld [vmem:[#allocation63_spill] sm:$0xff] }
 0x241   :  { %v3040_v6 = vxor.u32 %v2848_v52, %v2656_v8  ;;  %v2274_v22 = vshrl.u32 %v2082_v39, 16  ;;  %v1648_v29 = vadd.s32 176, %v6574_v36  ;;  %v1327_v43 = vmul.f32 0.9, %v1140_v50  ;;  %v8095_v50 = vld [vmem:[#allocation65_spill] sm:$0xff] }
 0x242   :  { %v3041_v10 = vxor.u32 %v2849_v1, %v2657_v4  ;;  %v3231_v28 = vmul.u32 3266489909, %v3039_v47  ;;  %v2275_v34 = vshrl.u32 %v2083_v30, 16  ;;  %v2276_v31 = vshrl.u32 %v2084_v57, 16 }
 0x243   :  { %v3232_v25 = vmul.u32 3266489909, %v3040_v6  ;;  %v2466_v40 = vxor.u32 %v2274_v22, %v2082_v39  ;;  %v1782_v19 = vmul.u32 384, %v1648_v29  ;;  %4964 = vrcp.f32 %v1327_v43 }
 0x244   :  { %v4963_v61 = vpop.eup %4962  ;;  %v3233_v9 = vmul.u32 3266489909, %v3041_v10  ;;  %v3423_v26 = vshrl.u32 %v3231_v28, 16  ;;  %v2467_v38 = vxor.u32 %v2275_v34, %v2083_v30  ;;  %v2468_v21 = vxor.u32 %v2276_v31, %v2084_v57 }
 0x245   :  { %v3424_v51 = vshrl.u32 %v3232_v25, 16  ;;  %v2658_v35 = vmul.u32 2246822507, %v2466_v40  ;;  %v7081_v14 = vmul.f32 %v4963_v61, %v8093_v7  ;;  %v7084_v8 = vmul.f32 %v4963_v61, %v8094_v13 }
 0x246   :  { %v3425_v2 = vshrl.u32 %v3233_v9, 16  ;;  %v3615_v0 = vxor.u32 %v3423_v26, %v3231_v28  ;;  %v2659_v58 = vmul.u32 2246822507, %v2467_v38  ;;  %v2660_v4 = vmul.u32 2246822507, %v2468_v21 }
 0x247   :  { %v3616_v15 = vxor.u32 %v3424_v51, %v3232_v25  ;;  %v2850_v39 = vshrl.u32 %v2658_v35, 13  ;;  %v7087_v52 = vmul.f32 %v4963_v61, %v8095_v50  ;;  %v1890_v55 = vadd.s32 %v1782_v19, %v6576_v33 }
 0x248   :  { %v3617_v18 = vxor.u32 %v3425_v2, %v3233_v9  ;;  %v3807_v16 = vshrl.u32 %v3615_v0, 8  ;;  %v2851_v1 = vshrl.u32 %v2659_v58, 13  ;;  %v2852_v47 = vshrl.u32 %v2660_v4, 13  ;;  %v1144_v9 = vpop.xlane.xlu1 %1143 }
 0x249   :  { %v3808_v30 = vshrl.u32 %v3616_v15, 8  ;;  %v3042_v57 = vxor.u32 %v2850_v39, %v2658_v35  ;;  %v1891_v6 = vadd.s32 %v1782_v19, %v6595_v41  ;;  %v1892_v22 = vadd.s32 %v1782_v19, %v6598_v46 }
 0x24a   :  { %v3809_v29 = vshrl.u32 %v3617_v18, 8  ;;  %vm3999_vm12 = vcmp.ge.s32.totalorder %v3807_v16, 1677722  ;;  %v3043_v43 = vxor.u32 %v2851_v1, %v2659_v58  ;;  %v3044_v10 = vxor.u32 %v2852_v47, %v2660_v4  ;;  %v8096_v16 = vld [vmem:[#allocation66_spill] sm:$0xff] }
 0x24b   :  { %vm4000_vm13 = vcmp.ge.s32.totalorder %v3808_v30, 1677722  ;;  %v4191_v28 = vsel %vm3999_vm12, %v1493_v63, 0.0  ;;  %v3234_v34 = vmul.u32 3266489909, %v3042_v57  ;;  %v2085_v31 = vxor.u32 %v6614_v12, %v1890_v55 }
 0x24c   :  { %vm4001_vm14 = vcmp.ge.s32.totalorder %v3809_v29, 1677722  ;;  %v4192_v25 = vsel %vm4000_vm13, %v1494_v53, 0.0  ;;  %4383 = vst [vmem:[#allocation7 + $0x1e0] sm:$0xff] %v4191_v28  ;;  %v3235_v40 = vmul.u32 3266489909, %v3043_v43  ;;  %v2086_v61 = vxor.u32 %v6614_v12, %v1891_v6 }
 0x24d   :  { %v4193_v26 = vsel %vm4001_vm14, %v1495_v11, 0.0  ;;  %4384 = vst [vmem:[#allocation7 + $0x1e8] sm:$0xff] %v4192_v25  ;;  %v3236_v38 = vmul.u32 3266489909, %v3044_v10  ;;  %v3426_v19 = vshrl.u32 %v3234_v34, 16  ;;  %v2087_v21 = vxor.u32 %v6614_v12, %v1892_v22  ;;  %v8097_v6 = vld [vmem:[#allocation67_spill] sm:$0xff] }
 0x24e   :  { %4385 = vst [vmem:[#allocation7 + $0x1f0] sm:$0xff] %v4193_v26  ;;  %v3427_v51 = vshrl.u32 %v3235_v40, 16  ;;  %v2277_v35 = vshrl.u32 %v2085_v31, 16  ;;  %v2278_v63 = vshrl.u32 %v2086_v61, 16  ;;  %v1649_v7 = vadd.s32 184, %v6574_v36  ;;  %v8098_v10 = vld [vmem:[#allocation68_spill] sm:$0xff] }
 0x24f   :  { %v3428_v13 = vshrl.u32 %v3236_v38, 16  ;;  %v3618_v2 = vxor.u32 %v3426_v19, %v3234_v34  ;;  %v2279_v53 = vshrl.u32 %v2087_v21, 16  ;;  %v1328_v0 = vmul.f32 0.9, %v1144_v9 }
 0x250   :  { %v4965_v58 = vpop.eup %4964  ;;  %v3619_v4 = vxor.u32 %v3427_v51, %v3235_v40  ;;  %v2469_v15 = vxor.u32 %v2277_v35, %v2085_v31  ;;  %v2470_v39 = vxor.u32 %v2278_v63, %v2086_v61  ;;  %v1783_v11 = vmul.u32 384, %v1649_v7  ;;  %v1148_v51 = vpop.xlane.xlu0 %1147 }
 0x251   :  { %v3620_v50 = vxor.u32 %v3428_v13, %v3236_v38  ;;  %v3810_v55 = vshrl.u32 %v3618_v2, 8  ;;  %v2471_v18 = vxor.u32 %v2279_v53, %v2087_v21  ;;  %v7097_v1 = vmul.f32 %v4965_v58, %v8096_v16 }
 0x252   :  { %v3811_v47 = vshrl.u32 %v3619_v4, 8  ;;  %v2661_v30 = vmul.u32 2246822507, %v2469_v15  ;;  %v2662_v57 = vmul.u32 2246822507, %v2470_v39  ;;  %v7100_v22 = vmul.f32 %v4965_v58, %v8097_v6 }
 0x253   :  { %v3812_v29 = vshrl.u32 %v3620_v50, 8  ;;  %vm4002_vm15 = vcmp.ge.s32.totalorder %v3810_v55, 1677722  ;;  %v2663_v43 = vmul.u32 2246822507, %v2471_v18  ;;  %v7103_v28 = vmul.f32 %v4965_v58, %v8098_v10 }
 0x254   :  { %vm4003_vm0 = vcmp.ge.s32.totalorder %v3811_v47, 1677722  ;;  %v4194_v34 = vsel %vm4002_vm15, %v7081_v14, 0.0  ;;  %v2853_v31 = vshrl.u32 %v2661_v30, 13  ;;  %v2854_v25 = vshrl.u32 %v2662_v57, 13 }
 0x255   :  { %vm4004_vm1 = vcmp.ge.s32.totalorder %v3812_v29, 1677722  ;;  %v4195_v40 = vsel %vm4003_vm0, %v7084_v8, 0.0  ;;  %4386 = vst [vmem:[#allocation7 + $0x1f8] sm:$0xff] %v4194_v34  ;;  %v2855_v61 = vshrl.u32 %v2663_v43, 13  ;;  %v1893_v9 = vadd.s32 %v1783_v11, %v6576_v33 }
 0x256   :  { %v4196_v26 = vsel %vm4004_vm1, %v7087_v52, 0.0  ;;  %4387 = vst [vmem:[#allocation7 + $0x200] sm:$0xff] %v4195_v40  ;;  %v3045_v38 = vxor.u32 %v2853_v31, %v2661_v30  ;;  %v3046_v19 = vxor.u32 %v2854_v25, %v2662_v57  ;;  %v1894_v21 = vadd.s32 %v1783_v11, %v6595_v41 }
 0x257   :  { %4388 = vst [vmem:[#allocation7 + $0x208] sm:$0xff] %v4196_v26  ;;  %v3047_v35 = vxor.u32 %v2855_v61, %v2663_v43  ;;  %v1895_v14 = vadd.s32 %v1783_v11, %v6598_v46  ;;  %v2088_v63 = vxor.u32 %v6614_v12, %v1893_v9  ;;  %4966 = vrcp.f32 %v1328_v0 }
 0x258   :  { %v3237_v8 = vmul.u32 3266489909, %v3045_v38  ;;  %v3238_v7 = vmul.u32 3266489909, %v3046_v19  ;;  %v2089_v13 = vxor.u32 %v6614_v12, %v1894_v21  ;;  %v1650_v2 = vadd.s32 192, %v6574_v36 }
 0x259   :  { %v3239_v52 = vmul.u32 3266489909, %v3047_v35  ;;  %v2090_v53 = vxor.u32 %v6614_v12, %v1895_v14  ;;  %v2280_v58 = vshrl.u32 %v2088_v63, 16  ;;  %v1329_v4 = vmul.f32 0.9, %v1148_v51 }
 0x25a   :  { %v3429_v15 = vshrl.u32 %v3237_v8, 16  ;;  %v3430_v39 = vshrl.u32 %v3238_v7, 16  ;;  %v2281_v50 = vshrl.u32 %v2089_v13, 16  ;;  %v1784_v55 = vmul.u32 384, %v1650_v2 }
 0x25b   :  { %v3431_v18 = vshrl.u32 %v3239_v52, 16  ;;  %v2282_v11 = vshrl.u32 %v2090_v53, 16  ;;  %v2472_v16 = vxor.u32 %v2280_v58, %v2088_v63  ;;  %4968 = vrcp.f32 %v1329_v4 }
 0x25c   :  { %v3621_v0 = vxor.u32 %v3429_v15, %v3237_v8  ;;  %v3622_v47 = vxor.u32 %v3430_v39, %v3238_v7  ;;  %v2473_v30 = vxor.u32 %v2281_v50, %v2089_v13  ;;  %v1896_v57 = vadd.s32 %v1784_v55, %v6576_v33 }
 0x25d   :  { %v3623_v6 = vxor.u32 %v3431_v18, %v3239_v52  ;;  %v2474_v29 = vxor.u32 %v2282_v11, %v2090_v53  ;;  %v2664_v43 = vmul.u32 2246822507, %v2472_v16  ;;  %v1897_v10 = vadd.s32 %v1784_v55, %v6595_v41  ;;  %v8100_v11 = vld [vmem:[#allocation70_spill] sm:$0xff] }
 0x25e   :  { %v3813_v34 = vshrl.u32 %v3621_v0, 8  ;;  %v3814_v31 = vshrl.u32 %v3622_v47, 8  ;;  %v2665_v25 = vmul.u32 2246822507, %v2473_v30  ;;  %v1898_v40 = vadd.s32 %v1784_v55, %v6598_v46  ;;  %v8099_v55 = vld [vmem:[#allocation69_spill] sm:$0xff]  ;;  %v8101_v0 = vld [vmem:[#allocation71_spill] sm:$0xff] }
 0x25f   :  { %v3815_v61 = vshrl.u32 %v3623_v6, 8  ;;  %v2666_v9 = vmul.u32 2246822507, %v2474_v29  ;;  %v2856_v26 = vshrl.u32 %v2664_v43, 13  ;;  %v2091_v38 = vxor.u32 %v6614_v12, %v1896_v57 }
 0x260   :  { %vm4005_vm2 = vcmp.ge.s32.totalorder %v3813_v34, 1677722  ;;  %vm4006_vm3 = vcmp.ge.s32.totalorder %v3814_v31, 1677722  ;;  %v2857_v19 = vshrl.u32 %v2665_v25, 13  ;;  %v2092_v21 = vxor.u32 %v6614_v12, %v1897_v10 }
 0x261   :  { %vm4007_vm4 = vcmp.ge.s32.totalorder %v3815_v61, 1677722  ;;  %v4197_v51 = vsel %vm4005_vm2, %v7097_v1, 0.0  ;;  %v4198_v35 = vsel %vm4006_vm3, %v7100_v22, 0.0  ;;  %v2858_v14 = vshrl.u32 %v2666_v9, 13  ;;  %v1152_v22 = vpop.xlane.xlu1 %1151 }
 0x262   :  { %v4199_v63 = vsel %vm4007_vm4, %v7103_v28, 0.0  ;;  %4389 = vst [vmem:[#allocation7 + $0x210] sm:$0xff] %v4197_v51  ;;  %4390 = vst [vmem:[#allocation7 + $0x218] sm:$0xff] %v4198_v35  ;;  %v3048_v8 = vxor.u32 %v2856_v26, %v2664_v43  ;;  %v3049_v7 = vxor.u32 %v2857_v19, %v2665_v25  ;;  %v2093_v13 = vxor.u32 %v6614_v12, %v1898_v40  ;;  %v8102_v35 = vld [vmem:[#allocation72_spill] sm:$0xff] }
 0x263   :  { %4391 = vst [vmem:[#allocation7 + $0x220] sm:$0xff] %v4199_v63  ;;  %v3050_v2 = vxor.u32 %v2858_v14, %v2666_v9  ;;  %v2283_v52 = vshrl.u32 %v2091_v38, 16  ;;  %v2284_v53 = vshrl.u32 %v2092_v21, 16  ;;  %v1651_v58 = vadd.s32 200, %v6574_v36  ;;  %v8103_v63 = vld [vmem:[#allocation73_spill] sm:$0xff] }
 0x264   :  { %v4967_v4 = vpop.eup %4966  ;;  %v3240_v15 = vmul.u32 3266489909, %v3048_v8  ;;  %v3241_v1 = vmul.u32 3266489909, %v3049_v7  ;;  %v2285_v39 = vshrl.u32 %v2093_v13, 16  ;;  %v1652_v50 = vadd.s32 208, %v6574_v36 }
 0x265   :  { %v3242_v28 = vmul.u32 3266489909, %v3050_v2  ;;  %v1502_v18 = vmul.f32 %v4967_v4, %v8099_v55  ;;  %v1503_v16 = vmul.f32 %v4967_v4, %v8100_v11  ;;  %v1504_v47 = vmul.f32 %v4967_v4, %v8101_v0 }
 0x266   :  { %v3432_v30 = vshrl.u32 %v3240_v15, 16  ;;  %v3433_v57 = vshrl.u32 %v3241_v1, 16  ;;  %v2475_v6 = vxor.u32 %v2283_v52, %v2091_v38  ;;  %v2476_v29 = vxor.u32 %v2284_v53, %v2092_v21  ;;  %v8104_v53 = vld [vmem:[#allocation74_spill] sm:$0xff] }
 0x267   :  { %v3434_v43 = vshrl.u32 %v3242_v28, 16  ;;  %v2477_v10 = vxor.u32 %v2285_v39, %v2093_v13  ;;  %v1785_v34 = vmul.u32 384, %v1651_v58  ;;  %v1330_v31 = vmul.f32 0.9, %v1152_v22 }
 0x268   :  { %v4969_v25 = vpop.eup %4968  ;;  %v3624_v40 = vxor.u32 %v3432_v30, %v3240_v15  ;;  %v3625_v61 = vxor.u32 %v3433_v57, %v3241_v1  ;;  %v2667_v9 = vmul.u32 2246822507, %v2475_v6  ;;  %v2668_v26 = vmul.u32 2246822507, %v2476_v29  ;;  %v1156_v57 = vpop.xlane.xlu0 %1155 }
 0x269   :  { %v3626_v19 = vxor.u32 %v3434_v43, %v3242_v28  ;;  %v2669_v51 = vmul.u32 2246822507, %v2477_v10  ;;  %v7130_v14 = vmul.f32 %v4969_v25, %v8102_v35  ;;  %v7133_v8 = vmul.f32 %v4969_v25, %v8103_v63 }
 0x26a   :  { %v3816_v7 = vshrl.u32 %v3624_v40, 8  ;;  %v3817_v38 = vshrl.u32 %v3625_v61, 8  ;;  %v2859_v21 = vshrl.u32 %v2667_v9, 13  ;;  %v2860_v2 = vshrl.u32 %v2668_v26, 13 }
 0x26b   :  { %v3818_v13 = vshrl.u32 %v3626_v19, 8  ;;  %v2861_v52 = vshrl.u32 %v2669_v51, 13  ;;  %v1507_v58 = vmul.f32 %v4969_v25, %v8104_v53  ;;  %v1899_v4 = vadd.s32 %v1785_v34, %v6576_v33 }
 0x26c   :  { %vm4008_vm5 = vcmp.ge.s32.totalorder %v3816_v7, 1677722  ;;  %vm4009_vm6 = vcmp.ge.s32.totalorder %v3817_v38, 1677722  ;;  %v3051_v15 = vxor.u32 %v2859_v21, %v2667_v9  ;;  %v3052_v1 = vxor.u32 %v2860_v2, %v2668_v26 }
 0x26d   :  { %vm4010_vm7 = vcmp.ge.s32.totalorder %v3818_v13, 1677722  ;;  %v4200_v39 = vsel %vm4008_vm5, %v1502_v18, 0.0  ;;  %v4201_v22 = vsel %vm4009_vm6, %v1503_v16, 0.0  ;;  %v3053_v28 = vxor.u32 %v2861_v52, %v2669_v51 }
 0x26e   :  { %v4202_v55 = vsel %vm4010_vm7, %v1504_v47, 0.0  ;;  %4392 = vst [vmem:[#allocation7 + $0x228] sm:$0xff] %v4200_v39  ;;  %4393 = vst [vmem:[#allocation7 + $0x230] sm:$0xff] %v4201_v22  ;;  %v3243_v11 = vmul.u32 3266489909, %v3051_v15  ;;  %v1900_v30 = vadd.s32 %v1785_v34, %v6595_v41  ;;  %v1901_v29 = vadd.s32 %v1785_v34, %v6598_v46 }
 0x26f   :  { %v3244_v0 = vmul.u32 3266489909, %v3052_v1  ;;  %4394 = vst [vmem:[#allocation7 + $0x238] sm:$0xff] %v4202_v55  ;;  %v3245_v6 = vmul.u32 3266489909, %v3053_v28  ;;  %v2094_v43 = vxor.u32 %v6614_v12, %v1899_v4  ;;  %4970 = vrcp.f32 %v1330_v31 }
 0x270   :  { %v3435_v10 = vshrl.u32 %v3243_v11, 16  ;;  %v2095_v18 = vxor.u32 %v6614_v12, %v1900_v30  ;;  %v1786_v16 = vmul.u32 384, %v1652_v50  ;;  %v2096_v40 = vxor.u32 %v6614_v12, %v1901_v29 }
 0x271   :  { %v3436_v25 = vshrl.u32 %v3244_v0, 16  ;;  %v3437_v47 = vshrl.u32 %v3245_v6, 16  ;;  %v2286_v61 = vshrl.u32 %v2094_v43, 16  ;;  %v1331_v9 = vmul.f32 0.9, %v1156_v57  ;;  %v1160_v57 = vpop.xlane.xlu1 %1159 }
 0x272   :  { %v3627_v26 = vxor.u32 %v3435_v10, %v3243_v11  ;;  %v2287_v51 = vshrl.u32 %v2095_v18, 16  ;;  %v1902_v35 = vadd.s32 %v1786_v16, %v6576_v33  ;;  %v2288_v34 = vshrl.u32 %v2096_v40, 16 }
 0x273   :  { %v3628_v19 = vxor.u32 %v3436_v25, %v3244_v0  ;;  %v3629_v63 = vxor.u32 %v3437_v47, %v3245_v6  ;;  %v2478_v7 = vxor.u32 %v2286_v61, %v2094_v43  ;;  %v1903_v31 = vadd.s32 %v1786_v16, %v6595_v41 }
 0x274   :  { %v3819_v38 = vshrl.u32 %v3627_v26, 8  ;;  %v2479_v2 = vxor.u32 %v2287_v51, %v2095_v18  ;;  %v1904_v50 = vadd.s32 %v1786_v16, %v6598_v46  ;;  %v2480_v52 = vxor.u32 %v2288_v34, %v2096_v40 }
 0x275   :  { %v3820_v21 = vshrl.u32 %v3628_v19, 8  ;;  %v3821_v13 = vshrl.u32 %v3629_v63, 8  ;;  %v2670_v53 = vmul.u32 2246822507, %v2478_v7  ;;  %v2097_v4 = vxor.u32 %v6614_v12, %v1902_v35  ;;  %v8105_v63 = vld [vmem:[#allocation75_spill] sm:$0xff]  ;;  %v8106_v7 = vld [vmem:[#allocation76_spill] sm:$0xff] }
 0x276   :  { %vm4011_vm8 = vcmp.ge.s32.totalorder %v3819_v38, 1677722  ;;  %v2671_v15 = vmul.u32 2246822507, %v2479_v2  ;;  %v2098_v1 = vxor.u32 %v6614_v12, %v1903_v31  ;;  %v2672_v28 = vmul.u32 2246822507, %v2480_v52 }
 0x277   :  { %vm4012_vm9 = vcmp.ge.s32.totalorder %v3820_v21, 1677722  ;;  %vm4013_vm10 = vcmp.ge.s32.totalorder %v3821_v13, 1677722  ;;  %v4203_v39 = vsel %vm4011_vm8, %v7130_v14, 0.0  ;;  %v2862_v11 = vshrl.u32 %v2670_v53, 13 }
 0x278   :  { %v4204_v22 = vsel %vm4012_vm9, %v7133_v8, 0.0  ;;  %v4205_v55 = vsel %vm4013_vm10, %v1507_v58, 0.0  ;;  %4395 = vst [vmem:[#allocation7 + $0x240] sm:$0xff] %v4203_v39  ;;  %v2863_v0 = vshrl.u32 %v2671_v15, 13  ;;  %v2099_v30 = vxor.u32 %v6614_v12, %v1904_v50  ;;  %v8107_v31 = vld [vmem:[#allocation77_spill] sm:$0xff] }
 0x279   :  { %4396 = vst [vmem:[#allocation7 + $0x248] sm:$0xff] %v4204_v22  ;;  %4397 = vst [vmem:[#allocation7 + $0x250] sm:$0xff] %v4205_v55  ;;  %v2864_v6 = vshrl.u32 %v2672_v28, 13  ;;  %v2289_v29 = vshrl.u32 %v2097_v4, 16  ;;  %v2290_v43 = vshrl.u32 %v2098_v1, 16  ;;  %4972 = vrcp.f32 %v1331_v9 }
 0x27a   :  { %v3054_v10 = vxor.u32 %v2862_v11, %v2670_v53  ;;  %v3055_v25 = vxor.u32 %v2863_v0, %v2671_v15  ;;  %v2291_v18 = vshrl.u32 %v2099_v30, 16  ;;  %v1653_v14 = vadd.s32 216, %v6574_v36 }
 0x27b   :  { %v3056_v8 = vxor.u32 %v2864_v6, %v2672_v28  ;;  %v2481_v16 = vxor.u32 %v2289_v29, %v2097_v4  ;;  %v2482_v58 = vxor.u32 %v2290_v43, %v2098_v1  ;;  %v1332_v47 = vmul.f32 0.9, %v1160_v57 }
 0x27c   :  { %v4971_v40 = vpop.eup %4970  ;;  %v3246_v61 = vmul.u32 3266489909, %v3054_v10  ;;  %v3247_v26 = vmul.u32 3266489909, %v3055_v25  ;;  %v2483_v19 = vxor.u32 %v2291_v18, %v2099_v30  ;;  %v1654_v51 = vadd.s32 224, %v6574_v36 }
 0x27d   :  { %v3248_v35 = vmul.u32 3266489909, %v3056_v8  ;;  %v1508_v34 = vmul.f32 %v4971_v40, %v8105_v63  ;;  %v1509_v9 = vmul.f32 %v4971_v40, %v8106_v7  ;;  %v1510_v38 = vmul.f32 %v4971_v40, %v8107_v31  ;;  %v1164_v63 = vpop.xlane.xlu0 %1163  ;;  %v8108_v31 = vld [vmem:[#allocation78_spill] sm:$0xff] }
 0x27e   :  { %v3438_v21 = vshrl.u32 %v3246_v61, 16  ;;  %v3439_v2 = vshrl.u32 %v3247_v26, 16  ;;  %v2673_v50 = vmul.u32 2246822507, %v2481_v16  ;;  %v2674_v13 = vmul.u32 2246822507, %v2482_v58 }
 0x27f   :  { %v3440_v52 = vshrl.u32 %v3248_v35, 16  ;;  %v2675_v53 = vmul.u32 2246822507, %v2483_v19  ;;  %v1787_v4 = vmul.u32 384, %v1653_v14  ;;  %4974 = vrcp.f32 %v1332_v47 }
 0x280   :  { %v3630_v15 = vxor.u32 %v3438_v21, %v3246_v61  ;;  %v3631_v1 = vxor.u32 %v3439_v2, %v3247_v26  ;;  %v2865_v39 = vshrl.u32 %v2673_v50, 13  ;;  %v2866_v22 = vshrl.u32 %v2674_v13, 13  ;;  %v8109_v2 = vld [vmem:[#allocation79_spill] sm:$0xff] }
 0x281   :  { %v3632_v28 = vxor.u32 %v3440_v52, %v3248_v35  ;;  %v2867_v55 = vshrl.u32 %v2675_v53, 13  ;;  %v1905_v11 = vadd.s32 %v1787_v4, %v6576_v33  ;;  %v1906_v0 = vadd.s32 %v1787_v4, %v6595_v41 }
 0x282   :  { %v3822_v30 = vshrl.u32 %v3630_v15, 8  ;;  %v3823_v57 = vshrl.u32 %v3631_v1, 8  ;;  %v3057_v6 = vxor.u32 %v2865_v39, %v2673_v50  ;;  %v3058_v29 = vxor.u32 %v2866_v22, %v2674_v13  ;;  %v8110_v13 = vld [vmem:[#allocation80_spill] sm:$0xff] }
 0x283   :  { %v3824_v43 = vshrl.u32 %v3632_v28, 8  ;;  %v3059_v10 = vxor.u32 %v2867_v55, %v2675_v53  ;;  %v1907_v25 = vadd.s32 %v1787_v4, %v6598_v46  ;;  %v2100_v18 = vxor.u32 %v6614_v12, %v1905_v11 }
 0x284   :  { %vm4014_vm11 = vcmp.ge.s32.totalorder %v3822_v30, 1677722  ;;  %vm4015_vm12 = vcmp.ge.s32.totalorder %v3823_v57, 1677722  ;;  %v3249_v14 = vmul.u32 3266489909, %v3057_v6  ;;  %v2101_v8 = vxor.u32 %v6614_v12, %v1906_v0 }
 0x285   :  { %vm4016_vm13 = vcmp.ge.s32.totalorder %v3824_v43, 1677722  ;;  %v4206_v16 = vsel %vm4014_vm11, %v1508_v34, 0.0  ;;  %v4207_v58 = vsel %vm4015_vm12, %v1509_v9, 0.0  ;;  %v3250_v47 = vmul.u32 3266489909, %v3058_v29 }
 0x286   :  { %v4973_v40 = vpop.eup %4972  ;;  %v4208_v61 = vsel %vm4016_vm13, %v1510_v38, 0.0  ;;  %4398 = vst [vmem:[#allocation7 + $0x258] sm:$0xff] %v4206_v16  ;;  %4399 = vst [vmem:[#allocation7 + $0x260] sm:$0xff] %v4207_v58  ;;  %v3251_v26 = vmul.u32 3266489909, %v3059_v10  ;;  %v3441_v19 = vshrl.u32 %v3249_v14, 16  ;;  %v2102_v35 = vxor.u32 %v6614_v12, %v1907_v25 }
 0x287   :  { %4400 = vst [vmem:[#allocation7 + $0x268] sm:$0xff] %v4208_v61  ;;  %v3442_v7 = vshrl.u32 %v3250_v47, 16  ;;  %v1511_v21 = vmul.f32 %v4973_v40, %v8108_v31  ;;  %v1512_v50 = vmul.f32 %v4973_v40, %v8109_v2  ;;  %v1513_v52 = vmul.f32 %v4973_v40, %v8110_v13  ;;  %v8111_v16 = vld [vmem:[#allocation81_spill] sm:$0xff]  ;;  %v1168_v13 = vpop.xlane.xlu1 %1167 }
 0x288   :  { %v3443_v34 = vshrl.u32 %v3251_v26, 16  ;;  %v3633_v9 = vxor.u32 %v3441_v19, %v3249_v14  ;;  %v2292_v53 = vshrl.u32 %v2100_v18, 16  ;;  %v2293_v4 = vshrl.u32 %v2101_v8, 16 }
 0x289   :  { %v3634_v38 = vxor.u32 %v3442_v7, %v3250_v47  ;;  %v2294_v15 = vshrl.u32 %v2102_v35, 16  ;;  %v1788_v1 = vmul.u32 384, %v1654_v51  ;;  %v1333_v39 = vmul.f32 0.9, %v1164_v63 }
 0x28a   :  { %v3635_v22 = vxor.u32 %v3443_v34, %v3251_v26  ;;  %v3825_v28 = vshrl.u32 %v3633_v9, 8  ;;  %v2484_v55 = vxor.u32 %v2292_v53, %v2100_v18  ;;  %v2485_v11 = vxor.u32 %v2293_v4, %v2101_v8  ;;  %v8112_v26 = vld [vmem:[#allocation82_spill] sm:$0xff] }
 0x28b   :  { %v3826_v0 = vshrl.u32 %v3634_v38, 8  ;;  %v2486_v30 = vxor.u32 %v2294_v15, %v2102_v35  ;;  %v1908_v57 = vadd.s32 %v1788_v1, %v6576_v33  ;;  %v1909_v6 = vadd.s32 %v1788_v1, %v6595_v41  ;;  %v8113_v35 = vld [vmem:[#allocation83_spill] sm:$0xff] }
 0x28c   :  { %v4975_v29 = vpop.eup %4974  ;;  %v3827_v43 = vshrl.u32 %v3635_v22, 8  ;;  %vm4017_vm14 = vcmp.ge.s32.totalorder %v3825_v28, 1677722  ;;  %v2676_v10 = vmul.u32 2246822507, %v2484_v55  ;;  %v1910_v25 = vadd.s32 %v1788_v1, %v6598_v46 }
 0x28d   :  { %vm4018_vm15 = vcmp.ge.s32.totalorder %v3826_v0, 1677722  ;;  %v4209_v14 = vsel %vm4017_vm14, %v1511_v21, 0.0  ;;  %v2677_v51 = vmul.u32 2246822507, %v2485_v11  ;;  %v7168_v58 = vmul.f32 %v4975_v29, %v8111_v16 }
 0x28e   :  { %vm4019_vm0 = vcmp.ge.s32.totalorder %v3827_v43, 1677722  ;;  %v4210_v18 = vsel %vm4018_vm15, %v1512_v50, 0.0  ;;  %4401 = vst [vmem:[#allocation7 + $0x270] sm:$0xff] %v4209_v14  ;;  %v2678_v8 = vmul.u32 2246822507, %v2486_v30  ;;  %v1515_v19 = vmul.f32 %v4975_v29, %v8112_v26 }
 0x28f   :  { %v2868_v47 = vshrl.u32 %v2676_v10, 13  ;;  %v4211_v40 = vsel %vm4019_vm0, %v1513_v52, 0.0  ;;  %4402 = vst [vmem:[#allocation7 + $0x278] sm:$0xff] %v4210_v18  ;;  %v2869_v61 = vshrl.u32 %v2677_v51, 13  ;;  %v1516_v63 = vmul.f32 %v4975_v29, %v8113_v35 }
 0x290   :  { %4403 = vst [vmem:[#allocation7 + $0x280] sm:$0xff] %v4211_v40  ;;  %v2870_v7 = vshrl.u32 %v2678_v8, 13  ;;  %v2103_v21 = vxor.u32 %v6614_v12, %v1908_v57  ;;  %v2104_v2 = vxor.u32 %v6614_v12, %v1909_v6  ;;  %v2105_v50 = vxor.u32 %v6614_v12, %v1910_v25 }
 0x291   :  { %v3060_v31 = vxor.u32 %v2868_v47, %v2676_v10  ;;  %v3061_v34 = vxor.u32 %v2869_v61, %v2677_v51  ;;  %4976 = vrcp.f32 %v1333_v39  ;;  %v1655_v52 = vadd.s32 232, %v6574_v36 }
 0x292   :  { %v3062_v9 = vxor.u32 %v2870_v7, %v2678_v8  ;;  %v2295_v4 = vshrl.u32 %v2103_v21, 16  ;;  %v2296_v38 = vshrl.u32 %v2104_v2, 16  ;;  %v2297_v1 = vshrl.u32 %v2105_v50, 16 }
 0x293   :  { %v3252_v53 = vmul.u32 3266489909, %v3060_v31  ;;  %v3253_v15 = vmul.u32 3266489909, %v3061_v34  ;;  %v1334_v28 = vmul.f32 0.9, %v1168_v13 }
 0x294   :  { %v1789_v22 = vmul.u32 384, %v1655_v52  ;;  %v3254_v55 = vmul.u32 3266489909, %v3062_v9  ;;  %v2487_v0 = vxor.u32 %v2295_v4, %v2103_v21  ;;  %v2488_v30 = vxor.u32 %v2296_v38, %v2104_v2 }
 0x295   :  { %v3444_v11 = vshrl.u32 %v3252_v53, 16  ;;  %v3445_v57 = vshrl.u32 %v3253_v15, 16  ;;  %v2489_v6 = vxor.u32 %v2297_v1, %v2105_v50  ;;  %4978 = vrcp.f32 %v1334_v28 }
 0x296   :  { %v1911_v29 = vadd.s32 %v1789_v22, %v6576_v33  ;;  %v1912_v39 = vadd.s32 %v1789_v22, %v6595_v41  ;;  %v3446_v43 = vshrl.u32 %v3254_v55, 16  ;;  %v2679_v25 = vmul.u32 2246822507, %v2487_v0 }
 0x297   :  { %v3636_v10 = vxor.u32 %v3444_v11, %v3252_v53  ;;  %v2680_v14 = vmul.u32 2246822507, %v2488_v30  ;;  %v3637_v51 = vxor.u32 %v3445_v57, %v3253_v15  ;;  %v2681_v16 = vmul.u32 2246822507, %v2489_v6 }
 0x298   :  { %v1913_v18 = vadd.s32 %v1789_v22, %v6598_v46  ;;  %v2106_v8 = vxor.u32 %v6614_v12, %v1911_v29  ;;  %v3638_v47 = vxor.u32 %v3446_v43, %v3254_v55  ;;  %v2871_v61 = vshrl.u32 %v2679_v25, 13  ;;  %v8114_v29 = vld [vmem:[#allocation84_spill] sm:$0xff]  ;;  %v8115_v43 = vld [vmem:[#allocation85_spill] sm:$0xff] }
 0x299   :  { %v3828_v40 = vshrl.u32 %v3636_v10, 8  ;;  %v2872_v26 = vshrl.u32 %v2680_v14, 13  ;;  %v3829_v35 = vshrl.u32 %v3637_v51, 8  ;;  %v2873_v7 = vshrl.u32 %v2681_v16, 13  ;;  %v1172_v10 = vpop.xlane.xlu0 %1171 }
 0x29a   :  { %v2107_v31 = vxor.u32 %v6614_v12, %v1912_v39  ;;  %v2108_v21 = vxor.u32 %v6614_v12, %v1913_v18  ;;  %v3830_v2 = vshrl.u32 %v3638_v47, 8  ;;  %v3063_v13 = vxor.u32 %v2871_v61, %v2679_v25 }
 0x29b   :  { %vm4020_vm1 = vcmp.ge.s32.totalorder %v3828_v40, 1677722  ;;  %v3064_v34 = vxor.u32 %v2872_v26, %v2680_v14  ;;  %vm4021_vm2 = vcmp.ge.s32.totalorder %v3829_v35, 1677722  ;;  %v3065_v52 = vxor.u32 %v2873_v7, %v2681_v16  ;;  %v8116_v14 = vld [vmem:[#allocation86_spill] sm:$0xff] }
 0x29c   :  { %v4212_v50 = vsel %vm4020_vm1, %v7168_v58, 0.0  ;;  %v2298_v9 = vshrl.u32 %v2106_v8, 16  ;;  %vm4022_vm3 = vcmp.ge.s32.totalorder %v3830_v2, 1677722  ;;  %v4213_v53 = vsel %vm4021_vm2, %v1515_v19, 0.0 }
 0x29d   :  { %4404 = vst [vmem:[#allocation7 + $0x288] sm:$0xff] %v4212_v50  ;;  %v3255_v4 = vmul.u32 3266489909, %v3063_v13  ;;  %v2299_v38 = vshrl.u32 %v2107_v31, 16  ;;  %v4214_v15 = vsel %vm4022_vm3, %v1516_v63, 0.0  ;;  %4405 = vst [vmem:[#allocation7 + $0x290] sm:$0xff] %v4213_v53 }
 0x29e   :  { %v3256_v1 = vmul.u32 3266489909, %v3064_v34  ;;  %v3257_v22 = vmul.u32 3266489909, %v3065_v52  ;;  %v2300_v55 = vshrl.u32 %v2108_v21, 16  ;;  %v4977_v11 = vpop.eup %4976  ;;  %4406 = vst [vmem:[#allocation7 + $0x298] sm:$0xff] %v4214_v15  ;;  %v2490_v30 = vxor.u32 %v2298_v9, %v2106_v8  ;;  %v1176_v9 = vpop.xlane.xlu1 %1175 }
 0x29f   :  { %v3447_v0 = vshrl.u32 %v3255_v4, 16  ;;  %v2491_v57 = vxor.u32 %v2299_v38, %v2107_v31  ;;  %v1517_v39 = vmul.f32 %v4977_v11, %v8114_v29  ;;  %v1518_v19 = vmul.f32 %v4977_v11, %v8115_v43 }
 0x2a0   :  { %v3448_v6 = vshrl.u32 %v3256_v1, 16  ;;  %v3449_v58 = vshrl.u32 %v3257_v22, 16  ;;  %v1519_v63 = vmul.f32 %v4977_v11, %v8116_v14  ;;  %v2492_v51 = vxor.u32 %v2300_v55, %v2108_v21 }
 0x2a1   :  { %v3639_v25 = vxor.u32 %v3447_v0, %v3255_v4  ;;  %v2682_v16 = vmul.u32 2246822507, %v2490_v30  ;;  %v2683_v40 = vmul.u32 2246822507, %v2491_v57  ;;  %v1656_v61 = vadd.s32 240, %v6574_v36 }
 0x2a2   :  { %v3640_v18 = vxor.u32 %v3448_v6, %v3256_v1  ;;  %v3641_v47 = vxor.u32 %v3449_v58, %v3257_v22  ;;  %v2684_v26 = vmul.u32 2246822507, %v2492_v51  ;;  %v1335_v35 = vmul.f32 0.9, %v1172_v10  ;;  %v4979_v14 = vpop.eup %4978 }
 0x2a3   :  { %v3831_v8 = vshrl.u32 %v3639_v25, 8  ;;  %v2874_v28 = vshrl.u32 %v2682_v16, 13  ;;  %v2875_v2 = vshrl.u32 %v2683_v40, 13  ;;  %v1790_v13 = vmul.u32 384, %v1656_v61  ;;  %v8117_v61 = vld [vmem:[#allocation87_spill] sm:$0xff] }
 0x2a4   :  { %v3832_v7 = vshrl.u32 %v3640_v18, 8  ;;  %v3833_v31 = vshrl.u32 %v3641_v47, 8  ;;  %v2876_v34 = vshrl.u32 %v2684_v26, 13  ;;  %4980 = vrcp.f32 %v1335_v35 }
 0x2a5   :  { %vm4023_vm4 = vcmp.ge.s32.totalorder %v3831_v8, 1677722  ;;  %v3066_v50 = vxor.u32 %v2874_v28, %v2682_v16  ;;  %v3067_v52 = vxor.u32 %v2875_v2, %v2683_v40  ;;  %v1914_v22 = vadd.s32 %v1790_v13, %v6576_v33 }
 0x2a6   :  { %vm4024_vm5 = vcmp.ge.s32.totalorder %v3832_v7, 1677722  ;;  %vm4025_vm6 = vcmp.ge.s32.totalorder %v3833_v31, 1677722  ;;  %v4215_v21 = vsel %vm4023_vm4, %v1517_v39, 0.0  ;;  %v3068_v38 = vxor.u32 %v2876_v34, %v2684_v26  ;;  %v8118_v26 = vld [vmem:[#allocation88_spill] sm:$0xff] }
 0x2a7   :  { %v4216_v53 = vsel %vm4024_vm5, %v1518_v19, 0.0  ;;  %v4217_v4 = vsel %vm4025_vm6, %v1519_v63, 0.0  ;;  %4407 = vst [vmem:[#allocation7 + $0x2a0] sm:$0xff] %v4215_v21  ;;  %v3258_v15 = vmul.u32 3266489909, %v3066_v50  ;;  %v1915_v55 = vadd.s32 %v1790_v13, %v6595_v41  ;;  %v8119_v7 = vld [vmem:[#allocation89_spill] sm:$0xff] }
 0x2a8   :  { %4408 = vst [vmem:[#allocation7 + $0x2a8] sm:$0xff] %v4216_v53  ;;  %4409 = vst [vmem:[#allocation7 + $0x2b0] sm:$0xff] %v4217_v4  ;;  %v3259_v1 = vmul.u32 3266489909, %v3067_v52  ;;  %v1916_v11 = vadd.s32 %v1790_v13, %v6598_v46  ;;  %v3260_v0 = vmul.u32 3266489909, %v3068_v38  ;;  %v2109_v29 = vxor.u32 %v6614_v12, %v1914_v22 }
 0x2a9   :  { %v3450_v30 = vshrl.u32 %v3258_v15, 16  ;;  %v1657_v57 = vadd.s32 248, %v6574_v36  ;;  %v1336_v6 = vmul.f32 0.9, %v1176_v9  ;;  %v2110_v39 = vxor.u32 %v6614_v12, %v1915_v55 }
 0x2aa   :  { %v3451_v58 = vshrl.u32 %v3259_v1, 16  ;;  %v2111_v43 = vxor.u32 %v6614_v12, %v1916_v11  ;;  %v3452_v19 = vshrl.u32 %v3260_v0, 16  ;;  %v2301_v51 = vshrl.u32 %v2109_v29, 16 }
 0x2ab   :  { %v3642_v10 = vxor.u32 %v3450_v30, %v3258_v15  ;;  %v1791_v25 = vmul.u32 384, %v1657_v57  ;;  %4982 = vrcp.f32 %v1336_v6  ;;  %v2302_v16 = vshrl.u32 %v2110_v39, 16  ;;  %v1180_v30 = vpop.xlane.xlu0 %1179  ;;  %v8120_v6 = vld [vmem:[#allocation90_spill] sm:$0xff] }
 0x2ac   :  { %v3643_v63 = vxor.u32 %v3451_v58, %v3259_v1  ;;  %v2303_v18 = vshrl.u32 %v2111_v43, 16  ;;  %v3644_v47 = vxor.u32 %v3452_v19, %v3260_v0  ;;  %v1520_v8 = vmul.f32 %v4979_v14, %v8117_v61 }
 0x2ad   :  { %v3834_v40 = vshrl.u32 %v3642_v10, 8  ;;  %v1521_v28 = vmul.f32 %v4979_v14, %v8118_v26  ;;  %v1522_v31 = vmul.f32 %v4979_v14, %v8119_v7  ;;  %v2493_v2 = vxor.u32 %v2301_v51, %v2109_v29  ;;  %v8121_v29 = vld [vmem:[#allocation91_spill] sm:$0xff] }
 0x2ae   :  { %v3835_v35 = vshrl.u32 %v3643_v63, 8  ;;  %v2494_v13 = vxor.u32 %v2302_v16, %v2110_v39  ;;  %v3836_v34 = vshrl.u32 %v3644_v47, 8  ;;  %v2495_v50 = vxor.u32 %v2303_v18, %v2111_v43  ;;  %v8122_v43 = vld [vmem:[#allocation92_spill] sm:$0xff] }
 0x2af   :  { %vm4026_vm7 = vcmp.ge.s32.totalorder %v3834_v40, 1677722  ;;  %v1917_v21 = vadd.s32 %v1791_v25, %v6576_v33  ;;  %v2685_v9 = vmul.u32 2246822507, %v2493_v2  ;;  %v1918_v53 = vadd.s32 %v1791_v25, %v6595_v41 }
 0x2b0   :  { %vm4027_vm8 = vcmp.ge.s32.totalorder %v3835_v35, 1677722  ;;  %v4218_v52 = vsel %vm4026_vm7, %v1520_v8, 0.0  ;;  %vm4028_vm9 = vcmp.ge.s32.totalorder %v3836_v34, 1677722  ;;  %v1919_v15 = vadd.s32 %v1791_v25, %v6598_v46 }
 0x2b1   :  { %v4219_v4 = vsel %vm4027_vm8, %v1521_v28, 0.0  ;;  %4410 = vst [vmem:[#allocation7 + $0x2b8] sm:$0xff] %v4218_v52  ;;  %v2686_v38 = vmul.u32 2246822507, %v2494_v13  ;;  %v4981_v1 = vpop.eup %4980  ;;  %v4220_v22 = vsel %vm4028_vm9, %v1522_v31, 0.0  ;;  %v2877_v11 = vshrl.u32 %v2685_v9, 13 }
 0x2b2   :  { %4411 = vst [vmem:[#allocation7 + $0x2c0] sm:$0xff] %v4219_v4  ;;  %v2687_v55 = vmul.u32 2246822507, %v2495_v50  ;;  %v2112_v0 = vxor.u32 %v6614_v12, %v1917_v21  ;;  %4412 = vst [vmem:[#allocation7 + $0x2c8] sm:$0xff] %v4220_v22  ;;  %v1523_v58 = vmul.f32 %v4981_v1, %v8120_v6  ;;  %v1524_v39 = vmul.f32 %v4981_v1, %v8121_v29  ;;  %v8124_v4 = vld [vmem:[#allocation94_spill] sm:$0xff] }
 0x2b3   :  { %v2878_v57 = vshrl.u32 %v2686_v38, 13  ;;  %v1525_v19 = vmul.f32 %v4981_v1, %v8122_v43  ;;  %v3069_v14 = vxor.u32 %v2877_v11, %v2685_v9  ;;  %v2113_v25 = vxor.u32 %v6614_v12, %v1918_v53  ;;  %v8123_v9 = vld [vmem:[#allocation93_spill] sm:$0xff] }
 0x2b4   :  { %v2879_v10 = vshrl.u32 %v2687_v55, 13  ;;  %v2114_v63 = vxor.u32 %v6614_v12, %v1919_v15  ;;  %v2304_v16 = vshrl.u32 %v2112_v0, 16  ;;  %v1658_v18 = vadd.s32 256, %v6574_v36 }
 0x2b5   :  { %v3070_v51 = vxor.u32 %v2878_v57, %v2686_v38  ;;  %v1337_v47 = vmul.f32 0.9, %v1180_v30  ;;  %v3261_v61 = vmul.u32 3266489909, %v3069_v14  ;;  %v2305_v8 = vshrl.u32 %v2113_v25, 16  ;;  %v8125_v30 = vld [vmem:[#allocation95_spill] sm:$0xff] }
 0x2b6   :  { %v3071_v40 = vxor.u32 %v2879_v10, %v2687_v55  ;;  %v2306_v26 = vshrl.u32 %v2114_v63, 16  ;;  %v2496_v35 = vxor.u32 %v2304_v16, %v2112_v0  ;;  %v1792_v7 = vmul.u32 384, %v1658_v18 }
 0x2b7   :  { %v3262_v28 = vmul.u32 3266489909, %v3070_v51  ;;  %4984 = vrcp.f32 %v1337_v47  ;;  %v3453_v13 = vshrl.u32 %v3261_v61, 16  ;;  %v2497_v34 = vxor.u32 %v2305_v8, %v2113_v25 }
 0x2b8   :  { %v4983_v31 = vpop.eup %4982  ;;  %v3263_v2 = vmul.u32 3266489909, %v3071_v40  ;;  %v2498_v50 = vxor.u32 %v2306_v26, %v2114_v63  ;;  %v2688_v52 = vmul.u32 2246822507, %v2496_v35  ;;  %v1920_v6 = vadd.s32 %v1792_v7, %v6576_v33 }
 0x2b9   :  { %v3454_v21 = vshrl.u32 %v3262_v28, 16  ;;  %v7208_v53 = vmul.f32 %v4983_v31, %v8123_v9  ;;  %v7211_v38 = vmul.f32 %v4983_v31, %v8124_v4  ;;  %v3645_v1 = vxor.u32 %v3453_v13, %v3261_v61 }
 0x2ba   :  { %v3455_v15 = vshrl.u32 %v3263_v2, 16  ;;  %v2689_v22 = vmul.u32 2246822507, %v2497_v34  ;;  %v2690_v55 = vmul.u32 2246822507, %v2498_v50  ;;  %v2880_v0 = vshrl.u32 %v2688_v52, 13 }
 0x2bb   :  { %v3646_v11 = vxor.u32 %v3454_v21, %v3262_v28  ;;  %v7214_v57 = vmul.f32 %v4983_v31, %v8125_v30  ;;  %v3837_v43 = vshrl.u32 %v3645_v1, 8  ;;  %v1921_v51 = vadd.s32 %v1792_v7, %v6595_v41 }
 0x2bc   :  { %v3647_v29 = vxor.u32 %v3455_v15, %v3263_v2  ;;  %v2881_v10 = vshrl.u32 %v2689_v22, 13  ;;  %v2882_v14 = vshrl.u32 %v2690_v55, 13  ;;  %v3072_v63 = vxor.u32 %v2880_v0, %v2688_v52  ;;  %v1184_v2 = vpop.xlane.xlu1 %1183 }
 0x2bd   :  { %v3838_v25 = vshrl.u32 %v3646_v11, 8  ;;  %v1922_v16 = vadd.s32 %v1792_v7, %v6598_v46  ;;  %vm4029_vm10 = vcmp.ge.s32.totalorder %v3837_v43, 1677722  ;;  %v2115_v26 = vxor.u32 %v6614_v12, %v1920_v6  ;;  %v8126_v43 = vld [vmem:[#allocation96_spill] sm:$0xff] }
 0x2be   :  { %v3839_v18 = vshrl.u32 %v3647_v29, 8  ;;  %v3073_v47 = vxor.u32 %v2881_v10, %v2689_v22  ;;  %v3074_v40 = vxor.u32 %v2882_v14, %v2690_v55  ;;  %v4221_v61 = vsel %vm4029_vm10, %v1523_v58, 0.0 }
 0x2bf   :  { %vm4030_vm11 = vcmp.ge.s32.totalorder %v3838_v25, 1677722  ;;  %v3264_v8 = vmul.u32 3266489909, %v3072_v63  ;;  %4413 = vst [vmem:[#allocation7 + $0x2d0] sm:$0xff] %v4221_v61  ;;  %v2116_v31 = vxor.u32 %v6614_v12, %v1921_v51  ;;  %v2117_v50 = vxor.u32 %v6614_v12, %v1922_v16  ;;  %v8127_v51 = vld [vmem:[#allocation97_spill] sm:$0xff] }
 0x2c0   :  { %vm4031_vm12 = vcmp.ge.s32.totalorder %v3839_v18, 1677722  ;;  %v4222_v28 = vsel %vm4030_vm11, %v1524_v39, 0.0  ;;  %v3265_v35 = vmul.u32 3266489909, %v3073_v47  ;;  %v2307_v52 = vshrl.u32 %v2115_v26, 16 }
 0x2c1   :  { %v4223_v13 = vsel %vm4031_vm12, %v1525_v19, 0.0  ;;  %4414 = vst [vmem:[#allocation7 + $0x2d8] sm:$0xff] %v4222_v28  ;;  %v3266_v34 = vmul.u32 3266489909, %v3074_v40  ;;  %v3456_v7 = vshrl.u32 %v3264_v8, 16  ;;  %v2308_v58 = vshrl.u32 %v2116_v31, 16 }
 0x2c2   :  { %4415 = vst [vmem:[#allocation7 + $0x2e0] sm:$0xff] %v4223_v13  ;;  %v3457_v21 = vshrl.u32 %v3265_v35, 16  ;;  %v1659_v9 = vadd.s32 264, %v6574_v36  ;;  %v2309_v39 = vshrl.u32 %v2117_v50, 16  ;;  %v1338_v1 = vmul.f32 0.9, %v1184_v2 }
 0x2c3   :  { %v3458_v4 = vshrl.u32 %v3266_v34, 16  ;;  %v3648_v15 = vxor.u32 %v3456_v7, %v3264_v8  ;;  %v2499_v11 = vxor.u32 %v2307_v52, %v2115_v26  ;;  %v2500_v0 = vxor.u32 %v2308_v58, %v2116_v31  ;;  %v8128_v40 = vld [vmem:[#allocation98_spill] sm:$0xff] }
 0x2c4   :  { %v4985_v22 = vpop.eup %4984  ;;  %v3649_v55 = vxor.u32 %v3457_v21, %v3265_v35  ;;  %v1793_v19 = vmul.u32 384, %v1659_v9  ;;  %v2501_v29 = vxor.u32 %v2309_v39, %v2117_v50  ;;  %v1188_v21 = vpop.xlane.xlu0 %1187  ;;  %4986 = vrcp.f32 %v1338_v1 }
 0x2c5   :  { %v3650_v30 = vxor.u32 %v3458_v4, %v3266_v34  ;;  %v3840_v6 = vshrl.u32 %v3648_v15, 8  ;;  %v7224_v10 = vmul.f32 %v4985_v22, %v8126_v43  ;;  %v2691_v25 = vmul.u32 2246822507, %v2499_v11 }
 0x2c6   :  { %v3841_v14 = vshrl.u32 %v3649_v55, 8  ;;  %v2692_v63 = vmul.u32 2246822507, %v2500_v0  ;;  %v7227_v16 = vmul.f32 %v4985_v22, %v8127_v51  ;;  %v2693_v47 = vmul.u32 2246822507, %v2501_v29 }
 0x2c7   :  { %v3842_v18 = vshrl.u32 %v3650_v30, 8  ;;  %vm4032_vm13 = vcmp.ge.s32.totalorder %v3840_v6, 1677722  ;;  %v7230_v61 = vmul.f32 %v4985_v22, %v8128_v40  ;;  %v2883_v26 = vshrl.u32 %v2691_v25, 13 }
 0x2c8   :  { %vm4033_vm14 = vcmp.ge.s32.totalorder %v3841_v14, 1677722  ;;  %v4224_v8 = vsel %vm4032_vm13, %v7208_v53, 0.0  ;;  %v2884_v28 = vshrl.u32 %v2692_v63, 13  ;;  %v2885_v31 = vshrl.u32 %v2693_v47, 13 }
 0x2c9   :  { %vm4034_vm15 = vcmp.ge.s32.totalorder %v3842_v18, 1677722  ;;  %v4225_v35 = vsel %vm4033_vm14, %v7211_v38, 0.0  ;;  %4416 = vst [vmem:[#allocation7 + $0x2e8] sm:$0xff] %v4224_v8  ;;  %v1923_v2 = vadd.s32 %v1793_v19, %v6576_v33  ;;  %v3075_v34 = vxor.u32 %v2883_v26, %v2691_v25 }
 0x2ca   :  { %v4226_v13 = vsel %vm4034_vm15, %v7214_v57, 0.0  ;;  %4417 = vst [vmem:[#allocation7 + $0x2f0] sm:$0xff] %v4225_v35  ;;  %v3076_v7 = vxor.u32 %v2884_v28, %v2692_v63  ;;  %v1924_v50 = vadd.s32 %v1793_v19, %v6595_v41  ;;  %v3077_v52 = vxor.u32 %v2885_v31, %v2693_v47 }
 0x2cb   :  { %4418 = vst [vmem:[#allocation7 + $0x2f8] sm:$0xff] %v4226_v13  ;;  %v1925_v53 = vadd.s32 %v1793_v19, %v6598_v46  ;;  %v2118_v58 = vxor.u32 %v6614_v12, %v1923_v2  ;;  %v3267_v38 = vmul.u32 3266489909, %v3075_v34  ;;  %v1660_v15 = vadd.s32 272, %v6574_v36 }
 0x2cc   :  { %v3268_v9 = vmul.u32 3266489909, %v3076_v7  ;;  %v2119_v4 = vxor.u32 %v6614_v12, %v1924_v50  ;;  %v3269_v57 = vmul.u32 3266489909, %v3077_v52  ;;  %v1339_v55 = vmul.f32 0.9, %v1188_v21 }
 0x2cd   :  { %v2120_v39 = vxor.u32 %v6614_v12, %v1925_v53  ;;  %v2310_v22 = vshrl.u32 %v2118_v58, 16  ;;  %v3459_v11 = vshrl.u32 %v3267_v38, 16  ;;  %v1794_v6 = vmul.u32 384, %v1660_v15 }
 0x2ce   :  { %v3460_v0 = vshrl.u32 %v3268_v9, 16  ;;  %v2311_v30 = vshrl.u32 %v2119_v4, 16  ;;  %v3461_v29 = vshrl.u32 %v3269_v57, 16  ;;  %4988 = vrcp.f32 %v1339_v55 }
 0x2cf   :  { %v2312_v19 = vshrl.u32 %v2120_v39, 16  ;;  %v2502_v43 = vxor.u32 %v2310_v22, %v2118_v58  ;;  %v3651_v1 = vxor.u32 %v3459_v11, %v3267_v38  ;;  %v1926_v63 = vadd.s32 %v1794_v6, %v6576_v33 }
 0x2d0   :  { %v3652_v14 = vxor.u32 %v3460_v0, %v3268_v9  ;;  %v2503_v25 = vxor.u32 %v2311_v30, %v2119_v4  ;;  %v3653_v51 = vxor.u32 %v3461_v29, %v3269_v57  ;;  %v1927_v40 = vadd.s32 %v1794_v6, %v6595_v41 }
 0x2d1   :  { %v2504_v18 = vxor.u32 %v2312_v19, %v2120_v39  ;;  %v2694_v47 = vmul.u32 2246822507, %v2502_v43  ;;  %v3843_v8 = vshrl.u32 %v3651_v1, 8  ;;  %v1928_v35 = vadd.s32 %v1794_v6, %v6598_v46  ;;  %v4987_v55 = vpop.eup %4986  ;;  %v8129_v6 = vld [vmem:[#allocation99_spill] sm:$0xff]  ;;  %v8130_v19 = vld [vmem:[#allocation100_spill] sm:$0xff]  ;;  %v8131_v1 = vld [vmem:[#allocation101_spill] sm:$0xff] }
 0x2d2   :  { %v3844_v26 = vshrl.u32 %v3652_v14, 8  ;;  %v2695_v28 = vmul.u32 2246822507, %v2503_v25  ;;  %v3845_v31 = vshrl.u32 %v3653_v51, 8  ;;  %v2121_v34 = vxor.u32 %v6614_v12, %v1926_v63 }
 0x2d3   :  { %v2696_v2 = vmul.u32 2246822507, %v2504_v18  ;;  %v2886_v13 = vshrl.u32 %v2694_v47, 13  ;;  %vm4035_vm0 = vcmp.ge.s32.totalorder %v3843_v8, 1677722  ;;  %v2122_v50 = vxor.u32 %v6614_v12, %v1927_v40 }
 0x2d4   :  { %vm4036_vm1 = vcmp.ge.s32.totalorder %v3844_v26, 1677722  ;;  %v2887_v7 = vshrl.u32 %v2695_v28, 13  ;;  %vm4037_vm2 = vcmp.ge.s32.totalorder %v3845_v31, 1677722  ;;  %v4227_v21 = vsel %vm4035_vm0, %v7224_v10, 0.0 }
 0x2d5   :  { %v4228_v52 = vsel %vm4036_vm1, %v7227_v16, 0.0  ;;  %v2888_v53 = vshrl.u32 %v2696_v2, 13  ;;  %v4229_v58 = vsel %vm4037_vm2, %v7230_v61, 0.0  ;;  %4419 = vst [vmem:[#allocation7 + $0x300] sm:$0xff] %v4227_v21  ;;  %v3078_v38 = vxor.u32 %v2886_v13, %v2694_v47  ;;  %v1192_v16 = vpop.xlane.xlu1 %1191 }
 0x2d6   :  { %4420 = vst [vmem:[#allocation7 + $0x308] sm:$0xff] %v4228_v52  ;;  %v3079_v9 = vxor.u32 %v2887_v7, %v2695_v28  ;;  %v2123_v4 = vxor.u32 %v6614_v12, %v1928_v35  ;;  %4421 = vst [vmem:[#allocation7 + $0x310] sm:$0xff] %v4229_v58  ;;  %v2313_v57 = vshrl.u32 %v2121_v34, 16  ;;  %v2314_v39 = vshrl.u32 %v2122_v50, 16  ;;  %v8132_v52 = vld [vmem:[#allocation102_spill] sm:$0xff]  ;;  %v8133_v58 = vld [vmem:[#allocation103_spill] sm:$0xff] }
 0x2d7   :  { %v3080_v15 = vxor.u32 %v2888_v53, %v2696_v2  ;;  %v1661_v22 = vadd.s32 280, %v6574_v36  ;;  %v3270_v11 = vmul.u32 3266489909, %v3078_v38  ;;  %v1662_v30 = vadd.s32 288, %v6574_v36 }
 0x2d8   :  { %v3271_v10 = vmul.u32 3266489909, %v3079_v9  ;;  %v2315_v0 = vshrl.u32 %v2123_v4, 16  ;;  %v1532_v29 = vmul.f32 %v4987_v55, %v8129_v6  ;;  %v1533_v43 = vmul.f32 %v4987_v55, %v8130_v19 }
 0x2d9   :  { %v3272_v61 = vmul.u32 3266489909, %v3080_v15  ;;  %v1534_v14 = vmul.f32 %v4987_v55, %v8131_v1  ;;  %v3462_v25 = vshrl.u32 %v3270_v11, 16  ;;  %v2505_v51 = vxor.u32 %v2313_v57, %v2121_v34 }
 0x2da   :  { %v3463_v63 = vshrl.u32 %v3271_v10, 16  ;;  %v2506_v18 = vxor.u32 %v2314_v39, %v2122_v50  ;;  %v2507_v40 = vxor.u32 %v2315_v0, %v2123_v4  ;;  %v1795_v8 = vmul.u32 384, %v1661_v22  ;;  %v8134_v39 = vld [vmem:[#allocation104_spill] sm:$0xff] }
 0x2db   :  { %v3464_v47 = vshrl.u32 %v3272_v61, 16  ;;  %v1340_v26 = vmul.f32 0.9, %v1192_v16  ;;  %v4989_v28 = vpop.eup %4988  ;;  %v3654_v35 = vxor.u32 %v3462_v25, %v3270_v11  ;;  %v2697_v2 = vmul.u32 2246822507, %v2505_v51 }
 0x2dc   :  { %v3655_v31 = vxor.u32 %v3463_v63, %v3271_v10  ;;  %v2698_v13 = vmul.u32 2246822507, %v2506_v18  ;;  %v2699_v21 = vmul.u32 2246822507, %v2507_v40  ;;  %v7257_v53 = vmul.f32 %v4989_v28, %v8132_v52  ;;  %v1196_v63 = vpop.xlane.xlu0 %1195 }
 0x2dd   :  { %v3656_v7 = vxor.u32 %v3464_v47, %v3272_v61  ;;  %v7260_v38 = vmul.f32 %v4989_v28, %v8133_v58  ;;  %v3846_v9 = vshrl.u32 %v3654_v35, 8  ;;  %v2889_v50 = vshrl.u32 %v2697_v2, 13 }
 0x2de   :  { %v3847_v34 = vshrl.u32 %v3655_v31, 8  ;;  %v2890_v15 = vshrl.u32 %v2698_v13, 13  ;;  %v2891_v57 = vshrl.u32 %v2699_v21, 13  ;;  %v1537_v22 = vmul.f32 %v4989_v28, %v8134_v39 }
 0x2df   :  { %v3848_v4 = vshrl.u32 %v3656_v7, 8  ;;  %v1929_v55 = vadd.s32 %v1795_v8, %v6576_v33  ;;  %vm4038_vm3 = vcmp.ge.s32.totalorder %v3846_v9, 1677722  ;;  %v3081_v11 = vxor.u32 %v2889_v50, %v2697_v2 }
 0x2e0   :  { %vm4039_vm4 = vcmp.ge.s32.totalorder %v3847_v34, 1677722  ;;  %v3082_v10 = vxor.u32 %v2890_v15, %v2698_v13  ;;  %v4230_v0 = vsel %vm4038_vm3, %v1532_v29, 0.0  ;;  %v3083_v61 = vxor.u32 %v2891_v57, %v2699_v21 }
 0x2e1   :  { %vm4040_vm5 = vcmp.ge.s32.totalorder %v3848_v4, 1677722  ;;  %v4231_v16 = vsel %vm4039_vm4, %v1533_v43, 0.0  ;;  %4422 = vst [vmem:[#allocation7 + $0x318] sm:$0xff] %v4230_v0  ;;  %v3273_v19 = vmul.u32 3266489909, %v3081_v11  ;;  %v1930_v25 = vadd.s32 %v1795_v8, %v6595_v41 }
 0x2e2   :  { %v4232_v6 = vsel %vm4040_vm5, %v1534_v14, 0.0  ;;  %4423 = vst [vmem:[#allocation7 + $0x320] sm:$0xff] %v4231_v16  ;;  %v3274_v1 = vmul.u32 3266489909, %v3082_v10  ;;  %v3275_v51 = vmul.u32 3266489909, %v3083_v61  ;;  %v1931_v18 = vadd.s32 %v1795_v8, %v6598_v46 }
 0x2e3   :  { %4424 = vst [vmem:[#allocation7 + $0x328] sm:$0xff] %v4232_v6  ;;  %v2124_v47 = vxor.u32 %v6614_v12, %v1929_v55  ;;  %4990 = vrcp.f32 %v1340_v26  ;;  %v3465_v40 = vshrl.u32 %v3273_v19, 16  ;;  %v2125_v29 = vxor.u32 %v6614_v12, %v1930_v25 }
 0x2e4   :  { %v3466_v28 = vshrl.u32 %v3274_v1, 16  ;;  %v1796_v43 = vmul.u32 384, %v1662_v30  ;;  %v3467_v14 = vshrl.u32 %v3275_v51, 16  ;;  %v2126_v35 = vxor.u32 %v6614_v12, %v1931_v18 }
 0x2e5   :  { %v2316_v31 = vshrl.u32 %v2124_v47, 16  ;;  %v1341_v2 = vmul.f32 0.9, %v1196_v63  ;;  %v3657_v13 = vxor.u32 %v3465_v40, %v3273_v19  ;;  %v2317_v21 = vshrl.u32 %v2125_v29, 16  ;;  %v1200_v63 = vpop.xlane.xlu1 %1199 }
 0x2e6   :  { %v3658_v7 = vxor.u32 %v3466_v28, %v3274_v1  ;;  %v1932_v52 = vadd.s32 %v1796_v43, %v6576_v33  ;;  %v3659_v58 = vxor.u32 %v3467_v14, %v3275_v51  ;;  %v2318_v8 = vshrl.u32 %v2126_v35, 16 }
 0x2e7   :  { %v2508_v9 = vxor.u32 %v2316_v31, %v2124_v47  ;;  %v1933_v26 = vadd.s32 %v1796_v43, %v6595_v41  ;;  %v3849_v34 = vshrl.u32 %v3657_v13, 8  ;;  %v2509_v15 = vxor.u32 %v2317_v21, %v2125_v29 }
 0x2e8   :  { %v3850_v50 = vshrl.u32 %v3658_v7, 8  ;;  %v1934_v30 = vadd.s32 %v1796_v43, %v6598_v46  ;;  %v3851_v4 = vshrl.u32 %v3659_v58, 8  ;;  %v2510_v57 = vxor.u32 %v2318_v8, %v2126_v35  ;;  %v8135_v58 = vld [vmem:[#allocation105_spill] sm:$0xff] }
 0x2e9   :  { %v2700_v39 = vmul.u32 2246822507, %v2508_v9  ;;  %v2127_v55 = vxor.u32 %v6614_v12, %v1932_v52  ;;  %vm4041_vm6 = vcmp.ge.s32.totalorder %v3849_v34, 1677722  ;;  %v2701_v11 = vmul.u32 2246822507, %v2509_v15 }
 0x2ea   :  { %vm4042_vm7 = vcmp.ge.s32.totalorder %v3850_v50, 1677722  ;;  %v2128_v10 = vxor.u32 %v6614_v12, %v1933_v26  ;;  %vm4043_vm8 = vcmp.ge.s32.totalorder %v3851_v4, 1677722  ;;  %v4233_v0 = vsel %vm4041_vm6, %v7257_v53, 0.0  ;;  %v8136_v9 = vld [vmem:[#allocation106_spill] sm:$0xff] }
 0x2eb   :  { %v4234_v16 = vsel %vm4042_vm7, %v7260_v38, 0.0  ;;  %v2702_v61 = vmul.u32 2246822507, %v2510_v57  ;;  %v4235_v6 = vsel %vm4043_vm8, %v1537_v22, 0.0  ;;  %4425 = vst [vmem:[#allocation7 + $0x330] sm:$0xff] %v4233_v0  ;;  %v2892_v19 = vshrl.u32 %v2700_v39, 13 }
 0x2ec   :  { %4426 = vst [vmem:[#allocation7 + $0x338] sm:$0xff] %v4234_v16  ;;  %v2893_v1 = vshrl.u32 %v2701_v11, 13  ;;  %v2129_v25 = vxor.u32 %v6614_v12, %v1934_v30  ;;  %4427 = vst [vmem:[#allocation7 + $0x340] sm:$0xff] %v4235_v6  ;;  %v2319_v18 = vshrl.u32 %v2127_v55, 16  ;;  %v2320_v47 = vshrl.u32 %v2128_v10, 16  ;;  %v8137_v26 = vld [vmem:[#allocation107_spill] sm:$0xff] }
 0x2ed   :  { %v2894_v51 = vshrl.u32 %v2702_v61, 13  ;;  %4992 = vrcp.f32 %v1341_v2  ;;  %v3084_v40 = vxor.u32 %v2892_v19, %v2700_v39  ;;  %v1663_v53 = vadd.s32 296, %v6574_v36 }
 0x2ee   :  { %v3085_v28 = vxor.u32 %v2893_v1, %v2701_v11  ;;  %v2321_v29 = vshrl.u32 %v2129_v25, 16  ;;  %v2511_v43 = vxor.u32 %v2319_v18, %v2127_v55  ;;  %v2512_v22 = vxor.u32 %v2320_v47, %v2128_v10 }
 0x2ef   :  { %v3086_v38 = vxor.u32 %v2894_v51, %v2702_v61  ;;  %v1342_v14 = vmul.f32 0.9, %v1200_v63  ;;  %v3276_v31 = vmul.u32 3266489909, %v3084_v40  ;;  %v1664_v21 = vadd.s32 304, %v6574_v36 }
 0x2f0   :  { %v4991_v35 = vpop.eup %4990  ;;  %v3277_v13 = vmul.u32 3266489909, %v3085_v28  ;;  %v2513_v7 = vxor.u32 %v2321_v29, %v2129_v25  ;;  %v2703_v30 = vmul.u32 2246822507, %v2511_v43 }
 0x2f1   :  { %v3278_v52 = vmul.u32 3266489909, %v3086_v38  ;;  %v1538_v8 = vmul.f32 %v4991_v35, %v8135_v58  ;;  %v1539_v2 = vmul.f32 %v4991_v35, %v8136_v9  ;;  %v1540_v34 = vmul.f32 %v4991_v35, %v8137_v26  ;;  %v1204_v58 = vpop.xlane.xlu0 %1203  ;;  %v8138_v26 = vld [vmem:[#allocation108_spill] sm:$0xff] }
 0x2f2   :  { %v3468_v50 = vshrl.u32 %v3276_v31, 16  ;;  %v3469_v15 = vshrl.u32 %v3277_v13, 16  ;;  %v2704_v4 = vmul.u32 2246822507, %v2512_v22  ;;  %v2705_v39 = vmul.u32 2246822507, %v2513_v7 }
 0x2f3   :  { %v3470_v57 = vshrl.u32 %v3278_v52, 16  ;;  %v1797_v55 = vmul.u32 384, %v1663_v53  ;;  %4994 = vrcp.f32 %v1342_v14  ;;  %v2895_v0 = vshrl.u32 %v2703_v30, 13 }
 0x2f4   :  { %v3660_v11 = vxor.u32 %v3468_v50, %v3276_v31  ;;  %v3661_v10 = vxor.u32 %v3469_v15, %v3277_v13  ;;  %v2896_v16 = vshrl.u32 %v2704_v4, 13  ;;  %v2897_v6 = vshrl.u32 %v2705_v39, 13  ;;  %v8139_v15 = vld [vmem:[#allocation109_spill] sm:$0xff] }
 0x2f5   :  { %v3662_v61 = vxor.u32 %v3470_v57, %v3278_v52  ;;  %v1935_v19 = vadd.s32 %v1797_v55, %v6576_v33  ;;  %v1936_v1 = vadd.s32 %v1797_v55, %v6595_v41  ;;  %v3087_v51 = vxor.u32 %v2895_v0, %v2703_v30 }
 0x2f6   :  { %v3852_v25 = vshrl.u32 %v3660_v11, 8  ;;  %v3853_v63 = vshrl.u32 %v3661_v10, 8  ;;  %v3088_v18 = vxor.u32 %v2896_v16, %v2704_v4  ;;  %v3089_v40 = vxor.u32 %v2897_v6, %v2705_v39  ;;  %v8140_v4 = vld [vmem:[#allocation110_spill] sm:$0xff] }
 0x2f7   :  { %v3854_v47 = vshrl.u32 %v3662_v61, 8  ;;  %v1937_v28 = vadd.s32 %v1797_v55, %v6598_v46  ;;  %v2130_v29 = vxor.u32 %v6614_v12, %v1935_v19  ;;  %v3279_v53 = vmul.u32 3266489909, %v3087_v51 }
 0x2f8   :  { %vm4044_vm9 = vcmp.ge.s32.totalorder %v3852_v25, 1677722  ;;  %vm4045_vm10 = vcmp.ge.s32.totalorder %v3853_v63, 1677722  ;;  %v2131_v38 = vxor.u32 %v6614_v12, %v1936_v1  ;;  %v3280_v14 = vmul.u32 3266489909, %v3088_v18 }
 0x2f9   :  { %vm4046_vm11 = vcmp.ge.s32.totalorder %v3854_v47, 1677722  ;;  %v4236_v43 = vsel %vm4044_vm9, %v1538_v8, 0.0  ;;  %v4237_v22 = vsel %vm4045_vm10, %v1539_v2, 0.0  ;;  %v3281_v13 = vmul.u32 3266489909, %v3089_v40 }
 0x2fa   :  { %v4993_v35 = vpop.eup %4992  ;;  %v4238_v31 = vsel %vm4046_vm11, %v1540_v34, 0.0  ;;  %4428 = vst [vmem:[#allocation7 + $0x348] sm:$0xff] %v4236_v43  ;;  %4429 = vst [vmem:[#allocation7 + $0x350] sm:$0xff] %v4237_v22  ;;  %v3471_v7 = vshrl.u32 %v3279_v53, 16  ;;  %v2132_v52 = vxor.u32 %v6614_v12, %v1937_v28  ;;  %v3472_v9 = vshrl.u32 %v3280_v14, 16  ;;  %v8141_v43 = vld [vmem:[#allocation111_spill] sm:$0xff] }
 0x2fb   :  { %4430 = vst [vmem:[#allocation7 + $0x358] sm:$0xff] %v4238_v31  ;;  %v1541_v50 = vmul.f32 %v4993_v35, %v8138_v26  ;;  %v1542_v30 = vmul.f32 %v4993_v35, %v8139_v15  ;;  %v1543_v57 = vmul.f32 %v4993_v35, %v8140_v4  ;;  %v3473_v8 = vshrl.u32 %v3281_v13, 16  ;;  %v1208_v4 = vpop.xlane.xlu1 %1207 }
 0x2fc   :  { %v3663_v2 = vxor.u32 %v3471_v7, %v3279_v53  ;;  %v2322_v39 = vshrl.u32 %v2130_v29, 16  ;;  %v2323_v55 = vshrl.u32 %v2131_v38, 16  ;;  %v3664_v34 = vxor.u32 %v3472_v9, %v3280_v14 }
 0x2fd   :  { %v2324_v11 = vshrl.u32 %v2132_v52, 16  ;;  %v1798_v10 = vmul.u32 384, %v1664_v21  ;;  %v1343_v0 = vmul.f32 0.9, %v1204_v58  ;;  %v3665_v16 = vxor.u32 %v3473_v8, %v3281_v13  ;;  %v8142_v13 = vld [vmem:[#allocation112_spill] sm:$0xff] }
 0x2fe   :  { %v3855_v61 = vshrl.u32 %v3663_v2, 8  ;;  %v2514_v6 = vxor.u32 %v2322_v39, %v2130_v29  ;;  %v2515_v19 = vxor.u32 %v2323_v55, %v2131_v38  ;;  %v3856_v1 = vshrl.u32 %v3664_v34, 8 }
 0x2ff   :  { %v2516_v25 = vxor.u32 %v2324_v11, %v2132_v52  ;;  %v1938_v63 = vadd.s32 %v1798_v10, %v6576_v33  ;;  %v1939_v51 = vadd.s32 %v1798_v10, %v6595_v41  ;;  %v3857_v47 = vshrl.u32 %v3665_v16, 8  ;;  %v8143_v52 = vld [vmem:[#allocation113_spill] sm:$0xff] }
 0x300   :  { %v4995_v18 = vpop.eup %4994  ;;  %vm4047_vm12 = vcmp.ge.s32.totalorder %v3855_v61, 1677722  ;;  %v2706_v40 = vmul.u32 2246822507, %v2514_v6  ;;  %v1940_v28 = vadd.s32 %v1798_v10, %v6598_v46  ;;  %vm4048_vm13 = vcmp.ge.s32.totalorder %v3856_v1, 1677722 }
 0x301   :  { %v4239_v53 = vsel %vm4047_vm12, %v1541_v50, 0.0  ;;  %v2707_v21 = vmul.u32 2246822507, %v2515_v19  ;;  %v7295_v22 = vmul.f32 %v4995_v18, %v8141_v43  ;;  %vm4049_vm14 = vcmp.ge.s32.totalorder %v3857_v47, 1677722 }
 0x302   :  { %v4240_v29 = vsel %vm4048_vm13, %v1542_v30, 0.0  ;;  %4431 = vst [vmem:[#allocation7 + $0x360] sm:$0xff] %v4239_v53  ;;  %v2708_v38 = vmul.u32 2246822507, %v2516_v25  ;;  %v2898_v14 = vshrl.u32 %v2706_v40, 13  ;;  %v4241_v35 = vsel %vm4049_vm14, %v1543_v57, 0.0 }
 0x303   :  { %4432 = vst [vmem:[#allocation7 + $0x368] sm:$0xff] %v4240_v29  ;;  %v2899_v31 = vshrl.u32 %v2707_v21, 13  ;;  %v1545_v7 = vmul.f32 %v4995_v18, %v8142_v13  ;;  %v1546_v58 = vmul.f32 %v4995_v18, %v8143_v52  ;;  %4433 = vst [vmem:[#allocation7 + $0x370] sm:$0xff] %v4241_v35  ;;  %v2133_v50 = vxor.u32 %v6614_v12, %v1938_v63 }
 0x304   :  { %v2900_v9 = vshrl.u32 %v2708_v38, 13  ;;  %v3090_v26 = vxor.u32 %v2898_v14, %v2706_v40  ;;  %v2134_v15 = vxor.u32 %v6614_v12, %v1939_v51  ;;  %v2135_v30 = vxor.u32 %v6614_v12, %v1940_v28 }
 0x305   :  { %v3091_v8 = vxor.u32 %v2899_v31, %v2707_v21  ;;  %4996 = vrcp.f32 %v1343_v0  ;;  %v1665_v57 = vadd.s32 312, %v6574_v36  ;;  %v2325_v55 = vshrl.u32 %v2133_v50, 16 }
 0x306   :  { %v3092_v2 = vxor.u32 %v2900_v9, %v2708_v38  ;;  %v3282_v39 = vmul.u32 3266489909, %v3090_v26  ;;  %v2326_v34 = vshrl.u32 %v2134_v15, 16  ;;  %v2327_v10 = vshrl.u32 %v2135_v30, 16 }
 0x307   :  { %v3283_v11 = vmul.u32 3266489909, %v3091_v8  ;;  %v1799_v16 = vmul.u32 384, %v1665_v57  ;;  %v1344_v61 = vmul.f32 0.9, %v1208_v4  ;;  %v2517_v1 = vxor.u32 %v2325_v55, %v2133_v50 }
 0x308   :  { %v3284_v6 = vmul.u32 3266489909, %v3092_v2  ;;  %v3474_v19 = vshrl.u32 %v3282_v39, 16  ;;  %v2518_v25 = vxor.u32 %v2326_v34, %v2134_v15  ;;  %v2519_v51 = vxor.u32 %v2327_v10, %v2135_v30 }
 0x309   :  { %v3475_v63 = vshrl.u32 %v3283_v11, 16  ;;  %v1941_v18 = vadd.s32 %v1799_v16, %v6576_v33  ;;  %v1942_v0 = vadd.s32 %v1799_v16, %v6595_v41  ;;  %v2709_v28 = vmul.u32 2246822507, %v2517_v1 }
 0x30a   :  { %v3476_v47 = vshrl.u32 %v3284_v6, 16  ;;  %v3666_v40 = vxor.u32 %v3474_v19, %v3282_v39  ;;  %v2710_v53 = vmul.u32 2246822507, %v2518_v25  ;;  %v2711_v43 = vmul.u32 2246822507, %v2519_v51 }
 0x30b   :  { %v3667_v21 = vxor.u32 %v3475_v63, %v3283_v11  ;;  %v1943_v29 = vadd.s32 %v1799_v16, %v6598_v46  ;;  %v2136_v38 = vxor.u32 %v6614_v12, %v1941_v18  ;;  %v2901_v31 = vshrl.u32 %v2709_v28, 13  ;;  %v8144_v18 = vld [vmem:[#allocation114_spill] sm:$0xff] }
 0x30c   :  { %v3668_v14 = vxor.u32 %v3476_v47, %v3284_v6  ;;  %v3858_v35 = vshrl.u32 %v3666_v40, 8  ;;  %v2902_v13 = vshrl.u32 %v2710_v53, 13  ;;  %v2903_v9 = vshrl.u32 %v2711_v43, 13  ;;  %v8145_v47 = vld [vmem:[#allocation115_spill] sm:$0xff]  ;;  %v1212_v40 = vpop.xlane.xlu0 %1211 }
 0x30d   :  { %v3859_v52 = vshrl.u32 %v3667_v21, 8  ;;  %v2137_v26 = vxor.u32 %v6614_v12, %v1942_v0  ;;  %v2138_v50 = vxor.u32 %v6614_v12, %v1943_v29  ;;  %v3093_v4 = vxor.u32 %v2901_v31, %v2709_v28 }
 0x30e   :  { %v3860_v15 = vshrl.u32 %v3668_v14, 8  ;;  %vm4050_vm15 = vcmp.ge.s32.totalorder %v3858_v35, 1677722  ;;  %v3094_v8 = vxor.u32 %v2902_v13, %v2710_v53  ;;  %v3095_v57 = vxor.u32 %v2903_v9, %v2711_v43  ;;  %v8146_v53 = vld [vmem:[#allocation116_spill] sm:$0xff] }
 0x30f   :  { %vm4051_vm0 = vcmp.ge.s32.totalorder %v3859_v52, 1677722  ;;  %v4242_v30 = vsel %vm4050_vm15, %v7295_v22, 0.0  ;;  %v2328_v2 = vshrl.u32 %v2136_v38, 16  ;;  %v3285_v55 = vmul.u32 3266489909, %v3093_v4 }
 0x310   :  { %vm4052_vm1 = vcmp.ge.s32.totalorder %v3860_v15, 1677722  ;;  %v4243_v39 = vsel %vm4051_vm0, %v1545_v7, 0.0  ;;  %4434 = vst [vmem:[#allocation7 + $0x378] sm:$0xff] %v4242_v30  ;;  %v2329_v34 = vshrl.u32 %v2137_v26, 16  ;;  %v2330_v6 = vshrl.u32 %v2138_v50, 16 }
 0x311   :  { %v4244_v11 = vsel %vm4052_vm1, %v1546_v58, 0.0  ;;  %4435 = vst [vmem:[#allocation7 + $0x380] sm:$0xff] %v4243_v39  ;;  %v3286_v10 = vmul.u32 3266489909, %v3094_v8  ;;  %v3287_v16 = vmul.u32 3266489909, %v3095_v57  ;;  %v2520_v25 = vxor.u32 %v2328_v2, %v2136_v38  ;;  %v1216_v2 = vpop.xlane.xlu1 %1215 }
 0x312   :  { %v4997_v19 = vpop.eup %4996  ;;  %4436 = vst [vmem:[#allocation7 + $0x388] sm:$0xff] %v4244_v11  ;;  %v3477_v1 = vshrl.u32 %v3285_v55, 16  ;;  %v2521_v63 = vxor.u32 %v2329_v34, %v2137_v26  ;;  %4998 = vrcp.f32 %v1344_v61  ;;  %v2522_v21 = vxor.u32 %v2330_v6, %v2138_v50 }
 0x313   :  { %v3478_v51 = vshrl.u32 %v3286_v10, 16  ;;  %v3479_v22 = vshrl.u32 %v3287_v16, 16  ;;  %v1547_v0 = vmul.f32 %v4997_v19, %v8144_v18  ;;  %v1548_v7 = vmul.f32 %v4997_v19, %v8145_v47 }
 0x314   :  { %v3669_v28 = vxor.u32 %v3477_v1, %v3285_v55  ;;  %v1549_v58 = vmul.f32 %v4997_v19, %v8146_v53  ;;  %v2712_v43 = vmul.u32 2246822507, %v2520_v25  ;;  %v2713_v35 = vmul.u32 2246822507, %v2521_v63 }
 0x315   :  { %v3670_v29 = vxor.u32 %v3478_v51, %v3286_v10  ;;  %v3671_v14 = vxor.u32 %v3479_v22, %v3287_v16  ;;  %v1666_v31 = vadd.s32 320, %v6574_v36  ;;  %v2714_v13 = vmul.u32 2246822507, %v2522_v21 }
 0x316   :  { %v3861_v38 = vshrl.u32 %v3669_v28, 8  ;;  %v2904_v61 = vshrl.u32 %v2712_v43, 13  ;;  %v1345_v52 = vmul.f32 0.9, %v1212_v40  ;;  %v2905_v15 = vshrl.u32 %v2713_v35, 13 }
 0x317   :  { %v3862_v9 = vshrl.u32 %v3670_v29, 8  ;;  %v3863_v26 = vshrl.u32 %v3671_v14, 8  ;;  %v1800_v4 = vmul.u32 384, %v1666_v31  ;;  %v2906_v8 = vshrl.u32 %v2714_v13, 13  ;;  %v8147_v31 = vld [vmem:[#allocation117_spill] sm:$0xff] }
 0x318   :  { %vm4053_vm2 = vcmp.ge.s32.totalorder %v3861_v38, 1677722  ;;  %v3096_v30 = vxor.u32 %v2904_v61, %v2712_v43  ;;  %5000 = vrcp.f32 %v1345_v52  ;;  %v3097_v57 = vxor.u32 %v2905_v15, %v2713_v35 }
 0x319   :  { %vm4054_vm3 = vcmp.ge.s32.totalorder %v3862_v9, 1677722  ;;  %vm4055_vm4 = vcmp.ge.s32.totalorder %v3863_v26, 1677722  ;;  %v4245_v50 = vsel %vm4053_vm2, %v1547_v0, 0.0  ;;  %v3098_v34 = vxor.u32 %v2906_v8, %v2714_v13  ;;  %v8148_v13 = vld [vmem:[#allocation118_spill] sm:$0xff] }
 0x31a   :  { %v4246_v39 = vsel %vm4054_vm3, %v1548_v7, 0.0  ;;  %v4247_v55 = vsel %vm4055_vm4, %v1549_v58, 0.0  ;;  %4437 = vst [vmem:[#allocation7 + $0x390] sm:$0xff] %v4245_v50  ;;  %v3288_v11 = vmul.u32 3266489909, %v3096_v30  ;;  %v1944_v16 = vadd.s32 %v1800_v4, %v6576_v33  ;;  %v8149_v9 = vld [vmem:[#allocation119_spill] sm:$0xff] }
 0x31b   :  { %4438 = vst [vmem:[#allocation7 + $0x398] sm:$0xff] %v4246_v39  ;;  %4439 = vst [vmem:[#allocation7 + $0x3a0] sm:$0xff] %v4247_v55  ;;  %v3289_v10 = vmul.u32 3266489909, %v3097_v57  ;;  %v1945_v6 = vadd.s32 %v1800_v4, %v6595_v41  ;;  %v1946_v19 = vadd.s32 %v1800_v4, %v6598_v46  ;;  %v3290_v1 = vmul.u32 3266489909, %v3098_v34 }
 0x31c   :  { %v3480_v25 = vshrl.u32 %v3288_v11, 16  ;;  %v1667_v63 = vadd.s32 328, %v6574_v36  ;;  %v1346_v51 = vmul.f32 0.9, %v1216_v2  ;;  %v2139_v18 = vxor.u32 %v6614_v12, %v1944_v16 }
 0x31d   :  { %v3481_v22 = vshrl.u32 %v3289_v10, 16  ;;  %v2140_v0 = vxor.u32 %v6614_v12, %v1945_v6  ;;  %v2141_v47 = vxor.u32 %v6614_v12, %v1946_v19  ;;  %v3482_v7 = vshrl.u32 %v3290_v1, 16 }
 0x31e   :  { %v3672_v40 = vxor.u32 %v3480_v25, %v3288_v11  ;;  %v1801_v28 = vmul.u32 384, %v1667_v63  ;;  %5002 = vrcp.f32 %v1346_v51  ;;  %v2331_v21 = vshrl.u32 %v2139_v18, 16  ;;  %v1220_v25 = vpop.xlane.xlu0 %1219  ;;  %v8150_v51 = vld [vmem:[#allocation120_spill] sm:$0xff] }
 0x31f   :  { %v4999_v53 = vpop.eup %4998  ;;  %v3673_v58 = vxor.u32 %v3481_v22, %v3289_v10  ;;  %v2332_v43 = vshrl.u32 %v2140_v0, 16  ;;  %v2333_v29 = vshrl.u32 %v2141_v47, 16  ;;  %v3674_v14 = vxor.u32 %v3482_v7, %v3290_v1 }
 0x320   :  { %v3864_v35 = vshrl.u32 %v3672_v40, 8  ;;  %v1550_v38 = vmul.f32 %v4999_v53, %v8147_v31  ;;  %v1551_v61 = vmul.f32 %v4999_v53, %v8148_v13  ;;  %v1552_v26 = vmul.f32 %v4999_v53, %v8149_v9 }
 0x321   :  { %v3865_v52 = vshrl.u32 %v3673_v58, 8  ;;  %v2523_v15 = vxor.u32 %v2331_v21, %v2139_v18  ;;  %v2524_v4 = vxor.u32 %v2332_v43, %v2140_v0  ;;  %v3866_v8 = vshrl.u32 %v3674_v14, 8  ;;  %v8151_v18 = vld [vmem:[#allocation121_spill] sm:$0xff] }
 0x322   :  { %vm4056_vm5 = vcmp.ge.s32.totalorder %v3864_v35, 1677722  ;;  %v2525_v30 = vxor.u32 %v2333_v29, %v2141_v47  ;;  %v1947_v50 = vadd.s32 %v1801_v28, %v6576_v33  ;;  %v1948_v39 = vadd.s32 %v1801_v28, %v6595_v41  ;;  %v8152_v47 = vld [vmem:[#allocation122_spill] sm:$0xff] }
 0x323   :  { %vm4057_vm6 = vcmp.ge.s32.totalorder %v3865_v52, 1677722  ;;  %v4248_v57 = vsel %vm4056_vm5, %v1550_v38, 0.0  ;;  %v2715_v2 = vmul.u32 2246822507, %v2523_v15  ;;  %v1949_v11 = vadd.s32 %v1801_v28, %v6598_v46 }
 0x324   :  { %vm4058_vm7 = vcmp.ge.s32.totalorder %v3866_v8, 1677722  ;;  %v4249_v55 = vsel %vm4057_vm6, %v1551_v61, 0.0  ;;  %4440 = vst [vmem:[#allocation7 + $0x3a8] sm:$0xff] %v4248_v57  ;;  %v2716_v34 = vmul.u32 2246822507, %v2524_v4  ;;  %v2142_v1 = vxor.u32 %v6614_v12, %v1947_v50 }
 0x325   :  { %v5001_v10 = vpop.eup %5000  ;;  %v4250_v16 = vsel %vm4058_vm7, %v1552_v26, 0.0  ;;  %4441 = vst [vmem:[#allocation7 + $0x3b0] sm:$0xff] %v4249_v55  ;;  %v2717_v6 = vmul.u32 2246822507, %v2525_v30  ;;  %v2907_v19 = vshrl.u32 %v2715_v2, 13  ;;  %v2143_v28 = vxor.u32 %v6614_v12, %v1948_v39  ;;  %v8154_v55 = vld [vmem:[#allocation124_spill] sm:$0xff] }
 0x326   :  { %4442 = vst [vmem:[#allocation7 + $0x3b8] sm:$0xff] %v4250_v16  ;;  %v2908_v63 = vshrl.u32 %v2716_v34, 13  ;;  %v1553_v22 = vmul.f32 %v5001_v10, %v8150_v51  ;;  %v1554_v0 = vmul.f32 %v5001_v10, %v8151_v18  ;;  %v1555_v7 = vmul.f32 %v5001_v10, %v8152_v47 }
 0x327   :  { %v2909_v40 = vshrl.u32 %v2717_v6, 13  ;;  %v3099_v53 = vxor.u32 %v2907_v19, %v2715_v2  ;;  %v2144_v58 = vxor.u32 %v6614_v12, %v1949_v11  ;;  %v2334_v43 = vshrl.u32 %v2142_v1, 16  ;;  %v8153_v2 = vld [vmem:[#allocation123_spill] sm:$0xff] }
 0x328   :  { %v3100_v21 = vxor.u32 %v2908_v63, %v2716_v34  ;;  %v1668_v29 = vadd.s32 336, %v6574_v36  ;;  %v1347_v14 = vmul.f32 0.9, %v1220_v25  ;;  %v2335_v38 = vshrl.u32 %v2143_v28, 16  ;;  %v8155_v25 = vld [vmem:[#allocation125_spill] sm:$0xff] }
 0x329   :  { %v3101_v35 = vxor.u32 %v2909_v40, %v2717_v6  ;;  %v3291_v31 = vmul.u32 3266489909, %v3099_v53  ;;  %v2336_v13 = vshrl.u32 %v2144_v58, 16  ;;  %v2526_v52 = vxor.u32 %v2334_v43, %v2142_v1 }
 0x32a   :  { %v3292_v61 = vmul.u32 3266489909, %v3100_v21  ;;  %v1802_v9 = vmul.u32 384, %v1668_v29  ;;  %5004 = vrcp.f32 %v1347_v14  ;;  %v2527_v8 = vxor.u32 %v2335_v38, %v2143_v28 }
 0x32b   :  { %v5003_v26 = vpop.eup %5002  ;;  %v3293_v15 = vmul.u32 3266489909, %v3101_v35  ;;  %v3483_v4 = vshrl.u32 %v3291_v31, 16  ;;  %v2528_v30 = vxor.u32 %v2336_v13, %v2144_v58  ;;  %v2718_v57 = vmul.u32 2246822507, %v2526_v52 }
 0x32c   :  { %v3484_v50 = vshrl.u32 %v3292_v61, 16  ;;  %v7335_v39 = vmul.f32 %v5003_v26, %v8153_v2  ;;  %v7338_v34 = vmul.f32 %v5003_v26, %v8154_v55  ;;  %v2719_v16 = vmul.u32 2246822507, %v2527_v8 }
 0x32d   :  { %v3485_v11 = vshrl.u32 %v3293_v15, 16  ;;  %v3675_v10 = vxor.u32 %v3483_v4, %v3291_v31  ;;  %v2720_v6 = vmul.u32 2246822507, %v2528_v30  ;;  %v2910_v1 = vshrl.u32 %v2718_v57, 13 }
 0x32e   :  { %v3676_v19 = vxor.u32 %v3484_v50, %v3292_v61  ;;  %v7341_v63 = vmul.f32 %v5003_v26, %v8155_v25  ;;  %v1950_v51 = vadd.s32 %v1802_v9, %v6576_v33  ;;  %v2911_v40 = vshrl.u32 %v2719_v16, 13 }
 0x32f   :  { %v3677_v18 = vxor.u32 %v3485_v11, %v3293_v15  ;;  %v3867_v47 = vshrl.u32 %v3675_v10, 8  ;;  %v2912_v53 = vshrl.u32 %v2720_v6, 13  ;;  %v3102_v58 = vxor.u32 %v2910_v1, %v2718_v57  ;;  %v1224_v15 = vpop.xlane.xlu1 %1223 }
 0x330   :  { %v3868_v28 = vshrl.u32 %v3676_v19, 8  ;;  %v1951_v21 = vadd.s32 %v1802_v9, %v6595_v41  ;;  %v1952_v43 = vadd.s32 %v1802_v9, %v6598_v46  ;;  %v3103_v14 = vxor.u32 %v2911_v40, %v2719_v16 }
 0x331   :  { %v3869_v29 = vshrl.u32 %v3677_v18, 8  ;;  %vm4059_vm8 = vcmp.ge.s32.totalorder %v3867_v47, 1677722  ;;  %v3104_v35 = vxor.u32 %v2912_v53, %v2720_v6  ;;  %v3294_v38 = vmul.u32 3266489909, %v3102_v58  ;;  %v8156_v47 = vld [vmem:[#allocation126_spill] sm:$0xff] }
 0x332   :  { %vm4060_vm9 = vcmp.ge.s32.totalorder %v3868_v28, 1677722  ;;  %v4251_v31 = vsel %vm4059_vm8, %v1553_v22, 0.0  ;;  %v2145_v13 = vxor.u32 %v6614_v12, %v1950_v51  ;;  %v3295_v52 = vmul.u32 3266489909, %v3103_v14 }
 0x333   :  { %vm4061_vm10 = vcmp.ge.s32.totalorder %v3869_v29, 1677722  ;;  %v4252_v61 = vsel %vm4060_vm9, %v1554_v0, 0.0  ;;  %4443 = vst [vmem:[#allocation7 + $0x3c0] sm:$0xff] %v4251_v31  ;;  %v2146_v26 = vxor.u32 %v6614_v12, %v1951_v21  ;;  %v3296_v8 = vmul.u32 3266489909, %v3104_v35 }
 0x334   :  { %v4253_v4 = vsel %vm4061_vm10, %v1555_v7, 0.0  ;;  %4444 = vst [vmem:[#allocation7 + $0x3c8] sm:$0xff] %v4252_v61  ;;  %v3486_v9 = vshrl.u32 %v3294_v38, 16  ;;  %v2147_v30 = vxor.u32 %v6614_v12, %v1952_v43  ;;  %v3487_v50 = vshrl.u32 %v3295_v52, 16  ;;  %v8157_v21 = vld [vmem:[#allocation127_spill] sm:$0xff]  ;;  %v8158_v35 = vld [vmem:[#allocation128_spill] sm:$0xff] }
 0x335   :  { %4445 = vst [vmem:[#allocation7 + $0x3d0] sm:$0xff] %v4253_v4  ;;  %v2337_v57 = vshrl.u32 %v2145_v13, 16  ;;  %v2338_v22 = vshrl.u32 %v2146_v26, 16  ;;  %v1669_v2 = vadd.s32 344, %v6574_v36  ;;  %v3488_v55 = vshrl.u32 %v3296_v8, 16 }
 0x336   :  { %v3678_v11 = vxor.u32 %v3486_v9, %v3294_v38  ;;  %v2339_v0 = vshrl.u32 %v2147_v30, 16  ;;  %v1348_v10 = vmul.f32 0.9, %v1224_v15  ;;  %v3679_v6 = vxor.u32 %v3487_v50, %v3295_v52  ;;  %v1228_v50 = vpop.xlane.xlu0 %1227 }
 0x337   :  { %v5005_v16 = vpop.eup %5004  ;;  %v2529_v19 = vxor.u32 %v2337_v57, %v2145_v13  ;;  %v2530_v1 = vxor.u32 %v2338_v22, %v2146_v26  ;;  %v1803_v7 = vmul.u32 384, %v1669_v2  ;;  %v3680_v25 = vxor.u32 %v3488_v55, %v3296_v8 }
 0x338   :  { %v3870_v51 = vshrl.u32 %v3678_v11, 8  ;;  %v2531_v18 = vxor.u32 %v2339_v0, %v2147_v30  ;;  %v7351_v40 = vmul.f32 %v5005_v16, %v8156_v47  ;;  %v3871_v53 = vshrl.u32 %v3679_v6, 8 }
 0x339   :  { %v2721_v28 = vmul.u32 2246822507, %v2529_v19  ;;  %v2722_v58 = vmul.u32 2246822507, %v2530_v1  ;;  %v7354_v43 = vmul.f32 %v5005_v16, %v8157_v21  ;;  %v3872_v29 = vshrl.u32 %v3680_v25, 8 }
 0x33a   :  { %vm4062_vm11 = vcmp.ge.s32.totalorder %v3870_v51, 1677722  ;;  %v2723_v14 = vmul.u32 2246822507, %v2531_v18  ;;  %v7357_v31 = vmul.f32 %v5005_v16, %v8158_v35  ;;  %vm4063_vm12 = vcmp.ge.s32.totalorder %v3871_v53, 1677722 }
 0x33b   :  { %v4254_v38 = vsel %vm4062_vm11, %v7335_v39, 0.0  ;;  %v2913_v13 = vshrl.u32 %v2721_v28, 13  ;;  %v2914_v61 = vshrl.u32 %v2722_v58, 13  ;;  %vm4064_vm13 = vcmp.ge.s32.totalorder %v3872_v29, 1677722 }
 0x33c   :  { %v4255_v52 = vsel %vm4063_vm12, %v7338_v34, 0.0  ;;  %4446 = vst [vmem:[#allocation7 + $0x3d8] sm:$0xff] %v4254_v38  ;;  %v2915_v26 = vshrl.u32 %v2723_v14, 13  ;;  %v1953_v15 = vadd.s32 %v1803_v7, %v6576_v33  ;;  %v4256_v4 = vsel %vm4064_vm13, %v7341_v63, 0.0 }
 0x33d   :  { %4447 = vst [vmem:[#allocation7 + $0x3e0] sm:$0xff] %v4255_v52  ;;  %v3105_v8 = vxor.u32 %v2913_v13, %v2721_v28  ;;  %v3106_v9 = vxor.u32 %v2914_v61, %v2722_v58  ;;  %v1954_v30 = vadd.s32 %v1803_v7, %v6595_v41  ;;  %4448 = vst [vmem:[#allocation7 + $0x3e8] sm:$0xff] %v4256_v4  ;;  %5006 = vrcp.f32 %v1348_v10 }
 0x33e   :  { %v3107_v57 = vxor.u32 %v2915_v26, %v2723_v14  ;;  %v1955_v39 = vadd.s32 %v1803_v7, %v6598_v46  ;;  %v2148_v22 = vxor.u32 %v6614_v12, %v1953_v15  ;;  %v1670_v11 = vadd.s32 352, %v6574_v36 }
 0x33f   :  { %v3297_v34 = vmul.u32 3266489909, %v3105_v8  ;;  %v3298_v2 = vmul.u32 3266489909, %v3106_v9  ;;  %v2149_v55 = vxor.u32 %v6614_v12, %v1954_v30  ;;  %v1349_v6 = vmul.f32 0.9, %v1228_v50 }
 0x340   :  { %v3299_v63 = vmul.u32 3266489909, %v3107_v57  ;;  %v2150_v0 = vxor.u32 %v6614_v12, %v1955_v39  ;;  %v2340_v16 = vshrl.u32 %v2148_v22, 16  ;;  %v1804_v51 = vmul.u32 384, %v1670_v11 }
 0x341   :  { %v3489_v19 = vshrl.u32 %v3297_v34, 16  ;;  %v3490_v1 = vshrl.u32 %v3298_v2, 16  ;;  %v2341_v25 = vshrl.u32 %v2149_v55, 16  ;;  %5008 = vrcp.f32 %v1349_v6 }
 0x342   :  { %v3491_v18 = vshrl.u32 %v3299_v63, 16  ;;  %v2342_v7 = vshrl.u32 %v2150_v0, 16  ;;  %v2532_v47 = vxor.u32 %v2340_v16, %v2148_v22  ;;  %v1956_v58 = vadd.s32 %v1804_v51, %v6576_v33 }
 0x343   :  { %v3681_v10 = vxor.u32 %v3489_v19, %v3297_v34  ;;  %v3682_v53 = vxor.u32 %v3490_v1, %v3298_v2  ;;  %v2533_v28 = vxor.u32 %v2341_v25, %v2149_v55  ;;  %v1957_v35 = vadd.s32 %v1804_v51, %v6595_v41 }
 0x344   :  { %v3683_v21 = vxor.u32 %v3491_v18, %v3299_v63  ;;  %v2534_v29 = vxor.u32 %v2342_v7, %v2150_v0  ;;  %v2724_v14 = vmul.u32 2246822507, %v2532_v47  ;;  %v1958_v52 = vadd.s32 %v1804_v51, %v6598_v46  ;;  %v8159_v51 = vld [vmem:[#allocation129_spill] sm:$0xff]  ;;  %v8160_v7 = vld [vmem:[#allocation130_spill] sm:$0xff] }
 0x345   :  { %v3873_v38 = vshrl.u32 %v3681_v10, 8  ;;  %v3874_v13 = vshrl.u32 %v3682_v53, 8  ;;  %v2725_v61 = vmul.u32 2246822507, %v2533_v28  ;;  %v2151_v8 = vxor.u32 %v6614_v12, %v1956_v58  ;;  %v8161_v10 = vld [vmem:[#allocation131_spill] sm:$0xff] }
 0x346   :  { %v3875_v26 = vshrl.u32 %v3683_v21, 8  ;;  %v2726_v15 = vmul.u32 2246822507, %v2534_v29  ;;  %v2916_v4 = vshrl.u32 %v2724_v14, 13  ;;  %v2152_v30 = vxor.u32 %v6614_v12, %v1957_v35 }
 0x347   :  { %vm4065_vm14 = vcmp.ge.s32.totalorder %v3873_v38, 1677722  ;;  %vm4066_vm15 = vcmp.ge.s32.totalorder %v3874_v13, 1677722  ;;  %v2917_v9 = vshrl.u32 %v2725_v61, 13  ;;  %v2153_v55 = vxor.u32 %v6614_v12, %v1958_v52 }
 0x348   :  { %vm4067_vm0 = vcmp.ge.s32.totalorder %v3875_v26, 1677722  ;;  %v4257_v50 = vsel %vm4065_vm14, %v7351_v40, 0.0  ;;  %v4258_v57 = vsel %vm4066_vm15, %v7354_v43, 0.0  ;;  %v2918_v39 = vshrl.u32 %v2726_v15, 13  ;;  %v1232_v43 = vpop.xlane.xlu1 %1231 }
 0x349   :  { %v4259_v22 = vsel %vm4067_vm0, %v7357_v31, 0.0  ;;  %4449 = vst [vmem:[#allocation7 + $0x3f0] sm:$0xff] %v4257_v50  ;;  %4450 = vst [vmem:[#allocation7 + $0x3f8] sm:$0xff] %v4258_v57  ;;  %v3108_v34 = vxor.u32 %v2916_v4, %v2724_v14  ;;  %v3109_v2 = vxor.u32 %v2917_v9, %v2725_v61  ;;  %v2343_v63 = vshrl.u32 %v2151_v8, 16  ;;  %v8162_v57 = vld [vmem:[#allocation132_spill] sm:$0xff] }
 0x34a   :  { %4451 = vst [vmem:[#allocation7 + $0x400] sm:$0xff] %v4259_v22  ;;  %v3110_v11 = vxor.u32 %v2918_v39, %v2726_v15  ;;  %v2344_v0 = vshrl.u32 %v2152_v30, 16  ;;  %v1671_v16 = vadd.s32 360, %v6574_v36  ;;  %v5007_v6 = vpop.eup %5006  ;;  %v2345_v1 = vshrl.u32 %v2153_v55, 16  ;;  %v8163_v22 = vld [vmem:[#allocation133_spill] sm:$0xff] }
 0x34b   :  { %v3300_v19 = vmul.u32 3266489909, %v3108_v34  ;;  %v3301_v40 = vmul.u32 3266489909, %v3109_v2  ;;  %v1672_v25 = vadd.s32 368, %v6574_v36  ;;  %v1562_v18 = vmul.f32 %v5007_v6, %v8159_v51 }
 0x34c   :  { %v3302_v31 = vmul.u32 3266489909, %v3110_v11  ;;  %v1563_v47 = vmul.f32 %v5007_v6, %v8160_v7  ;;  %v1564_v53 = vmul.f32 %v5007_v6, %v8161_v10  ;;  %v2535_v21 = vxor.u32 %v2343_v63, %v2151_v8 }
 0x34d   :  { %v3492_v28 = vshrl.u32 %v3300_v19, 16  ;;  %v3493_v58 = vshrl.u32 %v3301_v40, 16  ;;  %v2536_v29 = vxor.u32 %v2344_v0, %v2152_v30  ;;  %v2537_v35 = vxor.u32 %v2345_v1, %v2153_v55  ;;  %v8164_v0 = vld [vmem:[#allocation134_spill] sm:$0xff] }
 0x34e   :  { %v3494_v14 = vshrl.u32 %v3302_v31, 16  ;;  %v1805_v38 = vmul.u32 384, %v1671_v16  ;;  %v1350_v13 = vmul.f32 0.9, %v1232_v43  ;;  %v5009_v61 = vpop.eup %5008  ;;  %v2727_v15 = vmul.u32 2246822507, %v2535_v21 }
 0x34f   :  { %v3684_v52 = vxor.u32 %v3492_v28, %v3300_v19  ;;  %v3685_v26 = vxor.u32 %v3493_v58, %v3301_v40  ;;  %v2728_v4 = vmul.u32 2246822507, %v2536_v29  ;;  %v2729_v50 = vmul.u32 2246822507, %v2537_v35  ;;  %v1236_v58 = vpop.xlane.xlu0 %1235 }
 0x350   :  { %v3686_v9 = vxor.u32 %v3494_v14, %v3302_v31  ;;  %v7384_v39 = vmul.f32 %v5009_v61, %v8162_v57  ;;  %v7387_v34 = vmul.f32 %v5009_v61, %v8163_v22  ;;  %v2919_v30 = vshrl.u32 %v2727_v15, 13 }
 0x351   :  { %v3876_v2 = vshrl.u32 %v3684_v52, 8  ;;  %v3877_v8 = vshrl.u32 %v3685_v26, 8  ;;  %v2920_v11 = vshrl.u32 %v2728_v4, 13  ;;  %v2921_v63 = vshrl.u32 %v2729_v50, 13 }
 0x352   :  { %v3878_v55 = vshrl.u32 %v3686_v9, 8  ;;  %v1567_v16 = vmul.f32 %v5009_v61, %v8164_v0  ;;  %v1959_v6 = vadd.s32 %v1805_v38, %v6576_v33  ;;  %v3111_v19 = vxor.u32 %v2919_v30, %v2727_v15 }
 0x353   :  { %vm4068_vm1 = vcmp.ge.s32.totalorder %v3876_v2, 1677722  ;;  %vm4069_vm2 = vcmp.ge.s32.totalorder %v3877_v8, 1677722  ;;  %v3112_v40 = vxor.u32 %v2920_v11, %v2728_v4  ;;  %v3113_v31 = vxor.u32 %v2921_v63, %v2729_v50 }
 0x354   :  { %vm4070_vm3 = vcmp.ge.s32.totalorder %v3878_v55, 1677722  ;;  %v4260_v1 = vsel %vm4068_vm1, %v1562_v18, 0.0  ;;  %v4261_v43 = vsel %vm4069_vm2, %v1563_v47, 0.0  ;;  %v3303_v7 = vmul.u32 3266489909, %v3111_v19 }
 0x355   :  { %v4262_v51 = vsel %vm4070_vm3, %v1564_v53, 0.0  ;;  %4452 = vst [vmem:[#allocation7 + $0x408] sm:$0xff] %v4260_v1  ;;  %4453 = vst [vmem:[#allocation7 + $0x410] sm:$0xff] %v4261_v43  ;;  %v3304_v10 = vmul.u32 3266489909, %v3112_v40  ;;  %v1960_v28 = vadd.s32 %v1805_v38, %v6595_v41  ;;  %v1961_v29 = vadd.s32 %v1805_v38, %v6598_v46 }
 0x356   :  { %4454 = vst [vmem:[#allocation7 + $0x418] sm:$0xff] %v4262_v51  ;;  %v3305_v21 = vmul.u32 3266489909, %v3113_v31  ;;  %v2154_v14 = vxor.u32 %v6614_v12, %v1959_v6  ;;  %5010 = vrcp.f32 %v1350_v13  ;;  %v3495_v35 = vshrl.u32 %v3303_v7, 16 }
 0x357   :  { %v3496_v61 = vshrl.u32 %v3304_v10, 16  ;;  %v2155_v18 = vxor.u32 %v6614_v12, %v1960_v28  ;;  %v1806_v47 = vmul.u32 384, %v1672_v25  ;;  %v2156_v52 = vxor.u32 %v6614_v12, %v1961_v29 }
 0x358   :  { %v3497_v53 = vshrl.u32 %v3305_v21, 16  ;;  %v2346_v26 = vshrl.u32 %v2154_v14, 16  ;;  %v1351_v15 = vmul.f32 0.9, %v1236_v58  ;;  %v3687_v4 = vxor.u32 %v3495_v35, %v3303_v7  ;;  %v1240_v58 = vpop.xlane.xlu1 %1239 }
 0x359   :  { %v3688_v9 = vxor.u32 %v3496_v61, %v3304_v10  ;;  %v2347_v50 = vshrl.u32 %v2155_v18, 16  ;;  %v1962_v57 = vadd.s32 %v1806_v47, %v6576_v33  ;;  %v2348_v38 = vshrl.u32 %v2156_v52, 16 }
 0x35a   :  { %v3689_v22 = vxor.u32 %v3497_v53, %v3305_v21  ;;  %v2538_v2 = vxor.u32 %v2346_v26, %v2154_v14  ;;  %v1963_v13 = vadd.s32 %v1806_v47, %v6595_v41  ;;  %v3879_v8 = vshrl.u32 %v3687_v4, 8 }
 0x35b   :  { %v3880_v30 = vshrl.u32 %v3688_v9, 8  ;;  %v2539_v11 = vxor.u32 %v2347_v50, %v2155_v18  ;;  %v1964_v25 = vadd.s32 %v1806_v47, %v6598_v46  ;;  %v2540_v63 = vxor.u32 %v2348_v38, %v2156_v52 }
 0x35c   :  { %v3881_v55 = vshrl.u32 %v3689_v22, 8  ;;  %v2730_v0 = vmul.u32 2246822507, %v2538_v2  ;;  %v2157_v6 = vxor.u32 %v6614_v12, %v1962_v57  ;;  %vm4071_vm4 = vcmp.ge.s32.totalorder %v3879_v8, 1677722  ;;  %v8165_v22 = vld [vmem:[#allocation135_spill] sm:$0xff] }
 0x35d   :  { %vm4072_vm5 = vcmp.ge.s32.totalorder %v3880_v30, 1677722  ;;  %v2731_v19 = vmul.u32 2246822507, %v2539_v11  ;;  %v2158_v40 = vxor.u32 %v6614_v12, %v1963_v13  ;;  %v4263_v1 = vsel %vm4071_vm4, %v7384_v39, 0.0  ;;  %v8166_v2 = vld [vmem:[#allocation136_spill] sm:$0xff] }
 0x35e   :  { %vm4073_vm6 = vcmp.ge.s32.totalorder %v3881_v55, 1677722  ;;  %v4264_v43 = vsel %vm4072_vm5, %v7387_v34, 0.0  ;;  %v2732_v31 = vmul.u32 2246822507, %v2540_v63  ;;  %4455 = vst [vmem:[#allocation7 + $0x420] sm:$0xff] %v4263_v1  ;;  %v2159_v28 = vxor.u32 %v6614_v12, %v1964_v25 }
 0x35f   :  { %v4265_v51 = vsel %vm4073_vm6, %v1567_v16, 0.0  ;;  %4456 = vst [vmem:[#allocation7 + $0x428] sm:$0xff] %v4264_v43  ;;  %v2922_v7 = vshrl.u32 %v2730_v0, 13  ;;  %v2923_v10 = vshrl.u32 %v2731_v19, 13  ;;  %v2349_v29 = vshrl.u32 %v2157_v6, 16  ;;  %v8167_v13 = vld [vmem:[#allocation137_spill] sm:$0xff] }
 0x360   :  { %4457 = vst [vmem:[#allocation7 + $0x430] sm:$0xff] %v4265_v51  ;;  %v2924_v21 = vshrl.u32 %v2732_v31, 13  ;;  %v2350_v14 = vshrl.u32 %v2158_v40, 16  ;;  %5012 = vrcp.f32 %v1351_v15  ;;  %v2351_v18 = vshrl.u32 %v2159_v28, 16 }
 0x361   :  { %v3114_v35 = vxor.u32 %v2922_v7, %v2730_v0  ;;  %v3115_v61 = vxor.u32 %v2923_v10, %v2731_v19  ;;  %v1673_v39 = vadd.s32 376, %v6574_v36  ;;  %v2541_v47 = vxor.u32 %v2349_v29, %v2157_v6 }
 0x362   :  { %v3116_v34 = vxor.u32 %v2924_v21, %v2732_v31  ;;  %v2542_v16 = vxor.u32 %v2350_v14, %v2158_v40  ;;  %v1352_v53 = vmul.f32 0.9, %v1240_v58  ;;  %v2543_v9 = vxor.u32 %v2351_v18, %v2159_v28 }
 0x363   :  { %v5011_v52 = vpop.eup %5010  ;;  %v3306_v26 = vmul.u32 3266489909, %v3114_v35  ;;  %v3307_v4 = vmul.u32 3266489909, %v3115_v61  ;;  %v1674_v50 = vadd.s32 384, %v6574_v36 }
 0x364   :  { %v3308_v57 = vmul.u32 3266489909, %v3116_v34  ;;  %v1568_v38 = vmul.f32 %v5011_v52, %v8165_v22  ;;  %v1569_v15 = vmul.f32 %v5011_v52, %v8166_v2  ;;  %v1570_v8 = vmul.f32 %v5011_v52, %v8167_v13  ;;  %v1244_v22 = vpop.xlane.xlu0 %1243  ;;  %v8168_v13 = vld [vmem:[#allocation138_spill] sm:$0xff] }
 0x365   :  { %v3498_v30 = vshrl.u32 %v3306_v26, 16  ;;  %v3499_v11 = vshrl.u32 %v3307_v4, 16  ;;  %v2733_v25 = vmul.u32 2246822507, %v2541_v47  ;;  %v2734_v55 = vmul.u32 2246822507, %v2542_v16 }
 0x366   :  { %v3500_v63 = vshrl.u32 %v3308_v57, 16  ;;  %v2735_v0 = vmul.u32 2246822507, %v2543_v9  ;;  %v1807_v6 = vmul.u32 384, %v1673_v39  ;;  %5014 = vrcp.f32 %v1352_v53 }
 0x367   :  { %v3690_v19 = vxor.u32 %v3498_v30, %v3306_v26  ;;  %v3691_v40 = vxor.u32 %v3499_v11, %v3307_v4  ;;  %v2925_v1 = vshrl.u32 %v2733_v25, 13  ;;  %v2926_v43 = vshrl.u32 %v2734_v55, 13  ;;  %v8169_v11 = vld [vmem:[#allocation139_spill] sm:$0xff] }
 0x368   :  { %v3692_v31 = vxor.u32 %v3500_v63, %v3308_v57  ;;  %v2927_v51 = vshrl.u32 %v2735_v0, 13  ;;  %v1965_v7 = vadd.s32 %v1807_v6, %v6576_v33  ;;  %v1966_v10 = vadd.s32 %v1807_v6, %v6595_v41 }
 0x369   :  { %v3882_v28 = vshrl.u32 %v3690_v19, 8  ;;  %v3883_v58 = vshrl.u32 %v3691_v40, 8  ;;  %v3117_v21 = vxor.u32 %v2925_v1, %v2733_v25  ;;  %v3118_v29 = vxor.u32 %v2926_v43, %v2734_v55  ;;  %v8170_v55 = vld [vmem:[#allocation140_spill] sm:$0xff] }
 0x36a   :  { %v3884_v14 = vshrl.u32 %v3692_v31, 8  ;;  %v3119_v35 = vxor.u32 %v2927_v51, %v2735_v0  ;;  %v1967_v61 = vadd.s32 %v1807_v6, %v6598_v46  ;;  %v2160_v18 = vxor.u32 %v6614_v12, %v1965_v7 }
 0x36b   :  { %vm4074_vm7 = vcmp.ge.s32.totalorder %v3882_v28, 1677722  ;;  %vm4075_vm8 = vcmp.ge.s32.totalorder %v3883_v58, 1677722  ;;  %v3309_v39 = vmul.u32 3266489909, %v3117_v21  ;;  %v2161_v34 = vxor.u32 %v6614_v12, %v1966_v10 }
 0x36c   :  { %vm4076_vm9 = vcmp.ge.s32.totalorder %v3884_v14, 1677722  ;;  %v4266_v47 = vsel %vm4074_vm7, %v1568_v38, 0.0  ;;  %v4267_v16 = vsel %vm4075_vm8, %v1569_v15, 0.0  ;;  %v3310_v53 = vmul.u32 3266489909, %v3118_v29 }
 0x36d   :  { %v5013_v52 = vpop.eup %5012  ;;  %v4268_v26 = vsel %vm4076_vm9, %v1570_v8, 0.0  ;;  %4458 = vst [vmem:[#allocation7 + $0x438] sm:$0xff] %v4266_v47  ;;  %4459 = vst [vmem:[#allocation7 + $0x440] sm:$0xff] %v4267_v16  ;;  %v3311_v4 = vmul.u32 3266489909, %v3119_v35  ;;  %v3501_v9 = vshrl.u32 %v3309_v39, 16  ;;  %v2162_v57 = vxor.u32 %v6614_v12, %v1967_v61 }
 0x36e   :  { %4460 = vst [vmem:[#allocation7 + $0x448] sm:$0xff] %v4268_v26  ;;  %v3502_v2 = vshrl.u32 %v3310_v53, 16  ;;  %v1571_v30 = vmul.f32 %v5013_v52, %v8168_v13  ;;  %v1572_v25 = vmul.f32 %v5013_v52, %v8169_v11  ;;  %v1573_v63 = vmul.f32 %v5013_v52, %v8170_v55  ;;  %v8171_v47 = vld [vmem:[#allocation141_spill] sm:$0xff]  ;;  %v1248_v55 = vpop.xlane.xlu1 %1247 }
 0x36f   :  { %v3503_v38 = vshrl.u32 %v3311_v4, 16  ;;  %v3693_v15 = vxor.u32 %v3501_v9, %v3309_v39  ;;  %v2352_v0 = vshrl.u32 %v2160_v18, 16  ;;  %v2353_v6 = vshrl.u32 %v2161_v34, 16 }
 0x370   :  { %v3694_v8 = vxor.u32 %v3502_v2, %v3310_v53  ;;  %v2354_v19 = vshrl.u32 %v2162_v57, 16  ;;  %v1808_v40 = vmul.u32 384, %v1674_v50  ;;  %v1353_v1 = vmul.f32 0.9, %v1244_v22 }
 0x371   :  { %v3695_v43 = vxor.u32 %v3503_v38, %v3311_v4  ;;  %v3885_v31 = vshrl.u32 %v3693_v15, 8  ;;  %v2544_v51 = vxor.u32 %v2352_v0, %v2160_v18  ;;  %v2545_v7 = vxor.u32 %v2353_v6, %v2161_v34  ;;  %v8172_v4 = vld [vmem:[#allocation142_spill] sm:$0xff] }
 0x372   :  { %v3886_v10 = vshrl.u32 %v3694_v8, 8  ;;  %v2546_v28 = vxor.u32 %v2354_v19, %v2162_v57  ;;  %v1968_v58 = vadd.s32 %v1808_v40, %v6576_v33  ;;  %v1969_v21 = vadd.s32 %v1808_v40, %v6595_v41  ;;  %v8173_v57 = vld [vmem:[#allocation143_spill] sm:$0xff] }
 0x373   :  { %v5015_v29 = vpop.eup %5014  ;;  %v3887_v14 = vshrl.u32 %v3695_v43, 8  ;;  %vm4077_vm10 = vcmp.ge.s32.totalorder %v3885_v31, 1677722  ;;  %v2736_v35 = vmul.u32 2246822507, %v2544_v51  ;;  %v1970_v61 = vadd.s32 %v1808_v40, %v6598_v46 }
 0x374   :  { %vm4078_vm11 = vcmp.ge.s32.totalorder %v3886_v10, 1677722  ;;  %v4269_v39 = vsel %vm4077_vm10, %v1571_v30, 0.0  ;;  %v2737_v50 = vmul.u32 2246822507, %v2545_v7  ;;  %v7422_v16 = vmul.f32 %v5015_v29, %v8171_v47 }
 0x375   :  { %vm4079_vm12 = vcmp.ge.s32.totalorder %v3887_v14, 1677722  ;;  %v4270_v18 = vsel %vm4078_vm11, %v1572_v25, 0.0  ;;  %4461 = vst [vmem:[#allocation7 + $0x450] sm:$0xff] %v4269_v39  ;;  %v2738_v34 = vmul.u32 2246822507, %v2546_v28  ;;  %v1575_v9 = vmul.f32 %v5015_v29, %v8172_v4 }
 0x376   :  { %v2928_v53 = vshrl.u32 %v2736_v35, 13  ;;  %v4271_v52 = vsel %vm4079_vm12, %v1573_v63, 0.0  ;;  %4462 = vst [vmem:[#allocation7 + $0x458] sm:$0xff] %v4270_v18  ;;  %v2929_v26 = vshrl.u32 %v2737_v50, 13  ;;  %v1576_v22 = vmul.f32 %v5015_v29, %v8173_v57 }
 0x377   :  { %4463 = vst [vmem:[#allocation7 + $0x460] sm:$0xff] %v4271_v52  ;;  %v2930_v2 = vshrl.u32 %v2738_v34, 13  ;;  %v2163_v30 = vxor.u32 %v6614_v12, %v1968_v58  ;;  %v2164_v11 = vxor.u32 %v6614_v12, %v1969_v21  ;;  %v2165_v25 = vxor.u32 %v6614_v12, %v1970_v61 }
 0x378   :  { %v3120_v13 = vxor.u32 %v2928_v53, %v2736_v35  ;;  %v3121_v38 = vxor.u32 %v2929_v26, %v2737_v50  ;;  %5016 = vrcp.f32 %v1353_v1  ;;  %v1675_v63 = vadd.s32 392, %v6574_v36 }
 0x379   :  { %v3122_v15 = vxor.u32 %v2930_v2, %v2738_v34  ;;  %v2355_v6 = vshrl.u32 %v2163_v30, 16  ;;  %v2356_v8 = vshrl.u32 %v2164_v11, 16  ;;  %v2357_v40 = vshrl.u32 %v2165_v25, 16 }
 0x37a   :  { %v3312_v0 = vmul.u32 3266489909, %v3120_v13  ;;  %v3313_v19 = vmul.u32 3266489909, %v3121_v38  ;;  %v1354_v31 = vmul.f32 0.9, %v1248_v55 }
 0x37b   :  { %v1809_v43 = vmul.u32 384, %v1675_v63  ;;  %v3314_v51 = vmul.u32 3266489909, %v3122_v15  ;;  %v2547_v10 = vxor.u32 %v2355_v6, %v2163_v30  ;;  %v2548_v28 = vxor.u32 %v2356_v8, %v2164_v11 }
 0x37c   :  { %v3504_v7 = vshrl.u32 %v3312_v0, 16  ;;  %v3505_v58 = vshrl.u32 %v3313_v19, 16  ;;  %v2549_v21 = vxor.u32 %v2357_v40, %v2165_v25  ;;  %5018 = vrcp.f32 %v1354_v31 }
 0x37d   :  { %v1971_v29 = vadd.s32 %v1809_v43, %v6576_v33  ;;  %v1972_v1 = vadd.s32 %v1809_v43, %v6595_v41  ;;  %v3506_v14 = vshrl.u32 %v3314_v51, 16  ;;  %v2739_v61 = vmul.u32 2246822507, %v2547_v10 }
 0x37e   :  { %v3696_v35 = vxor.u32 %v3504_v7, %v3312_v0  ;;  %v2740_v39 = vmul.u32 2246822507, %v2548_v28  ;;  %v3697_v50 = vxor.u32 %v3505_v58, %v3313_v19  ;;  %v2741_v47 = vmul.u32 2246822507, %v2549_v21 }
 0x37f   :  { %v1973_v18 = vadd.s32 %v1809_v43, %v6598_v46  ;;  %v2166_v34 = vxor.u32 %v6614_v12, %v1971_v29  ;;  %v3698_v53 = vxor.u32 %v3506_v14, %v3314_v51  ;;  %v2931_v26 = vshrl.u32 %v2739_v61, 13  ;;  %v8174_v29 = vld [vmem:[#allocation144_spill] sm:$0xff]  ;;  %v8175_v14 = vld [vmem:[#allocation145_spill] sm:$0xff] }
 0x380   :  { %v3888_v52 = vshrl.u32 %v3696_v35, 8  ;;  %v2932_v4 = vshrl.u32 %v2740_v39, 13  ;;  %v3889_v57 = vshrl.u32 %v3697_v50, 8  ;;  %v2933_v2 = vshrl.u32 %v2741_v47, 13  ;;  %v1252_v35 = vpop.xlane.xlu0 %1251 }
 0x381   :  { %v2167_v13 = vxor.u32 %v6614_v12, %v1972_v1  ;;  %v2168_v30 = vxor.u32 %v6614_v12, %v1973_v18  ;;  %v3890_v11 = vshrl.u32 %v3698_v53, 8  ;;  %v3123_v55 = vxor.u32 %v2931_v26, %v2739_v61 }
 0x382   :  { %vm4080_vm13 = vcmp.ge.s32.totalorder %v3888_v52, 1677722  ;;  %v3124_v38 = vxor.u32 %v2932_v4, %v2740_v39  ;;  %vm4081_vm14 = vcmp.ge.s32.totalorder %v3889_v57, 1677722  ;;  %v3125_v63 = vxor.u32 %v2933_v2, %v2741_v47  ;;  %v8176_v39 = vld [vmem:[#allocation146_spill] sm:$0xff] }
 0x383   :  { %v4272_v25 = vsel %vm4080_vm13, %v7422_v16, 0.0  ;;  %v2358_v15 = vshrl.u32 %v2166_v34, 16  ;;  %vm4082_vm15 = vcmp.ge.s32.totalorder %v3890_v11, 1677722  ;;  %v4273_v0 = vsel %vm4081_vm14, %v1575_v9, 0.0 }
 0x384   :  { %4464 = vst [vmem:[#allocation7 + $0x468] sm:$0xff] %v4272_v25  ;;  %v3315_v6 = vmul.u32 3266489909, %v3123_v55  ;;  %v2359_v8 = vshrl.u32 %v2167_v13, 16  ;;  %v4274_v19 = vsel %vm4082_vm15, %v1576_v22, 0.0  ;;  %4465 = vst [vmem:[#allocation7 + $0x470] sm:$0xff] %v4273_v0 }
 0x385   :  { %v3316_v40 = vmul.u32 3266489909, %v3124_v38  ;;  %v3317_v43 = vmul.u32 3266489909, %v3125_v63  ;;  %v2360_v51 = vshrl.u32 %v2168_v30, 16  ;;  %v5017_v7 = vpop.eup %5016  ;;  %4466 = vst [vmem:[#allocation7 + $0x478] sm:$0xff] %v4274_v19  ;;  %v2550_v28 = vxor.u32 %v2358_v15, %v2166_v34  ;;  %v1256_v15 = vpop.xlane.xlu1 %1255 }
 0x386   :  { %v3507_v10 = vshrl.u32 %v3315_v6, 16  ;;  %v2551_v58 = vxor.u32 %v2359_v8, %v2167_v13  ;;  %v1577_v1 = vmul.f32 %v5017_v7, %v8174_v29  ;;  %v1578_v9 = vmul.f32 %v5017_v7, %v8175_v14 }
 0x387   :  { %v3508_v21 = vshrl.u32 %v3316_v40, 16  ;;  %v3509_v16 = vshrl.u32 %v3317_v43, 16  ;;  %v1579_v22 = vmul.f32 %v5017_v7, %v8176_v39  ;;  %v2552_v50 = vxor.u32 %v2360_v51, %v2168_v30 }
 0x388   :  { %v3699_v61 = vxor.u32 %v3507_v10, %v3315_v6  ;;  %v2742_v47 = vmul.u32 2246822507, %v2550_v28  ;;  %v2743_v52 = vmul.u32 2246822507, %v2551_v58  ;;  %v1676_v26 = vadd.s32 400, %v6574_v36 }
 0x389   :  { %v3700_v18 = vxor.u32 %v3508_v21, %v3316_v40  ;;  %v3701_v53 = vxor.u32 %v3509_v16, %v3317_v43  ;;  %v2744_v4 = vmul.u32 2246822507, %v2552_v50  ;;  %v1355_v57 = vmul.f32 0.9, %v1252_v35  ;;  %v5019_v39 = vpop.eup %5018 }
 0x38a   :  { %v3891_v34 = vshrl.u32 %v3699_v61, 8  ;;  %v2934_v31 = vshrl.u32 %v2742_v47, 13  ;;  %v2935_v11 = vshrl.u32 %v2743_v52, 13  ;;  %v1810_v55 = vmul.u32 384, %v1676_v26  ;;  %v8177_v26 = vld [vmem:[#allocation147_spill] sm:$0xff] }
 0x38b   :  { %v3892_v2 = vshrl.u32 %v3700_v18, 8  ;;  %v3893_v13 = vshrl.u32 %v3701_v53, 8  ;;  %v2936_v38 = vshrl.u32 %v2744_v4, 13  ;;  %5020 = vrcp.f32 %v1355_v57 }
 0x38c   :  { %vm4083_vm0 = vcmp.ge.s32.totalorder %v3891_v34, 1677722  ;;  %v3126_v25 = vxor.u32 %v2934_v31, %v2742_v47  ;;  %v3127_v63 = vxor.u32 %v2935_v11, %v2743_v52  ;;  %v1974_v43 = vadd.s32 %v1810_v55, %v6576_v33 }
 0x38d   :  { %vm4084_vm1 = vcmp.ge.s32.totalorder %v3892_v2, 1677722  ;;  %vm4085_vm2 = vcmp.ge.s32.totalorder %v3893_v13, 1677722  ;;  %v4275_v30 = vsel %vm4083_vm0, %v1577_v1, 0.0  ;;  %v3128_v8 = vxor.u32 %v2936_v38, %v2744_v4  ;;  %v8178_v4 = vld [vmem:[#allocation148_spill] sm:$0xff] }
 0x38e   :  { %v4276_v0 = vsel %vm4084_vm1, %v1578_v9, 0.0  ;;  %v4277_v6 = vsel %vm4085_vm2, %v1579_v22, 0.0  ;;  %4467 = vst [vmem:[#allocation7 + $0x480] sm:$0xff] %v4275_v30  ;;  %v3318_v19 = vmul.u32 3266489909, %v3126_v25  ;;  %v1975_v51 = vadd.s32 %v1810_v55, %v6595_v41  ;;  %v8179_v2 = vld [vmem:[#allocation149_spill] sm:$0xff] }
 0x38f   :  { %4468 = vst [vmem:[#allocation7 + $0x488] sm:$0xff] %v4276_v0  ;;  %4469 = vst [vmem:[#allocation7 + $0x490] sm:$0xff] %v4277_v6  ;;  %v3319_v40 = vmul.u32 3266489909, %v3127_v63  ;;  %v1976_v7 = vadd.s32 %v1810_v55, %v6598_v46  ;;  %v3320_v10 = vmul.u32 3266489909, %v3128_v8  ;;  %v2169_v29 = vxor.u32 %v6614_v12, %v1974_v43 }
 0x390   :  { %v3510_v28 = vshrl.u32 %v3318_v19, 16  ;;  %v1677_v58 = vadd.s32 408, %v6574_v36  ;;  %v1356_v21 = vmul.f32 0.9, %v1256_v15  ;;  %v2170_v1 = vxor.u32 %v6614_v12, %v1975_v51 }
 0x391   :  { %v3511_v16 = vshrl.u32 %v3319_v40, 16  ;;  %v2171_v14 = vxor.u32 %v6614_v12, %v1976_v7  ;;  %v3512_v9 = vshrl.u32 %v3320_v10, 16  ;;  %v2361_v50 = vshrl.u32 %v2169_v29, 16 }
 0x392   :  { %v3702_v35 = vxor.u32 %v3510_v28, %v3318_v19  ;;  %v1811_v61 = vmul.u32 384, %v1677_v58  ;;  %5022 = vrcp.f32 %v1356_v21  ;;  %v2362_v47 = vshrl.u32 %v2170_v1, 16  ;;  %v1260_v28 = vpop.xlane.xlu0 %1259  ;;  %v8180_v21 = vld [vmem:[#allocation150_spill] sm:$0xff] }
 0x393   :  { %v3703_v22 = vxor.u32 %v3511_v16, %v3319_v40  ;;  %v2363_v18 = vshrl.u32 %v2171_v14, 16  ;;  %v3704_v53 = vxor.u32 %v3512_v9, %v3320_v10  ;;  %v1580_v34 = vmul.f32 %v5019_v39, %v8177_v26 }
 0x394   :  { %v3894_v52 = vshrl.u32 %v3702_v35, 8  ;;  %v1581_v31 = vmul.f32 %v5019_v39, %v8178_v4  ;;  %v1582_v13 = vmul.f32 %v5019_v39, %v8179_v2  ;;  %v2553_v11 = vxor.u32 %v2361_v50, %v2169_v29  ;;  %v8181_v29 = vld [vmem:[#allocation151_spill] sm:$0xff] }
 0x395   :  { %v3895_v57 = vshrl.u32 %v3703_v22, 8  ;;  %v2554_v55 = vxor.u32 %v2362_v47, %v2170_v1  ;;  %v3896_v38 = vshrl.u32 %v3704_v53, 8  ;;  %v2555_v25 = vxor.u32 %v2363_v18, %v2171_v14 }
 0x396   :  { %vm4086_vm3 = vcmp.ge.s32.totalorder %v3894_v52, 1677722  ;;  %v1977_v30 = vadd.s32 %v1811_v61, %v6576_v33  ;;  %v2745_v15 = vmul.u32 2246822507, %v2553_v11  ;;  %v1978_v0 = vadd.s32 %v1811_v61, %v6595_v41 }
 0x397   :  { %vm4087_vm4 = vcmp.ge.s32.totalorder %v3895_v57, 1677722  ;;  %v4278_v63 = vsel %vm4086_vm3, %v1580_v34, 0.0  ;;  %vm4088_vm5 = vcmp.ge.s32.totalorder %v3896_v38, 1677722  ;;  %v1979_v19 = vadd.s32 %v1811_v61, %v6598_v46 }
 0x398   :  { %v4279_v6 = vsel %vm4087_vm4, %v1581_v31, 0.0  ;;  %4470 = vst [vmem:[#allocation7 + $0x498] sm:$0xff] %v4278_v63  ;;  %v2746_v8 = vmul.u32 2246822507, %v2554_v55  ;;  %v5021_v40 = vpop.eup %5020  ;;  %v4280_v43 = vsel %vm4088_vm5, %v1582_v13, 0.0  ;;  %v2937_v7 = vshrl.u32 %v2745_v15, 13 }
 0x399   :  { %4471 = vst [vmem:[#allocation7 + $0x4a0] sm:$0xff] %v4279_v6  ;;  %v2747_v51 = vmul.u32 2246822507, %v2555_v25  ;;  %v2172_v10 = vxor.u32 %v6614_v12, %v1977_v30  ;;  %4472 = vst [vmem:[#allocation7 + $0x4a8] sm:$0xff] %v4280_v43  ;;  %v1583_v16 = vmul.f32 %v5021_v40, %v8180_v21  ;;  %v1584_v1 = vmul.f32 %v5021_v40, %v8181_v29 }
 0x39a   :  { %v2938_v58 = vshrl.u32 %v2746_v8, 13  ;;  %v1585_v14 = vmul.f32 %v5021_v40, %v6644_v17  ;;  %v3129_v35 = vxor.u32 %v2937_v7, %v2745_v15  ;;  %v2173_v61 = vxor.u32 %v6614_v12, %v1978_v0 }
 0x39b   :  { %v2939_v9 = vshrl.u32 %v2747_v51, 13  ;;  %v2174_v39 = vxor.u32 %v6614_v12, %v1979_v19  ;;  %v2364_v50 = vshrl.u32 %v2172_v10, 16  ;;  %v1678_v47 = vadd.s32 416, %v6574_v36 }
 0x39c   :  { %v3130_v22 = vxor.u32 %v2938_v58, %v2746_v8  ;;  %v1357_v18 = vmul.f32 0.9, %v1260_v28  ;;  %v3321_v52 = vmul.u32 3266489909, %v3129_v35  ;;  %v2365_v26 = vshrl.u32 %v2173_v61, 16 }
 0x39d   :  { %v3131_v53 = vxor.u32 %v2939_v9, %v2747_v51  ;;  %v2366_v34 = vshrl.u32 %v2174_v39, 16  ;;  %v2556_v31 = vxor.u32 %v2364_v50, %v2172_v10  ;;  %v1812_v57 = vmul.u32 384, %v1678_v47 }
 0x39e   :  { %v3322_v4 = vmul.u32 3266489909, %v3130_v22  ;;  %5024 = vrcp.f32 %v1357_v18  ;;  %v3513_v13 = vshrl.u32 %v3321_v52, 16  ;;  %v2557_v11 = vxor.u32 %v2365_v26, %v2173_v61 }
 0x39f   :  { %v5023_v17 = vpop.eup %5022  ;;  %v3323_v2 = vmul.u32 3266489909, %v3131_v53  ;;  %v2558_v55 = vxor.u32 %v2366_v34, %v2174_v39  ;;  %v2748_v25 = vmul.u32 2246822507, %v2556_v31  ;;  %v1980_v51 = vadd.s32 %v1812_v57, %v6576_v33  ;;  %v1264_v53 = vpop.xlane.xlu1 %1263 }
 0x3a0   :  { %v3514_v38 = vshrl.u32 %v3322_v4, 16  ;;  %v7462_v30 = vmul.f32 %v5023_v17, %v6649_v23  ;;  %v7465_v63 = vmul.f32 %v5023_v17, %v6654_v44  ;;  %v3705_v0 = vxor.u32 %v3513_v13, %v3321_v52 }
 0x3a1   :  { %v3515_v15 = vshrl.u32 %v3323_v2, 16  ;;  %v2749_v6 = vmul.u32 2246822507, %v2557_v11  ;;  %v2750_v8 = vmul.u32 2246822507, %v2558_v55  ;;  %v2940_v40 = vshrl.u32 %v2748_v25, 13 }
 0x3a2   :  { %v3706_v19 = vxor.u32 %v3514_v38, %v3322_v4  ;;  %v7468_v43 = vmul.f32 %v5023_v17, %v6658_v3  ;;  %v3897_v10 = vshrl.u32 %v3705_v0, 8  ;;  %v1981_v44 = vadd.s32 %v1812_v57, %v6595_v41 }
 0x3a3   :  { %v3707_v7 = vxor.u32 %v3515_v15, %v3323_v2  ;;  %v2941_v28 = vshrl.u32 %v2749_v6, 13  ;;  %v2942_v58 = vshrl.u32 %v2750_v8, 13  ;;  %v3132_v21 = vxor.u32 %v2940_v40, %v2748_v25 }
 0x3a4   :  { %v3898_v23 = vshrl.u32 %v3706_v19, 8  ;;  %v1982_v29 = vadd.s32 %v1812_v57, %v6598_v46  ;;  %vm4089_vm6 = vcmp.ge.s32.totalorder %v3897_v10, 1677722  ;;  %v2175_v22 = vxor.u32 %v6614_v12, %v1980_v51  ;;  %v8182_v19 = vld [vmem:[#allocation152_spill] sm:$0xff] }
 0x3a5   :  { %v3899_v9 = vshrl.u32 %v3707_v7, 8  ;;  %v3133_v35 = vxor.u32 %v2941_v28, %v2749_v6  ;;  %v3134_v61 = vxor.u32 %v2942_v58, %v2750_v8  ;;  %v4281_v39 = vsel %vm4089_vm6, %v1583_v16, 0.0  ;;  %v8183_v28 = vld [vmem:[#allocation153_spill] sm:$0xff] }
 0x3a6   :  { %vm4090_vm7 = vcmp.ge.s32.totalorder %v3898_v23, 1677722  ;;  %v3324_v3 = vmul.u32 3266489909, %v3132_v21  ;;  %4473 = vst [vmem:[#allocation7 + $0x4b0] sm:$0xff] %v4281_v39  ;;  %v2176_v18 = vxor.u32 %v6614_v12, %v1981_v44  ;;  %v2177_v4 = vxor.u32 %v6614_v12, %v1982_v29 }
 0x3a7   :  { %vm4091_vm8 = vcmp.ge.s32.totalorder %v3899_v9, 1677722  ;;  %v4282_v50 = vsel %vm4090_vm7, %v1584_v1, 0.0  ;;  %v3325_v47 = vmul.u32 3266489909, %v3133_v35  ;;  %v2367_v57 = vshrl.u32 %v2175_v22, 16 }
 0x3a8   :  { %v4283_v52 = vsel %vm4091_vm8, %v1585_v14, 0.0  ;;  %4474 = vst [vmem:[#allocation7 + $0x4b8] sm:$0xff] %v4282_v50  ;;  %v3326_v26 = vmul.u32 3266489909, %v3134_v61  ;;  %v3516_v34 = vshrl.u32 %v3324_v3, 16  ;;  %v2368_v16 = vshrl.u32 %v2176_v18, 16 }
 0x3a9   :  { %4475 = vst [vmem:[#allocation7 + $0x4c0] sm:$0xff] %v4283_v52  ;;  %v3517_v31 = vshrl.u32 %v3325_v47, 16  ;;  %v1679_v17 = vadd.s32 424, %v6574_v36  ;;  %v2369_v1 = vshrl.u32 %v2177_v4, 16  ;;  %v1358_v11 = vmul.f32 0.9, %v1264_v53 }
 0x3aa   :  { %v3518_v2 = vshrl.u32 %v3326_v26, 16  ;;  %v3708_v13 = vxor.u32 %v3516_v34, %v3324_v3  ;;  %v2559_v25 = vxor.u32 %v2367_v57, %v2175_v22  ;;  %v2560_v15 = vxor.u32 %v2368_v16, %v2176_v18  ;;  %v1268_v18 = vpop.xlane.xlu0 %1267 }
 0x3ab   :  { %v5025_v55 = vpop.eup %5024  ;;  %v3709_v38 = vxor.u32 %v3517_v31, %v3325_v47  ;;  %v1813_v14 = vmul.u32 384, %v1679_v17  ;;  %v2561_v8 = vxor.u32 %v2369_v1, %v2177_v4  ;;  %5026 = vrcp.f32 %v1358_v11 }
 0x3ac   :  { %v3710_v0 = vxor.u32 %v3518_v2, %v3326_v26  ;;  %v3900_v6 = vshrl.u32 %v3708_v13, 8  ;;  %v7478_v40 = vmul.f32 %v5025_v55, %v8182_v19  ;;  %v2751_v7 = vmul.u32 2246822507, %v2559_v25 }
 0x3ad   :  { %v3901_v51 = vshrl.u32 %v3709_v38, 8  ;;  %v2752_v10 = vmul.u32 2246822507, %v2560_v15  ;;  %v7481_v58 = vmul.f32 %v5025_v55, %v8183_v28  ;;  %v2753_v21 = vmul.u32 2246822507, %v2561_v8 }
 0x3ae   :  { %v3902_v23 = vshrl.u32 %v3710_v0, 8  ;;  %vm4092_vm9 = vcmp.ge.s32.totalorder %v3900_v6, 1677722  ;;  %v7484_v44 = vmul.f32 %v5025_v55, %v6673_v42  ;;  %v2943_v9 = vshrl.u32 %v2751_v7, 13 }
 0x3af   :  { %vm4093_vm10 = vcmp.ge.s32.totalorder %v3901_v51, 1677722  ;;  %v4284_v29 = vsel %vm4092_vm9, %v7462_v30, 0.0  ;;  %v2944_v35 = vshrl.u32 %v2752_v10, 13  ;;  %v2945_v39 = vshrl.u32 %v2753_v21, 13 }
 0x3b0   :  { %vm4094_vm11 = vcmp.ge.s32.totalorder %v3902_v23, 1677722  ;;  %v4285_v61 = vsel %vm4093_vm10, %v7465_v63, 0.0  ;;  %4476 = vst [vmem:[#allocation7 + $0x4c8] sm:$0xff] %v4284_v29  ;;  %v1983_v3 = vadd.s32 %v1813_v14, %v6576_v33  ;;  %v3135_v50 = vxor.u32 %v2943_v9, %v2751_v7 }
 0x3b1   :  { %v4286_v22 = vsel %vm4094_vm11, %v7468_v43, 0.0  ;;  %4477 = vst [vmem:[#allocation7 + $0x4d0] sm:$0xff] %v4285_v61  ;;  %v3136_v47 = vxor.u32 %v2944_v35, %v2752_v10  ;;  %v1984_v42 = vadd.s32 %v1813_v14, %v6595_v41  ;;  %v3137_v53 = vxor.u32 %v2945_v39, %v2753_v21 }
 0x3b2   :  { %4478 = vst [vmem:[#allocation7 + $0x4d8] sm:$0xff] %v4286_v22  ;;  %v1985_v30 = vadd.s32 %v1813_v14, %v6598_v46  ;;  %v2178_v52 = vxor.u32 %v6614_v12, %v1983_v3  ;;  %v3327_v63 = vmul.u32 3266489909, %v3135_v50  ;;  %v1680_v4 = vadd.s32 432, %v6574_v36 }
 0x3b3   :  { %v3328_v26 = vmul.u32 3266489909, %v3136_v47  ;;  %v2179_v34 = vxor.u32 %v6614_v12, %v1984_v42  ;;  %v3329_v43 = vmul.u32 3266489909, %v3137_v53  ;;  %v1359_v16 = vmul.f32 0.9, %v1268_v18 }
 0x3b4   :  { %v2180_v31 = vxor.u32 %v6614_v12, %v1985_v30  ;;  %v2370_v57 = vshrl.u32 %v2178_v52, 16  ;;  %v3519_v17 = vshrl.u32 %v3327_v63, 16  ;;  %v1814_v1 = vmul.u32 384, %v1680_v4 }
 0x3b5   :  { %v3520_v2 = vshrl.u32 %v3328_v26, 16  ;;  %v2371_v13 = vshrl.u32 %v2179_v34, 16  ;;  %v3521_v55 = vshrl.u32 %v3329_v43, 16  ;;  %5028 = vrcp.f32 %v1359_v16 }
 0x3b6   :  { %v2372_v38 = vshrl.u32 %v2180_v31, 16  ;;  %v2562_v25 = vxor.u32 %v2370_v57, %v2178_v52  ;;  %v3711_v11 = vxor.u32 %v3519_v17, %v3327_v63  ;;  %v1986_v0 = vadd.s32 %v1814_v1, %v6576_v33 }
 0x3b7   :  { %v3712_v15 = vxor.u32 %v3520_v2, %v3328_v26  ;;  %v2563_v14 = vxor.u32 %v2371_v13, %v2179_v34  ;;  %v3713_v6 = vxor.u32 %v3521_v55, %v3329_v43  ;;  %v1987_v51 = vadd.s32 %v1814_v1, %v6595_v41 }
 0x3b8   :  { %v2564_v8 = vxor.u32 %v2372_v38, %v2180_v31  ;;  %v2754_v19 = vmul.u32 2246822507, %v2562_v25  ;;  %v3903_v7 = vshrl.u32 %v3711_v11, 8  ;;  %v1988_v23 = vadd.s32 %v1814_v1, %v6598_v46  ;;  %v5027_v34 = vpop.eup %5026 }
 0x3b9   :  { %v3904_v10 = vshrl.u32 %v3712_v15, 8  ;;  %v2755_v28 = vmul.u32 2246822507, %v2563_v14  ;;  %v3905_v21 = vshrl.u32 %v3713_v6, 8  ;;  %v2181_v35 = vxor.u32 %v6614_v12, %v1986_v0 }
 0x3ba   :  { %v2756_v29 = vmul.u32 2246822507, %v2564_v8  ;;  %v2946_v9 = vshrl.u32 %v2754_v19, 13  ;;  %vm4095_vm12 = vcmp.ge.s32.totalorder %v3903_v7, 1677722  ;;  %v2182_v39 = vxor.u32 %v6614_v12, %v1987_v51 }
 0x3bb   :  { %vm4096_vm13 = vcmp.ge.s32.totalorder %v3904_v10, 1677722  ;;  %v2947_v61 = vshrl.u32 %v2755_v28, 13  ;;  %vm4097_vm14 = vcmp.ge.s32.totalorder %v3905_v21, 1677722  ;;  %v4287_v3 = vsel %vm4095_vm12, %v7478_v40, 0.0 }
 0x3bc   :  { %v4288_v22 = vsel %vm4096_vm13, %v7481_v58, 0.0  ;;  %v2948_v50 = vshrl.u32 %v2756_v29, 13  ;;  %v4289_v47 = vsel %vm4097_vm14, %v7484_v44, 0.0  ;;  %4479 = vst [vmem:[#allocation7 + $0x4e0] sm:$0xff] %v4287_v3  ;;  %v3138_v42 = vxor.u32 %v2946_v9, %v2754_v19  ;;  %v1272_v58 = vpop.xlane.xlu1 %1271 }
 0x3bd   :  { %4480 = vst [vmem:[#allocation7 + $0x4e8] sm:$0xff] %v4288_v22  ;;  %v3139_v18 = vxor.u32 %v2947_v61, %v2755_v28  ;;  %v2183_v53 = vxor.u32 %v6614_v12, %v1988_v23  ;;  %4481 = vst [vmem:[#allocation7 + $0x4f0] sm:$0xff] %v4289_v47  ;;  %v2373_v52 = vshrl.u32 %v2181_v35, 16  ;;  %v2374_v63 = vshrl.u32 %v2182_v39, 16 }
 0x3be   :  { %v3140_v30 = vxor.u32 %v2948_v50, %v2756_v29  ;;  %v1681_v26 = vadd.s32 440, %v6574_v36  ;;  %v3330_v4 = vmul.u32 3266489909, %v3138_v42  ;;  %v1682_v31 = vadd.s32 448, %v6574_v36 }
 0x3bf   :  { %v3331_v40 = vmul.u32 3266489909, %v3139_v18  ;;  %v2375_v43 = vshrl.u32 %v2183_v53, 16  ;;  %v1592_v57 = vmul.f32 %v5027_v34, %v6678_v56  ;;  %v1593_v16 = vmul.f32 %v5027_v34, %v6682_v54  ;;  %v1276_v18 = vpop.xlane.xlu0 %1275 }
 0x3c0   :  { %v3332_v44 = vmul.u32 3266489909, %v3140_v30  ;;  %v1594_v17 = vmul.f32 %v5027_v34, %v6686_v59  ;;  %v3522_v2 = vshrl.u32 %v3330_v4, 16  ;;  %v2565_v1 = vxor.u32 %v2373_v52, %v2181_v35 }
 0x3c1   :  { %v3523_v13 = vshrl.u32 %v3331_v40, 16  ;;  %v2566_v55 = vxor.u32 %v2374_v63, %v2182_v39  ;;  %v2567_v25 = vxor.u32 %v2375_v43, %v2183_v53  ;;  %v1815_v11 = vmul.u32 384, %v1681_v26 }
 0x3c2   :  { %v3524_v38 = vshrl.u32 %v3332_v44, 16  ;;  %v1360_v15 = vmul.f32 0.9, %v1272_v58  ;;  %v5029_v14 = vpop.eup %5028  ;;  %v3714_v0 = vxor.u32 %v3522_v2, %v3330_v4  ;;  %v2757_v8 = vmul.u32 2246822507, %v2565_v1 }
 0x3c3   :  { %v3715_v6 = vxor.u32 %v3523_v13, %v3331_v40  ;;  %v2758_v19 = vmul.u32 2246822507, %v2566_v55  ;;  %v2759_v7 = vmul.u32 2246822507, %v2567_v25  ;;  %v7511_v56 = vmul.f32 %v5029_v14, %v6691_v24 }
 0x3c4   :  { %v3716_v51 = vxor.u32 %v3524_v38, %v3332_v44  ;;  %v7514_v54 = vmul.f32 %v5029_v14, %v6694_v45  ;;  %v3906_v59 = vshrl.u32 %v3714_v0, 8  ;;  %v2949_v28 = vshrl.u32 %v2757_v8, 13 }
 0x3c5   :  { %v3907_v10 = vshrl.u32 %v3715_v6, 8  ;;  %v2950_v23 = vshrl.u32 %v2758_v19, 13  ;;  %v2951_v29 = vshrl.u32 %v2759_v7, 13  ;;  %v1597_v9 = vmul.f32 %v5029_v14, %v6698_v5 }
 0x3c6   :  { %v3908_v21 = vshrl.u32 %v3716_v51, 8  ;;  %v1989_v35 = vadd.s32 %v1815_v11, %v6576_v33  ;;  %vm4098_vm15 = vcmp.ge.s32.totalorder %v3906_v59, 1677722  ;;  %v3141_v61 = vxor.u32 %v2949_v28, %v2757_v8 }
 0x3c7   :  { %vm4099_vm0 = vcmp.ge.s32.totalorder %v3907_v10, 1677722  ;;  %v3142_v39 = vxor.u32 %v2950_v23, %v2758_v19  ;;  %v4290_v24 = vsel %vm4098_vm15, %v1592_v57, 0.0  ;;  %v3143_v22 = vxor.u32 %v2951_v29, %v2759_v7  ;;  %v1280_v29 = vpop.xlane.xlu1 %1279 }
 0x3c8   :  { %vm4100_vm1 = vcmp.ge.s32.totalorder %v3908_v21, 1677722  ;;  %v4291_v3 = vsel %vm4099_vm0, %v1593_v16, 0.0  ;;  %4482 = vst [vmem:[#allocation7 + $0x4f8] sm:$0xff] %v4290_v24  ;;  %v3333_v50 = vmul.u32 3266489909, %v3141_v61  ;;  %v1990_v42 = vadd.s32 %v1815_v11, %v6595_v41 }
 0x3c9   :  { %v4292_v45 = vsel %vm4100_vm1, %v1594_v17, 0.0  ;;  %4483 = vst [vmem:[#allocation7 + $0x500] sm:$0xff] %v4291_v3  ;;  %v3334_v47 = vmul.u32 3266489909, %v3142_v39  ;;  %v3335_v5 = vmul.u32 3266489909, %v3143_v22  ;;  %v1991_v53 = vadd.s32 %v1815_v11, %v6598_v46 }
 0x3ca   :  { %4484 = vst [vmem:[#allocation7 + $0x508] sm:$0xff] %v4292_v45  ;;  %v2184_v30 = vxor.u32 %v6614_v12, %v1989_v35  ;;  %5030 = vrcp.f32 %v1360_v15  ;;  %v3525_v52 = vshrl.u32 %v3333_v50, 16  ;;  %v2185_v26 = vxor.u32 %v6614_v12, %v1990_v42 }
 0x3cb   :  { %v3526_v63 = vshrl.u32 %v3334_v47, 16  ;;  %v1816_v34 = vmul.u32 384, %v1682_v31  ;;  %v3527_v4 = vshrl.u32 %v3335_v5, 16  ;;  %v2186_v40 = vxor.u32 %v6614_v12, %v1991_v53 }
 0x3cc   :  { %v2376_v43 = vshrl.u32 %v2184_v30, 16  ;;  %v1361_v58 = vmul.f32 0.9, %v1276_v18  ;;  %v3717_v44 = vxor.u32 %v3525_v52, %v3333_v50  ;;  %v2377_v16 = vshrl.u32 %v2185_v26, 16 }
 0x3cd   :  { %v3718_v57 = vxor.u32 %v3526_v63, %v3334_v47  ;;  %v1992_v17 = vadd.s32 %v1816_v34, %v6576_v33  ;;  %v3719_v2 = vxor.u32 %v3527_v4, %v3335_v5  ;;  %v2378_v13 = vshrl.u32 %v2186_v40, 16 }
 0x3ce   :  { %v2568_v1 = vxor.u32 %v2376_v43, %v2184_v30  ;;  %v1993_v55 = vadd.s32 %v1816_v34, %v6595_v41  ;;  %v3909_v38 = vshrl.u32 %v3717_v44, 8  ;;  %v2569_v11 = vxor.u32 %v2377_v16, %v2185_v26 }
 0x3cf   :  { %v3910_v25 = vshrl.u32 %v3718_v57, 8  ;;  %v1994_v31 = vadd.s32 %v1816_v34, %v6598_v46  ;;  %v3911_v15 = vshrl.u32 %v3719_v2, 8  ;;  %v2570_v14 = vxor.u32 %v2378_v13, %v2186_v40 }
 0x3d0   :  { %v2760_v0 = vmul.u32 2246822507, %v2568_v1  ;;  %v2187_v6 = vxor.u32 %v6614_v12, %v1992_v17  ;;  %vm4101_vm2 = vcmp.ge.s32.totalorder %v3909_v38, 1677722  ;;  %v2761_v8 = vmul.u32 2246822507, %v2569_v11 }
 0x3d1   :  { %vm4102_vm3 = vcmp.ge.s32.totalorder %v3910_v25, 1677722  ;;  %v2188_v19 = vxor.u32 %v6614_v12, %v1993_v55  ;;  %vm4103_vm4 = vcmp.ge.s32.totalorder %v3911_v15, 1677722  ;;  %v4293_v51 = vsel %vm4101_vm2, %v7511_v56, 0.0 }
 0x3d2   :  { %v4294_v7 = vsel %vm4102_vm3, %v7514_v54, 0.0  ;;  %v2762_v59 = vmul.u32 2246822507, %v2570_v14  ;;  %v4295_v10 = vsel %vm4103_vm4, %v1597_v9, 0.0  ;;  %4485 = vst [vmem:[#allocation7 + $0x510] sm:$0xff] %v4293_v51  ;;  %v2952_v28 = vshrl.u32 %v2760_v0, 13 }
 0x3d3   :  { %4486 = vst [vmem:[#allocation7 + $0x518] sm:$0xff] %v4294_v7  ;;  %v2953_v23 = vshrl.u32 %v2761_v8, 13  ;;  %v2189_v21 = vxor.u32 %v6614_v12, %v1994_v31  ;;  %4487 = vst [vmem:[#allocation7 + $0x520] sm:$0xff] %v4295_v10  ;;  %v2379_v61 = vshrl.u32 %v2187_v6, 16  ;;  %v2380_v39 = vshrl.u32 %v2188_v19, 16 }
 0x3d4   :  { %v2954_v35 = vshrl.u32 %v2762_v59, 13  ;;  %5032 = vrcp.f32 %v1361_v58  ;;  %v3144_v24 = vxor.u32 %v2952_v28, %v2760_v0  ;;  %v1683_v56 = vadd.s32 456, %v6574_v36 }
 0x3d5   :  { %v3145_v3 = vxor.u32 %v2953_v23, %v2761_v8  ;;  %v2381_v22 = vshrl.u32 %v2189_v21, 16  ;;  %v2571_v45 = vxor.u32 %v2379_v61, %v2187_v6  ;;  %v2572_v9 = vxor.u32 %v2380_v39, %v2188_v19 }
 0x3d6   :  { %v3146_v54 = vxor.u32 %v2954_v35, %v2762_v59  ;;  %v1362_v50 = vmul.f32 0.9, %v1280_v29  ;;  %v3336_v42 = vmul.u32 3266489909, %v3144_v24  ;;  %v1684_v53 = vadd.s32 464, %v6574_v36  ;;  %v1284_v29 = vpop.xlane.xlu0 %1283  ;;  %v8184_v24 = vld [vmem:[#allocation154_spill] sm:$0xff] }
 0x3d7   :  { %v5031_v47 = vpop.eup %5030  ;;  %v3337_v18 = vmul.u32 3266489909, %v3145_v3  ;;  %v2573_v5 = vxor.u32 %v2381_v22, %v2189_v21  ;;  %v2763_v40 = vmul.u32 2246822507, %v2571_v45 }
 0x3d8   :  { %v3338_v30 = vmul.u32 3266489909, %v3146_v54  ;;  %v1598_v52 = vmul.f32 %v5031_v47, %v6703_v20  ;;  %v1599_v63 = vmul.f32 %v5031_v47, %v6706_v27  ;;  %v1600_v26 = vmul.f32 %v5031_v47, %v6714_v48 }
 0x3d9   :  { %v3528_v34 = vshrl.u32 %v3336_v42, 16  ;;  %v3529_v4 = vshrl.u32 %v3337_v18, 16  ;;  %v2764_v43 = vmul.u32 2246822507, %v2572_v9  ;;  %v2765_v44 = vmul.u32 2246822507, %v2573_v5 }
 0x3da   :  { %v3530_v58 = vshrl.u32 %v3338_v30, 16  ;;  %v1817_v57 = vmul.u32 384, %v1683_v56  ;;  %5034 = vrcp.f32 %v1362_v50  ;;  %v2955_v2 = vshrl.u32 %v2763_v40, 13 }
 0x3db   :  { %v3720_v16 = vxor.u32 %v3528_v34, %v3336_v42  ;;  %v3721_v17 = vxor.u32 %v3529_v4, %v3337_v18  ;;  %v2956_v13 = vshrl.u32 %v2764_v43, 13  ;;  %v2957_v55 = vshrl.u32 %v2765_v44, 13 }
 0x3dc   :  { %v3722_v1 = vxor.u32 %v3530_v58, %v3338_v30  ;;  %v1995_v20 = vadd.s32 %v1817_v57, %v6576_v33  ;;  %v1996_v27 = vadd.s32 %v1817_v57, %v6595_v41  ;;  %v3147_v25 = vxor.u32 %v2955_v2, %v2763_v40 }
 0x3dd   :  { %v3912_v38 = vshrl.u32 %v3720_v16, 8  ;;  %v3913_v48 = vshrl.u32 %v3721_v17, 8  ;;  %v3148_v11 = vxor.u32 %v2956_v13, %v2764_v43  ;;  %v3149_v15 = vxor.u32 %v2957_v55, %v2765_v44  ;;  %v8185_v44 = vld [vmem:[#allocation155_spill] sm:$0xff]  ;;  %v8186_v55 = vld [vmem:[#allocation156_spill] sm:$0xff] }
 0x3de   :  { %v3914_v31 = vshrl.u32 %v3722_v1, 8  ;;  %v1997_v14 = vadd.s32 %v1817_v57, %v6598_v46  ;;  %v2190_v0 = vxor.u32 %v6614_v12, %v1995_v20  ;;  %v3339_v6 = vmul.u32 3266489909, %v3147_v25 }
 0x3df   :  { %vm4104_vm5 = vcmp.ge.s32.totalorder %v3912_v38, 1677722  ;;  %vm4105_vm6 = vcmp.ge.s32.totalorder %v3913_v48, 1677722  ;;  %v2191_v8 = vxor.u32 %v6614_v12, %v1996_v27  ;;  %v3340_v7 = vmul.u32 3266489909, %v3148_v11 }
 0x3e0   :  { %vm4106_vm7 = vcmp.ge.s32.totalorder %v3914_v31, 1677722  ;;  %v4296_v19 = vsel %vm4104_vm5, %v1598_v52, 0.0  ;;  %v4297_v51 = vsel %vm4105_vm6, %v1599_v63, 0.0  ;;  %v3341_v28 = vmul.u32 3266489909, %v3149_v15  ;;  %v1288_v15 = vpop.xlane.xlu1 %1287 }
 0x3e1   :  { %v5033_v59 = vpop.eup %5032  ;;  %v4298_v10 = vsel %vm4106_vm7, %v1600_v26, 0.0  ;;  %4488 = vst [vmem:[#allocation7 + $0x528] sm:$0xff] %v4296_v19  ;;  %4489 = vst [vmem:[#allocation7 + $0x530] sm:$0xff] %v4297_v51  ;;  %v3531_v23 = vshrl.u32 %v3339_v6, 16  ;;  %v2192_v21 = vxor.u32 %v6614_v12, %v1997_v14  ;;  %v3532_v35 = vshrl.u32 %v3340_v7, 16  ;;  %v8187_v27 = vld [vmem:[#allocation157_spill] sm:$0xff] }
 0x3e2   :  { %4490 = vst [vmem:[#allocation7 + $0x538] sm:$0xff] %v4298_v10  ;;  %v1601_v61 = vmul.f32 %v5033_v59, %v6721_v37  ;;  %v1602_v39 = vmul.f32 %v5033_v59, %v6727_v49  ;;  %v1603_v3 = vmul.f32 %v5033_v59, %v8184_v24  ;;  %v3533_v22 = vshrl.u32 %v3341_v28, 16 }
 0x3e3   :  { %v3723_v56 = vxor.u32 %v3531_v23, %v3339_v6  ;;  %v2382_v54 = vshrl.u32 %v2190_v0, 16  ;;  %v2383_v45 = vshrl.u32 %v2191_v8, 16  ;;  %v3724_v9 = vxor.u32 %v3532_v35, %v3340_v7 }
 0x3e4   :  { %v2384_v50 = vshrl.u32 %v2192_v21, 16  ;;  %v1818_v47 = vmul.u32 384, %v1684_v53  ;;  %v1363_v42 = vmul.f32 0.9, %v1284_v29  ;;  %v3725_v18 = vxor.u32 %v3533_v22, %v3341_v28 }
 0x3e5   :  { %v3915_v5 = vshrl.u32 %v3723_v56, 8  ;;  %v2574_v30 = vxor.u32 %v2382_v54, %v2190_v0  ;;  %v2575_v52 = vxor.u32 %v2383_v45, %v2191_v8  ;;  %v3916_v63 = vshrl.u32 %v3724_v9, 8 }
 0x3e6   :  { %v2576_v26 = vxor.u32 %v2384_v50, %v2192_v21  ;;  %v1998_v37 = vadd.s32 %v1818_v47, %v6576_v33  ;;  %v1999_v49 = vadd.s32 %v1818_v47, %v6595_v41  ;;  %v3917_v4 = vshrl.u32 %v3725_v18, 8 }
 0x3e7   :  { %v5035_v34 = vpop.eup %5034  ;;  %vm4107_vm8 = vcmp.ge.s32.totalorder %v3915_v5, 1677722  ;;  %v2766_v40 = vmul.u32 2246822507, %v2574_v30  ;;  %v2000_v43 = vadd.s32 %v1818_v47, %v6598_v46  ;;  %vm4108_vm9 = vcmp.ge.s32.totalorder %v3916_v63, 1677722 }
 0x3e8   :  { %v4299_v58 = vsel %vm4107_vm8, %v1601_v61, 0.0  ;;  %v2767_v53 = vmul.u32 2246822507, %v2575_v52  ;;  %v7549_v57 = vmul.f32 %v5035_v34, %v8185_v44  ;;  %vm4109_vm10 = vcmp.ge.s32.totalorder %v3917_v4, 1677722 }
 0x3e9   :  { %v4300_v16 = vsel %vm4108_vm9, %v1602_v39, 0.0  ;;  %4491 = vst [vmem:[#allocation7 + $0x540] sm:$0xff] %v4299_v58  ;;  %v2768_v17 = vmul.u32 2246822507, %v2576_v26  ;;  %v2958_v2 = vshrl.u32 %v2766_v40, 13  ;;  %v4301_v13 = vsel %vm4109_vm10, %v1603_v3, 0.0 }
 0x3ea   :  { %4492 = vst [vmem:[#allocation7 + $0x548] sm:$0xff] %v4300_v16  ;;  %v2959_v1 = vshrl.u32 %v2767_v53, 13  ;;  %v1605_v20 = vmul.f32 %v5035_v34, %v8186_v55  ;;  %v1606_v38 = vmul.f32 %v5035_v34, %v8187_v27  ;;  %4493 = vst [vmem:[#allocation7 + $0x550] sm:$0xff] %v4301_v13  ;;  %v2193_v11 = vxor.u32 %v6614_v12, %v1998_v37 }
 0x3eb   :  { %v2960_v48 = vshrl.u32 %v2768_v17, 13  ;;  %v3150_v25 = vxor.u32 %v2958_v2, %v2766_v40  ;;  %v2194_v31 = vxor.u32 %v6614_v12, %v1999_v49  ;;  %v2195_v0 = vxor.u32 %v6614_v12, %v2000_v43 }
 0x3ec   :  { %v3151_v14 = vxor.u32 %v2959_v1, %v2767_v53  ;;  %5036 = vrcp.f32 %v1363_v42  ;;  %v1685_v6 = vadd.s32 472, %v6574_v36  ;;  %v2385_v51 = vshrl.u32 %v2193_v11, 16 }
 0x3ed   :  { %v3152_v8 = vxor.u32 %v2960_v48, %v2768_v17  ;;  %v3342_v19 = vmul.u32 3266489909, %v3150_v25  ;;  %v2386_v7 = vshrl.u32 %v2194_v31, 16  ;;  %v2387_v10 = vshrl.u32 %v2195_v0, 16 }
 0x3ee   :  { %v3343_v59 = vmul.u32 3266489909, %v3151_v14  ;;  %v1819_v28 = vmul.u32 384, %v1685_v6  ;;  %v1364_v23 = vmul.f32 0.9, %v1288_v15  ;;  %v2577_v35 = vxor.u32 %v2385_v51, %v2193_v11  ;;  %v8188_v14 = vld [vmem:[#allocation158_spill] sm:$0xff] }
 0x3ef   :  { %v3344_v21 = vmul.u32 3266489909, %v3152_v8  ;;  %v3534_v29 = vshrl.u32 %v3342_v19, 16  ;;  %v2578_v61 = vxor.u32 %v2386_v7, %v2194_v31  ;;  %v2579_v24 = vxor.u32 %v2387_v10, %v2195_v0  ;;  %v8189_v6 = vld [vmem:[#allocation159_spill] sm:$0xff]  ;;  %v1292_v8 = vpop.xlane.xlu0 %1291  ;;  %v8190_v51 = vld [vmem:[#allocation160_spill] sm:$0xff] }
 0x3f0   :  { %v3535_v39 = vshrl.u32 %v3343_v59, 16  ;;  %v2001_v3 = vadd.s32 %v1819_v28, %v6576_v33  ;;  %v2002_v22 = vadd.s32 %v1819_v28, %v6595_v41  ;;  %v2769_v45 = vmul.u32 2246822507, %v2577_v35 }
 0x3f1   :  { %v3536_v56 = vshrl.u32 %v3344_v21, 16  ;;  %v3726_v54 = vxor.u32 %v3534_v29, %v3342_v19  ;;  %v2770_v9 = vmul.u32 2246822507, %v2578_v61  ;;  %v2771_v47 = vmul.u32 2246822507, %v2579_v24 }
 0x3f2   :  { %v3727_v50 = vxor.u32 %v3535_v39, %v3343_v59  ;;  %v2003_v42 = vadd.s32 %v1819_v28, %v6598_v46  ;;  %v2196_v18 = vxor.u32 %v6614_v12, %v2001_v3  ;;  %v2961_v52 = vshrl.u32 %v2769_v45, 13 }
 0x3f3   :  { %v3728_v5 = vxor.u32 %v3536_v56, %v3344_v21  ;;  %v3918_v30 = vshrl.u32 %v3726_v54, 8  ;;  %v2962_v63 = vshrl.u32 %v2770_v9, 13  ;;  %v2963_v37 = vshrl.u32 %v2771_v47, 13 }
 0x3f4   :  { %v3919_v26 = vshrl.u32 %v3727_v50, 8  ;;  %v2197_v49 = vxor.u32 %v6614_v12, %v2002_v22  ;;  %v2198_v34 = vxor.u32 %v6614_v12, %v2003_v42  ;;  %v3153_v40 = vxor.u32 %v2961_v52, %v2769_v45 }
 0x3f5   :  { %v3920_v4 = vshrl.u32 %v3728_v5, 8  ;;  %vm4110_vm11 = vcmp.ge.s32.totalorder %v3918_v30, 1677722  ;;  %v3154_v43 = vxor.u32 %v2962_v63, %v2770_v9  ;;  %v3155_v53 = vxor.u32 %v2963_v37, %v2771_v47  ;;  %v1296_v47 = vpop.xlane.xlu1 %1295 }
 0x3f6   :  { %vm4111_vm12 = vcmp.ge.s32.totalorder %v3919_v26, 1677722  ;;  %v4302_v58 = vsel %vm4110_vm11, %v7549_v57, 0.0  ;;  %v2388_v44 = vshrl.u32 %v2196_v18, 16  ;;  %v3345_v17 = vmul.u32 3266489909, %v3153_v40 }
 0x3f7   :  { %vm4112_vm13 = vcmp.ge.s32.totalorder %v3920_v4, 1677722  ;;  %v4303_v16 = vsel %vm4111_vm12, %v1605_v20, 0.0  ;;  %4494 = vst [vmem:[#allocation7 + $0x558] sm:$0xff] %v4302_v58  ;;  %v2389_v2 = vshrl.u32 %v2197_v49, 16  ;;  %v2390_v27 = vshrl.u32 %v2198_v34, 16 }
 0x3f8   :  { %v4304_v13 = vsel %vm4112_vm13, %v1606_v38, 0.0  ;;  %4495 = vst [vmem:[#allocation7 + $0x560] sm:$0xff] %v4303_v16  ;;  %v3346_v1 = vmul.u32 3266489909, %v3154_v43  ;;  %v3347_v55 = vmul.u32 3266489909, %v3155_v53  ;;  %v2580_v11 = vxor.u32 %v2388_v44, %v2196_v18 }
 0x3f9   :  { %v5037_v48 = vpop.eup %5036  ;;  %4496 = vst [vmem:[#allocation7 + $0x568] sm:$0xff] %v4304_v13  ;;  %v3537_v25 = vshrl.u32 %v3345_v17, 16  ;;  %v2581_v31 = vxor.u32 %v2389_v2, %v2197_v49  ;;  %5038 = vrcp.f32 %v1364_v23  ;;  %v2582_v7 = vxor.u32 %v2390_v27, %v2198_v34 }
 0x3fa   :  { %v3538_v15 = vshrl.u32 %v3346_v1, 16  ;;  %v3539_v57 = vshrl.u32 %v3347_v55, 16  ;;  %v1607_v0 = vmul.f32 %v5037_v48, %v8188_v14  ;;  %v1608_v20 = vmul.f32 %v5037_v48, %v8189_v6 }
 0x3fb   :  { %v3729_v19 = vxor.u32 %v3537_v25, %v3345_v17  ;;  %v1609_v38 = vmul.f32 %v5037_v48, %v8190_v51  ;;  %v2772_v59 = vmul.u32 2246822507, %v2580_v11  ;;  %v2773_v21 = vmul.u32 2246822507, %v2581_v31 }
 0x3fc   :  { %v3730_v10 = vxor.u32 %v3538_v15, %v3346_v1  ;;  %v3731_v28 = vxor.u32 %v3539_v57, %v3347_v55  ;;  %v1686_v29 = vadd.s32 480, %v6574_v36  ;;  %v2774_v61 = vmul.u32 2246822507, %v2582_v7  ;;  %v8191_v15 = vld [vmem:[#allocation161_spill] sm:$0xff] }
 0x3fd   :  { %v3921_v35 = vshrl.u32 %v3729_v19, 8  ;;  %v2964_v23 = vshrl.u32 %v2772_v59, 13  ;;  %v1365_v39 = vmul.f32 0.9, %v1292_v8  ;;  %v2965_v22 = vshrl.u32 %v2773_v21, 13 }
 0x3fe   :  { %v3922_v24 = vshrl.u32 %v3730_v10, 8  ;;  %v3923_v3 = vshrl.u32 %v3731_v28, 8  ;;  %v1820_v56 = vmul.u32 384, %v1686_v29  ;;  %v2966_v54 = vshrl.u32 %v2774_v61, 13 }
 0x3ff   :  { %vm4113_vm14 = vcmp.ge.s32.totalorder %v3921_v35, 1677722  ;;  %v3156_v45 = vxor.u32 %v2964_v23, %v2772_v59  ;;  %5040 = vrcp.f32 %v1365_v39  ;;  %v3157_v50 = vxor.u32 %v2965_v22, %v2773_v21  ;;  %v8193_v22 = vld [vmem:[#allocation163_spill] sm:$0xff] }
 0x400   :  { %vm4114_vm15 = vcmp.ge.s32.totalorder %v3922_v24, 1677722  ;;  %vm4115_vm0 = vcmp.ge.s32.totalorder %v3923_v3, 1677722  ;;  %v4305_v9 = vsel %vm4113_vm14, %v1607_v0, 0.0  ;;  %v3158_v5 = vxor.u32 %v2966_v54, %v2774_v61  ;;  %v8192_v0 = vld [vmem:[#allocation162_spill] sm:$0xff]  ;;  %v1300_v24 = vpop.xlane.xlu0 %1299 }
 0x401   :  { %v4306_v42 = vsel %vm4114_vm15, %v1608_v20, 0.0  ;;  %v4307_v18 = vsel %vm4115_vm0, %v1609_v38, 0.0  ;;  %4497 = vst [vmem:[#allocation7 + $0x570] sm:$0xff] %v4305_v9  ;;  %v3348_v30 = vmul.u32 3266489909, %v3156_v45  ;;  %v2004_v63 = vadd.s32 %v1820_v56, %v6576_v33 }
 0x402   :  { %4498 = vst [vmem:[#allocation7 + $0x578] sm:$0xff] %v4306_v42  ;;  %4499 = vst [vmem:[#allocation7 + $0x580] sm:$0xff] %v4307_v18  ;;  %v3349_v52 = vmul.u32 3266489909, %v3157_v50  ;;  %v2005_v26 = vadd.s32 %v1820_v56, %v6595_v41  ;;  %v2006_v37 = vadd.s32 %v1820_v56, %v6598_v46  ;;  %v3350_v49 = vmul.u32 3266489909, %v3158_v5 }
 0x403   :  { %v3540_v34 = vshrl.u32 %v3348_v30, 16  ;;  %v1687_v4 = vadd.s32 488, %v6574_v36  ;;  %v1366_v40 = vmul.f32 0.9, %v1296_v47  ;;  %v2199_v58 = vxor.u32 %v6614_v12, %v2004_v63 }
 0x404   :  { %v3541_v43 = vshrl.u32 %v3349_v52, 16  ;;  %v2200_v53 = vxor.u32 %v6614_v12, %v2005_v26  ;;  %v2201_v44 = vxor.u32 %v6614_v12, %v2006_v37  ;;  %v3542_v16 = vshrl.u32 %v3350_v49, 16 }
 0x405   :  { %v3732_v17 = vxor.u32 %v3540_v34, %v3348_v30  ;;  %v1821_v2 = vmul.u32 384, %v1687_v4  ;;  %5042 = vrcp.f32 %v1366_v40  ;;  %v2391_v55 = vshrl.u32 %v2199_v58, 16 }
 0x406   :  { %v5039_v13 = vpop.eup %5038  ;;  %v3733_v1 = vxor.u32 %v3541_v43, %v3349_v52  ;;  %v2392_v27 = vshrl.u32 %v2200_v53, 16  ;;  %v2393_v48 = vshrl.u32 %v2201_v44, 16  ;;  %v3734_v25 = vxor.u32 %v3542_v16, %v3350_v49  ;;  %v8194_v49 = vld [vmem:[#allocation164_spill] sm:$0xff] }
 0x407   :  { %v3924_v11 = vshrl.u32 %v3732_v17, 8  ;;  %v1610_v31 = vmul.f32 %v5039_v13, %v6767_v62  ;;  %v1611_v57 = vmul.f32 %v5039_v13, %v8191_v15  ;;  %v1612_v6 = vmul.f32 %v5039_v13, %v8192_v0  ;;  %v8196_v15 = vld [vmem:[#allocation166_spill] sm:$0xff] }
 0x408   :  { %v3925_v14 = vshrl.u32 %v3733_v1, 8  ;;  %v2583_v20 = vxor.u32 %v2391_v55, %v2199_v58  ;;  %v2584_v8 = vxor.u32 %v2392_v27, %v2200_v53  ;;  %v3926_v19 = vshrl.u32 %v3734_v25, 8 }
 0x409   :  { %vm4116_vm1 = vcmp.ge.s32.totalorder %v3924_v11, 1677722  ;;  %v2585_v51 = vxor.u32 %v2393_v48, %v2201_v44  ;;  %v2007_v38 = vadd.s32 %v1821_v2, %v6576_v33  ;;  %v2008_v10 = vadd.s32 %v1821_v2, %v6595_v41 }
 0x40a   :  { %vm4117_vm2 = vcmp.ge.s32.totalorder %v3925_v14, 1677722  ;;  %v4308_v7 = vsel %vm4116_vm1, %v1610_v31, 0.0  ;;  %v2775_v59 = vmul.u32 2246822507, %v2583_v20  ;;  %v2009_v21 = vadd.s32 %v1821_v2, %v6598_v46  ;;  %v8195_v2 = vld [vmem:[#allocation165_spill] sm:$0xff] }
 0x40b   :  { %vm4118_vm3 = vcmp.ge.s32.totalorder %v3926_v19, 1677722  ;;  %v4309_v28 = vsel %vm4117_vm2, %v1611_v57, 0.0  ;;  %4500 = vst [vmem:[#allocation7 + $0x588] sm:$0xff] %v4308_v7  ;;  %v2776_v62 = vmul.u32 2246822507, %v2584_v8  ;;  %v2202_v39 = vxor.u32 %v6614_v12, %v2007_v38 }
 0x40c   :  { %v5041_v29 = vpop.eup %5040  ;;  %v4310_v35 = vsel %vm4118_vm3, %v1612_v6, 0.0  ;;  %4501 = vst [vmem:[#allocation7 + $0x590] sm:$0xff] %v4309_v28  ;;  %v2777_v61 = vmul.u32 2246822507, %v2585_v51  ;;  %v2967_v23 = vshrl.u32 %v2775_v59, 13  ;;  %v2203_v9 = vxor.u32 %v6614_v12, %v2008_v10 }
 0x40d   :  { %4502 = vst [vmem:[#allocation7 + $0x598] sm:$0xff] %v4310_v35  ;;  %v2968_v3 = vshrl.u32 %v2776_v62, 13  ;;  %v1613_v56 = vmul.f32 %v5041_v29, %v8193_v22  ;;  %v2204_v50 = vxor.u32 %v6614_v12, %v2009_v21  ;;  %v2394_v42 = vshrl.u32 %v2202_v39, 16 }
 0x40e   :  { %v2969_v54 = vshrl.u32 %v2777_v61, 13  ;;  %v3159_v45 = vxor.u32 %v2967_v23, %v2775_v59  ;;  %v1688_v18 = vadd.s32 496, %v6574_v36  ;;  %v1367_v5 = vmul.f32 0.9, %v1300_v24 }
 0x40f   :  { %v3160_v47 = vxor.u32 %v2968_v3, %v2776_v62  ;;  %v2395_v63 = vshrl.u32 %v2203_v9, 16  ;;  %v2396_v26 = vshrl.u32 %v2204_v50, 16  ;;  %v1614_v34 = vmul.f32 %v5041_v29, %v8194_v49 }
 0x410   :  { %v3161_v30 = vxor.u32 %v2969_v54, %v2777_v61  ;;  %v3351_v52 = vmul.u32 3266489909, %v3159_v45  ;;  %v2586_v4 = vxor.u32 %v2394_v42, %v2202_v39  ;;  %v1822_v40 = vmul.u32 384, %v1688_v18  ;;  %v1304_v54 = vpop.xlane.xlu1 %1303  ;;  %v8197_v18 = vld [vmem:[#allocation167_spill] sm:$0xff] }
 0x411   :  { %v3352_v37 = vmul.u32 3266489909, %v3160_v47  ;;  %v2587_v44 = vxor.u32 %v2395_v63, %v2203_v9  ;;  %v2588_v16 = vxor.u32 %v2396_v26, %v2204_v50  ;;  %v1615_v13 = vmul.f32 %v5041_v29, %v8195_v2 }
 0x412   :  { %v7587_v43 = vpop.eup %5042  ;;  %v3353_v58 = vmul.u32 3266489909, %v3161_v30  ;;  %v3543_v53 = vshrl.u32 %v3351_v52, 16  ;;  %v2778_v1 = vmul.u32 2246822507, %v2586_v4  ;;  %5044 = vrcp.f32 %v1367_v5 }
 0x413   :  { %v3544_v17 = vshrl.u32 %v3352_v37, 16  ;;  %v2779_v48 = vmul.u32 2246822507, %v2587_v44  ;;  %v2780_v25 = vmul.u32 2246822507, %v2588_v16  ;;  %v1616_v57 = vmul.f32 %v7587_v43, %v8196_v15  ;;  %v8198_v44 = vld [vmem:[#allocation168_spill] sm:$0xff] }
 0x414   :  { %v3545_v55 = vshrl.u32 %v3353_v58, 16  ;;  %v3735_v27 = vxor.u32 %v3543_v53, %v3351_v52  ;;  %v2970_v31 = vshrl.u32 %v2778_v1, 13  ;;  %v2010_v14 = vadd.s32 %v1822_v40, %v6576_v33 }
 0x415   :  { %v3736_v11 = vxor.u32 %v3544_v17, %v3352_v37  ;;  %v2971_v20 = vshrl.u32 %v2779_v48, 13  ;;  %v2972_v8 = vshrl.u32 %v2780_v25, 13  ;;  %v2011_v38 = vadd.s32 %v1822_v40, %v6595_v41 }
 0x416   :  { %v3737_v0 = vxor.u32 %v3545_v55, %v3353_v58  ;;  %v3927_v6 = vshrl.u32 %v3735_v27, 8  ;;  %v3162_v51 = vxor.u32 %v2970_v31, %v2778_v1  ;;  %v2012_v7 = vadd.s32 %v1822_v40, %v6598_v46 }
 0x417   :  { %v3928_v19 = vshrl.u32 %v3736_v11, 8  ;;  %v3163_v10 = vxor.u32 %v2971_v20, %v2779_v48  ;;  %v3164_v28 = vxor.u32 %v2972_v8, %v2780_v25  ;;  %v2205_v29 = vxor.u32 %v6614_v12, %v2010_v14 }
 0x418   :  { %v3929_v59 = vshrl.u32 %v3737_v0, 8  ;;  %vm4119_vm4 = vcmp.ge.s32.totalorder %v3927_v6, 1677722  ;;  %v3354_v21 = vmul.u32 3266489909, %v3162_v51  ;;  %v2206_v23 = vxor.u32 %v6614_v12, %v2011_v38 }
 0x419   :  { %vm4120_vm5 = vcmp.ge.s32.totalorder %v3928_v19, 1677722  ;;  %v4311_v62 = vsel %vm4119_vm4, %v1613_v56, 0.0  ;;  %v3355_v61 = vmul.u32 3266489909, %v3163_v10  ;;  %v2207_v22 = vxor.u32 %v6614_v12, %v2012_v7 }
 0x41a   :  { %vm4121_vm6 = vcmp.ge.s32.totalorder %v3929_v59, 1677722  ;;  %v4312_v35 = vsel %vm4120_vm5, %v1614_v34, 0.0  ;;  %4503 = vst [vmem:[#allocation7 + $0x5a0] sm:$0xff] %v4311_v62  ;;  %v3356_v24 = vmul.u32 3266489909, %v3164_v28  ;;  %v1617_v5 = vmul.f32 %v7587_v43, %v8197_v18 }
 0x41b   :  { %v4313_v39 = vsel %vm4121_vm6, %v1615_v13, 0.0  ;;  %4504 = vst [vmem:[#allocation7 + $0x5a8] sm:$0xff] %v4312_v35  ;;  %v3546_v3 = vshrl.u32 %v3354_v21, 16  ;;  %v3547_v45 = vshrl.u32 %v3355_v61, 16  ;;  %v2397_v9 = vshrl.u32 %v2205_v29, 16 }
 0x41c   :  { %4505 = vst [vmem:[#allocation7 + $0x5b0] sm:$0xff] %v4313_v39  ;;  %v2398_v56 = vshrl.u32 %v2206_v23, 16  ;;  %v1689_v50 = vadd.s32 504, %v6574_v36  ;;  %v3548_v47 = vshrl.u32 %v3356_v24, 16  ;;  %v2399_v30 = vshrl.u32 %v2207_v22, 16 }
 0x41d   :  { %v3738_v42 = vxor.u32 %v3546_v3, %v3354_v21  ;;  %v3739_v52 = vxor.u32 %v3547_v45, %v3355_v61  ;;  %v2589_v63 = vxor.u32 %v2397_v9, %v2205_v29  ;;  %v1368_v37 = vmul.f32 0.9, %v1304_v54  ;;  %v8200_v54 = vld [vmem:[#allocation170_spill] sm:$0xff] }
 0x41e   :  { %v2590_v26 = vxor.u32 %v2398_v56, %v2206_v23  ;;  %v3740_v49 = vxor.u32 %v3548_v47, %v3356_v24  ;;  %v2591_v4 = vxor.u32 %v2399_v30, %v2207_v22  ;;  %v1823_v40 = vmul.u32 384, %v1689_v50  ;;  %v8199_v23 = vld [vmem:[#allocation169_spill] sm:$0xff] }
 0x41f   :  { %v3930_v34 = vshrl.u32 %v3738_v42, 8  ;;  %v5045_v58 = vpop.eup %5044  ;;  %v3931_v53 = vshrl.u32 %v3739_v52, 8  ;;  %v1618_v16 = vmul.f32 %v7587_v43, %v8198_v44  ;;  %v2781_v36 = vmul.u32 2246822507, %v2589_v63 }
 0x420   :  { %v2782_v17 = vmul.u32 2246822507, %v2590_v26  ;;  %v3932_v2 = vshrl.u32 %v3740_v49, 8  ;;  %v2783_v13 = vmul.u32 2246822507, %v2591_v4  ;;  %v2013_v11 = vadd.s32 %v1823_v40, %v6576_v33 }
 0x421   :  { %vm4122_vm7 = vcmp.ge.s32.totalorder %v3930_v34, 1677722  ;;  %vm4123_vm8 = vcmp.ge.s32.totalorder %v3931_v53, 1677722  ;;  %v2973_v55 = vshrl.u32 %v2781_v36, 13  ;;  %v2014_v43 = vadd.s32 %v1823_v40, %v6595_v41 }
 0x422   :  { %v4314_v1 = vsel %vm4122_vm7, %v1616_v57, 0.0  ;;  %v2974_v27 = vshrl.u32 %v2782_v17, 13  ;;  %vm4124_vm9 = vcmp.ge.s32.totalorder %v3932_v2, 1677722  ;;  %v4315_v48 = vsel %vm4123_vm8, %v1617_v5, 0.0 }
 0x423   :  { %4506 = vst [vmem:[#allocation7 + $0x5b8] sm:$0xff] %v4314_v1  ;;  %v2975_v25 = vshrl.u32 %v2783_v13, 13  ;;  %v4316_v31 = vsel %vm4124_vm9, %v1618_v16, 0.0  ;;  %4507 = vst [vmem:[#allocation7 + $0x5c0] sm:$0xff] %v4315_v48  ;;  %v3165_v15 = vxor.u32 %v2973_v55, %v2781_v36  ;;  %v2015_v6 = vadd.s32 %v1823_v40, %v6598_v46 }
 0x424   :  { %v3166_v14 = vxor.u32 %v2974_v27, %v2782_v17  ;;  %4508 = vst [vmem:[#allocation7 + $0x5c8] sm:$0xff] %v4316_v31  ;;  %v2208_v57 = vxor.u32 %v6614_v12, %v2013_v11  ;;  %v2209_v19 = vxor.u32 %v6614_v12, %v2014_v43  ;;  %5046 = vrcp.f32 %v1368_v37  ;;  %v8201_v17 = vld [vmem:[#allocation171_spill] sm:$0xff] }
 0x425   :  { %v3167_v0 = vxor.u32 %v2975_v25, %v2783_v13  ;;  %v3357_v20 = vmul.u32 3266489909, %v3165_v15  ;;  %v2210_v38 = vxor.u32 %v6614_v12, %v2015_v6  ;;  %v1619_v46 = vmul.f32 %v5045_v58, %v6830_v60  ;;  %v8202_v13 = vld [vmem:[#allocation172_spill] sm:$0xff] }
 0x426   :  { %v3358_v8 = vmul.u32 3266489909, %v3166_v14  ;;  %v2400_v33 = vshrl.u32 %v2208_v57, 16  ;;  %v2401_v10 = vshrl.u32 %v2209_v19, 16  ;;  %v1620_v39 = vmul.f32 %v5045_v58, %v8199_v23 }
 0x427   :  { %v3359_v51 = vmul.u32 3266489909, %v3167_v0  ;;  %v3549_v7 = vshrl.u32 %v3357_v20, 16  ;;  %v2402_v41 = vshrl.u32 %v2210_v38, 16  ;;  %v1621_v45 = vmul.f32 %v5045_v58, %v8200_v54 }
 0x428   :  { %v3550_v59 = vshrl.u32 %v3358_v8, 16  ;;  %v2592_v62 = vxor.u32 %v2400_v33, %v2208_v57  ;;  %v2593_v35 = vxor.u32 %v2401_v10, %v2209_v19 }
 0x429   :  { %v3551_v28 = vshrl.u32 %v3359_v51, 16  ;;  %v3741_v21 = vxor.u32 %v3549_v7, %v3357_v20  ;;  %v2594_v24 = vxor.u32 %v2402_v41, %v2210_v38 }
 0x42a   :  { %v3742_v29 = vxor.u32 %v3550_v59, %v3358_v8  ;;  %v2784_v3 = vmul.u32 2246822507, %v2592_v62  ;;  %v2785_v9 = vmul.u32 2246822507, %v2593_v35 }
 0x42b   :  { %v3743_v61 = vxor.u32 %v3551_v28, %v3359_v51  ;;  %v3933_v22 = vshrl.u32 %v3741_v21, 8  ;;  %v2786_v50 = vmul.u32 2246822507, %v2594_v24 }
 0x42c   :  { %v3934_v12 = vshrl.u32 %v3742_v29, 8  ;;  %v2976_v47 = vshrl.u32 %v2784_v3, 13  ;;  %v2977_v42 = vshrl.u32 %v2785_v9, 13 }
 0x42d   :  { %v3935_v56 = vshrl.u32 %v3743_v61, 8  ;;  %vm4125_vm10 = vcmp.ge.s32.totalorder %v3933_v22, 1677722  ;;  %v2978_v5 = vshrl.u32 %v2786_v50, 13 }
 0x42e   :  { %vm4126_vm11 = vcmp.ge.s32.totalorder %v3934_v12, 1677722  ;;  %v4317_v18 = vsel %vm4125_vm10, %v1619_v46, 0.0  ;;  %v3168_v52 = vxor.u32 %v2976_v47, %v2784_v3  ;;  %v3169_v63 = vxor.u32 %v2977_v42, %v2785_v9 }
 0x42f   :  { %vm4127_vm12 = vcmp.ge.s32.totalorder %v3935_v56, 1677722  ;;  %v4318_v60 = vsel %vm4126_vm11, %v1620_v39, 0.0  ;;  %4509 = vst [vmem:[#allocation7 + $0x5d0] sm:$0xff] %v4317_v18  ;;  %v3170_v26 = vxor.u32 %v2978_v5, %v2786_v50 }
 0x430   :  { %v4319_v30 = vsel %vm4127_vm12, %v1621_v45, 0.0  ;;  %4510 = vst [vmem:[#allocation7 + $0x5d8] sm:$0xff] %v4318_v60  ;;  %v3360_v37 = vmul.u32 3266489909, %v3168_v52  ;;  %v3361_v49 = vmul.u32 3266489909, %v3169_v63 }
 0x431   :  { %4511 = vst [vmem:[#allocation7 + $0x5e0] sm:$0xff] %v4319_v30  ;;  %v3362_v34 = vmul.u32 3266489909, %v3170_v26  ;;  %v5047_v4 = vpop.eup %5046 }
 0x432   :  { %v3552_v40 = vshrl.u32 %v3360_v37, 16  ;;  %v3553_v58 = vshrl.u32 %v3361_v49, 16  ;;  %v1622_v2 = vmul.f32 %v5047_v4, %v8201_v17  ;;  %v1623_v1 = vmul.f32 %v5047_v4, %v8202_v13 }
 0x433   :  { %v3554_v53 = vshrl.u32 %v3362_v34, 16  ;;  %v1624_v48 = vmul.f32 %v5047_v4, %v6853_v32 }
 0x434   :  { %v3744_v44 = vxor.u32 %v3552_v40, %v3360_v37  ;;  %v3745_v16 = vxor.u32 %v3553_v58, %v3361_v49 }
 0x435   :  { %v3746_v36 = vxor.u32 %v3554_v53, %v3362_v34 }
 0x436   :  { %v3936_v55 = vshrl.u32 %v3744_v44, 8  ;;  %v3937_v27 = vshrl.u32 %v3745_v16, 8 }
 0x437   :  { %v3938_v25 = vshrl.u32 %v3746_v36, 8 }
 0x438   :  { %vm4128_vm13 = vcmp.ge.s32.totalorder %v3936_v55, 1677722  ;;  %vm4129_vm14 = vcmp.ge.s32.totalorder %v3937_v27, 1677722 }
 0x439   :  { %vm4130_vm15 = vcmp.ge.s32.totalorder %v3938_v25, 1677722  ;;  %v4320_v11 = vsel %vm4128_vm13, %v1622_v2, 0.0  ;;  %v4321_v31 = vsel %vm4129_vm14, %v1623_v1, 0.0 }
 0x43a   :  { %v4322_v15 = vsel %vm4130_vm15, %v1624_v48, 0.0  ;;  %4512 = vst [vmem:[#allocation7 + $0x5e8] sm:$0xff] %v4320_v11  ;;  %4513 = vst [vmem:[#allocation7 + $0x5f0] sm:$0xff] %v4321_v31 }
 0x43b   :  { %4514 = vst [vmem:[#allocation7 + $0x5f8] sm:$0xff] %v4322_v15 }
 0x43c   :  { %5208 = shalt.err (!%p5205_p9)
}
 0x43d   :  { %4526 = dma.vmem_to_hbm [thread:$0]  %s4521_s18, 24576, %s7623_s2, [#allocation6], %s5222_s12, %s5222_s12, %s5223_s13  }
 0x43e   :  { %5219 = dma.done.wait [#allocation6], 24576  }
 0x43f   :  { %5220 = vsyncadd [#allocation6], 4294942720 }
 0x440   :  { %4530 = vsyncpa [#allocation5], 1 }
 0x441   :  { %4531 = vsyncpa [#allocation6], 1 }

</bundles_post_ra>
